<compile_context>
chip_gen: v5e
topology: v5e:2x2
jax: 0.10.0
libtpu: 0.0.40
codegen_flags: <defaults>
</compile_context>

<pallas_src>
import jax
import jax.numpy as jnp
from jax.experimental import pallas as pl
from jax.experimental.pallas import tpu as pltpu

_KTAPS = 5  # all convs along time use a length-5 'valid' kernel


def _fused_kernel(x_ref, w1, s1, b1, w2, s2, b2, w3, s3, b3, w4, s4, b4,
                  wl, bl, o_ref):
    """Whole DeepConvNet forward for a batch tile.

    x_ref : (NB, 2, 750)      input tile (H folded into channels)
    w*    : (Cout, 5*Cin)     tap-stacked conv weights (conv1 pre-fused)
    s*,b* : (Cout, 1)         folded BatchNorm scale / bias (inference)
    wl    : (2, 200, 44)      Linear(8800, 2) weight reshaped to (out, C, W)
    bl    : (1, 2)            Linear bias
    o_ref : (1, NB, 2)        logits for this batch tile
    """
    nb = x_ref.shape[0]
    layers = ((w1, s1, b1), (w2, s2, b2), (w3, s3, b3), (w4, s4, b4))

    # Per-sample activations; conv matmuls below batch samples on the lane axis.
    acts = [x_ref[i].astype(jnp.float32) for i in range(nb)]        # (Cin, Win) each

    for w_ref, sc_ref, bs_ref in layers:
        w_st = w_ref[...]                         # (Cout, 5*Cin)
        sc = sc_ref[...]                          # (Cout, 1)
        bs = bs_ref[...]                          # (Cout, 1)
        cin, win = acts[0].shape
        wout = win - (_KTAPS - 1)                 # 'valid' conv width
        wpool = (wout - 1) // 2 + 1               # MaxPool2d(1, 2) width

        # im2col: 5 shifted contiguous slices stacked on the contraction axis,
        # batch concatenated on the lane axis -> ONE MXU matmul per layer.
        z = jnp.concatenate(
            [jnp.concatenate([a[:, k:k + wout] for k in range(_KTAPS)], axis=0)
             for a in acts],
            axis=1)                                                  # (5*Cin, NB*Wout)
        y = jnp.dot(w_st, z, preferred_element_type=jnp.float32)     # (Cout, NB*Wout)
        y = y * sc + bs                                              # folded BatchNorm
        y = jnp.where(y > 0.0, y, jnp.exp(jnp.minimum(y, 0.0)) - 1.0)  # ELU(alpha=1)
        # TODO(synk): Dropout(p=0.5) is identity in inference mode; training RNG masking omitted.

        # MaxPool2d(kernel_size=1, stride=2) == stride-2 subsample, done as an exact
        # matmul with a 0/1 selection matrix (avoids lane-strided loads / reshapes).
        rows_i = jax.lax.broadcasted_iota(jnp.int32, (wout, wpool), 0)
        cols_i = jax.lax.broadcasted_iota(jnp.int32, (wout, wpool), 1)
        sel = (rows_i == 2 * cols_i).astype(jnp.float32)             # (Wout, Wpool)
        acts = [jnp.dot(y[:, i * wout:(i + 1) * wout], sel,
                        preferred_element_type=jnp.float32)
                for i in range(nb)]                                   # (Cout, Wpool) each

    # classify: Flatten + Linear(8800, 2).  Weight is pre-reshaped to (2, 200, 44)
    # so the flatten never materializes: logit[j] = sum_{c,w} act[c,w] * wl[j,c,w].
    wl0 = wl[0]                                   # (200, 44)
    wl1 = wl[1]
    rows = []
    for a in acts:                                # a: (200, 44)
        v0 = jnp.sum(jnp.sum(a * wl0, axis=1, keepdims=True), axis=0, keepdims=True)
        v1 = jnp.sum(jnp.sum(a * wl1, axis=1, keepdims=True), axis=0, keepdims=True)
        rows.append(jnp.concatenate([v0, v1], axis=1))               # (1, 2)
    o_ref[0] = jnp.concatenate(rows, axis=0) + bl[...]               # (NB, 2)


def _cost_estimate(n, win0):
    """Advisory CostEstimate for the fused forward (helps XLA scheduling)."""
    chans = [(2, 25), (25, 50), (50, 100), (100, 200)]
    flops = 0
    trans = 0
    win = win0
    for cin, cout in chans:
        wout = win - (_KTAPS - 1)
        wpool = (wout - 1) // 2 + 1
        flops += 2 * n * cout * wout * _KTAPS * cin   # tap-stacked conv matmul
        flops += 2 * n * cout * wout * wpool          # pooling selection matmul
        trans += n * cout * wout                      # ELU exp
        win = wpool
    feat = 200 * win
    flops += 2 * n * feat * 2 + n * 2                 # linear head
    weight_elems = (25 * 10 + 50 * 125 + 100 * 250 + 200 * 500
                    + 2 * (25 + 50 + 100 + 200) + 2 * feat + 2)
    bytes_accessed = 4 * (n * 2 * win0 + weight_elems + n * 2)
    return pl.CostEstimate(flops=flops, transcendentals=trans,
                           bytes_accessed=bytes_accessed)


def fold_bn(gamma, beta, mean, var, eps=1e-5):
    scale = gamma / jnp.sqrt(var + eps)
    bias = beta - mean * scale
    return (scale.reshape(-1, 1).astype(jnp.float32),
            bias.reshape(-1, 1).astype(jnp.float32))


def _stack_taps(w):
    """PyTorch Conv2d weight (Cout, Cin, 1, K) -> tap-stacked (Cout, K*Cin), col = k*Cin + c."""
    cout, cin, _, k = w.shape
    return jnp.transpose(w[:, :, 0, :], (0, 2, 1)).reshape(cout, k * cin)


def init_params(key):
    ks = jax.random.split(key, 16)
    p = {}
    # conv1 = Conv2d(1,25,(1,5)) then Conv2d(25,25,(2,1)), both bias-free and with no
    # nonlinearity in between -> fuse into one (25, 2, 5) linear map, then tap-stack.
    w1a = jax.random.normal(ks[0], (25, 1, 1, 5), jnp.float32) * 0.1
    w1b = jax.random.normal(ks[1], (25, 25, 2, 1), jnp.float32) * 0.1
    w1_eff = jnp.einsum('gch,ck->ghk', w1b[:, :, :, 0], w1a[:, 0, 0, :])   # (25, 2, 5)
    p['w1'] = jnp.transpose(w1_eff, (0, 2, 1)).reshape(25, 10)             # (25, 5*2)
    p['w2'] = _stack_taps(jax.random.normal(ks[2], (50, 25, 1, 5), jnp.float32) * 0.1)
    p['w3'] = _stack_taps(jax.random.normal(ks[3], (100, 50, 1, 5), jnp.float32) * 0.1)
    p['w4'] = _stack_taps(jax.random.normal(ks[4], (200, 100, 1, 5), jnp.float32) * 0.1)
    for idx, c in zip(range(1, 5), (25, 50, 100, 200)):
        kk = jax.random.split(ks[4 + idx], 4)
        gamma = 1.0 + 0.1 * jax.random.normal(kk[0], (c,), jnp.float32)
        beta = 0.1 * jax.random.normal(kk[1], (c,), jnp.float32)
        mean = 0.1 * jax.random.normal(kk[2], (c,), jnp.float32)
        var = 1.0 + 0.1 * jax.random.uniform(kk[3], (c,), jnp.float32)
        p[f'bn{idx}_scale'], p[f'bn{idx}_bias'] = fold_bn(gamma, beta, mean, var)
    wl = jax.random.normal(ks[9], (2, 8800), jnp.float32) * 0.01
    bl = jax.random.normal(ks[10], (2,), jnp.float32) * 0.01
    p['wl'] = wl.reshape(2, 200, 44)   # (out, C4, W4): matches NCHW flatten order c*44 + w
    p['bl'] = bl.reshape(1, 2)
    return p


_PARAM_ORDER = ('w1', 'bn1_scale', 'bn1_bias', 'w2', 'bn2_scale', 'bn2_bias',
                'w3', 'bn3_scale', 'bn3_bias', 'w4', 'bn4_scale', 'bn4_bias',
                'wl', 'bl')


@jax.jit
def deep_conv_net_forward(params, x_nchw):
    n, _, hh, ww = x_nchw.shape               # (N, 1, 2, 750)
    x = x_nchw[:, 0, :, :]                    # fold H=2 into the fused-conv1 input channels
    g = 2 if (n % 2 == 0 and n >= 2) else 1   # 2-way batch split -> v7x megacore sharding
    nb = n // g

    def rep_spec(arr):                        # full-array block, replicated across the grid
        nd = arr.ndim
        return pl.BlockSpec(arr.shape, lambda i, _nd=nd: (0,) * _nd)

    operands = [x] + [params[k] for k in _PARAM_ORDER]
    in_specs = ([pl.BlockSpec((nb, hh, ww), lambda i: (i, 0, 0))]
                + [rep_spec(params[k]) for k in _PARAM_ORDER])

    out = pl.pallas_call(
        _fused_kernel,
        out_shape=jax.ShapeDtypeStruct((g, nb, 2), jnp.float32),
        grid=(g,),
        in_specs=in_specs,
        out_specs=pl.BlockSpec((1, nb, 2), lambda i: (i, 0, 0)),
        compiler_params=pltpu.CompilerParams(dimension_semantics=("parallel",)),
        cost_estimate=_cost_estimate(n, ww),
    )(*operands)
    return out.reshape(n, 2)


if __name__ == "__main__":
    key = jax.random.PRNGKey(0)
    kx, kp = jax.random.split(key)
    # Linear(8800, 2) fixes the spatial extent: input must be (N, 1, 2, 750).
    x = jax.random.normal(kx, (2, 1, 2, 750), jnp.float32)
    params = init_params(kp)
    out = deep_conv_net_forward(params, x)
    out = jax.block_until_ready(out)
    assert out.shape == (2, 2)
    assert bool(jnp.all(jnp.isfinite(out)))
    print("KERNEL_OK")
</pallas_src>

<mosaic_0001>
module attributes {stable_mosaic.version = 11 : i64} {
  func.func @_fused_kernel(%arg0: i32, %arg1: memref<1x2x750xf32, #tpu.memory_space<vmem>>, %arg2: memref<25x10xf32, #tpu.memory_space<vmem>>, %arg3: memref<25x1xf32, #tpu.memory_space<vmem>>, %arg4: memref<25x1xf32, #tpu.memory_space<vmem>>, %arg5: memref<50x125xf32, #tpu.memory_space<vmem>>, %arg6: memref<50x1xf32, #tpu.memory_space<vmem>>, %arg7: memref<50x1xf32, #tpu.memory_space<vmem>>, %arg8: memref<100x250xf32, #tpu.memory_space<vmem>>, %arg9: memref<100x1xf32, #tpu.memory_space<vmem>>, %arg10: memref<100x1xf32, #tpu.memory_space<vmem>>, %arg11: memref<200x500xf32, #tpu.memory_space<vmem>>, %arg12: memref<200x1xf32, #tpu.memory_space<vmem>>, %arg13: memref<200x1xf32, #tpu.memory_space<vmem>>, %arg14: memref<2x200x44xf32, #tpu.memory_space<vmem>>, %arg15: memref<1x2xf32, #tpu.memory_space<vmem>>, %arg16: memref<1x1x2xf32, #tpu.memory_space<vmem>>) attributes {dimension_semantics = [#tpu.dimension_semantics<parallel>], iteration_bounds = array<i64: 2>, scalar_prefetch = 0 : i64, scratch_operands = 0 : i64, tpu.core_type = #tpu.core_type<tc>, window_params = [{transform_indices = @transform_0, window_bounds = array<i64: 1, 2, 750>}, {pipeline_mode = #tpu.pipeline_mode<synchronous>, transform_indices = @transform_1, window_bounds = array<i64: 25, 10>}, {pipeline_mode = #tpu.pipeline_mode<synchronous>, transform_indices = @transform_2, window_bounds = array<i64: 25, 1>}, {pipeline_mode = #tpu.pipeline_mode<synchronous>, transform_indices = @transform_3, window_bounds = array<i64: 25, 1>}, {pipeline_mode = #tpu.pipeline_mode<synchronous>, transform_indices = @transform_4, window_bounds = array<i64: 50, 125>}, {pipeline_mode = #tpu.pipeline_mode<synchronous>, transform_indices = @transform_5, window_bounds = array<i64: 50, 1>}, {pipeline_mode = #tpu.pipeline_mode<synchronous>, transform_indices = @transform_6, window_bounds = array<i64: 50, 1>}, {pipeline_mode = #tpu.pipeline_mode<synchronous>, transform_indices = @transform_7, window_bounds = array<i64: 100, 250>}, {pipeline_mode = #tpu.pipeline_mode<synchronous>, transform_indices = @transform_8, window_bounds = array<i64: 100, 1>}, {pipeline_mode = #tpu.pipeline_mode<synchronous>, transform_indices = @transform_9, window_bounds = array<i64: 100, 1>}, {pipeline_mode = #tpu.pipeline_mode<synchronous>, transform_indices = @transform_10, window_bounds = array<i64: 200, 500>}, {pipeline_mode = #tpu.pipeline_mode<synchronous>, transform_indices = @transform_11, window_bounds = array<i64: 200, 1>}, {pipeline_mode = #tpu.pipeline_mode<synchronous>, transform_indices = @transform_12, window_bounds = array<i64: 200, 1>}, {pipeline_mode = #tpu.pipeline_mode<synchronous>, transform_indices = @transform_13, window_bounds = array<i64: 2, 200, 44>}, {pipeline_mode = #tpu.pipeline_mode<synchronous>, transform_indices = @transform_14, window_bounds = array<i64: 1, 2>}, {transform_indices = @transform_15, window_bounds = array<i64: 1, 1, 2>}]} {
    %c0 = arith.constant 0 : index
    %c0_0 = arith.constant 0 : index
    %c0_1 = arith.constant 0 : index
    %0 = vector.load %arg1[%c0, %c0_0, %c0_1] : memref<1x2x750xf32, #tpu.memory_space<vmem>>, vector<1x2x750xf32>
    %1 = vector.shape_cast %0 : vector<1x2x750xf32> to vector<2x750xf32>
    %c0_2 = arith.constant 0 : index
    %c0_3 = arith.constant 0 : index
    %2 = vector.load %arg2[%c0_2, %c0_3] : memref<25x10xf32, #tpu.memory_space<vmem>>, vector<25x10xf32>
    %c0_4 = arith.constant 0 : index
    %c0_5 = arith.constant 0 : index
    %3 = vector.load %arg3[%c0_4, %c0_5] : memref<25x1xf32, #tpu.memory_space<vmem>>, vector<25x1xf32>
    %c0_6 = arith.constant 0 : index
    %c0_7 = arith.constant 0 : index
    %4 = vector.load %arg4[%c0_6, %c0_7] : memref<25x1xf32, #tpu.memory_space<vmem>>, vector<25x1xf32>
    %5 = vector.extract_strided_slice %1 {offsets = [0, 0], sizes = [2, 746], strides = [1, 1]} : vector<2x750xf32> to vector<2x746xf32>
    %6 = vector.extract_strided_slice %1 {offsets = [0, 1], sizes = [2, 746], strides = [1, 1]} : vector<2x750xf32> to vector<2x746xf32>
    %7 = vector.extract_strided_slice %1 {offsets = [0, 2], sizes = [2, 746], strides = [1, 1]} : vector<2x750xf32> to vector<2x746xf32>
    %8 = vector.extract_strided_slice %1 {offsets = [0, 3], sizes = [2, 746], strides = [1, 1]} : vector<2x750xf32> to vector<2x746xf32>
    %9 = vector.extract_strided_slice %1 {offsets = [0, 4], sizes = [2, 746], strides = [1, 1]} : vector<2x750xf32> to vector<2x746xf32>
    %10 = tpu.concatenate %5, %6, %7, %8, %9 in 0 : vector<2x746xf32>, vector<2x746xf32>, vector<2x746xf32>, vector<2x746xf32>, vector<2x746xf32> -> vector<10x746xf32>
    %cst = arith.constant dense<0.000000e+00> : vector<25x746xf32>
    %11 = tpu.matmul %2, %10, %cst {dimension_numbers = #tpu.dot_dimension_numbers<[1], [0], [0], [1], [0, 0, 1, 1], [], []>} : vector<25x10xf32>, vector<10x746xf32>, vector<25x746xf32> -> vector<25x746xf32>
    %12 = vector.broadcast %3 : vector<25x1xf32> to vector<25x746xf32>
    %13 = arith.mulf %11, %12 : vector<25x746xf32>
    %14 = vector.broadcast %4 : vector<25x1xf32> to vector<25x746xf32>
    %15 = arith.addf %13, %14 : vector<25x746xf32>
    %cst_8 = arith.constant 0.000000e+00 : f32
    %16 = vector.broadcast %cst_8 : f32 to vector<25x746xf32>
    %17 = arith.cmpf ogt, %15, %16 : vector<25x746xf32>
    %cst_9 = arith.constant 0.000000e+00 : f32
    %18 = vector.broadcast %cst_9 : f32 to vector<25x746xf32>
    %19 = arith.minimumf %15, %18 : vector<25x746xf32>
    %20 = math.exp %19 : vector<25x746xf32>
    %cst_10 = arith.constant 1.000000e+00 : f32
    %21 = vector.broadcast %cst_10 : f32 to vector<25x746xf32>
    %22 = arith.subf %20, %21 : vector<25x746xf32>
    %23 = arith.select %17, %15, %22 : vector<25x746xi1>, vector<25x746xf32>
    %24 = tpu.iota {dimensions = array<i32: 0>} : vector<746x373xi32>
    %25 = tpu.iota {dimensions = array<i32: 1>} : vector<746x373xi32>
    %c2_i32 = arith.constant 2 : i32
    %26 = vector.broadcast %c2_i32 : i32 to vector<746x373xi32>
    %27 = arith.muli %26, %25 : vector<746x373xi32>
    %28 = arith.cmpi eq, %24, %27 : vector<746x373xi32>
    %29 = arith.extui %28 : vector<746x373xi1> to vector<746x373xi32>
    %30 = arith.sitofp %29 : vector<746x373xi32> to vector<746x373xf32>
    %cst_11 = arith.constant dense<0.000000e+00> : vector<25x373xf32>
    %31 = tpu.matmul %23, %30, %cst_11 {dimension_numbers = #tpu.dot_dimension_numbers<[1], [0], [0], [1], [0, 0, 1, 1], [], []>} : vector<25x746xf32>, vector<746x373xf32>, vector<25x373xf32> -> vector<25x373xf32>
    %c0_12 = arith.constant 0 : index
    %c0_13 = arith.constant 0 : index
    %32 = vector.load %arg5[%c0_12, %c0_13] : memref<50x125xf32, #tpu.memory_space<vmem>>, vector<50x125xf32>
    %c0_14 = arith.constant 0 : index
    %c0_15 = arith.constant 0 : index
    %33 = vector.load %arg6[%c0_14, %c0_15] : memref<50x1xf32, #tpu.memory_space<vmem>>, vector<50x1xf32>
    %c0_16 = arith.constant 0 : index
    %c0_17 = arith.constant 0 : index
    %34 = vector.load %arg7[%c0_16, %c0_17] : memref<50x1xf32, #tpu.memory_space<vmem>>, vector<50x1xf32>
    %35 = vector.extract_strided_slice %31 {offsets = [0, 0], sizes = [25, 369], strides = [1, 1]} : vector<25x373xf32> to vector<25x369xf32>
    %36 = vector.extract_strided_slice %31 {offsets = [0, 1], sizes = [25, 369], strides = [1, 1]} : vector<25x373xf32> to vector<25x369xf32>
    %37 = vector.extract_strided_slice %31 {offsets = [0, 2], sizes = [25, 369], strides = [1, 1]} : vector<25x373xf32> to vector<25x369xf32>
    %38 = vector.extract_strided_slice %31 {offsets = [0, 3], sizes = [25, 369], strides = [1, 1]} : vector<25x373xf32> to vector<25x369xf32>
    %39 = vector.extract_strided_slice %31 {offsets = [0, 4], sizes = [25, 369], strides = [1, 1]} : vector<25x373xf32> to vector<25x369xf32>
    %40 = tpu.concatenate %35, %36, %37, %38, %39 in 0 : vector<25x369xf32>, vector<25x369xf32>, vector<25x369xf32>, vector<25x369xf32>, vector<25x369xf32> -> vector<125x369xf32>
    %cst_18 = arith.constant dense<0.000000e+00> : vector<50x369xf32>
    %41 = tpu.matmul %32, %40, %cst_18 {dimension_numbers = #tpu.dot_dimension_numbers<[1], [0], [0], [1], [0, 0, 1, 1], [], []>} : vector<50x125xf32>, vector<125x369xf32>, vector<50x369xf32> -> vector<50x369xf32>
    %42 = vector.broadcast %33 : vector<50x1xf32> to vector<50x369xf32>
    %43 = arith.mulf %41, %42 : vector<50x369xf32>
    %44 = vector.broadcast %34 : vector<50x1xf32> to vector<50x369xf32>
    %45 = arith.addf %43, %44 : vector<50x369xf32>
    %cst_19 = arith.constant 0.000000e+00 : f32
    %46 = vector.broadcast %cst_19 : f32 to vector<50x369xf32>
    %47 = arith.cmpf ogt, %45, %46 : vector<50x369xf32>
    %cst_20 = arith.constant 0.000000e+00 : f32
    %48 = vector.broadcast %cst_20 : f32 to vector<50x369xf32>
    %49 = arith.minimumf %45, %48 : vector<50x369xf32>
    %50 = math.exp %49 : vector<50x369xf32>
    %cst_21 = arith.constant 1.000000e+00 : f32
    %51 = vector.broadcast %cst_21 : f32 to vector<50x369xf32>
    %52 = arith.subf %50, %51 : vector<50x369xf32>
    %53 = arith.select %47, %45, %52 : vector<50x369xi1>, vector<50x369xf32>
    %54 = tpu.iota {dimensions = array<i32: 0>} : vector<369x185xi32>
    %55 = tpu.iota {dimensions = array<i32: 1>} : vector<369x185xi32>
    %c2_i32_22 = arith.constant 2 : i32
    %56 = vector.broadcast %c2_i32_22 : i32 to vector<369x185xi32>
    %57 = arith.muli %56, %55 : vector<369x185xi32>
    %58 = arith.cmpi eq, %54, %57 : vector<369x185xi32>
    %59 = arith.extui %58 : vector<369x185xi1> to vector<369x185xi32>
    %60 = arith.sitofp %59 : vector<369x185xi32> to vector<369x185xf32>
    %cst_23 = arith.constant dense<0.000000e+00> : vector<50x185xf32>
    %61 = tpu.matmul %53, %60, %cst_23 {dimension_numbers = #tpu.dot_dimension_numbers<[1], [0], [0], [1], [0, 0, 1, 1], [], []>} : vector<50x369xf32>, vector<369x185xf32>, vector<50x185xf32> -> vector<50x185xf32>
    %c0_24 = arith.constant 0 : index
    %c0_25 = arith.constant 0 : index
    %62 = vector.load %arg8[%c0_24, %c0_25] : memref<100x250xf32, #tpu.memory_space<vmem>>, vector<100x250xf32>
    %c0_26 = arith.constant 0 : index
    %c0_27 = arith.constant 0 : index
    %63 = vector.load %arg9[%c0_26, %c0_27] : memref<100x1xf32, #tpu.memory_space<vmem>>, vector<100x1xf32>
    %c0_28 = arith.constant 0 : index
    %c0_29 = arith.constant 0 : index
    %64 = vector.load %arg10[%c0_28, %c0_29] : memref<100x1xf32, #tpu.memory_space<vmem>>, vector<100x1xf32>
    %65 = vector.extract_strided_slice %61 {offsets = [0, 0], sizes = [50, 181], strides = [1, 1]} : vector<50x185xf32> to vector<50x181xf32>
    %66 = vector.extract_strided_slice %61 {offsets = [0, 1], sizes = [50, 181], strides = [1, 1]} : vector<50x185xf32> to vector<50x181xf32>
    %67 = vector.extract_strided_slice %61 {offsets = [0, 2], sizes = [50, 181], strides = [1, 1]} : vector<50x185xf32> to vector<50x181xf32>
    %68 = vector.extract_strided_slice %61 {offsets = [0, 3], sizes = [50, 181], strides = [1, 1]} : vector<50x185xf32> to vector<50x181xf32>
    %69 = vector.extract_strided_slice %61 {offsets = [0, 4], sizes = [50, 181], strides = [1, 1]} : vector<50x185xf32> to vector<50x181xf32>
    %70 = tpu.concatenate %65, %66, %67, %68, %69 in 0 : vector<50x181xf32>, vector<50x181xf32>, vector<50x181xf32>, vector<50x181xf32>, vector<50x181xf32> -> vector<250x181xf32>
    %cst_30 = arith.constant dense<0.000000e+00> : vector<100x181xf32>
    %71 = tpu.matmul %62, %70, %cst_30 {dimension_numbers = #tpu.dot_dimension_numbers<[1], [0], [0], [1], [0, 0, 1, 1], [], []>} : vector<100x250xf32>, vector<250x181xf32>, vector<100x181xf32> -> vector<100x181xf32>
    %72 = vector.broadcast %63 : vector<100x1xf32> to vector<100x181xf32>
    %73 = arith.mulf %71, %72 : vector<100x181xf32>
    %74 = vector.broadcast %64 : vector<100x1xf32> to vector<100x181xf32>
    %75 = arith.addf %73, %74 : vector<100x181xf32>
    %cst_31 = arith.constant 0.000000e+00 : f32
    %76 = vector.broadcast %cst_31 : f32 to vector<100x181xf32>
    %77 = arith.cmpf ogt, %75, %76 : vector<100x181xf32>
    %cst_32 = arith.constant 0.000000e+00 : f32
    %78 = vector.broadcast %cst_32 : f32 to vector<100x181xf32>
    %79 = arith.minimumf %75, %78 : vector<100x181xf32>
    %80 = math.exp %79 : vector<100x181xf32>
    %cst_33 = arith.constant 1.000000e+00 : f32
    %81 = vector.broadcast %cst_33 : f32 to vector<100x181xf32>
    %82 = arith.subf %80, %81 : vector<100x181xf32>
    %83 = arith.select %77, %75, %82 : vector<100x181xi1>, vector<100x181xf32>
    %84 = tpu.iota {dimensions = array<i32: 0>} : vector<181x91xi32>
    %85 = tpu.iota {dimensions = array<i32: 1>} : vector<181x91xi32>
    %c2_i32_34 = arith.constant 2 : i32
    %86 = vector.broadcast %c2_i32_34 : i32 to vector<181x91xi32>
    %87 = arith.muli %86, %85 : vector<181x91xi32>
    %88 = arith.cmpi eq, %84, %87 : vector<181x91xi32>
    %89 = arith.extui %88 : vector<181x91xi1> to vector<181x91xi32>
    %90 = arith.sitofp %89 : vector<181x91xi32> to vector<181x91xf32>
    %cst_35 = arith.constant dense<0.000000e+00> : vector<100x91xf32>
    %91 = tpu.matmul %83, %90, %cst_35 {dimension_numbers = #tpu.dot_dimension_numbers<[1], [0], [0], [1], [0, 0, 1, 1], [], []>} : vector<100x181xf32>, vector<181x91xf32>, vector<100x91xf32> -> vector<100x91xf32>
    %c0_36 = arith.constant 0 : index
    %c0_37 = arith.constant 0 : index
    %92 = vector.load %arg11[%c0_36, %c0_37] : memref<200x500xf32, #tpu.memory_space<vmem>>, vector<200x500xf32>
    %c0_38 = arith.constant 0 : index
    %c0_39 = arith.constant 0 : index
    %93 = vector.load %arg12[%c0_38, %c0_39] : memref<200x1xf32, #tpu.memory_space<vmem>>, vector<200x1xf32>
    %c0_40 = arith.constant 0 : index
    %c0_41 = arith.constant 0 : index
    %94 = vector.load %arg13[%c0_40, %c0_41] : memref<200x1xf32, #tpu.memory_space<vmem>>, vector<200x1xf32>
    %95 = vector.extract_strided_slice %91 {offsets = [0, 0], sizes = [100, 87], strides = [1, 1]} : vector<100x91xf32> to vector<100x87xf32>
    %96 = vector.extract_strided_slice %91 {offsets = [0, 1], sizes = [100, 87], strides = [1, 1]} : vector<100x91xf32> to vector<100x87xf32>
    %97 = vector.extract_strided_slice %91 {offsets = [0, 2], sizes = [100, 87], strides = [1, 1]} : vector<100x91xf32> to vector<100x87xf32>
    %98 = vector.extract_strided_slice %91 {offsets = [0, 3], sizes = [100, 87], strides = [1, 1]} : vector<100x91xf32> to vector<100x87xf32>
    %99 = vector.extract_strided_slice %91 {offsets = [0, 4], sizes = [100, 87], strides = [1, 1]} : vector<100x91xf32> to vector<100x87xf32>
    %100 = tpu.concatenate %95, %96, %97, %98, %99 in 0 : vector<100x87xf32>, vector<100x87xf32>, vector<100x87xf32>, vector<100x87xf32>, vector<100x87xf32> -> vector<500x87xf32>
    %cst_42 = arith.constant dense<0.000000e+00> : vector<200x87xf32>
    %101 = tpu.matmul %92, %100, %cst_42 {dimension_numbers = #tpu.dot_dimension_numbers<[1], [0], [0], [1], [0, 0, 1, 1], [], []>} : vector<200x500xf32>, vector<500x87xf32>, vector<200x87xf32> -> vector<200x87xf32>
    %102 = vector.broadcast %93 : vector<200x1xf32> to vector<200x87xf32>
    %103 = arith.mulf %101, %102 : vector<200x87xf32>
    %104 = vector.broadcast %94 : vector<200x1xf32> to vector<200x87xf32>
    %105 = arith.addf %103, %104 : vector<200x87xf32>
    %cst_43 = arith.constant 0.000000e+00 : f32
    %106 = vector.broadcast %cst_43 : f32 to vector<200x87xf32>
    %107 = arith.cmpf ogt, %105, %106 : vector<200x87xf32>
    %cst_44 = arith.constant 0.000000e+00 : f32
    %108 = vector.broadcast %cst_44 : f32 to vector<200x87xf32>
    %109 = arith.minimumf %105, %108 : vector<200x87xf32>
    %110 = math.exp %109 : vector<200x87xf32>
    %cst_45 = arith.constant 1.000000e+00 : f32
    %111 = vector.broadcast %cst_45 : f32 to vector<200x87xf32>
    %112 = arith.subf %110, %111 : vector<200x87xf32>
    %113 = arith.select %107, %105, %112 : vector<200x87xi1>, vector<200x87xf32>
    %114 = tpu.iota {dimensions = array<i32: 0>} : vector<87x44xi32>
    %115 = tpu.iota {dimensions = array<i32: 1>} : vector<87x44xi32>
    %c2_i32_46 = arith.constant 2 : i32
    %116 = vector.broadcast %c2_i32_46 : i32 to vector<87x44xi32>
    %117 = arith.muli %116, %115 : vector<87x44xi32>
    %118 = arith.cmpi eq, %114, %117 : vector<87x44xi32>
    %119 = arith.extui %118 : vector<87x44xi1> to vector<87x44xi32>
    %120 = arith.sitofp %119 : vector<87x44xi32> to vector<87x44xf32>
    %cst_47 = arith.constant dense<0.000000e+00> : vector<200x44xf32>
    %121 = tpu.matmul %113, %120, %cst_47 {dimension_numbers = #tpu.dot_dimension_numbers<[1], [0], [0], [1], [0, 0, 1, 1], [], []>} : vector<200x87xf32>, vector<87x44xf32>, vector<200x44xf32> -> vector<200x44xf32>
    %c0_48 = arith.constant 0 : index
    %c0_49 = arith.constant 0 : index
    %c0_50 = arith.constant 0 : index
    %122 = vector.load %arg14[%c0_48, %c0_49, %c0_50] : memref<2x200x44xf32, #tpu.memory_space<vmem>>, vector<1x200x44xf32>
    %123 = vector.shape_cast %122 : vector<1x200x44xf32> to vector<200x44xf32>
    %c1 = arith.constant 1 : index
    %c0_51 = arith.constant 0 : index
    %c0_52 = arith.constant 0 : index
    %124 = vector.load %arg14[%c1, %c0_51, %c0_52] : memref<2x200x44xf32, #tpu.memory_space<vmem>>, vector<1x200x44xf32>
    %125 = vector.shape_cast %124 : vector<1x200x44xf32> to vector<200x44xf32>
    %126 = arith.mulf %121, %123 : vector<200x44xf32>
    %cst_53 = arith.constant dense<0.000000e+00> : vector<200xf32>
    %127 = vector.multi_reduction <add>, %126, %cst_53 [1] : vector<200x44xf32> to vector<200xf32>
    %128 = vector.shape_cast %127 : vector<200xf32> to vector<200x1xf32>
    %cst_54 = arith.constant dense<0.000000e+00> : vector<1xf32>
    %129 = vector.multi_reduction <add>, %128, %cst_54 [0] : vector<200x1xf32> to vector<1xf32>
    %130 = vector.shape_cast %129 : vector<1xf32> to vector<1x1xf32>
    %131 = arith.mulf %121, %125 : vector<200x44xf32>
    %cst_55 = arith.constant dense<0.000000e+00> : vector<200xf32>
    %132 = vector.multi_reduction <add>, %131, %cst_55 [1] : vector<200x44xf32> to vector<200xf32>
    %133 = vector.shape_cast %132 : vector<200xf32> to vector<200x1xf32>
    %cst_56 = arith.constant dense<0.000000e+00> : vector<1xf32>
    %134 = vector.multi_reduction <add>, %133, %cst_56 [0] : vector<200x1xf32> to vector<1xf32>
    %135 = vector.shape_cast %134 : vector<1xf32> to vector<1x1xf32>
    %136 = tpu.concatenate %130, %135 in 1 : vector<1x1xf32>, vector<1x1xf32> -> vector<1x2xf32>
    %c0_57 = arith.constant 0 : index
    %c0_58 = arith.constant 0 : index
    %137 = vector.load %arg15[%c0_57, %c0_58] : memref<1x2xf32, #tpu.memory_space<vmem>>, vector<1x2xf32>
    %138 = arith.addf %136, %137 : vector<1x2xf32>
    %c0_59 = arith.constant 0 : index
    %c0_60 = arith.constant 0 : index
    %c0_61 = arith.constant 0 : index
    %139 = vector.load %arg16[%c0_59, %c0_60, %c0_61] : memref<1x1x2xf32, #tpu.memory_space<vmem>>, vector<1x1x2xf32>
    %140 = vector.shape_cast %139 : vector<1x1x2xf32> to vector<1x2xf32>
    %141 = vector.shape_cast %138 : vector<1x2xf32> to vector<1x1x2xf32>
    tpu.vector_store %arg16[%c0_59, %c0_60, %c0_61], %141 {strides = array<i32>} : memref<1x1x2xf32, #tpu.memory_space<vmem>>, vector<1x1x2xf32>,
    return
  }
  func.func @transform_0(%arg0: i32) -> (i32, i32, i32) {
    %c0_i32 = arith.constant 0 : i32
    %c0_i32_0 = arith.constant 0 : i32
    %c0_i32_1 = arith.constant 0 : i32
    return %arg0, %c0_i32, %c0_i32_0 : i32, i32, i32
  }
  func.func @transform_1(%arg0: i32) -> (i32, i32) {
    %c0_i32 = arith.constant 0 : i32
    %c0_i32_0 = arith.constant 0 : i32
    %c0_i32_1 = arith.constant 0 : i32
    return %c0_i32, %c0_i32_0 : i32, i32
  }
  func.func @transform_2(%arg0: i32) -> (i32, i32) {
    %c0_i32 = arith.constant 0 : i32
    %c0_i32_0 = arith.constant 0 : i32
    %c0_i32_1 = arith.constant 0 : i32
    return %c0_i32, %c0_i32_0 : i32, i32
  }
  func.func @transform_3(%arg0: i32) -> (i32, i32) {
    %c0_i32 = arith.constant 0 : i32
    %c0_i32_0 = arith.constant 0 : i32
    %c0_i32_1 = arith.constant 0 : i32
    return %c0_i32, %c0_i32_0 : i32, i32
  }
  func.func @transform_4(%arg0: i32) -> (i32, i32) {
    %c0_i32 = arith.constant 0 : i32
    %c0_i32_0 = arith.constant 0 : i32
    %c0_i32_1 = arith.constant 0 : i32
    return %c0_i32, %c0_i32_0 : i32, i32
  }
  func.func @transform_5(%arg0: i32) -> (i32, i32) {
    %c0_i32 = arith.constant 0 : i32
    %c0_i32_0 = arith.constant 0 : i32
    %c0_i32_1 = arith.constant 0 : i32
    return %c0_i32, %c0_i32_0 : i32, i32
  }
  func.func @transform_6(%arg0: i32) -> (i32, i32) {
    %c0_i32 = arith.constant 0 : i32
    %c0_i32_0 = arith.constant 0 : i32
    %c0_i32_1 = arith.constant 0 : i32
    return %c0_i32, %c0_i32_0 : i32, i32
  }
  func.func @transform_7(%arg0: i32) -> (i32, i32) {
    %c0_i32 = arith.constant 0 : i32
    %c0_i32_0 = arith.constant 0 : i32
    %c0_i32_1 = arith.constant 0 : i32
    return %c0_i32, %c0_i32_0 : i32, i32
  }
  func.func @transform_8(%arg0: i32) -> (i32, i32) {
    %c0_i32 = arith.constant 0 : i32
    %c0_i32_0 = arith.constant 0 : i32
    %c0_i32_1 = arith.constant 0 : i32
    return %c0_i32, %c0_i32_0 : i32, i32
  }
  func.func @transform_9(%arg0: i32) -> (i32, i32) {
    %c0_i32 = arith.constant 0 : i32
    %c0_i32_0 = arith.constant 0 : i32
    %c0_i32_1 = arith.constant 0 : i32
    return %c0_i32, %c0_i32_0 : i32, i32
  }
  func.func @transform_10(%arg0: i32) -> (i32, i32) {
    %c0_i32 = arith.constant 0 : i32
    %c0_i32_0 = arith.constant 0 : i32
    %c0_i32_1 = arith.constant 0 : i32
    return %c0_i32, %c0_i32_0 : i32, i32
  }
  func.func @transform_11(%arg0: i32) -> (i32, i32) {
    %c0_i32 = arith.constant 0 : i32
    %c0_i32_0 = arith.constant 0 : i32
    %c0_i32_1 = arith.constant 0 : i32
    return %c0_i32, %c0_i32_0 : i32, i32
  }
  func.func @transform_12(%arg0: i32) -> (i32, i32) {
    %c0_i32 = arith.constant 0 : i32
    %c0_i32_0 = arith.constant 0 : i32
    %c0_i32_1 = arith.constant 0 : i32
    return %c0_i32, %c0_i32_0 : i32, i32
  }
  func.func @transform_13(%arg0: i32) -> (i32, i32, i32) {
    %c0_i32 = arith.constant 0 : i32
    %c0_i32_0 = arith.constant 0 : i32
    %c0_i32_1 = arith.constant 0 : i32
    %c0_i32_2 = arith.constant 0 : i32
    return %c0_i32, %c0_i32_0, %c0_i32_1 : i32, i32, i32
  }
  func.func @transform_14(%arg0: i32) -> (i32, i32) {
    %c0_i32 = arith.constant 0 : i32
    %c0_i32_0 = arith.constant 0 : i32
    %c0_i32_1 = arith.constant 0 : i32
    return %c0_i32, %c0_i32_0 : i32, i32
  }
  func.func @transform_15(%arg0: i32) -> (i32, i32, i32) {
    %c0_i32 = arith.constant 0 : i32
    %c0_i32_0 = arith.constant 0 : i32
    %c0_i32_1 = arith.constant 0 : i32
    return %arg0, %c0_i32, %c0_i32_0 : i32, i32, i32
  }
}

</mosaic_0001>

<bundles_post_ra>
// kernel: deep_conv_net_forward.1
= control target key start
LH: loop header
LB: loop body
LE: loop exit
PB: predicated region body
PF: predicated region fallthrough
CT: control target
= control target key end

     0   :  { %s13106_s0 = inlined_call_operand.vmem [shape: f32[2,2,750], index: 0, kind: input, shape index: {}]   ;;  %s13107_s1 = inlined_call_operand.vmem [shape: f32[25,10], index: 1, kind: input, shape index: {}]   ;;  %s13108_s2 = inlined_call_operand.vmem [shape: f32[25,1], index: 2, kind: input, shape index: {}]   ;;  %s13109_s3 = inlined_call_operand.vmem [shape: f32[25,1], index: 3, kind: input, shape index: {}]   ;;  %s13110_s4 = inlined_call_operand.vmem [shape: f32[50,125], index: 4, kind: input, shape index: {}]   ;;  %s13111_s5 = inlined_call_operand.vmem [shape: f32[50,1], index: 5, kind: input, shape index: {}]   ;;  %s13112_s6 = inlined_call_operand.vmem [shape: f32[50,1], index: 6, kind: input, shape index: {}]   ;;  %s13113_s7 = inlined_call_operand.vmem [shape: f32[100,250], index: 7, kind: input, shape index: {}]   ;;  %s13114_s8 = inlined_call_operand.vmem [shape: f32[100,1], index: 8, kind: input, shape index: {}]   ;;  %s13115_s9 = inlined_call_operand.vmem [shape: f32[100,1], index: 9, kind: input, shape index: {}]   ;;  %s13116_s10 = inlined_call_operand.vmem [shape: f32[200,500], index: 10, kind: input, shape index: {}]   ;;  %s13117_s11 = inlined_call_operand.vmem [shape: f32[200,1], index: 11, kind: input, shape index: {}]   ;;  %s13118_s12 = inlined_call_operand.vmem [shape: f32[200,1], index: 12, kind: input, shape index: {}]   ;;  %s13119_s13 = inlined_call_operand.vmem [shape: f32[2,200,44], index: 13, kind: input, shape index: {}]   ;;  %s13120_s14 = inlined_call_operand.vmem [shape: f32[1,2], index: 14, kind: input, shape index: {}]   ;;  %s13121_s15 = inlined_call_operand.hbm [shape: f32[2,1,2], index: 15, kind: output, shape index: {}]  }
   0x1   :  { %13467 = sst [smem:[#allocation109_spill]] %s13106_s0 }
   0x2   :  { %13468 = sst [smem:[#allocation110_spill]] %s13107_s1 }
   0x3   :  { %13469 = sst [smem:[#allocation111_spill]] %s13108_s2 }
   0x4   :  { %13470 = sst [smem:[#allocation112_spill]] %s13109_s3 }
   0x5   :  { %13471 = sst [smem:[#allocation113_spill]] %s13110_s4 }
   0x6   :  { %13472 = sst [smem:[#allocation114_spill]] %s13111_s5 }
   0x7   :  { %20 = vsyncpa [#allocation3], 0 }
   0x8   :  { %22 = vsyncpa [#allocation3 + $0x1], 0  ;;  %s8259_s18 = smov 0   ;;  %s8261_s19 = smov 0  }
   0x9   :  { %s8263_s20 = smov 0   ;;  %s8265_s21 = smov 0  }
   0xa LB: > { %13473 = sst [smem:[#allocation5_spill]] %s8166_s20  ;;  %s8280_s22 = sadd.s32 4294967295, %s8170_s21   ;;  %s8170_s21 = sphi %s8265_s21, %s14086_s21   ;;  %s8166_s20 = sphi %s8263_s20, %s14083_s20   ;;  %s8162_s19 = sphi %s8261_s19, %s14085_s19   ;;  %s8158_s18 = sphi %s8259_s18, %s14084_s18  }
   0xb   : > { %s6440_s23 = sadd.s32 4294967294, %s8170_s21   ;;  %s8284_s24 = sadd.s32 1, %s8170_s21  }
   0xc   : > { %s355_s25 = sadd.s32 1, %s8166_s20  ;;  %s352_s26 = ssub.s32 %s8170_s21, %s8284_s24 }
   0xd   : > { %p365_p0 = scmp.ne.s32.totalorder %s8166_s20, %s8162_s19  ;;  %p353_p1 = scmp.eq.s32.totalorder %s352_s26, 0 }
   0xe   : > { %p366_p2 = scmp.eq.s32.totalorder %s8280_s22, 1  ;;  %p371_p3 = scmp.ne.s32.totalorder %s8162_s19, %s8158_s18 }
   0xf   : > { %p372_p4 = scmp.eq.s32.totalorder %s6440_s23, 1  ;;  %p6443_p7 = scmp.ge.s32.totalorder %s8170_s21, 1 }
  0x10   : > { %s8295_s27 = scalar_select %p353_p1, %s8166_s20, %s355_s25  }
  0x11   : > { %p8297_p5 = por %p366_p2, %p365_p0  ;;  %p8301_p6 = por %p372_p4, %p371_p3 }
  0x12   : > { %13474 = sst [smem:[#allocation6_spill]] %s8295_s27  ;;  %p440_p8 = scmp.lt.s32.totalorder %s8170_s21, 3 }
  0x14   : > { %p441_p9 = pnand %p6443_p7, %p440_p8 }
  0x16   : > { %444 = sbr.rel (%p441_p9) target bundleno = 2550 (0x9f6), region = 80 }
  0x1b   : > { %p487_p10 = scmp.lt.s32.totalorder %s8280_s22, 1  ;;  %s13477_s0 = sld [smem:[#allocation109_spill]]  ;;  %v8176_v42 = vmov 0   ;;  %vm13134_vm0 = vcmask 1039360   ;;  %vm13162_vm1 = vcmask 1041408   ;;  %vm13135_vm2 = vcmask 1031168  }
  0x1c   : > { %s13126_s26 = smov 127   ;;  %s13128_s17 = smov 124   ;;  %7548 = vset.pattern.permute.xlu1 %v8176_v42  ;;  %7550 = vset.pattern.permute.xlu0 %v8176_v42  ;;  %vm13139_vm3 = vcmask 1022976   ;;  %vm13143_vm4 = vcmask 1043456   ;;  %vm13142_vm5 = vcmask 1014784   ;;  %vm13130_vm6 = vcmask 1045504  }
  0x1d   : > { %s488_s30 = scalar_select %p487_p10, %s8280_s22, 1  ;;  %7549 = vset.pattern.permute.xlu2 %v8176_v42  ;;  %vm673_vm7 = vcmask 80896  }
  0x1e   : > { %s13478_s2 = sld [smem:[#allocation111_spill]]  ;;  %s13786_s23 = smov 124  }
  0x1f   : > { %s7461_s16 = smul.u32 12, %s488_s30  ;;  %s13122_s30 = smov 126  }
  0x20   : > { %s13479_s3 = sld [smem:[#allocation112_spill]] }
  0x21   : > { %s491_s25 = scalar_lea.vmem %s13477_s0, %s7461_s16  ;;  %s13124_s16 = smov 125  }
  0x22   : > { %v492_v0 = vld [vmem:[%s491_s25] sm:$0xff]  ;;  %v493_v1 = vld [vmem:[%s491_s25 + $0x8] sm:$0xf]  ;;  %s13480_s1 = sld [smem:[#allocation110_spill]]  ;;  %s13802_s25 = smov 127  }
  0x23   : > { %508 = vst [vmem:[#allocation1] ss:$4 sm:$0xff] %v492_v0  ;;  %s13804_s5 = sld [smem:[#allocation114_spill]] }
  0x24   : > { %510 = vst [vmem:[#allocation1 + $0x20] ss:$4 sm:$0xff] %v493_v1  ;;  %v498_v43 = vld [vmem:[%s13478_s2] sm:$0xff]  ;;  %v499_v45 = vld [vmem:[%s13478_s2 + $0x8] sm:$0xff]  ;;  %s13855_s4 = sld [smem:[#allocation113_spill]] }
  0x26   : > { %v503_v47 = vld [vmem:[%s13479_s3 + $0x8] sm:$0xff]  ;;  %v505_v48 = vld [vmem:[%s13479_s3 + $0x18] sm:$0x1]  ;;  %v504_v52 = vld [vmem:[%s13479_s3 + $0x10] sm:$0xff] }
  0x27   : > { %v502_v53 = vld [vmem:[%s13479_s3] sm:$0xff]  ;;  %s485_s3 = sand.u32 1, %s8162_s19  }
  0x28   : > { %v496_v42 = vld [vmem:[%s13480_s1 + $0x10] sm:$0xff]  ;;  %s486_s0 = scalar_lea.vmem [#allocation2], %s485_s3 }
  0x29   : > { %s6383_s27 = sshll.u32 %s486_s0, 4  ;;  %s6384_s27 = int_to_ptr.vmem [resolvable:$true] %s6383_s27 }
  0x2a   : > { %v8312_v2 = vld.sshfl [vmem:[#allocation1] sm:$0xff pattern:$0x73625140]  ;;  %v8314_v3 = vld.sshfl [vmem:[#allocation1 + $0x8] sm:$0xff pattern:$0x73625140] }
  0x2b   : > { %v8316_v4 = vld.sshfl [vmem:[#allocation1 + $0x10] sm:$0xff pattern:$0x73625140]  ;;  %v8318_v5 = vld.sshfl [vmem:[#allocation1 + $0x18] sm:$0xff pattern:$0x73625140] }
  0x2c   : > { %524 = vst [vmem:[#allocation1 + $0x1] ss:$4 sm:$0xff] %v492_v0  ;;  %v8320_v6 = vld.sshfl [vmem:[#allocation1 + $0x20] sm:$0xff pattern:$0x73625140] }
  0x2d   : > { %v8322_v7 = vld.sshfl [vmem:[#allocation1 + $0x28] sm:$0xff pattern:$0x73625140] }
  0x2e   : > { %526 = vst [vmem:[#allocation1 + $0x21] ss:$4 sm:$0xff] %v493_v1 }
  0x33   : > { %v527_v8 = vld.sshfl [vmem:[#allocation1] sm:$0xff pattern:$0x73625140]  ;;  %v528_v9 = vld.sshfl [vmem:[#allocation1 + $0x8] sm:$0xff pattern:$0x73625140] }
  0x34   : > { %v529_v10 = vld.sshfl [vmem:[#allocation1 + $0x10] sm:$0xff pattern:$0x73625140]  ;;  %v530_v11 = vld.sshfl [vmem:[#allocation1 + $0x18] sm:$0xff pattern:$0x73625140]  ;;  %v7508_v12 = vpack.i.bf16 %v528_v9, %v527_v8 }
  0x35   : > { %558 = vst [vmem:[#allocation1 + $0x2] ss:$4 sm:$0xff] %v492_v0  ;;  %v7513_v13 = vpack.i.bf16 %v530_v11, %v529_v10  ;;  %v531_v14 = vld.sshfl [vmem:[#allocation1 + $0x20] sm:$0xff pattern:$0x73625140]  ;;  %v500_v8 = vld [vmem:[%s13478_s2 + $0x10] sm:$0xff] }
  0x36   : > { %7509 = vrot.lane.b32.xlu0 %v7508_v12, %s13126_s26  ;;  %v532_v15 = vld.sshfl [vmem:[#allocation1 + $0x28] sm:$0xff pattern:$0x73625140] }
  0x37   : > { %7514 = vrot.lane.b32.xlu2 %v7513_v13, %s13126_s26  ;;  %560 = vst [vmem:[#allocation1 + $0x22] ss:$4 sm:$0xff] %v493_v1  ;;  %v7533_v38 = vpack.i.bf16 %v532_v15, %v531_v14 }
  0x3c   : > { %v561_v16 = vld.sshfl [vmem:[#allocation1] sm:$0xff pattern:$0x73625140]  ;;  %v562_v17 = vld.sshfl [vmem:[#allocation1 + $0x8] sm:$0xff pattern:$0x73625140] }
  0x3d   : > { %v7518_v18 = vpack.i.bf16 %v562_v17, %v561_v16  ;;  %v563_v19 = vld.sshfl [vmem:[#allocation1 + $0x10] sm:$0xff pattern:$0x73625140]  ;;  %v564_v20 = vld.sshfl [vmem:[#allocation1 + $0x18] sm:$0xff pattern:$0x73625140] }
  0x3e   : > { %592 = vst [vmem:[#allocation1 + $0x3] ss:$4 sm:$0xff] %v492_v0  ;;  %v565_v21 = vld.sshfl [vmem:[#allocation1 + $0x20] sm:$0xff pattern:$0x73625140]  ;;  %v7523_v23 = vpack.i.bf16 %v564_v20, %v563_v19 }
  0x3f   : > { %7519 = vrot.lane.b32.xlu0 %v7518_v18, %s13122_s30  ;;  %v566_v22 = vld.sshfl [vmem:[#allocation1 + $0x28] sm:$0xff pattern:$0x73625140]  ;;  %v8392_v16 = vld [vmem:[%s13480_s1] sm:$0xff]  ;;  %v8397_v17 = vld [vmem:[%s13480_s1 + $0x18] sm:$0x1] }
  0x40   : > { %594 = vst [vmem:[#allocation1 + $0x23] ss:$4 sm:$0xff] %v493_v1  ;;  %v7543_v31 = vpack.i.bf16 %v566_v22, %v565_v21 }
  0x45   : > { %v595_v24 = vld.sshfl [vmem:[#allocation1] sm:$0xff pattern:$0x73625140]  ;;  %v596_v25 = vld.sshfl [vmem:[#allocation1 + $0x8] sm:$0xff pattern:$0x73625140] }
  0x46   : > { %v597_v26 = vld.sshfl [vmem:[#allocation1 + $0x10] sm:$0xff pattern:$0x73625140]  ;;  %v598_v27 = vld.sshfl [vmem:[#allocation1 + $0x18] sm:$0xff pattern:$0x73625140]  ;;  %v7528_v28 = vpack.i.bf16 %v596_v25, %v595_v24 }
  0x47   : > { %7524 = vrot.lane.b32.xlu0 %v7523_v23, %s13122_s30  ;;  %625 = vst [vmem:[#allocation1] ss:$4 sm:$0xff] %v492_v0  ;;  %v600_v29 = vld.sshfl [vmem:[#allocation1 + $0x28] sm:$0xff pattern:$0x73625140] }
  0x48   : > { %7529 = vrot.lane.b32.xlu2 %v7528_v28, %s13124_s16  ;;  %v599_v30 = vld.sshfl [vmem:[#allocation1 + $0x20] sm:$0xff pattern:$0x73625140] }
  0x49   : > { %627 = vst [vmem:[#allocation1 + $0x20] ss:$4 sm:$0xff] %v493_v1  ;;  %v7538_v35 = vpack.i.bf16 %v599_v30, %v598_v27 }
  0x4e   : > { %v628_v32 = vld.sshfl [vmem:[#allocation1] sm:$0xff pattern:$0x73625140]  ;;  %v629_v33 = vld.sshfl [vmem:[#allocation1 + $0x8] sm:$0xff pattern:$0x73625140] }
  0x4f   : > { %634 = vrot.lane.b32.xlu1 %v628_v32, %s13128_s17  ;;  %7544 = vrot.lane.b32.xlu0 %v7543_v31, %s13122_s30  ;;  %v631_v34 = vld.sshfl [vmem:[#allocation1 + $0x18] sm:$0xff pattern:$0x73625140]  ;;  %v630_v36 = vld.sshfl [vmem:[#allocation1 + $0x10] sm:$0xff pattern:$0x73625140] }
  0x50   : > { %605 = vrot.lane.b32.xlu2 %v597_v26, %s13124_s16  ;;  %v633_v37 = vld.sshfl [vmem:[#allocation1 + $0x28] sm:$0xff pattern:$0x73625140]  ;;  %v632_v39 = vld.sshfl [vmem:[#allocation1 + $0x20] sm:$0xff pattern:$0x73625140] }
  0x51   : > { %v495_v32 = vld [vmem:[%s13480_s1 + $0x8] sm:$0xff]  ;;  %s13790_s30 = smov 125  }
  0x57   : > { %636 = vrot.lane.b32.xlu1 %v629_v33, %s13128_s17  ;;  %640 = vrot.lane.b32.xlu0 %v631_v34, %s13128_s17 }
  0x58   : > { %7539 = vrot.lane.b32.xlu2 %v7538_v35, %s13124_s16 }
  0x5f   : > { %638 = vrot.lane.b32.xlu1 %v630_v36, %s13128_s17  ;;  %611 = vrot.lane.b32.xlu0 %v600_v29, %s13124_s16  ;;  %s13794_s16 = smov 126  }
  0x60   : > { %644 = vrot.lane.b32.xlu2 %v633_v37, %s13128_s17 }
  0x67   : > { %7534 = vrot.lane.b32.xlu1 %v7533_v38, %s13126_s26  ;;  %879 = vperm.xlu0 %7550, %v499_v45  }
  0x68   : > { %918 = vperm.xlu2 %7549, %v502_v53  }
  0x6f   : > { %642 = vrot.lane.b32.xlu1 %v632_v39, %s13128_s17  ;;  %933 = vperm.xlu0 %7550, %v505_v48  }
  0x70   : > { %884 = vperm.xlu2 %7549, %v500_v8  }
  0x77   : > { %874 = vperm.xlu1 %7548, %v498_v43  }
  0x7f   : > { %923 = vperm.xlu1 %7548, %v503_v47  }
  0x87   : > { %928 = vperm.xlu1 %7548, %v504_v52  }
  0x91   : > { %v8340_v41 = vpop.permute.xlu2 %7514 }
  0x92   : > { %v7517_v59 = vunpack.i.h.bf16 %v8340_v41  ;;  %v7516_v60 = vunpack.i.l.bf16 %v8340_v41 }
  0x94   : > { %v548_v15 = vsel %vm13134_vm0, %v7516_v60, %v7517_v59 }
  0x95   : > { %v655_v21 = vsel %vm13162_vm1, %v8316_v4, %v548_v15  ;;  %v501_v4 = vld [vmem:[%s13478_s2 + $0x18] sm:$0x1]  ;;  %v13494_v15 = vmov 0 }
  0x96   : > { %889 = vperm.xlu2 %7549, %v501_v4  }
  0xa2   : > { %v8348_v46 = vpop.permute.xlu2 %7529 }
  0xa3   : > { %v7532_v61 = vunpack.i.h.bf16 %v8348_v46  ;;  %v7531_v62 = vunpack.i.l.bf16 %v8348_v46 }
  0xa5   : > { %v614_v10 = vsel %vm13139_vm3, %v7531_v62, %v7532_v61 }
  0xa8   : > { %v7510_v40 = vpop.permute.xlu0 %7509 }
  0xa9   : > { %v7512_v50 = vunpack.i.h.bf16 %v7510_v40  ;;  %v7511_v51 = vunpack.i.l.bf16 %v7510_v40 }
  0xaa   : > { %v606_v54 = vpop.permute.xlu2 %605 }
  0xab   : > { %v546_v58 = vsel %vm13134_vm0, %v7511_v51, %v7512_v50  ;;  %v547_v18 = vsel %vm13134_vm0, %v7512_v50, %v7516_v60  ;;  %v615_v27 = vsel %vm13139_vm3, %v7532_v61, %v606_v54 }
  0xac   : > { %v653_v1 = vsel %vm13162_vm1, %v8312_v2, %v546_v58  ;;  %v654_v23 = vsel %vm13162_vm1, %v8314_v3, %v547_v18 }
  0xb1   : > { %v7520_v44 = vpop.permute.xlu0 %7519 }
  0xb2   : > { %v7522_v56 = vunpack.i.h.bf16 %v7520_v44  ;;  %v7521_v57 = vunpack.i.l.bf16 %v7520_v44  ;;  %v8381_v14 = vpop.permute.xlu2 %7539 }
  0xb3   : > { %v7541_v20 = vunpack.i.l.bf16 %v8381_v14  ;;  %v7542_v48 = vunpack.i.h.bf16 %v8381_v14 }
  0xb4   : > { %v580_v0 = vsel %vm13135_vm2, %v7521_v57, %v7522_v56 }
  0xb5   : > { %v660_v11 = vsel %vm13143_vm4, %v653_v1, %v580_v0  ;;  %v616_v29 = vsel %vm13139_vm3, %v606_v54, %v7541_v20  ;;  %v13313_v1 = vmov 1.0  }
  0xb6   : > { %v667_v19 = vsel %vm13130_vm6, %v660_v11, %v614_v10 }
  0xb9   : > { %v8356_v49 = vpop.permute.xlu0 %7524 }
  0xba   : > { %v7527_v12 = vunpack.i.h.bf16 %v8356_v49  ;;  %v7526_v13 = vunpack.i.l.bf16 %v8356_v49  ;;  %v645_v35 = vpop.permute.xlu2 %644  ;;  %v1104_v49 = vlaneseq }
  0xbc   : > { %v581_v22 = vsel %vm13135_vm2, %v7522_v56, %v7526_v13  ;;  %v582_v24 = vsel %vm13135_vm2, %v7526_v13, %v7527_v12  ;;  %v8487_v60 = vshrl.u32 %v1104_v49, 7  ;;  %v8489_v61 = vand.u32 127, %v1104_v49 }
  0xbd   : > { %v661_v28 = vsel %vm13143_vm4, %v654_v23, %v581_v22  ;;  %v662_v30 = vsel %vm13143_vm4, %v655_v21, %v582_v24  ;;  %v13502_v23 = vmov 0 }
  0xbe   : > { %v668_v33 = vsel %vm13130_vm6, %v661_v28, %v615_v27  ;;  %v669_v34 = vsel %vm13130_vm6, %v662_v30, %v616_v29  ;;  %13481 = vst [vmem:[#allocation7_spill] sm:$0xff] %v8487_v60  ;;  %v8495_v62 = vadd.s32 120, %v8487_v60  ;;  %v8501_v0 = vadd.s32 112, %v8487_v60 }
  0xbf   : > { %13482 = vst [vmem:[#allocation8_spill] sm:$0xff] %v8489_v61  ;;  %v8514_v8 = vadd.s32 104, %v8487_v60  ;;  %v8526_v10 = vadd.s32 88, %v8487_v60  ;;  %v8529_v11 = vadd.s32 248, %v8487_v60  ;;  %v8560_v13 = vadd.s32 240, %v8487_v60 }
  0xc0   : > { %13483 = vst [vmem:[#allocation9_spill] sm:$0xff] %v8495_v62  ;;  %v8575_v14 = vadd.s32 72, %v8487_v60  ;;  %v8602_v18 = vadd.s32 376, %v8487_v60  ;;  %v8616_v21 = vadd.s32 216, %v8487_v60  ;;  %v8628_v22 = vadd.s32 368, %v8487_v60 }
  0xc1   : > { %v635_v55 = vpop.permute.xlu1 %634  ;;  %v8369_v63 = vpop.permute.xlu0 %7544  ;;  %13485 = vst [vmem:[#allocation11_spill] sm:$0xff] %v8501_v0  ;;  %v8640_v24 = vadd.s32 48, %v8487_v60  ;;  %v8655_v4 = vadd.s32 360, %v8487_v60  ;;  %v8670_v27 = vadd.s32 40, %v8487_v60  ;;  %v8682_v28 = vadd.s32 200, %v8487_v60 }
  0xc2   : > { %v7547_v36 = vunpack.i.h.bf16 %v8369_v63  ;;  %v7546_v38 = vunpack.i.l.bf16 %v8369_v63  ;;  %v8498_v63 = vmul.u32 2, %v8489_v61  ;;  %13486 = vst [vmem:[#allocation12_spill] sm:$0xff] %v8514_v8  ;;  %v8685_v29 = vadd.s32 352, %v8487_v60 }
  0xc3   : > { %13488 = vst [vmem:[#allocation14_spill] sm:$0xff] %v8526_v10  ;;  %v13512_v30 = vmov 0  ;;  %v8926_v49 = vadd.s32 480, %v8487_v60 }
  0xc4   : > { %v584_v46 = vsel %vm13135_vm2, %v7546_v38, %v7547_v36  ;;  %13484 = vst [vmem:[#allocation10_spill] sm:$0xff] %v8498_v63  ;;  %vm13161_vm8 = vcmp.eq.s32.totalorder %v8495_v62, %v8498_v63  ;;  %vm13156_vm9 = vcmp.eq.s32.totalorder %v8501_v0, %v8498_v63  ;;  %vm13155_vm10 = vcmp.eq.s32.totalorder %v8514_v8, %v8498_v63 }
  0xc5   : > { %13489 = vst [vmem:[#allocation15_spill] sm:$0xff] %v8529_v11  ;;  %vm13149_vm12 = vcmp.eq.s32.totalorder %v8526_v10, %v8498_v63  ;;  %vm13131_vm13 = vcmp.eq.s32.totalorder %v8529_v11, %v8498_v63  ;;  %vm13132_vm15 = vcmp.eq.s32.totalorder %v8560_v13, %v8498_v63 }
  0xc6   : > { %13491 = vst [vmem:[#allocation17_spill] sm:$0xff] %v8560_v13 }
  0xc7   : > { %13492 = vst [vmem:[#allocation18_spill] sm:$0xff] %v8575_v14 }
  0xc8   : > { %13505 = vst [vmem:[#allocation25_spill] sm:$0xff] %v8640_v24 }
  0xc9   : > { %v637_v9 = vpop.permute.xlu1 %636  ;;  %v641_v25 = vpop.permute.xlu0 %640  ;;  %13506 = vst [vmem:[#allocation26_spill] sm:$0xff] %v8655_v4 }
  0xca   : > { %v647_v2 = vsel %vm13142_vm5, %v635_v55, %v637_v9  ;;  %v617_v55 = vsel %vm13139_vm3, %v7541_v20, %v7542_v48  ;;  %v8613_v20 = vadd.s32 56, %v8487_v60  ;;  %13510 = vst [vmem:[#allocation28_spill] sm:$0xff] %v8670_v27 }
  0xcb   : > { %6445 = vmatpush.msk.msra.mxu0 %vm13162_vm1, %v647_v2  ;;  %7432 = vmatpush.msk.msra.mxu1 %vm13162_vm1, %v647_v2  ;;  %v8578_v2 = vadd.s32 232, %v8487_v60  ;;  %13511 = vst [vmem:[#allocation29_spill] sm:$0xff] %v8685_v29 }
  0xcc   : > { %13501 = vst [vmem:[#allocation23_spill] sm:$0xff] %v8613_v20 }
  0xcd   : > { %713 = vmatpush.msra.mxu0 %v667_v19  ;;  %7433 = vmatpush.msra.mxu1 %v667_v19  ;;  %13493 = vst [vmem:[#allocation19_spill] sm:$0xff] %v8578_v2  ;;  %v13498_v19 = vmov 0 }
  0xce   : > { %6446 = vmatmul.msk.f32.vlgmr.msra.gmra.mxu0 %vm673_vm7, %v8392_v16  ;;  %6449 = vmatmul.msk.f32.vlgmr.msra.gmra.mxu1 %vm673_vm7, %v8397_v17  ;;  %13554 = vst [vmem:[#allocation60_spill] sm:$0xff] %v8926_v49 }
  0xd1   : > { %v639_v26 = vpop.permute.xlu1 %638  ;;  %v612_v43 = vpop.permute.xlu0 %611 }
  0xd2   : > { %v648_v3 = vsel %vm13142_vm5, %v637_v9, %v639_v26  ;;  %v649_v31 = vsel %vm13142_vm5, %v639_v26, %v641_v25  ;;  %v8523_v9 = vadd.s32 96, %v8487_v60  ;;  %v13507_v26 = vmov 0 }
  0xd3   : > { %6450 = vmatpush.msk.msrb.mxu1 %vm13162_vm1, %v648_v3  ;;  %6455 = vmatpush.msk.msra.mxu2 %vm13162_vm1, %v649_v31  ;;  %v8698_v3 = vadd.s32 32, %v8487_v60  ;;  %v8701_v31 = vadd.s32 192, %v8487_v60 }
  0xd4   : > { %13487 = vst [vmem:[#allocation13_spill] sm:$0xff] %v8523_v9  ;;  %vm13150_vm11 = vcmp.eq.s32.totalorder %v8523_v9, %v8498_v63 }
  0xd5   : > { %742 = vmatpush.msrb.mxu1 %v668_v33  ;;  %771 = vmatpush.msra.mxu2 %v669_v34  ;;  %13515 = vst [vmem:[#allocation31_spill] sm:$0xff] %v8698_v3  ;;  %v13517_v33 = vmov 0  ;;  %v8732_v34 = vadd.s32 24, %v8487_v60 }
  0xd6   : > { %6447 = vmatmul.msk.f32.gmra.mxu0 %vm673_vm7, %v495_v32  ;;  %6451 = vmatmul.msk.f32.vlgmr.msrb.gmra.mxu1 %vm673_vm7, %v8392_v16 }
  0xd7   : > { %6456 = vmatmul.msk.f32.vlgmr.msra.gmra.mxu2 %vm673_vm7, %v8392_v16  ;;  %6470 = vmatpush.msk.msra.mxu1 %vm13162_vm1, %v645_v35  ;;  %13520 = vst [vmem:[#allocation34_spill] sm:$0xff] %v8732_v34 }
  0xd8   : > { %6781 = vmatpush.msk.msrb.mxu2 %vm13161_vm8, %v13313_v1 }
  0xd9   : > { %v7535_v37 = vpop.permute.xlu1 %7534 }
  0xda   : > { %v7537_v39 = vunpack.i.h.bf16 %v7535_v37  ;;  %v7536_v40 = vunpack.i.l.bf16 %v7535_v37  ;;  %6782 = vmatpush.msk.msrb.mxu2 %vm13156_vm9, %v13313_v1  ;;  %v13523_v37 = vmov 0 }
  0xdc   : > { %v549_v44 = vsel %vm13134_vm0, %v7517_v59, %v7536_v40  ;;  %v550_v45 = vsel %vm13134_vm0, %v7536_v40, %v7537_v39  ;;  %v658_v47 = vsel %vm13162_vm1, %v8322_v7, %v7537_v39  ;;  %v618_v7 = vsel %vm13139_vm3, %v7542_v48, %v612_v43  ;;  %6783 = vmatpush.msk.msrb.mxu2 %vm13155_vm10, %v13313_v1 }
  0xdd   : > { %v657_v50 = vsel %vm13162_vm1, %v8320_v6, %v550_v45  ;;  %v665_v51 = vsel %vm13143_vm4, %v658_v47, %v7547_v36  ;;  %v656_v41 = vsel %vm13162_vm1, %v8318_v5, %v549_v44  ;;  %v583_v6 = vsel %vm13135_vm2, %v7527_v12, %v7546_v38 }
  0xde   : > { %6448 = vmatmul.msk.f32.gmra.mxu0 %vm673_vm7, %v496_v42  ;;  %6452 = vmatmul.msk.f32.gmra.mxu1 %vm673_vm7, %v495_v32  ;;  %v672_v52 = vsel %vm13130_vm6, %v665_v51, %v612_v43  ;;  %v664_v53 = vsel %vm13143_vm4, %v657_v50, %v584_v46  ;;  %v663_v56 = vsel %vm13143_vm4, %v656_v41, %v583_v6  ;;  %v8536_v12 = vadd.s32 80, %v8487_v60 }
  0xdf   : > { %6457 = vmatmul.msk.f32.gmra.mxu2 %vm673_vm7, %v495_v32  ;;  %858 = vmatpush.msra.mxu1 %v672_v52  ;;  %v671_v58 = vsel %vm13130_vm6, %v664_v53, %v618_v7  ;;  %v670_v59 = vsel %vm13130_vm6, %v663_v56, %v617_v55  ;;  %vm8582_vm6 = vcmp.eq.s32.totalorder %v8575_v14, %v8498_v63  ;;  %v8741_v36 = vadd.s32 336, %v8487_v60 }
  0xe0   : > { %13490 = vst [vmem:[#allocation16_spill] sm:$0xff] %v8536_v12  ;;  %6784 = vmatpush.msk.msrb.mxu2 %vm13150_vm11, %v13313_v1  ;;  %vm13144_vm14 = vcmp.eq.s32.totalorder %v8536_v12, %v8498_v63  ;;  %v13495_v15 = vsel %vm8582_vm6, 4294967295, %v13494_v15  ;;  %vm8633_vm0 = vcmp.eq.s32.totalorder %v8613_v20, %v8498_v63  ;;  %vm13137_vm2 = vcmp.eq.s32.totalorder %v8616_v21, %v8498_v63 }
  0xe1   : > { %v643_v54 = vpop.permute.xlu1 %642  ;;  %13496 = vst [vmem:[#allocation20_spill] sm:$0xff] %v13495_v15  ;;  %v13503_v23 = vsel %vm8633_vm0, 4294967295, %v13502_v23  ;;  %vm8693_vm3 = vcmp.eq.s32.totalorder %v8670_v27, %v8498_v63  ;;  %vm13147_vm4 = vcmp.eq.s32.totalorder %v8701_v31, %v8498_v63  ;;  %v8758_v38 = vadd.s32 16, %v8487_v60 }
  0xe2   : > { %v650_v5 = vsel %vm13142_vm5, %v641_v25, %v643_v54  ;;  %v651_v57 = vsel %vm13142_vm5, %v643_v54, %v645_v35  ;;  %6785 = vmatpush.msk.msrb.mxu2 %vm13149_vm12, %v13313_v1  ;;  %13504 = vst [vmem:[#allocation24_spill] sm:$0xff] %v13503_v23  ;;  %v8643_v25 = vadd.s32 208, %v8487_v60  ;;  %v13513_v30 = vsel %vm8693_vm3, 4294967295, %v13512_v30 }
  0xe3   : > { %6460 = vmatpush.msk.msra.mxu3 %vm13162_vm1, %v650_v5  ;;  %6465 = vmatpush.msk.msrb.mxu0 %vm13162_vm1, %v651_v57  ;;  %13514 = vst [vmem:[#allocation30_spill] sm:$0xff] %v13513_v30  ;;  %vm8723_vm5 = vcmp.eq.s32.totalorder %v8698_v3, %v8498_v63  ;;  %v8738_v35 = vadd.s32 184, %v8487_v60  ;;  %v8761_v39 = vadd.s32 176, %v8487_v60  ;;  %v8764_v40 = vadd.s32 328, %v8487_v60 }
  0xe4   : > { %6786 = vmatpush.msk.msrb.mxu2 %vm13144_vm14, %v13313_v1  ;;  %v13518_v33 = vsel %vm8723_vm5, 4294967295, %v13517_v33  ;;  %13522 = vst [vmem:[#allocation36_spill] sm:$0xff] %v8741_v36  ;;  %v13529_v43 = vmov 0  ;;  %v8794_v44 = vadd.s32 8, %v8487_v60  ;;  %v8800_v45 = vadd.s32 168, %v8487_v60 }
  0xe5   : > { %800 = vmatpush.msra.mxu3 %v670_v59  ;;  %829 = vmatpush.msrb.mxu0 %v671_v58  ;;  %13519 = vst [vmem:[#allocation33_spill] sm:$0xff] %v13518_v33  ;;  %vm13153_vm12 = vcmp.eq.s32.totalorder %v8761_v39, %v8498_v63  ;;  %vm13152_vm11 = vcmp.eq.s32.totalorder %v8764_v40, %v8498_v63  ;;  %v8803_v46 = vadd.s32 320, %v8487_v60  ;;  %v13535_v47 = vmov 0 }
  0xe6   : > { %6453 = vmatmul.msk.f32.gmra.mxu1 %vm673_vm7, %v496_v42  ;;  %6461 = vmatmul.msk.f32.vlgmr.msra.gmra.mxu3 %vm673_vm7, %v8392_v16  ;;  %13521 = vst [vmem:[#allocation35_spill] sm:$0xff] %v8738_v35  ;;  %v8820_v48 = vadd.s32 160, %v8487_v60  ;;  %v8823_v50 = vadd.s32 312, %v8487_v60  ;;  %v8826_v51 = vadd.s32 504, %v8487_v60  ;;  %v13541_v41 = vmov 0 }
  0xe7   : > { %6458 = vmatmul.msk.f32.gmra.mxu2 %vm673_vm7, %v496_v42  ;;  %6466 = vmatmul.msk.f32.vlgmr.msrb.gmra.mxu0 %vm673_vm7, %v8392_v16  ;;  %13526 = vst [vmem:[#allocation38_spill] sm:$0xff] %v8758_v38  ;;  %v8854_v52 = vadd.s32 152, %v8487_v60  ;;  %v8862_v7 = vadd.s32 304, %v8487_v60  ;;  %v8865_v53 = vadd.s32 496, %v8487_v60  ;;  %v8868_v6 = vadd.s32 632, %v8487_v60 }
  0xe8   : > { %6797 = vmatpush.msk.msrb.mxu3 %vm13131_vm13, %v13313_v1  ;;  %vm13133_vm13 = vcmp.eq.s32.totalorder %v8578_v2, %v8498_v63  ;;  %6787 = vmatpush.msk.msrb.mxu2 %vm8582_vm6, %v13313_v1  ;;  %13527 = vst [vmem:[#allocation39_spill] sm:$0xff] %v8761_v39  ;;  %vm13159_vm10 = vcmp.eq.s32.totalorder %v8820_v48, %v8498_v63  ;;  %v8881_v54 = vadd.s32 144, %v8487_v60  ;;  %v8884_v55 = vadd.s32 296, %v8487_v60 }
  0xe9   : > { %13528 = vst [vmem:[#allocation40_spill] sm:$0xff] %v8764_v40  ;;  %vm13160_vm9 = vcmp.eq.s32.totalorder %v8823_v50, %v8498_v63  ;;  %v8887_v56 = vadd.s32 488, %v8487_v60  ;;  %vm1443_vm8 = vcmp.eq.s32.totalorder %v8868_v6, %v8498_v63  ;;  %v8897_v5 = vadd.s32 624, %v8487_v60 }
  0xea   : > { %6798 = vmatpush.msk.msrb.mxu3 %vm13132_vm15, %v13313_v1  ;;  %13532 = vst [vmem:[#allocation42_spill] sm:$0xff] %v8794_v44  ;;  %vm13173_vm1 = vcmp.eq.s32.totalorder %v8884_v55, %v8498_v63  ;;  %v8914_v57 = vadd.s32 136, %v8487_v60  ;;  %v8923_v59 = vadd.s32 288, %v8487_v60  ;;  %v8971_v33 = vadd.s32 608, %v8487_v60 }
  0xeb   : > { %13533 = vst [vmem:[#allocation43_spill] sm:$0xff] %v8800_v45  ;;  %v8974_v30 = vadd.s32 272, %v8487_v60  ;;  %v8984_v23 = vadd.s32 600, %v8487_v60  ;;  %v9002_v15 = vadd.s32 456, %v8487_v60 }
  0xec   : > { %6799 = vmatpush.msk.msrb.mxu3 %vm13133_vm13, %v13313_v1  ;;  %vm1347_vm13 = vcmp.eq.s32.totalorder %v8602_v18, %v8498_v63  ;;  %13534 = vst [vmem:[#allocation44_spill] sm:$0xff] %v8803_v46 }
  0xed   : > { %6813 = vmatpush.msk.msra.mxu0 %vm1347_vm13, %v13313_v1  ;;  %vm13138_vm13 = vcmp.eq.s32.totalorder %v8628_v22, %v8498_v63  ;;  %13538 = vst [vmem:[#allocation46_spill] sm:$0xff] %v8820_v48 }
  0xee   : > { %6454 = vmatmul.msk.f32.gmra.mxu1 %vm673_vm7, %v8397_v17  ;;  %6462 = vmatmul.msk.f32.gmra.mxu3 %vm673_vm7, %v495_v32  ;;  %13539 = vst [vmem:[#allocation47_spill] sm:$0xff] %v8823_v50 }
  0xef   : > { %6459 = vmatmul.msk.f32.gmra.mxu2 %vm673_vm7, %v8397_v17  ;;  %6467 = vmatmul.msk.f32.gmra.mxu0 %vm673_vm7, %v495_v32  ;;  %13540 = vst [vmem:[#allocation48_spill] sm:$0xff] %v8826_v51 }
  0xf0   : > { %6814 = vmatpush.msk.msra.mxu0 %vm13138_vm13, %v13313_v1  ;;  %vm13140_vm13 = vcmp.eq.s32.totalorder %v8655_v4, %v8498_v63  ;;  %13544 = vst [vmem:[#allocation50_spill] sm:$0xff] %v8854_v52 }
  0xf1   : > { %13545 = vst [vmem:[#allocation51_spill] sm:$0xff] %v8862_v7 }
  0xf2   : > { %6815 = vmatpush.msk.msra.mxu0 %vm13140_vm13, %v13313_v1  ;;  %vm13148_vm13 = vcmp.eq.s32.totalorder %v8682_v28, %v8498_v63  ;;  %13546 = vst [vmem:[#allocation52_spill] sm:$0xff] %v8865_v53 }
  0xf3   : > { %13547 = vst [vmem:[#allocation53_spill] sm:$0xff] %v8868_v6 }
  0xf4   : > { %13548 = vst [vmem:[#allocation54_spill] sm:$0xff] %v8881_v54 }
  0xf5   : > { %13549 = vst [vmem:[#allocation55_spill] sm:$0xff] %v8884_v55 }
  0xf6   : > { %6463 = vmatmul.msk.f32.gmra.mxu3 %vm673_vm7, %v496_v42  ;;  %6471 = vmatmul.msk.f32.vlgmr.msra.gmra.mxu1 %vm673_vm7, %v8392_v16  ;;  %v8589_v16 = vadd.s32 64, %v8487_v60  ;;  %13550 = vst [vmem:[#allocation56_spill] sm:$0xff] %v8887_v56 }
  0xf7   : > { %6468 = vmatmul.msk.f32.gmra.mxu0 %vm673_vm7, %v496_v42  ;;  %13551 = vst [vmem:[#allocation57_spill] sm:$0xff] %v8897_v5 }
  0xf8   : > { %13497 = vst [vmem:[#allocation21_spill] sm:$0xff] %v8589_v16 }
  0xf9   : > { %13552 = vst [vmem:[#allocation58_spill] sm:$0xff] %v8914_v57 }
  0xfa   : > { %13553 = vst [vmem:[#allocation59_spill] sm:$0xff] %v8923_v59 }
  0xfb   : > { %13559 = vst [vmem:[#allocation65_spill] sm:$0xff] %v8971_v33 }
  0xfc   : > { %13560 = vst [vmem:[#allocation66_spill] sm:$0xff] %v8974_v30 }
  0xfd   : > { %13562 = vst [vmem:[#allocation68_spill] sm:$0xff] %v8984_v23 }
  0xfe   : > { %6464 = vmatmul.msk.f32.gmra.mxu3 %vm673_vm7, %v8397_v17  ;;  %6472 = vmatmul.msk.f32.gmra.mxu1 %vm673_vm7, %v495_v32  ;;  %v8704_v32 = vadd.s32 344, %v8487_v60  ;;  %13564 = vst [vmem:[#allocation70_spill] sm:$0xff] %v9002_v15 }
  0xff   : > { %6469 = vmatmul.msk.f32.gmra.mxu0 %vm673_vm7, %v8397_v17 }
 0x100   : > { %13516 = vst [vmem:[#allocation32_spill] sm:$0xff] %v8704_v32  ;;  %vm13146_vm14 = vcmp.eq.s32.totalorder %v8704_v32, %v8498_v63 }
 0x106   : > { %6473 = vmatmul.msk.f32.gmra.mxu1 %vm673_vm7, %v496_v42  ;;  %v8766_v42 = vpop.permute.xlu2 %918 }
 0x10e   : > { %6474 = vmatmul.msk.f32.gmra.mxu1 %vm673_vm7, %v8397_v17  ;;  %v8592_v17 = vadd.s32 224, %v8487_v60  ;;  %vm8606_vm7 = vcmp.eq.s32.totalorder %v8589_v16, %v8498_v63  ;;  %v8916_v58 = vpop.permute.xlu2 %884 }
 0x10f   : > { %v13499_v19 = vsel %vm8606_vm7, 4294967295, %v13498_v19  ;;  %6788 = vmatpush.msk.msrb.mxu2 %vm8606_vm7, %v13313_v1 }
 0x110   : > { %13500 = vst [vmem:[#allocation22_spill] sm:$0xff] %v13499_v19  ;;  %vm13136_vm15 = vcmp.eq.s32.totalorder %v8592_v17, %v8498_v63  ;;  %v8999_v19 = vadd.s32 264, %v8487_v60 }
 0x111   : > { %6800 = vmatpush.msk.msrb.mxu3 %vm13136_vm15, %v13313_v1  ;;  %6789 = vmatpush.msk.msrb.mxu2 %vm8633_vm0, %v13313_v1  ;;  %vm8663_vm15 = vcmp.eq.s32.totalorder %v8640_v24, %v8498_v63 }
 0x112   : > { %v13508_v26 = vsel %vm8663_vm15, 4294967295, %v13507_v26  ;;  %13563 = vst [vmem:[#allocation69_spill] sm:$0xff] %v8999_v19 }
 0x113   : > { %6801 = vmatpush.msk.msrb.mxu3 %vm13137_vm2, %v13313_v1  ;;  %13509 = vst [vmem:[#allocation27_spill] sm:$0xff] %v13508_v26  ;;  %vm13141_vm2 = vcmp.eq.s32.totalorder %v8643_v25, %v8498_v63  ;;  %6790 = vmatpush.msk.msrb.mxu2 %vm8663_vm15, %v13313_v1  ;;  %v8981_v26 = vadd.s32 464, %v8487_v60 }
 0x115   : > { %6802 = vmatpush.msk.msrb.mxu3 %vm13141_vm2, %v13313_v1  ;;  %6791 = vmatpush.msk.msrb.mxu2 %vm8693_vm3, %v13313_v1  ;;  %vm13145_vm2 = vcmp.eq.s32.totalorder %v8685_v29, %v8498_v63  ;;  %13561 = vst [vmem:[#allocation67_spill] sm:$0xff] %v8981_v26 }
 0x116   : > { %6816 = vmatpush.msk.msra.mxu0 %vm13145_vm2, %v13313_v1  ;;  %vm8753_vm2 = vcmp.eq.s32.totalorder %v8732_v34, %v8498_v63 }
 0x117   : > { %6803 = vmatpush.msk.msrb.mxu3 %vm13148_vm13, %v13313_v1  ;;  %6792 = vmatpush.msk.msrb.mxu2 %vm8723_vm5, %v13313_v1  ;;  %v13524_v37 = vsel %vm8753_vm2, 4294967295, %v13523_v37  ;;  %vm8785_vm13 = vcmp.eq.s32.totalorder %v8758_v38, %v8498_v63 }
 0x118   : > { %6817 = vmatpush.msk.msra.mxu0 %vm13146_vm14, %v13313_v1  ;;  %13525 = vst [vmem:[#allocation37_spill] sm:$0xff] %v13524_v37  ;;  %vm13154_vm14 = vcmp.eq.s32.totalorder %v8738_v35, %v8498_v63  ;;  %v13530_v43 = vsel %vm8785_vm13, 4294967295, %v13529_v43  ;;  %v8956_v37 = vadd.s32 472, %v8487_v60 }
 0x119   : > { %6804 = vmatpush.msk.msrb.mxu3 %vm13147_vm4, %v13313_v1  ;;  %6793 = vmatpush.msk.msrb.mxu2 %vm8753_vm2, %v13313_v1  ;;  %vm13151_vm4 = vcmp.eq.s32.totalorder %v8741_v36, %v8498_v63  ;;  %13531 = vst [vmem:[#allocation41_spill] sm:$0xff] %v13530_v43  ;;  %v8945_v43 = vadd.s32 280, %v8487_v60 }
 0x11a   : > { %6818 = vmatpush.msk.msra.mxu0 %vm13151_vm4, %v13313_v1  ;;  %vm8815_vm4 = vcmp.eq.s32.totalorder %v8794_v44, %v8498_v63  ;;  %13558 = vst [vmem:[#allocation64_spill] sm:$0xff] %v8956_v37 }
 0x11b   : > { %6805 = vmatpush.msk.msrb.mxu3 %vm13154_vm14, %v13313_v1  ;;  %6794 = vmatpush.msk.msrb.mxu2 %vm8785_vm13, %v13313_v1  ;;  %v13536_v47 = vsel %vm8815_vm4, 4294967295, %v13535_v47  ;;  %vm8845_vm14 = vcmp.eq.s32.totalorder %v8487_v60, %v8498_v63  ;;  %13557 = vst [vmem:[#allocation63_spill] sm:$0xff] %v8945_v43 }
 0x11c   : > { %6819 = vmatpush.msk.msra.mxu0 %vm13152_vm11, %v13313_v1  ;;  %13537 = vst [vmem:[#allocation45_spill] sm:$0xff] %v13536_v47  ;;  %vm13158_vm11 = vcmp.eq.s32.totalorder %v8800_v45, %v8498_v63  ;;  %v13542_v41 = vsel %vm8845_vm14, 4294967295, %v13541_v41  ;;  %v8942_v47 = vadd.s32 128, %v8487_v60 }
 0x11d   : > { %6806 = vmatpush.msk.msrb.mxu3 %vm13153_vm12, %v13313_v1  ;;  %6795 = vmatpush.msk.msrb.mxu2 %vm8815_vm4, %v13313_v1  ;;  %vm13157_vm12 = vcmp.eq.s32.totalorder %v8803_v46, %v8498_v63  ;;  %13543 = vst [vmem:[#allocation49_spill] sm:$0xff] %v13542_v41  ;;  %v8929_v41 = vadd.s32 616, %v8487_v60  ;;  %v13597_v46 = vmov 1.0  }
 0x11e   : > { %6820 = vmatpush.msk.msra.mxu0 %vm13157_vm12, %v13313_v1  ;;  %vm1395_vm12 = vcmp.eq.s32.totalorder %v8826_v51, %v8498_v63  ;;  %13556 = vst [vmem:[#allocation62_spill] sm:$0xff] %v8942_v47 }
 0x11f   : > { %6807 = vmatpush.msk.msrb.mxu3 %vm13158_vm11, %v13313_v1  ;;  %6796 = vmatpush.msk.msrb.mxu2 %vm8845_vm14, %v13313_v1  ;;  %vm13165_vm11 = vcmp.eq.s32.totalorder %v8854_v52, %v8498_v63  ;;  %vm1389_vm14 = vcmp.eq.s32.totalorder %v8887_v56, %v8498_v63  ;;  %13555 = vst [vmem:[#allocation61_spill] sm:$0xff] %v8929_v41  ;;  %v1201_v52 = vadd.s32 128, %v8489_v61  ;;  %v9056_v61 = vpop.permute.xlu2 %889 }
 0x120   : > { %6821 = vmatpush.msk.msra.mxu0 %vm13160_vm9, %v13313_v1  ;;  %6829 = vmatpush.msk.msrb.mxu1 %vm1395_vm12, %v13313_v1  ;;  %vm1392_vm9 = vcmp.eq.s32.totalorder %v8865_v53, %v8498_v63  ;;  %vm13172_vm12 = vcmp.eq.s32.totalorder %v8881_v54, %v8498_v63  ;;  %v9027_v54 = vadd.s32 256, %v8487_v60 }
 0x121   : > { %6808 = vmatpush.msk.msrb.mxu3 %vm13159_vm10, %v13313_v1  ;;  %vm13225_vm10 = vcmp.eq.s32.totalorder %v8862_v7, %v8498_v63  ;;  %6845 = vmatpush.msk.msra.mxu2 %vm1443_vm8, %v13313_v1  ;;  %vm13180_vm8 = vcmp.eq.s32.totalorder %v8914_v57, %v8498_v63  ;;  %v9004_v57 = vpop.permute.xlu1 %874 }
 0x122   : > { %6822 = vmatpush.msk.msra.mxu0 %vm13225_vm10, %v13313_v1  ;;  %6830 = vmatpush.msk.msrb.mxu1 %vm1392_vm9, %v13313_v1  ;;  %vm13206_vm9 = vcmp.eq.s32.totalorder %v8923_v59, %v8498_v63  ;;  %13567 = vst [vmem:[#allocation73_spill] sm:$0xff] %v9027_v54  ;;  %v9032_v59 = vpop.permute.xlu0 %879 }
 0x123   : > { %6809 = vmatpush.msk.msrb.mxu3 %vm13165_vm11, %v13313_v1  ;;  %vm1440_vm11 = vcmp.eq.s32.totalorder %v8897_v5, %v8498_v63 }
 0x124   : > { %6823 = vmatpush.msk.msra.mxu0 %vm13173_vm1, %v13313_v1  ;;  %6831 = vmatpush.msk.msrb.mxu1 %vm1389_vm14, %v13313_v1  ;;  %vm1437_vm1 = vcmp.eq.s32.totalorder %v8929_v41, %v8498_v63  ;;  %vm13192_vm14 = vcmp.eq.s32.totalorder %v8945_v43, %v8498_v63  ;;  %v9016_v43 = vadd.s32 744, %v8487_v60 }
 0x125   : > { %6810 = vmatpush.msk.msrb.mxu3 %vm13172_vm12, %v13313_v1  ;;  %6846 = vmatpush.msk.msra.mxu2 %vm1440_vm11, %v13313_v1  ;;  %vm1386_vm12 = vcmp.eq.s32.totalorder %v8926_v49, %v8498_v63  ;;  %vm13191_vm11 = vcmp.eq.s32.totalorder %v8942_v47, %v8498_v63  ;;  %v9013_v47 = vadd.s32 592, %v8487_v60 }
 0x126   : > { %6824 = vmatpush.msk.msra.mxu0 %vm13206_vm9, %v13313_v1  ;;  %6832 = vmatpush.msk.msrb.mxu1 %vm1386_vm12, %v13313_v1  ;;  %vm13203_vm12 = vcmp.eq.s32.totalorder %v8974_v30, %v8498_v63  ;;  %13566 = vst [vmem:[#allocation72_spill] sm:$0xff] %v9016_v43  ;;  %v9039_v30 = vadd.s32 584, %v8487_v60  ;;  %vm1485_vm9 = vcmp.eq.s32.totalorder %v9016_v43, %v8498_v63  ;;  %v9054_v43 = vadd.s32 440, %v8487_v60 }
 0x127   : > { %6811 = vmatpush.msk.msrb.mxu3 %vm13180_vm8, %v13313_v1  ;;  %6847 = vmatpush.msk.msra.mxu2 %vm1437_vm1, %v13313_v1  ;;  %vm1383_vm8 = vcmp.eq.s32.totalorder %v8956_v37, %v8498_v63  ;;  %vm1434_vm1 = vcmp.eq.s32.totalorder %v8971_v33, %v8498_v63  ;;  %13565 = vst [vmem:[#allocation71_spill] sm:$0xff] %v9013_v47 }
 0x128   : > { %6825 = vmatpush.msk.msra.mxu0 %vm13192_vm14, %v13313_v1  ;;  %6833 = vmatpush.msk.msrb.mxu1 %vm1383_vm8, %v13313_v1  ;;  %vm1431_vm14 = vcmp.eq.s32.totalorder %v8984_v23, %v8498_v63  ;;  %vm13222_vm8 = vcmp.eq.s32.totalorder %v8999_v19, %v8498_v63  ;;  %v9030_v23 = vadd.s32 448, %v8487_v60  ;;  %13569 = vst [vmem:[#allocation75_spill] sm:$0xff] %v9039_v30  ;;  %v9067_v19 = vadd.s32 576, %v8487_v60 }
 0x129   : > { %6812 = vmatpush.msk.msrb.mxu3 %vm13191_vm11, %v13313_v1  ;;  %6848 = vmatpush.msk.msra.mxu2 %vm1434_vm1, %v13313_v1  ;;  %vm1380_vm11 = vcmp.eq.s32.totalorder %v8981_v26, %v8498_v63  ;;  %vm1377_vm1 = vcmp.eq.s32.totalorder %v9002_v15, %v8498_v63  ;;  %13570 = vst [vmem:[#allocation76_spill] sm:$0xff] %v9054_v43 }
 0x12a   : > { %6826 = vmatpush.msk.msra.mxu0 %vm13203_vm12, %v13313_v1  ;;  %13568 = vst [vmem:[#allocation74_spill] sm:$0xff] %v9030_v23  ;;  %6834 = vmatpush.msk.msrb.mxu1 %vm1380_vm11, %v13313_v1  ;;  %vm1428_vm12 = vcmp.eq.s32.totalorder %v9013_v47, %v8498_v63  ;;  %vm13234_vm11 = vcmp.eq.s32.totalorder %v9027_v54, %v8498_v63  ;;  %v13226_v47 = vmov 0.0   ;;  %v9162_v45 = vpop.permute.xlu0 %933 }
 0x12b   : > { %6849 = vmatpush.msk.msra.mxu2 %vm1431_vm14, %v13313_v1  ;;  %vm1374_vm14 = vcmp.eq.s32.totalorder %v9030_v23, %v8498_v63  ;;  %v6778_v41 = vsel %vm1485_vm9, 1.0, %v13226_v47  ;;  %13571 = vst [vmem:[#allocation77_spill] sm:$0xff] %v9067_v19  ;;  %vm13572_vm9 = vcmask 1041408   ;;  %vm1371_vm10 = vcmp.eq.s32.totalorder %v9054_v43, %v8498_v63 }
 0x12c   : > { %6827 = vmatpush.msk.msra.mxu0 %vm13222_vm8, %v13313_v1  ;;  %6835 = vmatpush.msk.msrb.mxu1 %vm1377_vm1, %v13313_v1  ;;  %vm1425_vm8 = vcmp.eq.s32.totalorder %v9039_v30, %v8498_v63  ;;  %v9079_v47 = vmul.u32 2, %v1201_v52  ;;  %v9082_v30 = vadd.s32 432, %v8487_v60  ;;  %v9098_v52 = vadd.s32 728, %v8487_v60 }
 0x12d   : > { %6850 = vmatpush.msk.msra.mxu2 %vm1428_vm12, %v13313_v1  ;;  %6861 = vmatpush.msk.msra.mxu3 %vm13572_vm9, %v6778_v41  ;;  %vm1422_vm12 = vcmp.eq.s32.totalorder %v9067_v19, %v8498_v63  ;;  %v9095_v41 = vadd.s32 568, %v8487_v60  ;;  %v9132_v19 = vpop.permute.xlu1 %923  ;;  %v9140_v43 = vadd.s32 552, %v8487_v60  ;;  %v9143_v23 = vadd.s32 712, %v8487_v60 }
 0x12e   : > { %6828 = vmatpush.msk.msra.mxu0 %vm13234_vm11, %v13313_v1  ;;  %13574 = vst [vmem:[#allocation79_spill] sm:$0xff] %v9082_v30  ;;  %6836 = vmatpush.msk.msrb.mxu1 %vm1374_vm14, %v13313_v1  ;;  %vm13343_vm9 = vcmp.eq.s32.totalorder %v8495_v62, %v9079_v47  ;;  %vm1479_vm11 = vcmp.eq.s32.totalorder %v9098_v52, %v8498_v63  ;;  %v9137_v62 = vadd.s32 416, %v8487_v60 }
 0x12f   : > { %6851 = vmatpush.msk.msra.mxu2 %vm1425_vm8, %v13313_v1  ;;  %13575 = vst [vmem:[#allocation80_spill] sm:$0xff] %v9095_v41  ;;  %vm1368_vm8 = vcmp.eq.s32.totalorder %v9082_v30, %v8498_v63  ;;  %vm1419_vm14 = vcmp.eq.s32.totalorder %v9095_v41, %v8498_v63  ;;  %vm13261_vm4 = vcmp.eq.s32.totalorder %v8501_v0, %v9079_v47  ;;  %v9128_v41 = vadd.s32 720, %v8487_v60 }
 0x130   : > { %13576 = vst [vmem:[#allocation81_spill] sm:$0xff] %v9098_v52  ;;  %6837 = vmatpush.msk.msrb.mxu1 %vm1371_vm10, %v13313_v1  ;;  %6879 = vmatpush.msk.msrb.mxu0 %vm13343_vm9, %v13313_v1  ;;  %vm13342_vm10 = vcmp.eq.s32.totalorder %v8514_v8, %v9079_v47  ;;  %vm1348_vm9 = vcmp.eq.s32.totalorder %v8602_v18, %v9079_v47 }
 0x131   : > { %6852 = vmatpush.msk.msra.mxu2 %vm1422_vm12, %v13313_v1  ;;  %13579 = vst [vmem:[#allocation84_spill] sm:$0xff] %v9128_v41 }
 0x132   : > { %6838 = vmatpush.msk.msrb.mxu1 %vm1368_vm8, %v13313_v1  ;;  %13580 = vst [vmem:[#allocation85_spill] sm:$0xff] %v9137_v62  ;;  %6880 = vmatpush.msk.msrb.mxu0 %vm13261_vm4, %v13313_v1  ;;  %vm1476_vm8 = vcmp.eq.s32.totalorder %v9128_v41, %v8498_v63  ;;  %vm1473_vm4 = vcmp.eq.s32.totalorder %v9143_v23, %v8498_v63 }
 0x133   : > { %6853 = vmatpush.msk.msra.mxu2 %vm1419_vm14, %v13313_v1  ;;  %13581 = vst [vmem:[#allocation86_spill] sm:$0xff] %v9140_v43  ;;  %vm1413_vm14 = vcmp.eq.s32.totalorder %v9140_v43, %v8498_v63 }
 0x134   : > { %13582 = vst [vmem:[#allocation87_spill] sm:$0xff] %v9143_v23  ;;  %6881 = vmatpush.msk.msrb.mxu0 %vm13342_vm10, %v13313_v1  ;;  %v9195_v23 = vadd.s32 704, %v8487_v60 }
 0x136   : > { %13585 = vst [vmem:[#allocation90_spill] sm:$0xff] %v9195_v23 }
 0x14b   : > { %v715_v33 = vpop.f32.mrf.mxu0  ;;  %v724_v55 = vpop.f32.mrf.mxu1 }
 0x14c   : > { %v892_v48 = vmul.f32 %v9004_v57, %v715_v33  ;;  %v9077_v33 = vadd.s32 736, %v8487_v60  ;;  %v910_v54 = vmul.f32 %v9056_v61, %v724_v55  ;;  %v9122_v55 = vadd.s32 424, %v8487_v60 }
 0x14e   : > { %13573 = vst [vmem:[#allocation78_spill] sm:$0xff] %v9077_v33  ;;  %v9085_v15 = vadd.f32 %v8766_v42, %v892_v48  ;;  %vm1482_vm1 = vcmp.eq.s32.totalorder %v9077_v33, %v8498_v63  ;;  %v9125_v33 = vadd.s32 560, %v8487_v60  ;;  %vm1365_vm12 = vcmp.eq.s32.totalorder %v9122_v55, %v8498_v63 }
 0x14f   : > { %6862 = vmatpush.msk.msra.mxu3 %vm1482_vm1, %v13313_v1  ;;  %13577 = vst [vmem:[#allocation82_spill] sm:$0xff] %v9122_v55  ;;  %6839 = vmatpush.msk.msrb.mxu1 %vm1365_vm12, %v13313_v1  ;;  %vm13336_vm12 = vcmp.eq.s32.totalorder %v8523_v9, %v9079_v47  ;;  %v9226_v55 = vadd.s32 400, %v8487_v60 }
 0x150   : > { %v984_v48 = vmin.f32 %v9085_v15, 0.0  ;;  %13578 = vst [vmem:[#allocation83_spill] sm:$0xff] %v9125_v33  ;;  %vm1416_vm1 = vcmp.eq.s32.totalorder %v9125_v33, %v8498_v63  ;;  %6882 = vmatpush.msk.msrb.mxu0 %vm13336_vm12, %v13313_v1 }
 0x151   : > { %6863 = vmatpush.msk.msra.mxu3 %vm1479_vm11, %v13313_v1  ;;  %6854 = vmatpush.msk.msra.mxu2 %vm1416_vm1, %v13313_v1  ;;  %vm1362_vm11 = vcmp.eq.s32.totalorder %v9137_v62, %v8498_v63  ;;  %13586 = vst [vmem:[#allocation91_spill] sm:$0xff] %v9226_v55 }
 0x152   : > { %v1008_v30 = vmul.f32 1.442695, %v984_v48  ;;  %v9160_v48 = vadd.s32 408, %v8487_v60  ;;  %6840 = vmatpush.msk.msrb.mxu1 %vm1362_vm11, %v13313_v1  ;;  %vm13288_vm11 = vcmp.eq.s32.totalorder %v8526_v10, %v9079_v47 }
 0x153   : > { %v718_v26 = vpop.f32.mrf.mxu0  ;;  %v744_v7 = vpop.f32.mrf.mxu1  ;;  %6864 = vmatpush.msk.msra.mxu3 %vm1476_vm8, %v13313_v1  ;;  %6855 = vmatpush.msk.msra.mxu2 %vm1413_vm14, %v13313_v1  ;;  %vm960_vm14 = vcmp.gt.f32.partialorder %v9085_v15, 0.0 }
 0x154   : > { %13583 = vst [vmem:[#allocation88_spill] sm:$0xff] %v9160_v48  ;;  %v898_v52 = vmul.f32 %v9032_v59, %v718_v26  ;;  %v893_v5 = vmul.f32 %v9004_v57, %v744_v7  ;;  %7916 = vpow2.f32 %v1008_v30  ;;  %v9182_v26 = vadd.s32 544, %v8487_v60  ;;  %6883 = vmatpush.msk.msrb.mxu0 %vm13288_vm11, %v13313_v1 }
 0x155   : > { %vm1359_vm1 = vcmp.eq.s32.totalorder %v9160_v48, %v8498_v63  ;;  %6865 = vmatpush.msk.msra.mxu3 %vm1473_vm4, %v13313_v1  ;;  %vm1470_vm4 = vcmp.eq.s32.totalorder %v9195_v23, %v8498_v63 }
 0x156   : > { %13584 = vst [vmem:[#allocation89_spill] sm:$0xff] %v9182_v26  ;;  %v9185_v30 = vadd.f32 %v9132_v19, %v898_v52  ;;  %v9188_v7 = vadd.f32 %v8766_v42, %v893_v5  ;;  %vm1410_vm8 = vcmp.eq.s32.totalorder %v9182_v26, %v8498_v63  ;;  %v9207_v5 = vadd.f32 %v9162_v45, %v910_v54 }
 0x157   : > { %6841 = vmatpush.msk.msrb.mxu1 %vm1359_vm1, %v13313_v1  ;;  %6856 = vmatpush.msk.msra.mxu2 %vm1410_vm8, %v13313_v1  ;;  %vm1356_vm1 = vcmp.eq.s32.totalorder %v9226_v55, %v8498_v63 }
 0x158   : > { %v990_v52 = vmin.f32 %v9185_v30, 0.0  ;;  %v985_v41 = vmin.f32 %v9188_v7, 0.0  ;;  %6866 = vmatpush.msk.msra.mxu3 %vm1470_vm4, %v13313_v1  ;;  %v1002_v23 = vmin.f32 %v9207_v5, 0.0  ;;  %vm966_vm8 = vcmp.gt.f32.partialorder %v9185_v30, 0.0 }
 0x159   : > { %6842 = vmatpush.msk.msrb.mxu1 %vm1356_vm1, %v13313_v1  ;;  %vm13335_vm1 = vcmp.eq.s32.totalorder %v8536_v12, %v9079_v47 }
 0x15a   : > { %v7917_v9 = vpop.eup %7916  ;;  %v773_v26 = vpop.f32.mrf.mxu2  ;;  %v1020_v54 = vmul.f32 1.442695, %v990_v52  ;;  %v1010_v8 = vmul.f32 1.442695, %v985_v41  ;;  %6884 = vmatpush.msk.msrb.mxu0 %vm13335_vm1, %v13313_v1 }
 0x15b   : > { %v894_v43 = vmul.f32 %v9004_v57, %v773_v26  ;;  %v721_v0 = vpop.f32.mrf.mxu0  ;;  %v747_v33 = vpop.f32.mrf.mxu1  ;;  %v6475_v48 = vadd.f32 -1.0, %v7917_v9  ;;  %v9237_v9 = vadd.s32 536, %v8487_v60 }
 0x15c   : > { %v904_v62 = vmul.f32 %v8916_v58, %v721_v0  ;;  %v899_v10 = vmul.f32 %v9032_v59, %v747_v33  ;;  %7918 = vpow2.f32 %v1020_v54  ;;  %v9228_v41 = vpop.permute.xlu1 %928  ;;  %v9265_v54 = vadd.s32 392, %v8487_v60 }
 0x15d   : > { %v9231_v52 = vadd.f32 %v8766_v42, %v894_v43  ;;  %v9234_v26 = vsel %vm960_vm14, %v9085_v15, %v6475_v48  ;;  %7920 = vpow2.f32 %v1010_v8  ;;  %13588 = vst [vmem:[#allocation93_spill] sm:$0xff] %v9237_v9  ;;  %vm1407_vm4 = vcmp.eq.s32.totalorder %v9237_v9, %v8498_v63 }
 0x15e   : > { %13587 = vst [vmem:[#allocation92_spill] sm:$0xff] %v9234_v26  ;;  %v9240_v0 = vadd.f32 %v9228_v41, %v904_v62  ;;  %v9243_v33 = vadd.f32 %v9132_v19, %v899_v10  ;;  %2090 = vmatmul.f32.vlgmr.msrb.gmra.mxu2 %v9234_v26  ;;  %v9254_v62 = vadd.s32 696, %v8487_v60  ;;  %vm961_vm14 = vcmp.gt.f32.partialorder %v9188_v7, 0.0 }
 0x15f   : > { %v986_v43 = vmin.f32 %v9231_v52, 0.0  ;;  %v1044_v15 = vmul.f32 1.442695, %v1002_v23  ;;  %6857 = vmatpush.msk.msra.mxu2 %vm1407_vm4, %v13313_v1  ;;  %13590 = vst [vmem:[#allocation95_spill] sm:$0xff] %v9265_v54  ;;  %v9273_v23 = vadd.s32 528, %v8487_v60 }
 0x160   : > { %13589 = vst [vmem:[#allocation94_spill] sm:$0xff] %v9254_v62  ;;  %v996_v8 = vmin.f32 %v9240_v0, 0.0  ;;  %v991_v10 = vmin.f32 %v9243_v33, 0.0  ;;  %vm1467_vm11 = vcmp.eq.s32.totalorder %v9254_v62, %v8498_v63 }
 0x161   : > { %v1012_v48 = vmul.f32 1.442695, %v986_v43  ;;  %6867 = vmatpush.msk.msra.mxu3 %vm1467_vm11, %v13313_v1  ;;  %13591 = vst [vmem:[#allocation96_spill] sm:$0xff] %v9273_v23  ;;  %v9276_v43 = vadd.s32 688, %v8487_v60  ;;  %vm1353_vm11 = vcmp.eq.s32.totalorder %v9265_v54, %v8498_v63  ;;  %vm1404_vm4 = vcmp.eq.s32.totalorder %v9273_v23, %v8498_v63 }
 0x162   : > { %v7919_v9 = vpop.eup %7918  ;;  %v776_v55 = vpop.f32.mrf.mxu2  ;;  %v1032_v26 = vmul.f32 1.442695, %v996_v8  ;;  %v1022_v37 = vmul.f32 1.442695, %v991_v10  ;;  %6843 = vmatpush.msk.msrb.mxu1 %vm1353_vm11, %v13313_v1  ;;  %6858 = vmatpush.msk.msra.mxu2 %vm1404_vm4, %v13313_v1  ;;  %vm962_vm4 = vcmp.gt.f32.partialorder %v9231_v52, 0.0 }
 0x163   : > { %13592 = vst [vmem:[#allocation97_spill] sm:$0xff] %v9276_v43  ;;  %v7921_v62 = vpop.eup %7920  ;;  %7922 = vpow2.f32 %v1012_v48  ;;  %v900_v50 = vmul.f32 %v9032_v59, %v776_v55  ;;  %v750_v39 = vpop.f32.mrf.mxu1  ;;  %v6481_v8 = vadd.f32 -1.0, %v7919_v9  ;;  %vm1464_vm11 = vcmp.eq.s32.totalorder %v9276_v43, %v8498_v63 }
 0x164   : > { %v905_v10 = vmul.f32 %v8916_v58, %v750_v39  ;;  %v831_v6 = vpop.f32.mrf.mxu0  ;;  %v6476_v12 = vadd.f32 -1.0, %v7921_v62  ;;  %7924 = vpow2.f32 %v1032_v26  ;;  %6868 = vmatpush.msk.msra.mxu3 %vm1464_vm11, %v13313_v1  ;;  %v9326_v48 = vadd.s32 520, %v8487_v60 }
 0x165   : > { %v9286_v49 = vadd.f32 %v9132_v19, %v900_v50  ;;  %v896_v55 = vmul.f32 %v9004_v57, %v831_v6  ;;  %v9292_v9 = vsel %vm966_vm8, %v9185_v30, %v6481_v8  ;;  %7926 = vpow2.f32 %v1022_v37 }
 0x166   : > { %13593 = vst [vmem:[#allocation98_spill] sm:$0xff] %v9292_v9  ;;  %v9296_v39 = vadd.f32 %v9228_v41, %v905_v10  ;;  %2093 = vmatmul.f32.gmra.mxu2 %v9292_v9  ;;  %v9302_v50 = vsel %vm961_vm14, %v9188_v7, %v6476_v12  ;;  %7928 = vpow2.f32 %v1044_v15  ;;  %vm13329_vm8 = vcmp.eq.s32.totalorder %v8575_v14, %v9079_v47 }
 0x167   : > { %13594 = vst [vmem:[#allocation99_spill] sm:$0xff] %v9302_v50  ;;  %v992_v6 = vmin.f32 %v9286_v49, 0.0  ;;  %v9308_v30 = vadd.f32 %v8766_v42, %v896_v55  ;;  %2119 = vmatmul.f32.vlgmr.msrb.gmra.mxu3 %v9302_v50  ;;  %vm972_vm14 = vcmp.gt.f32.partialorder %v9240_v0, 0.0  ;;  %6885 = vmatpush.msk.msrb.mxu0 %vm13329_vm8, %v13313_v1  ;;  %v9322_v12 = vadd.s32 384, %v8487_v60 }
 0x168   : > { %v997_v37 = vmin.f32 %v9296_v39, 0.0  ;;  %v9329_v8 = vadd.s32 680, %v8487_v60  ;;  %vm968_vm8 = vcmp.gt.f32.partialorder %v9286_v49, 0.0  ;;  %vm973_vm12 = vcmp.gt.f32.partialorder %v9296_v39, 0.0 }
 0x169   : > { %13595 = vst [vmem:[#allocation100_spill] sm:$0xff] %v9322_v12  ;;  %v7923_v7 = vpop.eup %7922  ;;  %v988_v26 = vmin.f32 %v9308_v30, 0.0  ;;  %v802_v62 = vpop.f32.mrf.mxu3  ;;  %v1024_v15 = vmul.f32 1.442695, %v992_v6  ;;  %vm1350_vm11 = vcmp.eq.s32.totalorder %v9322_v12, %v8498_v63 }
 0x16a   : > { %13596 = vst [vmem:[#allocation101_spill] sm:$0xff] %v9329_v8  ;;  %v7925_v10 = vpop.eup %7924  ;;  %v779_v55 = vpop.f32.mrf.mxu2  ;;  %v895_v43 = vmul.f32 %v9004_v57, %v802_v62  ;;  %v6477_v14 = vadd.f32 -1.0, %v7923_v7  ;;  %v1034_v1 = vmul.f32 1.442695, %v997_v37  ;;  %6844 = vmatpush.msk.msrb.mxu1 %vm1350_vm11, %v13597_v46  ;;  %vm967_vm11 = vcmp.gt.f32.partialorder %v9243_v33, 0.0 }
 0x16b   : > { %v7927_v23 = vpop.eup %7926  ;;  %v1016_v50 = vmul.f32 1.442695, %v988_v26  ;;  %v906_v54 = vmul.f32 %v8916_v58, %v779_v55  ;;  %v753_v6 = vpop.f32.mrf.mxu1  ;;  %v6487_v9 = vadd.f32 -1.0, %v7925_v10  ;;  %7930 = vpow2.f32 %v1024_v15 }
 0x16c   : > { %v9337_v35 = vadd.f32 %v8766_v42, %v895_v43  ;;  %v911_v56 = vmul.f32 %v9056_v61, %v753_v6  ;;  %v834_v62 = vpop.f32.mrf.mxu0  ;;  %v9343_v37 = vsel %vm962_vm4, %v9231_v52, %v6477_v14  ;;  %v6482_v7 = vadd.f32 -1.0, %v7927_v23  ;;  %v7929_v26 = vpop.eup %7928 }
 0x16d   : > { %v9346_v55 = vadd.f32 %v9228_v41, %v906_v54  ;;  %2148 = vmatmul.f32.vlgmr.msra.gmra.mxu0 %v9343_v37  ;;  %v9352_v43 = vsel %vm972_vm14, %v9240_v0, %v6487_v9  ;;  %7932 = vpow2.f32 %v1034_v1  ;;  %vm1401_vm4 = vcmp.eq.s32.totalorder %v9326_v48, %v8498_v63 }
 0x16e   : > { %13598 = vst [vmem:[#allocation102_spill] sm:$0xff] %v9352_v43  ;;  %v987_v15 = vmin.f32 %v9337_v35, 0.0  ;;  %v9357_v10 = vadd.f32 %v9162_v45, %v911_v56  ;;  %2096 = vmatmul.f32.gmra.mxu2 %v9352_v43  ;;  %v9361_v14 = vsel %vm967_vm11, %v9243_v33, %v6482_v7  ;;  %7934 = vpow2.f32 %v1016_v50 }
 0x16f   : > { %v998_v52 = vmin.f32 %v9346_v55, 0.0  ;;  %2122 = vmatmul.f32.gmra.mxu3 %v9361_v14  ;;  %vm1461_vm14 = vcmp.eq.s32.totalorder %v9329_v8, %v8498_v63  ;;  %v6493_v56 = vadd.f32 -1.0, %v7929_v26  ;;  %6859 = vmatpush.msk.msra.mxu2 %vm1401_vm4, %v13597_v46  ;;  %vm13334_vm11 = vcmp.eq.s32.totalorder %v8589_v16, %v9079_v47 }
 0x170   : > { %v1014_v0 = vmul.f32 1.442695, %v987_v15  ;;  %6869 = vmatpush.msk.msra.mxu3 %vm1461_vm14, %v13597_v46  ;;  %v1003_v33 = vmin.f32 %v9357_v10, 0.0  ;;  %v902_v54 = vmul.f32 %v9032_v59, %v834_v62  ;;  %6886 = vmatpush.msk.msrb.mxu0 %vm13334_vm11, %v13597_v46  ;;  %v9381_v50 = vadd.s32 512, %v8487_v60 }
 0x171   : > { %v7931_v1 = vpop.eup %7930  ;;  %v805_v23 = vpop.f32.mrf.mxu3  ;;  %v1036_v9 = vmul.f32 1.442695, %v998_v52  ;;  %v9385_v15 = vadd.s32 672, %v8487_v60  ;;  %vm13341_vm14 = vcmp.eq.s32.totalorder %v8613_v20, %v9079_v47  ;;  %vm978_vm11 = vcmp.gt.f32.partialorder %v9207_v5, 0.0 }
 0x172   : > { %7936 = vpow2.f32 %v1014_v0  ;;  %v782_v6 = vpop.f32.mrf.mxu2  ;;  %v901_v7 = vmul.f32 %v9032_v59, %v805_v23  ;;  %v6483_v26 = vadd.f32 -1.0, %v7931_v1  ;;  %vm1398_vm4 = vcmp.eq.s32.totalorder %v9381_v50, %v8498_v63  ;;  %6887 = vmatpush.msk.msrb.mxu0 %vm13341_vm14, %v13597_v46 }
 0x173   : > { %13599 = vst [vmem:[#allocation103_spill] sm:$0xff] %v9385_v15  ;;  %v912_v62 = vmul.f32 %v9056_v61, %v782_v6  ;;  %v860_v8 = vpop.f32.mrf.mxu1  ;;  %7938 = vpow2.f32 %v1036_v9  ;;  %v7933_v52 = vpop.eup %7932  ;;  %6860 = vmatpush.msk.msra.mxu2 %vm1398_vm4, %v13597_v46  ;;  %vm1458_vm1 = vcmp.eq.s32.totalorder %v9385_v15, %v8498_v63  ;;  %v9404_v9 = vsel %vm978_vm11, %v9207_v5, %v6493_v56 }
 0x174   : > { %v837_v16 = vpop.f32.mrf.mxu0  ;;  %v897_v0 = vmul.f32 %v9004_v57, %v860_v8  ;;  %v9396_v1 = vsel %vm968_vm8, %v9286_v49, %v6483_v26  ;;  %v7935_v23 = vpop.eup %7934  ;;  %v6488_v57 = vadd.f32 -1.0, %v7933_v52  ;;  %6870 = vmatpush.msk.msra.mxu3 %vm1458_vm1, %v13597_v46  ;;  %vm13360_vm8 = vcmp.eq.s32.totalorder %v8529_v11, %v9079_v47 }
 0x175   : > { %2151 = vmatmul.f32.gmra.mxu0 %v9396_v1  ;;  %v9411_v49 = vadd.f32 %v9132_v19, %v902_v54  ;;  %vm974_vm4 = vcmp.gt.f32.partialorder %v9346_v55, 0.0  ;;  %v1046_v5 = vmul.f32 1.442695, %v1003_v33  ;;  %v9423_v56 = vadd.f32 %v9162_v45, %v912_v62  ;;  %6895 = vmatpush.msk.msra.mxu1 %vm13360_vm8, %v13597_v46 }
 0x176   : > { %v9414_v8 = vadd.f32 %v8766_v42, %v897_v0  ;;  %2099 = vmatmul.f32.gmra.mxu2 %v9404_v9  ;;  %v9426_v6 = vadd.f32 %v9132_v19, %v901_v7  ;;  %v9429_v54 = vsel %vm973_vm12, %v9296_v39, %v6488_v57  ;;  %vm963_vm1 = vcmp.gt.f32.partialorder %v9337_v35, 0.0 }
 0x177   : > { %2125 = vmatmul.f32.gmra.mxu3 %v9429_v54  ;;  %7940 = vpow2.f32 %v1046_v5  ;;  %v6479_v33 = vadd.f32 -1.0, %v7935_v23  ;;  %v9439_v7 = vadd.s32 664, %v8487_v60  ;;  %v908_v39 = vmul.f32 %v8916_v58, %v837_v16  ;;  %6911 = vmatpush.msk.msrb.mxu2 %vm1348_vm9, %v13597_v46 }
 0x178   : > { %v7937_v42 = vpop.eup %7936  ;;  %v989_v26 = vmin.f32 %v9414_v8, 0.0  ;;  %vm13345_vm12 = vcmp.eq.s32.totalorder %v8640_v24, %v9079_v47  ;;  %vm13359_vm11 = vcmp.eq.s32.totalorder %v8560_v13, %v9079_v47  ;;  %vm964_vm14 = vcmp.gt.f32.partialorder %v9308_v30, 0.0 }
 0x179   : > { %v7939_v62 = vpop.eup %7938  ;;  %v808_v52 = vpop.f32.mrf.mxu3  ;;  %v6478_v0 = vadd.f32 -1.0, %v7937_v42  ;;  %6888 = vmatpush.msk.msrb.mxu0 %vm13345_vm12, %v13597_v46  ;;  %6896 = vmatpush.msk.msra.mxu1 %vm13359_vm11, %v13597_v46  ;;  %vm1455_vm10 = vcmp.eq.s32.totalorder %v9439_v7, %v8498_v63  ;;  %v9466_v5 = vadd.s32 656, %v8487_v60  ;;  %v1004_v42 = vmin.f32 %v9423_v56, 0.0 }
 0x17a   : > { %v1018_v57 = vmul.f32 1.442695, %v989_v26  ;;  %v907_v15 = vmul.f32 %v8916_v58, %v808_v52  ;;  %v6489_v20 = vadd.f32 -1.0, %v7939_v62  ;;  %6871 = vmatpush.msk.msra.mxu3 %vm1455_vm10, %v13597_v46  ;;  %vm13346_vm9 = vcmp.eq.s32.totalorder %v8578_v2, %v9079_v47 }
 0x17b   : > { %v863_v16 = vpop.f32.mrf.mxu1  ;;  %v9459_v23 = vsel %vm963_vm1, %v9337_v35, %v6478_v0  ;;  %13601 = vst [vmem:[#allocation105_spill] sm:$0xff] %v9466_v5  ;;  %v9476_v35 = vsel %vm964_vm14, %v9308_v30, %v6479_v33  ;;  %vm1452_vm1 = vcmp.eq.s32.totalorder %v9466_v5, %v8498_v63  ;;  %v993_v30 = vmin.f32 %v9426_v6, 0.0  ;;  %6897 = vmatpush.msk.msra.mxu1 %vm13346_vm9, %v13597_v46 }
 0x17c   : > { %13600 = vst [vmem:[#allocation104_spill] sm:$0xff] %v9459_v23  ;;  %7942 = vpow2.f32 %v1018_v57  ;;  %v840_v26 = vpop.f32.mrf.mxu0  ;;  %v9472_v62 = vsel %vm974_vm4, %v9346_v55, %v6489_v20  ;;  %2177 = vmatmul.f32.vlgmr.msrb.gmra.mxu1 %v9459_v23  ;;  %v903_v52 = vmul.f32 %v9032_v59, %v863_v16  ;;  %vm13344_vm4 = vcmp.eq.s32.totalorder %v8670_v27, %v9079_v47 }
 0x17d   : > { %2154 = vmatmul.f32.gmra.mxu0 %v9472_v62  ;;  %v9487_v20 = vadd.s32 648, %v8487_v60  ;;  %v7941_v55 = vpop.eup %7940  ;;  %v9491_v33 = vadd.f32 %v9228_v41, %v908_v39  ;;  %6872 = vmatpush.msk.msra.mxu3 %vm1452_vm1, %v13597_v46  ;;  %vm13351_vm10 = vcmp.eq.s32.totalorder %v8628_v22, %v9079_v47  ;;  %v9500_v59 = vadd.f32 %v9228_v41, %v907_v15 }
 0x17e   : > { %2206 = vmatmul.f32.vlgmr.msra.gmra.mxu2 %v9476_v35  ;;  %v914_v0 = vmul.f32 %v9056_v61, %v840_v26  ;;  %v6494_v57 = vadd.f32 -1.0, %v7941_v55  ;;  %6889 = vmatpush.msk.msrb.mxu0 %vm13344_vm4, %v13597_v46  ;;  %vm979_vm1 = vcmp.gt.f32.partialorder %v9357_v10, 0.0  ;;  %vm13354_vm4 = vcmp.eq.s32.totalorder %v8698_v3, %v9079_v47 }
 0x17f   : > { %13602 = vst [vmem:[#allocation106_spill] sm:$0xff] %v9487_v20  ;;  %vm1449_vm14 = vcmp.eq.s32.totalorder %v9487_v20, %v8498_v63  ;;  %6912 = vmatpush.msk.msrb.mxu2 %vm13351_vm10, %v13597_v46  ;;  %vm13357_vm12 = vcmp.eq.s32.totalorder %v8592_v17, %v9079_v47  ;;  %vm13352_vm9 = vcmp.eq.s32.totalorder %v8655_v4, %v9079_v47  ;;  %v994_v15 = vmin.f32 %v9411_v49, 0.0 }
 0x180   : > { %6873 = vmatpush.msk.msra.mxu3 %vm1449_vm14, %v13597_v46  ;;  %v9527_v39 = vadd.f32 %v9132_v19, %v903_v52  ;;  %v9530_v16 = vsel %vm979_vm1, %v9357_v10, %v6494_v57  ;;  %6890 = vmatpush.msk.msrb.mxu0 %vm13354_vm4, %v13597_v46  ;;  %v1048_v55 = vmul.f32 1.442695, %v1004_v42  ;;  %v1026_v10 = vmul.f32 1.442695, %v993_v30 }
 0x181   : > { %v811_v26 = vpop.f32.mrf.mxu3  ;;  %6898 = vmatpush.msk.msra.mxu1 %vm13357_vm12, %v13597_v46  ;;  %2128 = vmatmul.f32.gmra.mxu3 %v9530_v16  ;;  %v9548_v52 = vadd.s32 640, %v8487_v60  ;;  %vm13353_vm14 = vcmp.eq.s32.totalorder %v8732_v34, %v9079_v47  ;;  %vm13355_vm1 = vcmp.eq.s32.totalorder %v8616_v21, %v9079_v47  ;;  %vm13356_vm10 = vcmp.eq.s32.totalorder %v8685_v29, %v9079_v47 }
 0x182   : > { %v7943_v20 = vpop.eup %7942  ;;  %v913_v19 = vmul.f32 %v9056_v61, %v811_v26  ;;  %6913 = vmatpush.msk.msrb.mxu2 %vm13352_vm9, %v13597_v46  ;;  %7944 = vpow2.f32 %v1048_v55  ;;  %v999_v42 = vmin.f32 %v9500_v59, 0.0  ;;  %v9558_v26 = vadd.f32 %v9162_v45, %v914_v0  ;;  %6891 = vmatpush.msk.msrb.mxu0 %vm13353_vm14, %v13597_v46 }
 0x183   : > { %13603 = vst [vmem:[#allocation107_spill] sm:$0xff] %v9548_v52  ;;  %v866_v57 = vpop.f32.mrf.mxu1  ;;  %7946 = vpow2.f32 %v1026_v10  ;;  %vm1446_vm9 = vcmp.eq.s32.totalorder %v9548_v52, %v8498_v63  ;;  %6899 = vmatpush.msk.msra.mxu1 %vm13355_vm1, %v13597_v46  ;;  %v995_v30 = vmin.f32 %v9527_v39, 0.0  ;;  %v1028_v0 = vmul.f32 1.442695, %v994_v15  ;;  %v13612_v63 = vld [vmem:[#allocation53_spill] sm:$0xff] }
 0x184   : > { %v9572_v55 = vadd.f32 %v9162_v45, %v913_v19  ;;  %6874 = vmatpush.msk.msra.mxu3 %vm1446_vm9, %v13597_v46  ;;  %6914 = vmatpush.msk.msrb.mxu2 %vm13356_vm10, %v13597_v46  ;;  %v6480_v10 = vadd.f32 -1.0, %v7943_v20  ;;  %v909_v5 = vmul.f32 %v8916_v58, %v866_v57  ;;  %vm965_vm14 = vcmp.gt.f32.partialorder %v9414_v8, 0.0 }
 0x185   : > { %vm13364_vm4 = vcmask 867328   ;;  %vm13358_vm1 = vcmp.eq.s32.totalorder %v8758_v38, %v9079_v47  ;;  %7948 = vpow2.f32 %v1028_v0  ;;  %vm13362_vm9 = vcmp.eq.s32.totalorder %v8643_v25, %v9079_v47 }
 0x186   : > { %v9584_v19 = vsel %vm965_vm14, %v9414_v8, %v6480_v10  ;;  %6892 = vmatpush.msk.msrb.mxu0 %vm13358_vm1, %v13597_v46  ;;  %vm13361_vm10 = vcmp.eq.s32.totalorder %v8704_v32, %v9079_v47  ;;  %6900 = vmatpush.msk.msra.mxu1 %vm13362_vm9, %v13597_v46  ;;  %vm1396_vm14 = vcmp.eq.s32.totalorder %v8826_v51, %v9079_v47  ;;  %v1038_v0 = vmul.f32 1.442695, %v999_v42  ;;  %v13606_v10 = vld [vmem:[#allocation35_spill] sm:$0xff]  ;;  %v13608_v42 = vld [vmem:[#allocation44_spill] sm:$0xff] }
 0x187   : > { %13604 = vst [vmem:[#allocation108_spill] sm:$0xff] %v9584_v19  ;;  %6915 = vmatpush.msk.msrb.mxu2 %vm13361_vm10, %v13597_v46  ;;  %vm13363_vm1 = vcmp.eq.s32.totalorder %v8794_v44, %v9079_v47  ;;  %vm13365_vm11 = vcmp.eq.s32.totalorder %v8682_v28, %v9079_v47  ;;  %6927 = vmatpush.msk.msrb.mxu3 %vm1396_vm14, %v13597_v46  ;;  %vm13607_vm8 = vcmp.gt.f32.partialorder %v9423_v56, 0.0 }
 0x188   : > { %v7945_v58 = vpop.eup %7944  ;;  %6893 = vmatpush.msk.msrb.mxu0 %vm13363_vm1, %v13597_v46  ;;  %vm13366_vm10 = vcmp.eq.s32.totalorder %v8741_v36, %v9079_v47  ;;  %vm1393_vm9 = vcmp.eq.s32.totalorder %v8865_v53, %v9079_v47  ;;  %vm13367_vm12 = vcmp.eq.s32.totalorder %v8487_v60, %v9079_v47  ;;  %v9622_v20 = vadd.f32 %v9228_v41, %v909_v5  ;;  %v13605_v5 = vld [vmem:[#allocation56_spill] sm:$0xff] }
 0x189   : > { %v7947_v8 = vpop.eup %7946  ;;  %v6495_v15 = vadd.f32 -1.0, %v7945_v58  ;;  %6875 = vmatmul.msk.f32.vlgmr.msra.gmra.mxu3 %vm13364_vm4, %v9584_v19  ;;  %6901 = vmatpush.msk.msra.mxu1 %vm13365_vm11, %v13597_v46  ;;  %vm13370_vm14 = vcmp.eq.s32.totalorder %v8701_v31, %v9079_v47  ;;  %vm1390_vm4 = vcmp.eq.s32.totalorder %v13605_v5, %v9079_v47  ;;  %vm13381_vm11 = vcmp.eq.s32.totalorder %v13606_v10, %v9079_v47 }
 0x18a   : > { %v6484_v57 = vadd.f32 -1.0, %v7947_v8  ;;  %6916 = vmatpush.msk.msrb.mxu2 %vm13366_vm10, %v13597_v46  ;;  %6928 = vmatpush.msk.msrb.mxu3 %vm1393_vm9, %v13597_v46  ;;  %vm970_vm1 = vcmp.gt.f32.partialorder %v9411_v49, 0.0  ;;  %vm13377_vm9 = vcmp.eq.s32.totalorder %v13608_v42, %v9079_v47  ;;  %v13609_v8 = vld [vmem:[#allocation60_spill] sm:$0xff]  ;;  %7950 = vpow2.f32 %v1038_v0 }
 0x18b   : > { %v869_v41 = vpop.f32.mrf.mxu1  ;;  %v9646_v58 = vsel %vm13607_vm8, %v9423_v56, %v6495_v15  ;;  %6894 = vmatpush.msk.msrb.mxu0 %vm13367_vm12, %v13597_v46  ;;  %6902 = vmatpush.msk.msra.mxu1 %vm13370_vm14, %v13597_v46  ;;  %vm1387_vm10 = vcmp.eq.s32.totalorder %v13609_v8, %v9079_v47  ;;  %v7949_v56 = vpop.eup %7948  ;;  %vm13610_vm8 = vcmp.gt.f32.partialorder %v9426_v6, 0.0  ;;  %vm13611_vm12 = vcmp.eq.s32.totalorder %v8764_v40, %v9079_v47  ;;  %v13621_v8 = vld [vmem:[#allocation46_spill] sm:$0xff] }
 0x18c   : > { %2157 = vmatmul.f32.gmra.mxu0 %v9646_v58  ;;  %v9665_v15 = vsel %vm13610_vm8, %v9426_v6, %v6484_v57  ;;  %6917 = vmatpush.msk.msrb.mxu2 %vm13611_vm12, %v13597_v46  ;;  %vm1444_vm14 = vcmp.eq.s32.totalorder %v13612_v63, %v9079_v47  ;;  %v13613_v53 = vmin.f32 %v9491_v33, 0.0  ;;  %v1005_v19 = vmin.f32 %v9572_v55, 0.0 }
 0x18d   : > { %2180 = vmatmul.f32.gmra.mxu1 %v9665_v15  ;;  %v6485_v60 = vadd.f32 -1.0, %v7949_v56  ;;  %v915_v6 = vmul.f32 %v9056_v61, %v869_v41  ;;  %6929 = vmatpush.msk.msrb.mxu3 %vm1390_vm4, %v13597_v46  ;;  %v1030_v57 = vmul.f32 1.442695, %v995_v30  ;;  %v13615_v61 = vld [vmem:[#allocation47_spill] sm:$0xff]  ;;  %v13616_v41 = vld [vmem:[#allocation64_spill] sm:$0xff]  ;;  %v1006_v30 = vmin.f32 %v9558_v26, 0.0 }
 0x18e   : > { %v1040_v51 = vmul.f32 1.442695, %v13613_v53  ;;  %6903 = vmatpush.msk.msra.mxu1 %vm13381_vm11, %v13597_v46  ;;  %6918 = vmatpush.msk.msrb.mxu2 %vm13377_vm9, %v13597_v46  ;;  %v13614_v53 = vld [vmem:[#allocation39_spill] sm:$0xff]  ;;  %vm13382_vm8 = vcmp.eq.s32.totalorder %v13615_v61, %v9079_v47  ;;  %vm1384_vm4 = vcmp.eq.s32.totalorder %v13616_v41, %v9079_v47  ;;  %v1001_v56 = vmin.f32 %v9622_v20, 0.0  ;;  %v13626_v61 = vld [vmem:[#allocation92_spill] sm:$0xff] }
 0x18f   : > { %vm13379_vm12 = vcmp.eq.s32.totalorder %v13614_v53, %v9079_v47  ;;  %v9700_v0 = vsel %vm970_vm1, %v9411_v49, %v6485_v60  ;;  %6930 = vmatpush.msk.msrb.mxu3 %vm1387_vm10, %v13597_v46  ;;  %6943 = vmatpush.msk.msra.mxu0 %vm1444_vm14, %v13597_v46  ;;  %v13618_v60 = vld [vmem:[#allocation43_spill] sm:$0xff]  ;;  %v9725_v41 = vadd.f32 %v9162_v45, %v915_v6  ;;  %v13622_v45 = vld [vmem:[#allocation61_spill] sm:$0xff]  ;;  %v1052_v42 = vmul.f32 1.442695, %v1006_v30  ;;  %v13630_v30 = vld [vmem:[#allocation74_spill] sm:$0xff] }
 0x190   : > { %7952 = vpow2.f32 %v1040_v51  ;;  %v13617_v51 = vld [vmem:[#allocation57_spill] sm:$0xff]  ;;  %2209 = vmatmul.f32.gmra.mxu2 %v9700_v0  ;;  %6904 = vmatpush.msk.msra.mxu1 %vm13379_vm12, %v13597_v46  ;;  %vm13385_vm10 = vcmp.eq.s32.totalorder %v13618_v60, %v9079_v47  ;;  %v13619_v49 = vld [vmem:[#allocation51_spill] sm:$0xff]  ;;  %vm13393_vm12 = vcmp.eq.s32.totalorder %v13621_v8, %v9079_v47  ;;  %v7951_v5 = vpop.eup %7950  ;;  %vm1438_vm1 = vcmp.eq.s32.totalorder %v13622_v45, %v9079_v47  ;;  %v13646_v45 = vld [vmem:[#allocation8_spill] sm:$0xff] }
 0x191   : > { %7954 = vpow2.f32 %v1030_v57  ;;  %vm1441_vm9 = vcmp.eq.s32.totalorder %v13617_v51, %v9079_v47  ;;  %v13620_v57 = vld [vmem:[#allocation67_spill] sm:$0xff]  ;;  %6919 = vmatpush.msk.msrb.mxu2 %vm13382_vm8, %v13597_v46  ;;  %6931 = vmatpush.msk.msrb.mxu3 %vm1384_vm4, %v13597_v46  ;;  %v1050_v51 = vmul.f32 1.442695, %v1005_v19  ;;  %vm976_vm8 = vcmp.gt.f32.partialorder %v9491_v33, 0.0  ;;  %v13625_v19 = vld [vmem:[#allocation70_spill] sm:$0xff] }
 0x192   : > { %vm1381_vm14 = vcmp.eq.s32.totalorder %v13620_v57, %v9079_v47  ;;  %6944 = vmatpush.msk.msra.mxu0 %vm1441_vm9, %v13597_v46  ;;  %6905 = vmatpush.msk.msra.mxu1 %vm13385_vm10, %v13597_v46  ;;  %v13623_v6 = vld [vmem:[#allocation55_spill] sm:$0xff]  ;;  %v6490_v57 = vadd.f32 -1.0, %v7951_v5  ;;  %vm13624_vm11 = vcmp.eq.s32.totalorder %v13619_v49, %v9079_v47  ;;  %vm1378_vm9 = vcmp.eq.s32.totalorder %v13625_v19, %v9079_v47  ;;  %v13627_v5 = vld [vmem:[#allocation65_spill] sm:$0xff]  ;;  %v13628_v49 = vld [vmem:[#allocation50_spill] sm:$0xff] }
 0x193   : > { %vm13394_vm4 = vcmp.eq.s32.totalorder %v13623_v6, %v9079_v47  ;;  %6920 = vmatpush.msk.msrb.mxu2 %vm13624_vm11, %v13597_v46  ;;  %6932 = vmatpush.msk.msrb.mxu3 %vm1381_vm14, %v13597_v46  ;;  %7956 = vpow2.f32 %v1050_v51  ;;  %vm1435_vm10 = vcmp.eq.s32.totalorder %v13627_v5, %v9079_v47  ;;  %v1042_v60 = vmul.f32 1.442695, %v1001_v56  ;;  %v13641_v19 = vld [vmem:[#allocation66_spill] sm:$0xff]  ;;  %v13644_v5 = vld [vmem:[#allocation75_spill] sm:$0xff] }
 0x194   : > { %2264 = vmatmul.f32.vlgmr.msrb.gmra.mxu0 %v13626_v61  ;;  %6906 = vmatpush.msk.msra.mxu1 %vm13393_vm12, %v13597_v46  ;;  %v1007_v52 = vmin.f32 %v9725_v41, 0.0  ;;  %vm13629_vm14 = vcmp.gt.f32.partialorder %v9500_v59, 0.0  ;;  %vm1375_vm12 = vcmp.eq.s32.totalorder %v13630_v30, %v9079_v47  ;;  %vm971_vm11 = vcmp.gt.f32.partialorder %v9527_v39, 0.0 }
 0x195   : > { %v9765_v51 = vsel %vm13629_vm14, %v9500_v59, %v6490_v57  ;;  %6945 = vmatpush.msk.msra.mxu0 %vm1438_vm1, %v13597_v46  ;;  %6921 = vmatpush.msk.msrb.mxu2 %vm13394_vm4, %v13597_v46  ;;  %7958 = vpow2.f32 %v1052_v42  ;;  %vm13632_vm14 = vcmp.eq.s32.totalorder %v13628_v49, %v9079_v47  ;;  %v13634_v42 = vld [vmem:[#allocation54_spill] sm:$0xff]  ;;  %v13637_v57 = vld [vmem:[#allocation76_spill] sm:$0xff]  ;;  %vm983_vm13 = vcmp.gt.f32.partialorder %v9725_v41, 0.0 }
 0x196   : > { %v7953_v63 = vpop.eup %7952  ;;  %2183 = vmatmul.f32.gmra.mxu1 %v9765_v51  ;;  %6933 = vmatpush.msk.msrb.mxu3 %vm1378_vm9, %v13597_v46  ;;  %7960 = vpow2.f32 %v1042_v60  ;;  %vm13406_vm4 = vcmp.eq.s32.totalorder %v13634_v42, %v9079_v47  ;;  %v1054_v60 = vmul.f32 1.442695, %v1007_v52  ;;  %v13642_v52 = vld [vmem:[#allocation79_spill] sm:$0xff] }
 0x197   : > { %v7955_v44 = vpop.eup %7954  ;;  %v6491_v61 = vadd.f32 -1.0, %v7953_v63  ;;  %v13631_v63 = vld [vmem:[#allocation59_spill] sm:$0xff]  ;;  %6946 = vmatpush.msk.msra.mxu0 %vm1435_vm10, %v13597_v46  ;;  %6907 = vmatpush.msk.msra.mxu1 %vm13632_vm14, %v13597_v46  ;;  %vm1372_vm10 = vcmp.eq.s32.totalorder %v13637_v57, %v9079_v47  ;;  %vm13638_vm14 = vcmask 867328  }
 0x198   : > { %v6486_v59 = vadd.f32 -1.0, %v7955_v44  ;;  %vm13396_vm1 = vcmp.eq.s32.totalorder %v13631_v63, %v9079_v47  ;;  %v13633_v44 = vld [vmem:[#allocation68_spill] sm:$0xff]  ;;  %6934 = vmatpush.msk.msrb.mxu3 %vm1375_vm12, %v13597_v46  ;;  %v13640_v57 = vld [vmem:[#allocation71_spill] sm:$0xff]  ;;  %7962 = vpow2.f32 %v1054_v60  ;;  %v1202_v63 = vadd.s32 256, %v13646_v45 }
 0x199   : > { %v9788_v56 = vsel %vm976_vm8, %v9491_v33, %v6491_v61  ;;  %vm1432_vm9 = vcmp.eq.s32.totalorder %v13633_v44, %v9079_v47  ;;  %v13636_v61 = vld [vmem:[#allocation63_spill] sm:$0xff]  ;;  %v7957_v30 = vpop.eup %7956  ;;  %6922 = vmatpush.msk.msrb.mxu2 %vm13396_vm1, %v13597_v46  ;;  %6908 = vmatpush.msk.msra.mxu1 %vm13406_vm4, %v13597_v46  ;;  %vm1429_vm12 = vcmp.eq.s32.totalorder %v13640_v57, %v9079_v47  ;;  %vm981_vm1 = vcmp.gt.f32.partialorder %v9572_v55, 0.0 }
 0x19a   : > { %2212 = vmatmul.f32.gmra.mxu2 %v9788_v56  ;;  %v9804_v33 = vsel %vm971_vm11, %v9527_v39, %v6486_v59  ;;  %vm13400_vm8 = vcmp.eq.s32.totalorder %v13636_v61, %v9079_v47  ;;  %v13639_v39 = vld [vmem:[#allocation58_spill] sm:$0xff]  ;;  %v6496_v59 = vadd.f32 -1.0, %v7957_v30  ;;  %6947 = vmatpush.msk.msra.mxu0 %vm1432_vm9, %v13597_v46  ;;  %vm1369_vm9 = vcmp.eq.s32.totalorder %v13642_v52, %v9079_v47 }
 0x19b   : > { %13635 = vst [vmem:[#allocation35_spill] sm:$0xff] %v9804_v33  ;;  %6876 = vmatmul.msk.f32.gmra.mxu3 %vm13638_vm14, %v9804_v33  ;;  %vm13405_vm11 = vcmp.eq.s32.totalorder %v13639_v39, %v9079_v47  ;;  %vm13408_vm14 = vcmp.eq.s32.totalorder %v13641_v19, %v9079_v47  ;;  %6923 = vmatpush.msk.msrb.mxu2 %vm13400_vm8, %v13597_v46  ;;  %v7959_v30 = vpop.eup %7958  ;;  %v13643_v33 = vld [vmem:[#allocation98_spill] sm:$0xff]  ;;  %vm982_vm4 = vcmp.gt.f32.partialorder %v9558_v26, 0.0  ;;  %v9869_v57 = vmul.u32 2, %v1202_v63  ;;  %v13651_v63 = vld [vmem:[#allocation85_spill] sm:$0xff] }
 0x19c   : > { %6935 = vmatpush.msk.msrb.mxu3 %vm1372_vm10, %v13597_v46  ;;  %v9837_v44 = vsel %vm981_vm1, %v9572_v55, %v6496_v59  ;;  %2267 = vmatmul.f32.gmra.mxu0 %v13643_v33  ;;  %vm1426_vm8 = vcmp.eq.s32.totalorder %v13644_v5, %v9079_v47  ;;  %v13645_v61 = vld [vmem:[#allocation62_spill] sm:$0xff]  ;;  %v7961_v60 = vpop.eup %7960  ;;  %v6497_v6 = vadd.f32 -1.0, %v7959_v30  ;;  %v13648_v59 = vld [vmem:[#allocation72_spill] sm:$0xff]  ;;  %v13649_v30 = vld [vmem:[#allocation69_spill] sm:$0xff]  ;;  %v13654_v52 = vmov 0.0  }
 0x19d   : > { %6909 = vmatpush.msk.msra.mxu1 %vm13405_vm11, %v13597_v46  ;;  %vm13411_vm10 = vcmp.eq.s32.totalorder %v13645_v61, %v9079_v47  ;;  %6948 = vmatpush.msk.msra.mxu0 %vm1429_vm12, %v13597_v46  ;;  %v13647_v55 = vld [vmem:[#allocation82_spill] sm:$0xff]  ;;  %vm1486_vm11 = vcmp.eq.s32.totalorder %v13648_v59, %v9079_v47  ;;  %v6492_v45 = vadd.f32 -1.0, %v7961_v60  ;;  %v13650_v60 = vld [vmem:[#allocation77_spill] sm:$0xff]  ;;  %vm1363_vm12 = vcmp.eq.s32.totalorder %v13651_v63, %v9079_v47 }
 0x19e   : > { %6924 = vmatpush.msk.msrb.mxu2 %vm13408_vm14, %v13597_v46  ;;  %vm1366_vm1 = vcmp.eq.s32.totalorder %v13647_v55, %v9079_v47  ;;  %2186 = vmatmul.f32.gmra.mxu1 %v9837_v44  ;;  %v9872_v33 = vsel %vm982_vm4, %v9558_v26, %v6497_v6  ;;  %vm977_vm14 = vcmp.gt.f32.partialorder %v9622_v20, 0.0  ;;  %v13653_v6 = vld [vmem:[#allocation73_spill] sm:$0xff]  ;;  %v7963_v5 = vpop.eup %7962  ;;  %vm1283_vm2 = vcmp.eq.s32.totalorder %v8682_v28, %v9869_v57 }
 0x19f   : > { %6936 = vmatpush.msk.msrb.mxu3 %vm1369_vm9, %v13597_v46  ;;  %6949 = vmatpush.msk.msra.mxu0 %vm1426_vm8, %v13597_v46  ;;  %vm1423_vm9 = vcmp.eq.s32.totalorder %v13650_v60, %v9079_v47  ;;  %v9889_v26 = vsel %vm977_vm14, %v9622_v20, %v6492_v45  ;;  %vm13417_vm4 = vcmp.eq.s32.totalorder %v13653_v6, %v9079_v47  ;;  %v6779_v60 = vsel %vm1486_vm11, 1.0, %v13654_v52  ;;  %v13657_v20 = vld [vmem:[#allocation88_spill] sm:$0xff]  ;;  %v13659_v55 = vld [vmem:[#allocation9_spill] sm:$0xff] }
 0x1a0   : > { %6910 = vmatpush.msk.msra.mxu1 %vm13411_vm10, %v13597_v46  ;;  %13652 = vst [vmem:[#allocation39_spill] sm:$0xff] %v9889_v26  ;;  %vm13655_vm8 = vcmask 867328   ;;  %vm13656_vm14 = vcmp.eq.s32.totalorder %v13649_v30, %v9079_v47  ;;  %v13658_v45 = vld [vmem:[#allocation80_spill] sm:$0xff]  ;;  %v6498_v63 = vadd.f32 -1.0, %v7963_v5  ;;  %vm1253_vm11 = vcmp.eq.s32.totalorder %v13659_v55, %v9869_v57  ;;  %v13663_v5 = vld [vmem:[#allocation11_spill] sm:$0xff] }
 0x1a1   : > { %6937 = vmatpush.msk.msrb.mxu3 %vm1366_vm1, %v13597_v46  ;;  %6925 = vmatpush.msk.msrb.mxu2 %vm13656_vm14, %v13597_v46  ;;  %vm1360_vm1 = vcmp.eq.s32.totalorder %v13657_v20, %v9079_v47  ;;  %vm1420_vm10 = vcmp.eq.s32.totalorder %v13658_v45, %v9079_v47  ;;  %vm13661_vm14 = vcmask 1041408   ;;  %v13662_v20 = vld [vmem:[#allocation83_spill] sm:$0xff] }
 0x1a2   : > { %2215 = vmatmul.f32.gmra.mxu2 %v9872_v33  ;;  %6950 = vmatpush.msk.msra.mxu0 %vm1423_vm9, %v13597_v46  ;;  %vm1250_vm9 = vcmp.eq.s32.totalorder %v13663_v5, %v9869_v57  ;;  %v13664_v55 = vld [vmem:[#allocation95_spill] sm:$0xff]  ;;  %v13668_v5 = vld [vmem:[#allocation78_spill] sm:$0xff] }
 0x1a3   : > { %6877 = vmatmul.msk.f32.gmra.mxu3 %vm13655_vm8, %v9889_v26  ;;  %6926 = vmatpush.msk.msrb.mxu2 %vm13417_vm4, %v13597_v46  ;;  %v13660_v26 = vld [vmem:[#allocation91_spill] sm:$0xff]  ;;  %vm1354_vm4 = vcmp.eq.s32.totalorder %v13664_v55, %v9079_v47  ;;  %v13674_v55 = vld [vmem:[#allocation13_spill] sm:$0xff] }
 0x1a4   : > { %6938 = vmatpush.msk.msrb.mxu3 %vm1363_vm12, %v13597_v46  ;;  %vm1357_vm8 = vcmp.eq.s32.totalorder %v13660_v26, %v9079_v47  ;;  %6959 = vmatpush.msk.msrb.mxu1 %vm13661_vm14, %v6779_v60  ;;  %vm1417_vm12 = vcmp.eq.s32.totalorder %v13662_v20, %v9079_v47  ;;  %v13665_v60 = vld [vmem:[#allocation99_spill] sm:$0xff]  ;;  %v9935_v26 = vsel %vm983_vm13, %v9725_v41, %v6498_v63  ;;  %v13667_v20 = vld [vmem:[#allocation86_spill] sm:$0xff]  ;;  %v13670_v41 = vld [vmem:[#allocation89_spill] sm:$0xff]  ;;  %vm13671_vm14 = vcmask 867328  }
 0x1a5   : > { %2270 = vmatmul.f32.gmra.mxu0 %v9352_v43  ;;  %6977 = vmatpush.msk.msra.mxu2 %vm1253_vm11, %v13597_v46  ;;  %13666 = vst [vmem:[#allocation46_spill] sm:$0xff] %v9935_v26  ;;  %v13669_v43 = vld [vmem:[#allocation12_spill] sm:$0xff]  ;;  %vm1411_vm13 = vcmp.eq.s32.totalorder %v13670_v41, %v9079_v47  ;;  %v13672_v63 = vld [vmem:[#allocation81_spill] sm:$0xff] }
 0x1a6   : > { %6939 = vmatpush.msk.msrb.mxu3 %vm1360_vm1, %v13597_v46  ;;  %6951 = vmatpush.msk.msra.mxu0 %vm1420_vm10, %v13597_v46  ;;  %vm1414_vm1 = vcmp.eq.s32.totalorder %v13667_v20, %v9079_v47  ;;  %vm1483_vm10 = vcmp.eq.s32.totalorder %v13668_v5, %v9079_v47  ;;  %vm1247_vm11 = vcmp.eq.s32.totalorder %v13669_v43, %v9869_v57  ;;  %v13673_v43 = vld [vmem:[#allocation93_spill] sm:$0xff] }
 0x1a7   : > { %2293 = vmatmul.f32.vlgmr.msra.gmra.mxu1 %v13665_v60  ;;  %6978 = vmatpush.msk.msra.mxu2 %vm1250_vm9, %v13597_v46  ;;  %vm1244_vm9 = vcmp.eq.s32.totalorder %v13674_v55, %v9869_v57  ;;  %v13678_v55 = vld [vmem:[#allocation87_spill] sm:$0xff] }
 0x1a8   : > { %6940 = vmatpush.msk.msrb.mxu3 %vm1357_vm8, %v13597_v46  ;;  %6952 = vmatpush.msk.msra.mxu0 %vm1417_vm12, %v13597_v46  ;;  %vm1351_vm8 = vcmp.eq.s32.totalorder %v9322_v12, %v9079_v47  ;;  %vm1480_vm12 = vcmp.eq.s32.totalorder %v13672_v63, %v9079_v47  ;;  %v13675_v12 = vld [vmem:[#allocation96_spill] sm:$0xff] }
 0x1a9   : > { %6960 = vmatpush.msk.msrb.mxu1 %vm1483_vm10, %v13597_v46  ;;  %6979 = vmatpush.msk.msra.mxu2 %vm1247_vm11, %v13597_v46  ;;  %vm1405_vm10 = vcmp.eq.s32.totalorder %v13675_v12, %v9079_v47 }
 0x1aa   : > { %2322 = vmatmul.f32.vlgmr.msrb.gmra.mxu2 %v9343_v37  ;;  %6941 = vmatpush.msk.msrb.mxu3 %vm1354_vm4, %v13597_v46  ;;  %vm1408_vm4 = vcmp.eq.s32.totalorder %v13673_v43, %v9079_v47 }
 0x1ab   : > { %6878 = vmatmul.msk.f32.gmra.mxu3 %vm13671_vm14, %v9935_v26  ;;  %6953 = vmatpush.msk.msra.mxu0 %vm1414_vm1, %v13597_v46  ;;  %vm1301_vm1 = vcmp.eq.s32.totalorder %v8529_v11, %v9869_v57  ;;  %v13676_v26 = vld [vmem:[#allocation84_spill] sm:$0xff]  ;;  %v13677_v11 = vld [vmem:[#allocation14_spill] sm:$0xff]  ;;  %vm1402_vm14 = vcmp.eq.s32.totalorder %v9326_v48, %v9079_v47 }
 0x1ac   : > { %6942 = vmatpush.msk.msrb.mxu3 %vm1351_vm8, %v13597_v46  ;;  %6961 = vmatpush.msk.msrb.mxu1 %vm1480_vm12, %v13597_v46  ;;  %vm1477_vm11 = vcmp.eq.s32.totalorder %v13676_v26, %v9079_v47  ;;  %vm1241_vm8 = vcmp.eq.s32.totalorder %v13677_v11, %v9869_v57  ;;  %vm1474_vm12 = vcmp.eq.s32.totalorder %v13678_v55, %v9079_v47  ;;  %v13680_v11 = vld [vmem:[#allocation90_spill] sm:$0xff] }
 0x1ad   : > { %6954 = vmatpush.msk.msra.mxu0 %vm1411_vm13, %v13597_v46  ;;  %6980 = vmatpush.msk.msra.mxu2 %vm1244_vm9, %v13597_v46  ;;  %vm1298_vm13 = vcmp.eq.s32.totalorder %v8560_v13, %v9869_v57  ;;  %v13679_v13 = vld [vmem:[#allocation16_spill] sm:$0xff]  ;;  %vm1295_vm9 = vcmp.eq.s32.totalorder %v8578_v2, %v9869_v57  ;;  %v13682_v2 = vld [vmem:[#allocation94_spill] sm:$0xff] }
 0x1ae   : > { %2273 = vmatmul.f32.gmra.mxu0 %v9404_v9  ;;  %6993 = vmatpush.msk.msra.mxu3 %vm1301_vm1, %v13597_v46  ;;  %vm1399_vm1 = vcmp.eq.s32.totalorder %v9381_v50, %v9079_v47 }
 0x1af   : > { %6955 = vmatpush.msk.msra.mxu0 %vm1408_vm4, %v13597_v46  ;;  %2296 = vmatmul.f32.gmra.mxu1 %v9361_v14  ;;  %vm1238_vm4 = vcmp.eq.s32.totalorder %v13679_v13, %v9869_v57  ;;  %v13681_v13 = vld [vmem:[#allocation18_spill] sm:$0xff] }
 0x1b0   : > { %6962 = vmatpush.msk.msrb.mxu1 %vm1477_vm11, %v13597_v46  ;;  %6994 = vmatpush.msk.msra.mxu3 %vm1298_vm13, %v13597_v46  ;;  %vm1235_vm11 = vcmp.eq.s32.totalorder %v13681_v13, %v9869_v57  ;;  %vm1292_vm13 = vcmp.eq.s32.totalorder %v8592_v17, %v9869_v57  ;;  %v13684_v13 = vld [vmem:[#allocation97_spill] sm:$0xff] }
 0x1b1   : > { %6956 = vmatpush.msk.msra.mxu0 %vm1405_vm10, %v13597_v46  ;;  %6981 = vmatpush.msk.msra.mxu2 %vm1241_vm8, %v13597_v46  ;;  %vm1471_vm10 = vcmp.eq.s32.totalorder %v13680_v11, %v9079_v47  ;;  %vm1468_vm8 = vcmp.eq.s32.totalorder %v13682_v2, %v9079_v47 }
 0x1b2   : > { %2325 = vmatmul.f32.gmra.mxu2 %v9396_v1  ;;  %6963 = vmatpush.msk.msrb.mxu1 %vm1474_vm12, %v13597_v46  ;;  %vm1349_vm12 = vcmp.eq.s32.totalorder %v8602_v18, %v9869_v57  ;;  %v13686_v18 = vld [vmem:[#allocation101_spill] sm:$0xff] }
 0x1b3   : > { %2351 = vmatmul.f32.vlgmr.msrb.gmra.mxu3 %v9459_v23  ;;  %6957 = vmatpush.msk.msra.mxu0 %vm1402_vm14, %v13597_v46  ;;  %v13683_v23 = vld [vmem:[#allocation21_spill] sm:$0xff] }
 0x1b4   : > { %6982 = vmatpush.msk.msra.mxu2 %vm1238_vm4, %v13597_v46  ;;  %6995 = vmatpush.msk.msra.mxu3 %vm1295_vm9, %v13597_v46  ;;  %vm1232_vm14 = vcmp.eq.s32.totalorder %v13683_v23, %v9869_v57  ;;  %vm1465_vm4 = vcmp.eq.s32.totalorder %v13684_v13, %v9079_v47  ;;  %v13685_v23 = vld [vmem:[#allocation23_spill] sm:$0xff] }
 0x1b5   : > { %6958 = vmatpush.msk.msra.mxu0 %vm1399_vm1, %v13597_v46  ;;  %6964 = vmatpush.msk.msrb.mxu1 %vm1471_vm10, %v13597_v46  ;;  %vm1229_vm9 = vcmp.eq.s32.totalorder %v13685_v23, %v9869_v57  ;;  %vm1289_vm1 = vcmp.eq.s32.totalorder %v8616_v21, %v9869_v57  ;;  %vm1346_vm10 = vcmp.eq.s32.totalorder %v8628_v22, %v9869_v57  ;;  %v13687_v23 = vld [vmem:[#allocation103_spill] sm:$0xff] }
 0x1b6   : > { %6983 = vmatpush.msk.msra.mxu2 %vm1235_vm11, %v13597_v46  ;;  %2380 = vmatmul.f32.vlgmr.msra.gmra.mxu0 %v9476_v35  ;;  %vm1462_vm11 = vcmp.eq.s32.totalorder %v13686_v18, %v9079_v47 }
 0x1b7   : > { %2299 = vmatmul.f32.gmra.mxu1 %v9429_v54  ;;  %6996 = vmatpush.msk.msra.mxu3 %vm1292_vm13, %v13597_v46  ;;  %vm1226_vm13 = vcmp.eq.s32.totalorder %v8640_v24, %v9869_v57  ;;  %v13691_v24 = vld [vmem:[#allocation42_spill] sm:$0xff] }
 0x1b8   : > { %6965 = vmatpush.msk.msrb.mxu1 %vm1468_vm8, %v13597_v46  ;;  %6984 = vmatpush.msk.msra.mxu2 %vm1232_vm14, %v13597_v46  ;;  %vm1286_vm8 = vcmp.eq.s32.totalorder %v8643_v25, %v9869_v57  ;;  %vm1343_vm14 = vcmp.eq.s32.totalorder %v8655_v4, %v9869_v57  ;;  %v13703_v4 = vld [vmem:[#allocation55_spill] sm:$0xff] }
 0x1b9   : > { %7009 = vmatpush.msk.msrb.mxu0 %vm1349_vm12, %v13597_v46  ;;  %6997 = vmatpush.msk.msra.mxu3 %vm1289_vm1, %v13597_v46  ;;  %vm1459_vm12 = vcmp.eq.s32.totalorder %v13687_v23, %v9079_v47  ;;  %vm1456_vm1 = vcmp.eq.s32.totalorder %v9439_v7, %v9079_v47 }
 0x1ba   : > { %2328 = vmatmul.f32.gmra.mxu2 %v9472_v62  ;;  %6966 = vmatpush.msk.msrb.mxu1 %vm1465_vm4, %v13597_v46  ;;  %vm1223_vm4 = vcmp.eq.s32.totalorder %v8670_v27, %v9869_v57  ;;  %v13688_v27 = vld [vmem:[#allocation105_spill] sm:$0xff] }
 0x1bb   : > { %2354 = vmatmul.f32.gmra.mxu3 %v9665_v15  ;;  %6985 = vmatpush.msk.msra.mxu2 %vm1229_vm9, %v13597_v46  ;;  %vm1340_vm9 = vcmp.eq.s32.totalorder %v8685_v29, %v9869_v57  ;;  %v13702_v29 = vld [vmem:[#allocation92_spill] sm:$0xff] }
 0x1bc   : > { %7010 = vmatpush.msk.msrb.mxu0 %vm1346_vm10, %v13597_v46  ;;  %6967 = vmatpush.msk.msrb.mxu1 %vm1462_vm11, %v13597_v46  ;;  %vm1220_vm10 = vcmp.eq.s32.totalorder %v8698_v3, %v9869_v57  ;;  %vm1280_vm11 = vcmp.eq.s32.totalorder %v8701_v31, %v9869_v57  ;;  %v13689_v3 = vld [vmem:[#allocation106_spill] sm:$0xff] }
 0x1bd   : > { %6986 = vmatpush.msk.msra.mxu2 %vm1226_vm13, %v13597_v46  ;;  %6998 = vmatpush.msk.msra.mxu3 %vm1286_vm8, %v13597_v46  ;;  %vm1337_vm13 = vcmp.eq.s32.totalorder %v8704_v32, %v9869_v57  ;;  %vm1217_vm8 = vcmp.eq.s32.totalorder %v8732_v34, %v9869_v57  ;;  %v13690_v34 = vld [vmem:[#allocation107_spill] sm:$0xff]  ;;  %v13698_v32 = vld [vmem:[#allocation48_spill] sm:$0xff] }
 0x1be   : > { %7011 = vmatpush.msk.msrb.mxu0 %vm1343_vm14, %v13597_v46  ;;  %6968 = vmatpush.msk.msrb.mxu1 %vm1459_vm12, %v13597_v46  ;;  %vm1277_vm14 = vcmp.eq.s32.totalorder %v13606_v10, %v9869_v57  ;;  %vm1334_vm12 = vcmp.eq.s32.totalorder %v8741_v36, %v9869_v57  ;;  %v13693_v36 = vld [vmem:[#allocation44_spill] sm:$0xff] }
 0x1bf   : > { %6987 = vmatpush.msk.msra.mxu2 %vm1223_vm4, %v13597_v46  ;;  %6999 = vmatpush.msk.msra.mxu3 %vm1283_vm2, %v13597_v46  ;;  %vm1453_vm2 = vcmp.eq.s32.totalorder %v13688_v27, %v9079_v47  ;;  %vm1450_vm4 = vcmp.eq.s32.totalorder %v13689_v3, %v9079_v47 }
 0x1c0   : > { %7012 = vmatpush.msk.msrb.mxu0 %vm1340_vm9, %v13597_v46  ;;  %2302 = vmatmul.f32.gmra.mxu1 %v9530_v16  ;;  %vm1214_vm9 = vcmp.eq.s32.totalorder %v8758_v38, %v9869_v57  ;;  %v13692_v38 = vld [vmem:[#allocation43_spill] sm:$0xff] }
 0x1c1   : > { %2383 = vmatmul.f32.gmra.mxu0 %v9700_v0  ;;  %6969 = vmatpush.msk.msrb.mxu1 %vm1456_vm1, %v13597_v46  ;;  %vm1274_vm1 = vcmp.eq.s32.totalorder %v13614_v53, %v9869_v57 }
 0x1c2   : > { %6988 = vmatpush.msk.msra.mxu2 %vm1220_vm10, %v13597_v46  ;;  %7000 = vmatpush.msk.msra.mxu3 %vm1280_vm11, %v13597_v46  ;;  %vm1331_vm10 = vcmp.eq.s32.totalorder %v8764_v40, %v9869_v57  ;;  %vm1447_vm11 = vcmp.eq.s32.totalorder %v13690_v34, %v9079_v47  ;;  %v13694_v40 = vld [vmem:[#allocation7_spill] sm:$0xff] }
 0x1c3   : > { %7013 = vmatpush.msk.msrb.mxu0 %vm1337_vm13, %v13597_v46  ;;  %2331 = vmatmul.f32.gmra.mxu2 %v9646_v58  ;;  %vm1211_vm13 = vcmp.eq.s32.totalorder %v13691_v24, %v9869_v57  ;;  %v13695_v24 = vld [vmem:[#allocation47_spill] sm:$0xff] }
 0x1c4   : > { %2357 = vmatmul.f32.gmra.mxu3 %v9765_v51  ;;  %6970 = vmatpush.msk.msrb.mxu1 %vm1453_vm2, %v13597_v46  ;;  %vm1271_vm2 = vcmp.eq.s32.totalorder %v13692_v38, %v9869_v57 }
 0x1c5   : > { %6989 = vmatpush.msk.msra.mxu2 %vm1217_vm8, %v13597_v46  ;;  %7001 = vmatpush.msk.msra.mxu3 %vm1277_vm14, %v13597_v46  ;;  %vm1328_vm8 = vcmp.eq.s32.totalorder %v13693_v36, %v9869_v57  ;;  %vm1208_vm14 = vcmp.eq.s32.totalorder %v13694_v40, %v9869_v57  ;;  %v13696_v36 = vld [vmem:[#allocation108_spill] sm:$0xff]  ;;  %v13699_v40 = vld [vmem:[#allocation51_spill] sm:$0xff] }
 0x1c6   : > { %7014 = vmatpush.msk.msrb.mxu0 %vm1334_vm12, %v13597_v46  ;;  %6971 = vmatpush.msk.msrb.mxu1 %vm1450_vm4, %v13597_v46  ;;  %vm1268_vm12 = vcmp.eq.s32.totalorder %v13621_v8, %v9869_v57  ;;  %vm1325_vm4 = vcmp.eq.s32.totalorder %v13695_v24, %v9869_v57  ;;  %v13700_v24 = vld [vmem:[#allocation52_spill] sm:$0xff] }
 0x1c7   : > { %6990 = vmatpush.msk.msra.mxu2 %vm1214_vm9, %v13597_v46  ;;  %7002 = vmatpush.msk.msra.mxu3 %vm1274_vm1, %v13597_v46  ;;  %vm13697_vm9 = vcmask 867328   ;;  %vm1397_vm1 = vcmp.eq.s32.totalorder %v13698_v32, %v9869_v57  ;;  %v13701_v32 = vld [vmem:[#allocation53_spill] sm:$0xff] }
 0x1c8   : > { %7015 = vmatpush.msk.msrb.mxu0 %vm1331_vm10, %v13597_v46  ;;  %6972 = vmatpush.msk.msrb.mxu1 %vm1447_vm11, %v13597_v46  ;;  %vm1265_vm10 = vcmp.eq.s32.totalorder %v13628_v49, %v9869_v57  ;;  %vm1322_vm11 = vcmp.eq.s32.totalorder %v13699_v40, %v9869_v57  ;;  %v13704_v40 = vld [vmem:[#allocation56_spill] sm:$0xff] }
 0x1c9   : > { %6991 = vmatpush.msk.msra.mxu2 %vm1211_vm13, %v13597_v46  ;;  %7003 = vmatpush.msk.msra.mxu3 %vm1271_vm2, %v13597_v46  ;;  %vm1394_vm13 = vcmp.eq.s32.totalorder %v13700_v24, %v9869_v57  ;;  %vm1445_vm2 = vcmp.eq.s32.totalorder %v13701_v32, %v9869_v57  ;;  %v13705_v24 = vld [vmem:[#allocation57_spill] sm:$0xff]  ;;  %v13707_v32 = vld [vmem:[#allocation60_spill] sm:$0xff] }
 0x1ca   : > { %7016 = vmatpush.msk.msrb.mxu0 %vm1328_vm8, %v13597_v46  ;;  %6973 = vmatmul.msk.f32.vlgmr.msrb.gmra.mxu1 %vm13697_vm9, %v13696_v36  ;;  %vm1262_vm8 = vcmp.eq.s32.totalorder %v13634_v42, %v9869_v57  ;;  %vm1259_vm9 = vcmp.eq.s32.totalorder %v13639_v39, %v9869_v57 }
 0x1cb   : > { %2386 = vmatmul.f32.gmra.mxu0 %v9788_v56  ;;  %6992 = vmatpush.msk.msra.mxu2 %vm1208_vm14, %v13597_v46  ;;  %vm1319_vm14 = vcmp.eq.s32.totalorder %v13703_v4, %v9869_v57 }
 0x1cc   : > { %7004 = vmatpush.msk.msra.mxu3 %vm1268_vm12, %v13597_v46  ;;  %7017 = vmatpush.msk.msrb.mxu0 %vm1325_vm4, %v13597_v46  ;;  %vm1391_vm12 = vcmp.eq.s32.totalorder %v13704_v40, %v9869_v57  ;;  %vm1442_vm4 = vcmp.eq.s32.totalorder %v13705_v24, %v9869_v57  ;;  %v13708_v40 = vld [vmem:[#allocation61_spill] sm:$0xff]  ;;  %v13709_v24 = vld [vmem:[#allocation63_spill] sm:$0xff] }
 0x1cd   : > { %7025 = vmatpush.msk.msra.mxu1 %vm1397_vm1, %v13597_v46  ;;  %2360 = vmatmul.f32.gmra.mxu3 %v9837_v44 }
 0x1ce   : > { %2438 = vmatmul.f32.vlgmr.msra.gmra.mxu2 %v13702_v29  ;;  %7005 = vmatpush.msk.msra.mxu3 %vm1265_vm10, %v13597_v46  ;;  %v13706_v29 = vld [vmem:[#allocation59_spill] sm:$0xff]  ;;  %vm1388_vm10 = vcmp.eq.s32.totalorder %v13707_v32, %v9869_v57  ;;  %v13710_v32 = vld [vmem:[#allocation64_spill] sm:$0xff] }
 0x1cf   : > { %7018 = vmatpush.msk.msrb.mxu0 %vm1322_vm11, %v13597_v46  ;;  %7026 = vmatpush.msk.msra.mxu1 %vm1394_vm13, %v13597_v46  ;;  %vm1316_vm1 = vcmp.eq.s32.totalorder %v13706_v29, %v9869_v57  ;;  %vm1439_vm11 = vcmp.eq.s32.totalorder %v13708_v40, %v9869_v57  ;;  %vm1256_vm13 = vcmp.eq.s32.totalorder %v13645_v61, %v9869_v57  ;;  %v13711_v40 = vld [vmem:[#allocation65_spill] sm:$0xff]  ;;  %v13712_v29 = vld [vmem:[#allocation35_spill] sm:$0xff] }
 0x1d0   : > { %7041 = vmatpush.msk.msrb.mxu2 %vm1445_vm2, %v13597_v46  ;;  %7006 = vmatpush.msk.msra.mxu3 %vm1262_vm8, %v13597_v46  ;;  %vm1313_vm2 = vcmp.eq.s32.totalorder %v13709_v24, %v9869_v57  ;;  %vm1385_vm8 = vcmp.eq.s32.totalorder %v13710_v32, %v9869_v57  ;;  %v13714_v32 = vld [vmem:[#allocation67_spill] sm:$0xff]  ;;  %v13717_v24 = vld [vmem:[#allocation70_spill] sm:$0xff] }
 0x1d1   : > { %7019 = vmatpush.msk.msrb.mxu0 %vm1319_vm14, %v13597_v46  ;;  %7027 = vmatpush.msk.msra.mxu1 %vm1391_vm12, %v13597_v46  ;;  %vm1436_vm14 = vcmp.eq.s32.totalorder %v13711_v40, %v9869_v57  ;;  %vm1487_vm12 = vcmp.eq.s32.totalorder %v13648_v59, %v9869_v57  ;;  %v13715_v40 = vld [vmem:[#allocation68_spill] sm:$0xff] }
 0x1d2   : > { %7042 = vmatpush.msk.msrb.mxu2 %vm1442_vm4, %v13597_v46  ;;  %7007 = vmatpush.msk.msra.mxu3 %vm1259_vm9, %v13597_v46  ;;  %vm13713_vm4 = vcmask 867328   ;;  %vm1310_vm9 = vcmp.eq.s32.totalorder %v13641_v19, %v9869_v57  ;;  %v6780_v59 = vsel %vm1487_vm12, 1.0, %v13654_v52  ;;  %v13716_v19 = vld [vmem:[#allocation98_spill] sm:$0xff] }
 0x1d3   : > { %7020 = vmatpush.msk.msrb.mxu0 %vm1316_vm1, %v13597_v46  ;;  %7028 = vmatpush.msk.msra.mxu1 %vm1388_vm10, %v13597_v46  ;;  %vm1382_vm1 = vcmp.eq.s32.totalorder %v13714_v32, %v9869_v57  ;;  %vm1433_vm10 = vcmp.eq.s32.totalorder %v13715_v40, %v9869_v57  ;;  %v13718_v32 = vld [vmem:[#allocation71_spill] sm:$0xff] }
 0x1d4   : > { %7043 = vmatpush.msk.msrb.mxu2 %vm1439_vm11, %v13597_v46  ;;  %2389 = vmatmul.f32.gmra.mxu0 %v9872_v33  ;;  %vm1307_vm11 = vcmp.eq.s32.totalorder %v13649_v30, %v9869_v57  ;;  %v13724_v40 = vld [vmem:[#allocation39_spill] sm:$0xff] }
 0x1d5   : > { %6974 = vmatmul.msk.f32.gmra.mxu1 %vm13713_vm4, %v13712_v29  ;;  %7008 = vmatpush.msk.msra.mxu3 %vm1256_vm13, %v13597_v46  ;;  %vm1379_vm13 = vcmp.eq.s32.totalorder %v13717_v24, %v9869_v57  ;;  %v13722_v24 = vld [vmem:[#allocation76_spill] sm:$0xff] }
 0x1d6   : > { %7021 = vmatpush.msk.msrb.mxu0 %vm1313_vm2, %v13597_v46  ;;  %7029 = vmatpush.msk.msra.mxu1 %vm1385_vm8, %v13597_v46  ;;  %vm1430_vm2 = vcmp.eq.s32.totalorder %v13718_v32, %v9869_v57  ;;  %vm1304_vm8 = vcmp.eq.s32.totalorder %v13653_v6, %v9869_v57  ;;  %v13727_v32 = vld [vmem:[#allocation102_spill] sm:$0xff] }
 0x1d7   : > { %7044 = vmatpush.msk.msrb.mxu2 %vm1436_vm14, %v13597_v46  ;;  %2467 = vmatmul.f32.vlgmr.msra.gmra.mxu3 %v13665_v60  ;;  %vm1484_vm14 = vcmp.eq.s32.totalorder %v13668_v5, %v9869_v57  ;;  %v13720_v60 = vld [vmem:[#allocation75_spill] sm:$0xff]  ;;  %v13723_v5 = vld [vmem:[#allocation77_spill] sm:$0xff] }
 0x1d8   : > { %2441 = vmatmul.f32.gmra.mxu2 %v13716_v19  ;;  %7022 = vmatpush.msk.msrb.mxu0 %vm1310_vm9, %v13597_v46  ;;  %v13719_v19 = vld [vmem:[#allocation74_spill] sm:$0xff]  ;;  %vm1427_vm4 = vcmp.eq.s32.totalorder %v13720_v60, %v9869_v57  ;;  %vm13721_vm9 = vcmask 1041408   ;;  %v13761_v60 = vld [vmem:[#allocation37_spill] sm:$0xff] }
 0x1d9   : > { %7030 = vmatpush.msk.msra.mxu1 %vm1382_vm1, %v13597_v46  ;;  %7045 = vmatpush.msk.msrb.mxu2 %vm1433_vm10, %v13597_v46  ;;  %vm1376_vm12 = vcmp.eq.s32.totalorder %v13719_v19, %v9869_v57  ;;  %vm1373_vm1 = vcmp.eq.s32.totalorder %v13722_v24, %v9869_v57  ;;  %vm1424_vm10 = vcmp.eq.s32.totalorder %v13723_v5, %v9869_v57  ;;  %v13728_v19 = vld [vmem:[#allocation82_spill] sm:$0xff] }
 0x1da   : > { %7023 = vmatpush.msk.msrb.mxu0 %vm1307_vm11, %v13597_v46  ;;  %7057 = vmatpush.msk.msrb.mxu3 %vm13721_vm9, %v6780_v59  ;;  %vm13725_vm11 = vcmask 867328   ;;  %v13726_v59 = vld [vmem:[#allocation79_spill] sm:$0xff] }
 0x1db   : > { %7031 = vmatpush.msk.msra.mxu1 %vm1379_vm13, %v13597_v46  ;;  %7046 = vmatpush.msk.msrb.mxu2 %vm1430_vm2, %v13597_v46  ;;  %vm1370_vm13 = vcmp.eq.s32.totalorder %v13726_v59, %v9869_v57  ;;  %vm1421_vm2 = vcmp.eq.s32.totalorder %v13658_v45, %v9869_v57  ;;  %v13730_v45 = vld [vmem:[#allocation85_spill] sm:$0xff] }
 0x1dc   : > { %7024 = vmatpush.msk.msrb.mxu0 %vm1304_vm8, %v13597_v46  ;;  %7058 = vmatpush.msk.msrb.mxu3 %vm1484_vm14, %v13597_v46  ;;  %vm1481_vm8 = vcmp.eq.s32.totalorder %v13672_v63, %v9869_v57  ;;  %vm1367_vm14 = vcmp.eq.s32.totalorder %v13728_v19, %v9869_v57  ;;  %vm1364_vm9 = vcmp.eq.s32.totalorder %v13730_v45, %v9869_v57  ;;  %v13765_v59 = vld [vmem:[#allocation45_spill] sm:$0xff]  ;;  %v13769_v19 = vld [vmem:[#allocation15_spill] sm:$0xff] }
 0x1dd   : > { %7032 = vmatpush.msk.msra.mxu1 %vm1376_vm12, %v13597_v46  ;;  %7047 = vmatpush.msk.msrb.mxu2 %vm1427_vm4, %v13597_v46  ;;  %vm1478_vm4 = vcmp.eq.s32.totalorder %v13676_v26, %v9869_v57  ;;  %v13731_v26 = vld [vmem:[#allocation88_spill] sm:$0xff] }
 0x1de   : > { %6975 = vmatmul.msk.f32.gmra.mxu1 %vm13725_vm11, %v13724_v40  ;;  %2496 = vmatmul.f32.vlgmr.msrb.gmra.mxu0 %v9343_v37  ;;  %v13729_v37 = vld [vmem:[#allocation83_spill] sm:$0xff]  ;;  %vm1361_vm11 = vcmp.eq.s32.totalorder %v13731_v26, %v9869_v57 }
 0x1df   : > { %7033 = vmatpush.msk.msra.mxu1 %vm1373_vm1, %v13597_v46  ;;  %7048 = vmatpush.msk.msrb.mxu2 %vm1424_vm10, %v13597_v46  ;;  %vm1418_vm12 = vcmp.eq.s32.totalorder %v13729_v37, %v9869_v57  ;;  %vm1415_vm1 = vcmp.eq.s32.totalorder %v13667_v20, %v9869_v57  ;;  %vm1475_vm10 = vcmp.eq.s32.totalorder %v13678_v55, %v9869_v57  ;;  %v13732_v20 = vld [vmem:[#allocation46_spill] sm:$0xff]  ;;  %v13734_v55 = vld [vmem:[#allocation91_spill] sm:$0xff] }
 0x1e0   : > { %2444 = vmatmul.f32.gmra.mxu2 %v13727_v32  ;;  %2470 = vmatmul.f32.gmra.mxu3 %v9361_v14  ;;  %v13767_v32 = vld [vmem:[#allocation49_spill] sm:$0xff] }
 0x1e1   : > { %7034 = vmatpush.msk.msra.mxu1 %vm1370_vm13, %v13597_v46  ;;  %7049 = vmatpush.msk.msrb.mxu2 %vm1421_vm2, %v13597_v46  ;;  %v10246_v14 = vpop.f32.mrf.mxu2  ;;  %vm1412_vm13 = vcmp.eq.s32.totalorder %v13670_v41, %v9869_v57  ;;  %vm1472_vm2 = vcmp.eq.s32.totalorder %v13680_v11, %v9869_v57  ;;  %v13735_v11 = vld [vmem:[#allocation95_spill] sm:$0xff] }
 0x1e2   : > { %7059 = vmatpush.msk.msrb.mxu3 %vm1481_vm8, %v13597_v46  ;;  %vm13733_vm8 = vcmask 867328  }
 0x1e3   : > { %7035 = vmatpush.msk.msra.mxu1 %vm1367_vm14, %v13597_v46  ;;  %7050 = vmatpush.msk.msrb.mxu2 %vm1418_vm12, %v13597_v46  ;;  %vm1358_vm14 = vcmp.eq.s32.totalorder %v13734_v55, %v9869_v57  ;;  %vm1409_vm12 = vcmp.eq.s32.totalorder %v13673_v43, %v9869_v57 }
 0x1e4   : > { %7060 = vmatpush.msk.msrb.mxu3 %vm1478_vm4, %v13597_v46  ;;  %vm1469_vm4 = vcmp.eq.s32.totalorder %v13682_v2, %v9869_v57  ;;  %v13736_v2 = vld [vmem:[#allocation100_spill] sm:$0xff] }
 0x1e5   : > { %7036 = vmatpush.msk.msra.mxu1 %vm1364_vm9, %v13597_v46  ;;  %7051 = vmatpush.msk.msrb.mxu2 %vm1415_vm1, %v13597_v46  ;;  %vm1355_vm9 = vcmp.eq.s32.totalorder %v13735_v11, %v9869_v57  ;;  %vm1406_vm1 = vcmp.eq.s32.totalorder %v13675_v12, %v9869_v57  ;;  %v13773_v11 = vld [vmem:[#allocation19_spill] sm:$0xff] }
 0x1e6   : > { %7061 = vmatpush.msk.msrb.mxu3 %vm1475_vm10, %v13597_v46  ;;  %6976 = vmatmul.msk.f32.gmra.mxu1 %vm13733_vm8, %v13732_v20  ;;  %vm1466_vm10 = vcmp.eq.s32.totalorder %v13684_v13, %v9869_v57  ;;  %vm1400_vm8 = vcmp.eq.s32.totalorder %v9381_v50, %v9869_v57  ;;  %v13737_v13 = vld [vmem:[#allocation104_spill] sm:$0xff] }
 0x1e7   : > { %2499 = vmatmul.f32.gmra.mxu0 %v9396_v1  ;;  %7037 = vmatpush.msk.msra.mxu1 %vm1361_vm11, %v13597_v46  ;;  %vm1352_vm11 = vcmp.eq.s32.totalorder %v13736_v2, %v9869_v57 }
 0x1e8   : > { %7052 = vmatpush.msk.msrb.mxu2 %vm1412_vm13, %v13597_v46  ;;  %7062 = vmatpush.msk.msrb.mxu3 %vm1472_vm2, %v13597_v46  ;;  %vm1403_vm13 = vcmp.eq.s32.totalorder %v9326_v48, %v9869_v57  ;;  %vm1463_vm2 = vcmp.eq.s32.totalorder %v13686_v18, %v9869_v57 }
 0x1e9   : > { %2447 = vmatmul.f32.gmra.mxu2 %v9404_v9  ;;  %2473 = vmatmul.f32.gmra.mxu3 %v9429_v54  ;;  %v10295_v12 = vpop.f32.mrf.mxu2  ;;  %v13742_v9 = vld [vmem:[#allocation11_spill] sm:$0xff] }
 0x1ea   : > { %7038 = vmatpush.msk.msra.mxu1 %vm1358_vm14, %v13597_v46  ;;  %7053 = vmatpush.msk.msrb.mxu2 %vm1409_vm12, %v13597_v46  ;;  %v10289_v43 = vpop.f32.mrf.mxu3  ;;  %vm1460_vm14 = vcmp.eq.s32.totalorder %v13687_v23, %v9869_v57  ;;  %vm1457_vm12 = vcmp.eq.s32.totalorder %v9439_v7, %v9869_v57  ;;  %v10316_v48 = vpop.f32.mrf.mxu0  ;;  %v13744_v7 = vld [vmem:[#allocation12_spill] sm:$0xff] }
 0x1eb   : > { %7063 = vmatpush.msk.msrb.mxu3 %vm1469_vm4, %v13597_v46  ;;  %vm1454_vm4 = vcmp.eq.s32.totalorder %v13688_v27, %v9869_v57  ;;  %v13739_v27 = vld [vmem:[#allocation9_spill] sm:$0xff] }
 0x1ec   : > { %7039 = vmatpush.msk.msra.mxu1 %vm1355_vm9, %v13597_v46  ;;  %7054 = vmatpush.msk.msrb.mxu2 %vm1406_vm1, %v13597_v46  ;;  %vm1451_vm9 = vcmp.eq.s32.totalorder %v13689_v3, %v9869_v57  ;;  %vm1448_vm1 = vcmp.eq.s32.totalorder %v13690_v34, %v9869_v57  ;;  %v13740_v3 = vld [vmem:[#allocation10_spill] sm:$0xff] }
 0x1ed   : > { %7064 = vmatpush.msk.msrb.mxu3 %vm1466_vm10, %v13597_v46  ;;  %vm13738_vm10 = vcmask 867328  }
 0x1ee   : > { %7040 = vmatpush.msk.msra.mxu1 %vm1352_vm11, %v13597_v46  ;;  %7055 = vmatpush.msk.msrb.mxu2 %vm1403_vm13, %v13597_v46  ;;  %vm13741_vm11 = vcmp.eq.s32.totalorder %v13739_v27, %v13740_v3  ;;  %vm13743_vm13 = vcmp.eq.s32.totalorder %v13742_v9, %v13740_v3 }
 0x1ef   : > { %7065 = vmatpush.msk.msrb.mxu3 %vm1463_vm2, %v13597_v46  ;;  %2502 = vmatmul.f32.gmra.mxu0 %v9472_v62  ;;  %vm13745_vm2 = vcmp.eq.s32.totalorder %v13744_v7, %v13740_v3  ;;  %v13746_v62 = vld [vmem:[#allocation13_spill] sm:$0xff] }
 0x1f0   : > { %2525 = vmatmul.f32.vlgmr.msra.gmra.mxu1 %v13737_v13  ;;  %7056 = vmatpush.msk.msrb.mxu2 %vm1400_vm8, %v13597_v46  ;;  %vm13747_vm8 = vcmp.eq.s32.totalorder %v13746_v62, %v13740_v3 }
 0x1f1   : > { %7066 = vmatpush.msk.msrb.mxu3 %vm1460_vm14, %v13597_v46  ;;  %2554 = vmatmul.f32.vlgmr.msrb.gmra.mxu2 %v9476_v35  ;;  %v2097_v1 = vpop.f32.mrf.mxu2  ;;  %vm13748_vm14 = vmmov %vm13738_vm10  ;;  %v13749_v35 = vld [vmem:[#allocation14_spill] sm:$0xff] }
 0x1f2   : > { %2476 = vmatmul.f32.gmra.mxu3 %v9530_v16  ;;  %v10321_v50 = vpop.f32.mrf.mxu3  ;;  %v10336_v34 = vpop.f32.mrf.mxu0  ;;  %v13751_v16 = vld [vmem:[#allocation16_spill] sm:$0xff] }
 0x1f3   : > { %7067 = vmatpush.msk.msrb.mxu3 %vm1457_vm12, %v13597_v46  ;;  %vm13750_vm12 = vcmp.eq.s32.totalorder %v13749_v35, %v13740_v3  ;;  %v2124_v30 = vadd.f32 %v10321_v50, %v10295_v12 }
 0x1f5   : > { %7068 = vmatpush.msk.msrb.mxu3 %vm1454_vm4, %v13597_v46  ;;  %vm13752_vm4 = vcmp.eq.s32.totalorder %v13751_v16, %v13740_v3 }
 0x1f7   : > { %7069 = vmatpush.msk.msrb.mxu3 %vm1451_vm9, %v13597_v46  ;;  %2505 = vmatmul.f32.gmra.mxu0 %v9646_v58  ;;  %vm13755_vm9 = vmmov %vm13738_vm10 }
 0x1f8   : > { %2528 = vmatmul.f32.gmra.mxu1 %v9665_v15 }
 0x1f9   : > { %7070 = vmatpush.msk.msrb.mxu3 %vm1448_vm1, %v13597_v46  ;;  %2557 = vmatmul.f32.gmra.mxu2 %v9700_v0  ;;  %v10348_v23 = vpop.f32.mrf.mxu1  ;;  %vm13760_vm1 = vmmov %vm13755_vm9 }
 0x1fa   : > { %7071 = vmatmul.msk.f32.vlgmr.msrb.gmra.mxu3 %vm13738_vm10, %v13696_v36  ;;  %v2126_v54 = vpop.f32.mrf.mxu3  ;;  %v2100_v36 = vpop.f32.mrf.mxu2  ;;  %vm13762_vm10 = vnez %v13761_v60 }
 0x1fb   : > { %7120 = vmatpush.msk.msra.mxu3 %vm13741_vm11, %v13597_v46  ;;  %v2155_v58 = vpop.f32.mrf.mxu0  ;;  %v2127_v2 = vadd.f32 %v2126_v54, %v2097_v1 }
 0x1fd   : > { %7121 = vmatpush.msk.msra.mxu3 %vm13743_vm13, %v13597_v46  ;;  %vm13766_vm13 = vnez %v13765_v59  ;;  %v2156_v18 = vadd.f32 %v2155_v58, %v2127_v2 }
 0x1ff   : > { %7122 = vmatpush.msk.msra.mxu3 %vm13745_vm2, %v13597_v46  ;;  %vm13768_vm2 = vnez %v13767_v32 }
 0x200   : > { %2531 = vmatmul.f32.gmra.mxu1 %v9765_v51 }
 0x201   : > { %2560 = vmatmul.f32.gmra.mxu2 %v9788_v56  ;;  %7123 = vmatpush.msk.msra.mxu3 %vm13747_vm8, %v13597_v46  ;;  %vm13770_vm8 = vcmp.eq.s32.totalorder %v13769_v19, %v9079_v47 }
 0x202   : > { %7072 = vmatmul.msk.f32.gmra.mxu3 %vm13748_vm14, %v13712_v29  ;;  %v10374_v56 = vpop.f32.mrf.mxu2 }
 0x203   : > { %7124 = vmatpush.msk.msra.mxu3 %vm13750_vm12, %v13597_v46  ;;  %vm13774_vm12 = vcmp.eq.s32.totalorder %v13773_v11, %v9079_v47 }
 0x204   : > { %v2129_v0 = vpop.f32.mrf.mxu3 }
 0x205   : > { %7125 = vmatpush.msk.msra.mxu3 %vm13752_vm4, %v13597_v46  ;;  %vm13775_vm4 = vcmp.eq.s32.totalorder %v8592_v17, %v9079_v47  ;;  %v2130_v13 = vadd.f32 %v2129_v0, %v2100_v36 }
 0x207   : > { %7126 = vmatpush.msk.msra.mxu3 %vm8582_vm6, %v13597_v46 }
 0x208   : > { %2534 = vmatmul.f32.gmra.mxu1 %v9837_v44 }
 0x209   : > { %2563 = vmatmul.f32.gmra.mxu2 %v9872_v33  ;;  %7127 = vmatpush.msk.msra.mxu3 %vm8606_vm7, %v13597_v46  ;;  %v2158_v63 = vpop.f32.mrf.mxu0 }
 0x20a   : > { %7073 = vmatmul.msk.f32.gmra.mxu3 %vm13755_vm9, %v13724_v40  ;;  %v10376_v57 = vpop.f32.mrf.mxu1  ;;  %v13763_v40 = vld [vmem:[#allocation41_spill] sm:$0xff]  ;;  %vm13776_vm9 = vcmp.eq.s32.totalorder %v8616_v21, %v9079_v47  ;;  %v2159_v1 = vadd.f32 %v2158_v63, %v2130_v13 }
 0x20b   : > { %7128 = vmatpush.msk.msra.mxu3 %vm8633_vm0, %v13597_v46  ;;  %vm13764_vm11 = vnez %v13763_v40 }
 0x20c   : > { %v10392_v29 = vpop.f32.mrf.mxu3 }
 0x20d   : > { %7129 = vmatpush.msk.msra.mxu3 %vm8663_vm15, %v13597_v46 }
 0x20f   : > { %7130 = vmatpush.msk.msra.mxu3 %vm8693_vm3, %v13597_v46 }
 0x211   : > { %7131 = vmatpush.msk.msra.mxu3 %vm8723_vm5, %v13597_v46  ;;  %v2265_v37 = vpop.f32.mrf.mxu0 }
 0x212   : > { %7074 = vmatmul.msk.f32.gmra.mxu3 %vm13760_vm1, %v13732_v20  ;;  %v13771_v20 = vld [vmem:[#allocation17_spill] sm:$0xff]  ;;  %vm13777_vm1 = vcmp.eq.s32.totalorder %v8643_v25, %v9079_v47 }
 0x213   : > { %7132 = vmatpush.msk.msra.mxu3 %vm13762_vm10, %v13597_v46  ;;  %v2184_v24 = vpop.f32.mrf.mxu1  ;;  %v10397_v5 = vpop.f32.mrf.mxu2  ;;  %vm13772_vm14 = vcmp.eq.s32.totalorder %v13771_v20, %v9079_v47 }
 0x214   : > { %v2185_v54 = vadd.f32 %v2184_v24, %v2156_v18 }
 0x215   : > { %7133 = vmatpush.msk.msra.mxu3 %vm13764_vm11, %v13597_v46 }
 0x217   : > { %7134 = vmatpush.msk.msra.mxu3 %vm13766_vm13, %v13597_v46 }
 0x219   : > { %7135 = vmatpush.msk.msra.mxu3 %vm13768_vm2, %v13597_v46  ;;  %v2268_v40 = vpop.f32.mrf.mxu0 }
 0x21b   : > { %7190 = vmatpush.msk.msrb.mxu3 %vm13770_vm8, %v13597_v46  ;;  %v2187_v45 = vpop.f32.mrf.mxu1  ;;  %vm13778_vm8 = vcmp.eq.s32.totalorder %v8682_v28, %v9079_v47 }
 0x21c   : > { %v2188_v36 = vadd.f32 %v2187_v45, %v2159_v1 }
 0x21d   : > { %v2213_v26 = vpop.f32.mrf.mxu2  ;;  %7191 = vmatpush.msk.msrb.mxu3 %vm13772_vm14, %v13597_v46  ;;  %vm13779_vm14 = vcmp.eq.s32.totalorder %v8701_v31, %v9079_v47 }
 0x21e   : > { %v10416_v55 = vpop.f32.mrf.mxu3  ;;  %v2214_v0 = vadd.f32 %v2213_v26, %v2185_v54 }
 0x21f   : > { %7192 = vmatpush.msk.msrb.mxu3 %vm13774_vm12, %v13597_v46  ;;  %vm13780_vm12 = vcmp.eq.s32.totalorder %v13606_v10, %v9079_v47 }
 0x221   : > { %7193 = vmatpush.msk.msrb.mxu3 %vm13775_vm4, %v13597_v46  ;;  %vm13781_vm4 = vcmp.eq.s32.totalorder %v13614_v53, %v9079_v47 }
 0x222   : > { %v2271_v24 = vpop.f32.mrf.mxu0 }
 0x223   : > { %7194 = vmatpush.msk.msrb.mxu3 %vm13776_vm9, %v13597_v46  ;;  %vm13782_vm9 = vcmp.eq.s32.totalorder %v13692_v38, %v9079_v47 }
 0x224   : > { %v2294_v59 = vpop.f32.mrf.mxu1 }
 0x225   : > { %v2216_v32 = vpop.f32.mrf.mxu2  ;;  %7195 = vmatpush.msk.msrb.mxu3 %vm13777_vm1, %v13597_v46  ;;  %vm13783_vm1 = vcmp.eq.s32.totalorder %v13621_v8, %v9079_v47 }
 0x226   : > { %v2242_v60 = vpop.f32.mrf.mxu3  ;;  %v2217_v58 = vadd.f32 %v2216_v32, %v2188_v36  ;;  %v2121_v36 = vadd.f32 %v10289_v43, %v10246_v14 }
 0x227   : > { %7196 = vmatpush.msk.msrb.mxu3 %vm13778_vm8, %v13597_v46  ;;  %v10446_v2 = vadd.f32 %v2242_v60, %v2214_v0  ;;  %vm13784_vm8 = vcmask 1043456  }
 0x229   : > { %7197 = vmatpush.msk.msrb.mxu3 %vm13779_vm14, %v13597_v46  ;;  %v13447_v32 = vrot.slane %v10446_v2, 4  ;;  %vm13785_vm14 = vcmp.eq.s32.totalorder %v13628_v49, %v9079_v47 }
 0x22b   : > { %7198 = vmatpush.msk.msrb.mxu3 %vm13780_vm12, %v13597_v46  ;;  %vm13787_vm12 = vcmp.eq.s32.totalorder %v13634_v42, %v9079_v47  ;;  %v2274_v54 = vpop.f32.mrf.mxu0 }
 0x22c   : > { %v2297_v33 = vpop.f32.mrf.mxu1 }
 0x22d   : > { %v2323_v44 = vpop.f32.mrf.mxu2  ;;  %7199 = vmatpush.msk.msrb.mxu3 %vm13781_vm4, %v13597_v46  ;;  %vm13788_vm4 = vcmp.eq.s32.totalorder %v13639_v39, %v9079_v47 }
 0x22e   : > { %v2245_v63 = vpop.f32.mrf.mxu3 }
 0x22f   : > { %v10452_v18 = vadd.f32 %v2245_v63, %v2217_v58  ;;  %7200 = vmatpush.msk.msrb.mxu3 %vm13782_vm9, %v13597_v46  ;;  %vm13789_vm9 = vcmp.eq.s32.totalorder %v13645_v61, %v9079_v47 }
 0x231   : > { %v2841_v60 = vrot.slane %v10452_v18, 4  ;;  %7201 = vmatpush.msk.msrb.mxu3 %vm13783_vm1, %v13597_v46  ;;  %vm13791_vm1 = vmmov %vm13784_vm8 }
 0x233   : > { %v2842_v45 = vsel %vm13784_vm8, %v13447_v32, %v2841_v60  ;;  %7202 = vmatpush.msk.msrb.mxu3 %vm13785_vm14, %v13597_v46  ;;  %v2295_v60 = vadd.f32 %v2294_v59, %v2265_v37  ;;  %v2381_v15 = vpop.f32.mrf.mxu0  ;;  %vm13792_vm8 = vmmov %vm13791_vm1  ;;  %vm13793_vm14 = vcmask 1041408  }
 0x234   : > { %2865 = vrot.lane.b32.xlu1 %v2842_v45, %s13786_s23  ;;  %v2300_v26 = vpop.f32.mrf.mxu1  ;;  %v2150_v45 = vadd.f32 %v10316_v48, %v2121_v36  ;;  %v2153_v48 = vadd.f32 %v10336_v34, %v2124_v30 }
 0x235   : > { %v2326_v13 = vpop.f32.mrf.mxu2  ;;  %7203 = vmatpush.msk.msrb.mxu3 %vm13787_vm12, %v13597_v46  ;;  %v2324_v32 = vadd.f32 %v2323_v44, %v2295_v60  ;;  %v2298_v44 = vadd.f32 %v2297_v33, %v2268_v40  ;;  %v2301_v40 = vadd.f32 %v2300_v26, %v2271_v24  ;;  %vm13795_vm12 = vmmov %vm13793_vm14 }
 0x236   : > { %v2352_v1 = vpop.f32.mrf.mxu3  ;;  %v2179_v41 = vadd.f32 %v10348_v23, %v2150_v45 }
 0x237   : > { %7204 = vmatpush.msk.msrb.mxu3 %vm13788_vm4, %v13597_v46  ;;  %v2353_v51 = vadd.f32 %v2352_v1, %v2324_v32  ;;  %vm13463_vm4 = vcmask 1042432  }
 0x238   : > { %v2208_v6 = vadd.f32 %v10374_v56, %v2179_v41  ;;  %v2182_v56 = vadd.f32 %v10376_v57, %v2153_v48  ;;  %v2327_v41 = vadd.f32 %v2326_v13, %v2298_v44 }
 0x239   : > { %7205 = vmatpush.msk.msrb.mxu3 %vm13789_vm9, %v13597_v46  ;;  %v2382_v14 = vadd.f32 %v2381_v15, %v2353_v51  ;;  %vm13796_vm9 = vmmov %vm13791_vm1 }
 0x23a   : > { %v10492_v61 = vadd.f32 %v10392_v29, %v2208_v6  ;;  %v2211_v6 = vadd.f32 %v10397_v5, %v2182_v56 }
 0x23c   : > { %v2826_v23 = vrot.slane %v10492_v61, 4  ;;  %v2761_v57 = vrot.slane %v10492_v61, 5 }
 0x23d   : > { %v2329_v0 = vpop.f32.mrf.mxu2  ;;  %v2303_v58 = vpop.f32.mrf.mxu1 }
 0x23e   : > { %v2355_v63 = vpop.f32.mrf.mxu3  ;;  %v2384_v15 = vpop.f32.mrf.mxu0  ;;  %v2330_v1 = vadd.f32 %v2329_v0, %v2301_v40  ;;  %v2304_v26 = vadd.f32 %v2303_v58, %v2274_v54  ;;  %v2695_v0 = vrot.slane %v10492_v61, 6 }
 0x23f   : > { %v2356_v50 = vadd.f32 %v2355_v63, %v2327_v41 }
 0x241   : > { %v2385_v34 = vadd.f32 %v2384_v15, %v2356_v50 }
 0x246   : > { %v2332_v43 = vpop.f32.mrf.mxu2 }
 0x247   : > { %v2358_v39 = vpop.f32.mrf.mxu3  ;;  %v2410_v42 = vpop.f32.mrf.mxu1 }
 0x248   : > { %v10494_v59 = vadd.f32 %v2410_v42, %v2382_v14  ;;  %v10503_v42 = vadd.f32 %v10416_v55, %v2211_v6  ;;  %v2359_v55 = vadd.f32 %v2358_v39, %v2330_v1  ;;  %v2387_v63 = vpop.f32.mrf.mxu0 }
 0x24a   : > { %v2827_v37 = vrot.slane %v10494_v59, 4  ;;  %v2762_v30 = vrot.slane %v10494_v59, 5  ;;  %v2829_v5 = vrot.slane %v10503_v42, 4  ;;  %v2696_v48 = vrot.slane %v10494_v59, 6 }
 0x24b   : > { %v2388_v56 = vadd.f32 %v2387_v63, %v2359_v55 }
 0x24c   : > { %v7551_v12 = vpack.i.bf16 %v2827_v37, %v2826_v23  ;;  %v7556_v13 = vpack.i.bf16 %v2762_v30, %v2761_v57  ;;  %v2830_v60 = vsel %vm13791_vm1, %v2826_v23, %v2829_v5  ;;  %v2698_v23 = vrot.slane %v10503_v42, 6 }
 0x24e   : > { %7552 = vrot.lane.b32.xlu0 %v7551_v12, %s13786_s23  ;;  %v2333_v12 = vadd.f32 %v2332_v43, %v2304_v26  ;;  %v2699_v15 = vsel %vm13795_vm12, %v2695_v0, %v2698_v23 }
 0x250   : > { %v2361_v51 = vpop.f32.mrf.mxu3 }
 0x251   : > { %v10506_v33 = vpop.f32.mrf.mxu2  ;;  %v2362_v58 = vadd.f32 %v2361_v51, %v2333_v12  ;;  %v2390_v40 = vpop.f32.mrf.mxu0 }
 0x252   : > { %v2413_v29 = vpop.f32.mrf.mxu1 }
 0x253   : > { %v10509_v32 = vadd.f32 %v2413_v29, %v2385_v34  ;;  %v2764_v34 = vrot.slane %v10503_v42, 5  ;;  %v2391_v1 = vadd.f32 %v2390_v40, %v2362_v58 }
 0x255   : > { %v2831_v36 = vrot.slane %v10509_v32, 4  ;;  %v2700_v24 = vrot.slane %v10509_v32, 6  ;;  %v2766_v54 = vrot.slane %v10509_v32, 5  ;;  %v2765_v51 = vsel %vm13463_vm4, %v2761_v57, %v2764_v34 }
 0x256   : > { %7557 = vrot.lane.b32.xlu0 %v7556_v13, %s13790_s30 }
 0x257   : > { %v2832_v45 = vsel %vm13792_vm8, %v2827_v37, %v2831_v36  ;;  %v7561_v37 = vpack.i.bf16 %v2696_v48, %v2695_v0  ;;  %v2701_v50 = vsel %vm13793_vm14, %v2696_v48, %v2700_v24  ;;  %v2767_v13 = vsel %vm13463_vm4, %v2762_v30, %v2766_v54  ;;  %vm13798_vm8 = vmmov %vm13791_vm1 }
 0x258   : > { %v7566_v14 = vpack.i.bf16 %v2832_v45, %v2830_v60  ;;  %v7576_v29 = vpack.i.bf16 %v2701_v50, %v2699_v15  ;;  %v2770_v60 = vrot.slane %v10446_v2, 5  ;;  %v7571_v48 = vpack.i.bf16 %v2767_v13, %v2765_v51  ;;  %vm13799_vm14 = vmmov %vm13795_vm12 }
 0x259   : > { %v2776_v50 = vrot.slane %v10452_v18, 5 }
 0x25a   : > { %v10518_v44 = vpop.f32.mrf.mxu3  ;;  %7567 = vrot.lane.b32.xlu1 %v7566_v14, %s13786_s23 }
 0x25b   : > { %v2416_v41 = vpop.f32.mrf.mxu1  ;;  %v10522_v39 = vpop.f32.mrf.mxu2 }
 0x25c   : > { %v10525_v6 = vadd.f32 %v2416_v41, %v2388_v56  ;;  %v2771_v56 = vsel %vm13463_vm4, %v2764_v34, %v2770_v60  ;;  %v2497_v51 = vpop.f32.mrf.mxu0 }
 0x25e   : > { %7562 = vrot.lane.b32.xlu0 %v7561_v37, %s13794_s16  ;;  %v2772_v43 = vrot.slane %v10525_v6, 5  ;;  %v2837_v26 = vrot.slane %v10525_v6, 4  ;;  %v2706_v13 = vrot.slane %v10525_v6, 6 }
 0x260   : > { %v2773_v30 = vsel %vm13463_vm4, %v2766_v54, %v2772_v43  ;;  %v2838_v37 = vsel %vm13791_vm1, %v2831_v36, %v2837_v26  ;;  %v13797_v54 = vrot.slane %v10446_v2, 4 }
 0x261   : > { %v7586_v12 = vpack.i.bf16 %v2773_v30, %v2771_v56 }
 0x262   : > { %7577 = vrot.lane.b32.xlu1 %v7576_v29, %s13794_s16  ;;  %v2836_v58 = vsel %vm13798_vm8, %v2829_v5, %v13797_v54  ;;  %v2707_v5 = vsel %vm13799_vm14, %v2700_v24, %v2706_v13  ;;  %v13453_v24 = vrot.slane %v10509_v32, 7  ;;  %vm13462_vm8 = vcmask 1040384  }
 0x263   : > { %v2419_v55 = vpop.f32.mrf.mxu1  ;;  %v10535_v63 = vpop.f32.mrf.mxu2  ;;  %v7581_v40 = vpack.i.bf16 %v2838_v37, %v2836_v58  ;;  %v13454_v58 = vrot.slane %v10503_v42, 7 }
 0x264   : > { %v10539_v45 = vadd.f32 %v2419_v55, %v2391_v1  ;;  %v2471_v14 = vpop.f32.mrf.mxu3  ;;  %v2777_v1 = vsel %vm13463_vm4, %v2770_v60, %v2776_v50  ;;  %v2704_v55 = vrot.slane %v10446_v2, 6  ;;  %v2639_v50 = vrot.slane %v10446_v2, 7 }
 0x266   : > { %v2843_v0 = vrot.slane %v10539_v45, 4  ;;  %7572 = vrot.lane.b32.xlu0 %v7571_v48, %s13790_s30  ;;  %v2778_v57 = vrot.slane %v10539_v45, 5  ;;  %v2712_v48 = vrot.slane %v10539_v45, 6  ;;  %v2705_v30 = vsel %vm13795_vm12, %v2698_v23, %v2704_v55 }
 0x267   : > { %v7591_v56 = vpack.i.bf16 %v2707_v5, %v2705_v30  ;;  %v2647_v54 = vrot.slane %v10539_v45, 7  ;;  %v2469_v23 = vadd.f32 %v10518_v44, %v10506_v33 }
 0x268   : > { %v2844_v41 = vsel %vm13796_vm9, %v2837_v26, %v2843_v0  ;;  %v2779_v29 = vsel %vm13463_vm4, %v2772_v43, %v2778_v57  ;;  %v2710_v43 = vrot.slane %v10452_v18, 6  ;;  %vm13800_vm9 = vmmov %vm13795_vm12  ;;  %vm13805_vm12 = vcmask 1043456  }
 0x269   : > { %2867 = vrot.lane.b32.xlu2 %v2844_v41, %s13786_s23  ;;  %v7601_v36 = vpack.i.bf16 %v2779_v29, %v2777_v1  ;;  %v2713_v60 = vsel %vm13800_vm9, %v2706_v13, %v2712_v48  ;;  %vm13801_vm1 = vmmov %vm13800_vm9  ;;  %v2645_v13 = vrot.slane %v10452_v18, 7  ;;  %v2498_v48 = vadd.f32 %v2497_v51, %v2469_v23 }
 0x26a   : > { %7587 = vrot.lane.b32.xlu1 %v7586_v12, %s13790_s30  ;;  %v2641_v12 = vrot.slane %v10525_v6, 7  ;;  %v2711_v57 = vsel %vm13801_vm1, %v2704_v55, %v2710_v43  ;;  %v2472_v55 = vadd.f32 %v2471_v14, %v10522_v39  ;;  %vm13803_vm14 = vmmov %vm13801_vm1 }
 0x26b   : > { %v7606_v37 = vpack.i.bf16 %v2713_v60, %v2711_v57  ;;  %v2646_v30 = vsel %vm13462_vm8, %v2639_v50, %v2645_v13  ;;  %vm13806_vm9 = vmmov %vm13805_vm12 }
 0x26c   : > { %v10555_v15 = vpop.f32.mrf.mxu2  ;;  %v2474_v34 = vpop.f32.mrf.mxu3  ;;  %v2642_v29 = vsel %vm13462_vm8, %v13453_v24, %v2641_v12  ;;  %v2648_v33 = vsel %vm13462_vm8, %v2641_v12, %v2647_v54  ;;  %vm13807_vm1 = vmmov %vm13806_vm9 }
 0x26d   : > { %v2526_v26 = vpop.f32.mrf.mxu1 }
 0x26e   : > { %7582 = vrot.lane.b32.xlu0 %v7581_v40, %s13786_s23  ;;  %v2500_v40 = vpop.f32.mrf.mxu0  ;;  %v2527_v60 = vadd.f32 %v2526_v26, %v2498_v48 }
 0x26f   : > { %v2501_v57 = vadd.f32 %v2500_v40, %v2472_v55 }
 0x271   : > { %7602 = vrot.lane.b32.xlu2 %v7601_v36, %s13790_s30  ;;  %v2640_v36 = vsel %vm13462_vm8, %v13454_v58, %v2639_v50  ;;  %v2475_v58 = vadd.f32 %v2474_v34, %v10535_v63 }
 0x272   : > { %v7596_v44 = vpack.i.bf16 %v2642_v29, %v2640_v36 }
 0x274   : > { %v2555_v0 = vpop.f32.mrf.mxu2 }
 0x275   : > { %v2477_v41 = vpop.f32.mrf.mxu3  ;;  %v2529_v1 = vpop.f32.mrf.mxu1 }
 0x276   : > { %7592 = vrot.lane.b32.xlu0 %v7591_v56, %s13794_s16  ;;  %v7611_v56 = vpack.i.bf16 %v2648_v33, %v2646_v30  ;;  %v2530_v24 = vadd.f32 %v2529_v1, %v2501_v57  ;;  %v2503_v14 = vpop.f32.mrf.mxu0  ;;  %v2478_v55 = vadd.f32 %v2477_v41, %v10555_v15  ;;  %v2603_v15 = vld [vmem:[%s13804_s5] sm:$0xff] }
 0x277   : > { %v2504_v50 = vadd.f32 %v2503_v14, %v2475_v58 }
 0x279   : > { %7607 = vrot.lane.b32.xlu2 %v7606_v37, %s13794_s16  ;;  %v2556_v37 = vadd.f32 %v2555_v0, %v2527_v60 }
 0x27c   : > { %v2558_v5 = vpop.f32.mrf.mxu2 }
 0x27d   : > { %v2584_v43 = vpop.f32.mrf.mxu3  ;;  %v2559_v12 = vadd.f32 %v2558_v5, %v2530_v24  ;;  %v2532_v51 = vpop.f32.mrf.mxu1 }
 0x27e   : > { %7597 = vrot.lane.b32.xlu0 %v7596_v44, %s13802_s25  ;;  %v10591_v39 = vadd.f32 %v2584_v43, %v2556_v37  ;;  %v2533_v34 = vadd.f32 %v2532_v51, %v2504_v50  ;;  %v2506_v43 = vpop.f32.mrf.mxu0 }
 0x27f   : > { %v2507_v60 = vadd.f32 %v2506_v43, %v2478_v55  ;;  %v13809_v43 = vrot.slane %v10509_v32, 7 }
 0x280   : > { %v2828_v26 = vrot.slane %v10591_v39, 4  ;;  %v2697_v40 = vrot.slane %v10591_v39, 6  ;;  %v2763_v13 = vrot.slane %v10591_v39, 5 }
 0x281   : > { %7612 = vrot.lane.b32.xlu2 %v7611_v56, %s13802_s25 }
 0x284   : > { %v2561_v29 = vpop.f32.mrf.mxu2 }
 0x285   : > { %v2587_v54 = vpop.f32.mrf.mxu3  ;;  %v2562_v33 = vadd.f32 %v2561_v29, %v2533_v34  ;;  %v2535_v30 = vpop.f32.mrf.mxu1 }
 0x286   : > { %v10593_v23 = vadd.f32 %v2587_v54, %v2559_v12  ;;  %v2536_v37 = vadd.f32 %v2535_v30, %v2507_v60 }
 0x288   : > { %v2702_v0 = vrot.slane %v10593_v23, 6  ;;  %v2768_v63 = vrot.slane %v10593_v23, 5  ;;  %v2833_v5 = vrot.slane %v10593_v23, 4 }
 0x289   : > { %2851 = vrot.lane.b32.xlu2 %v2828_v26, %s13786_s23 }
 0x28a   : > { %v2703_v24 = vsel %vm13803_vm14, %v2697_v40, %v2702_v0  ;;  %v2769_v1 = vsel %vm13463_vm4, %v2763_v13, %v2768_v63  ;;  %v2834_v41 = vsel %vm13805_vm12, %v2828_v26, %v2833_v5  ;;  %v2611_v26 = vld [vmem:[%s13112_s6 + $0x8] sm:$0xff]  ;;  %vm13808_vm12 = vmmov %vm13803_vm14 }
 0x28b   : > { %v7646_v36 = vpack.i.bf16 %v2697_v40, %v2703_v24  ;;  %v7616_v58 = vpack.i.bf16 %v2763_v13, %v2769_v1 }
 0x28c   : > { %v2564_v57 = vpop.f32.mrf.mxu2 }
 0x28d   : > { %v2590_v44 = vpop.f32.mrf.mxu3  ;;  %7647 = vrot.lane.b32.xlu0 %v7646_v36, %s13794_s16  ;;  %7617 = vrot.lane.b32.xlu1 %v7616_v58, %s13790_s30  ;;  %v2565_v51 = vadd.f32 %v2564_v57, %v2536_v37  ;;  %v13810_v57 = vrot.slane %v10503_v42, 7 }
 0x28e   : > { %v10606_v48 = vadd.f32 %v2590_v44, %v2562_v33  ;;  %v2631_v44 = vrot.slane %v10494_v59, 7 }
 0x290   : > { %v2839_v56 = vrot.slane %v10606_v48, 4  ;;  %v2774_v29 = vrot.slane %v10606_v48, 5  ;;  %v2708_v55 = vrot.slane %v10606_v48, 6  ;;  %v2636_v30 = vsel %vm13462_vm8, %v2631_v44, %v13809_v43 }
 0x292   : > { %v2840_v14 = vsel %vm13806_vm9, %v2833_v5, %v2839_v56  ;;  %v2775_v24 = vsel %vm13463_vm4, %v2768_v63, %v2774_v29  ;;  %v2709_v5 = vsel %vm13808_vm12, %v2702_v0, %v2708_v55  ;;  %v2630_v63 = vrot.slane %v10492_v61, 7 }
 0x293   : > { %v7621_v12 = vpack.i.bf16 %v2834_v41, %v2840_v14  ;;  %v2643_v41 = vrot.slane %v10606_v48, 7  ;;  %v2637_v14 = vrot.slane %v10593_v23, 7  ;;  %vm13466_vm9 = vcmask 1044480  }
 0x294   : > { %v2634_v37 = vsel %vm13462_vm8, %v2630_v63, %v13810_v57  ;;  %vm13813_vm12 = vcmask 1022976  }
 0x295   : > { %v2593_v54 = vpop.f32.mrf.mxu3  ;;  %3044 = vperm.xlu0 %7550, %v2603_v15   ;;  %7622 = vrot.lane.b32.xlu1 %v7621_v12, %s13786_s23  ;;  %v7631_v15 = vpack.i.bf16 %v2636_v30, %v2634_v37  ;;  %v2607_v30 = vld [vmem:[%s13804_s5 + $0x20] sm:$0xff] }
 0x296   : > { %v10616_v50 = vadd.f32 %v2593_v54, %v2565_v51  ;;  %v7641_v51 = vpack.i.bf16 %v2631_v44, %v2630_v63  ;;  %v2614_v54 = vld [vmem:[%s13112_s6 + $0x20] sm:$0xff]  ;;  %v2613_v44 = vld [vmem:[%s13112_s6 + $0x18] sm:$0xff] }
 0x298   : > { %v2845_v40 = vrot.slane %v10616_v50, 4  ;;  %v2780_v13 = vrot.slane %v10616_v50, 5  ;;  %v2714_v36 = vrot.slane %v10616_v50, 6  ;;  %v2649_v0 = vrot.slane %v10616_v50, 7 }
 0x29a   : > { %v2846_v34 = vsel %vm13807_vm1, %v2839_v56, %v2845_v40  ;;  %v2781_v1 = vsel %vm13463_vm4, %v2774_v29, %v2780_v13  ;;  %v2715_v33 = vsel %vm13803_vm14, %v2708_v55, %v2714_v36  ;;  %v2606_v56 = vld [vmem:[%s13804_s5 + $0x18] sm:$0xff]  ;;  %v2650_v12 = vsel %vm13462_vm8, %v2643_v41, %v2649_v0  ;;  %v2604_v36 = vld [vmem:[%s13804_s5 + $0x8] sm:$0xff]  ;;  %v2612_v55 = vld [vmem:[%s13112_s6 + $0x10] sm:$0xff] }
 0x29b   : > { %2869 = vrot.lane.b32.xlu2 %v2846_v34, %s13786_s23  ;;  %v7626_v58 = vpack.i.bf16 %v2775_v24, %v2781_v1  ;;  %v7636_v60 = vpack.i.bf16 %v2709_v5, %v2715_v33  ;;  %v2644_v29 = vsel %vm13462_vm8, %v2637_v14, %v2643_v41  ;;  %v2632_v13 = vrot.slane %v10591_v39, 7  ;;  %v2609_v24 = vld [vmem:[%s13804_s5 + $0x30] sm:$0x3]  ;;  %v2610_v1 = vld [vmem:[%s13112_s6] sm:$0xff] }
 0x29c   : > { %v7651_v40 = vpack.i.bf16 %v2644_v29, %v2650_v12  ;;  %vm13811_vm1 = vcmask 1014784   ;;  %v2616_v41 = vld [vmem:[%s13112_s6 + $0x30] sm:$0x3] }
 0x29d   : > { %3105 = vperm.xlu0 %7550, %v2611_v26   ;;  %7627 = vrot.lane.b32.xlu1 %v7626_v58, %s13790_s30  ;;  %v2638_v34 = vsel %vm13462_vm8, %v2632_v13, %v2637_v14  ;;  %v2605_v58 = vld [vmem:[%s13804_s5 + $0x10] sm:$0xff]  ;;  %vm13812_vm14 = vmmov %vm13811_vm1 }
 0x29e   : > { %v7656_v26 = vpack.i.bf16 %v2632_v13, %v2638_v34 }
 0x2a3   : > { %7637 = vrot.lane.b32.xlu2 %v7636_v60, %s13794_s16 }
 0x2a5   : > { %3059 = vperm.xlu0 %7550, %v2606_v56   ;;  %7632 = vrot.lane.b32.xlu1 %v7631_v15, %s13802_s25  ;;  %v2608_v56 = vld [vmem:[%s13804_s5 + $0x28] sm:$0xff] }
 0x2a6   : > { %v2866_v5 = vpop.permute.xlu1 %2865  ;;  %v2615_v15 = vld [vmem:[%s13112_s6 + $0x28] sm:$0xff] }
 0x2ab   : > { %7642 = vrot.lane.b32.xlu2 %v7641_v51, %s13802_s25 }
 0x2ad   : > { %3120 = vperm.xlu0 %7550, %v2614_v54   ;;  %7652 = vrot.lane.b32.xlu1 %v7651_v40, %s13802_s25 }
 0x2b3   : > { %7657 = vrot.lane.b32.xlu2 %v7656_v26, %s13802_s25 }
 0x2b5   : > { %3074 = vperm.xlu0 %7550, %v2609_v24   ;;  %3100 = vperm.xlu1 %7548, %v2610_v1  }
 0x2bb   : > { %3049 = vperm.xlu2 %7549, %v2604_v36  }
 0x2bd   : > { %3054 = vperm.xlu1 %7548, %v2605_v58  }
 0x2c0   : > { %v10674_v33 = vpop.permute.xlu0 %7552 }
 0x2c1   : > { %v13459_v1 = vunpack.i.h.bf16 %v10674_v33  ;;  %v7554_v36 = vunpack.i.l.bf16 %v10674_v33 }
 0x2c3   : > { %3110 = vperm.xlu2 %7549, %v2612_v55   ;;  %v10679_v63 = vpop.permute.xlu2 %2867 }
 0x2c4   : > { %v2877_v43 = vsel %vm13811_vm1, %v2866_v5, %v10679_v63 }
 0x2c5   : > { %3115 = vperm.xlu1 %7548, %v2613_v44   ;;  %7075 = vmatpush.msk.msra.mxu0 %vm13466_vm9, %v2877_v43 }
 0x2c8   : > { %v10687_v60 = vpop.permute.xlu0 %7557 }
 0x2c9   : > { %v7559_v43 = vunpack.i.l.bf16 %v10687_v60 }
 0x2cb   : > { %3064 = vperm.xlu2 %7549, %v2607_v30   ;;  %v10694_v37 = vpop.permute.xlu2 %7602 }
 0x2cc   : > { %v10692_v57 = vpop.permute.xlu1 %7567  ;;  %v13456_v54 = vunpack.i.h.bf16 %v10694_v37  ;;  %v7604_v29 = vunpack.i.l.bf16 %v10694_v37 }
 0x2cd   : > { %3069 = vperm.xlu1 %7548, %v2608_v56   ;;  %v13458_v13 = vunpack.i.h.bf16 %v10692_v57  ;;  %v7569_v34 = vunpack.i.l.bf16 %v10692_v57 }
 0x2ce   : > { %v2812_v5 = vsel %vm13813_vm12, %v7604_v29, %v13456_v54  ;;  %vm13815_vm12 = vcmask 1043456  }
 0x2cf   : > { %v2873_v56 = vsel %vm13811_vm1, %v7569_v34, %v13458_v13 }
 0x2d0   : > { %v10699_v0 = vpop.permute.xlu0 %7562 }
 0x2d3   : > { %3125 = vperm.xlu2 %7549, %v2615_v15   ;;  %v10708_v51 = vpop.permute.xlu2 %7607 }
 0x2d4   : > { %v10704_v14 = vpop.permute.xlu1 %7577  ;;  %v13460_v15 = vunpack.i.h.bf16 %v10708_v51 }
 0x2d5   : > { %3130 = vperm.xlu1 %7548, %v2616_v41   ;;  %v7609_v41 = vunpack.i.l.bf16 %v10708_v51 }
 0x2d8   : > { %v10706_v12 = vpop.permute.xlu0 %7572 }
 0x2d9   : > { %v7574_v29 = vunpack.i.l.bf16 %v10706_v12 }
 0x2db   : > { %v10722_v55 = vpop.permute.xlu2 %7612 }
 0x2dc   : > { %v10720_v58 = vpop.permute.xlu1 %7587 }
 0x2dd   : > { %v7589_v30 = vunpack.i.l.bf16 %v10720_v58  ;;  %v13816_v13 = vunpack.i.h.bf16 %v10720_v58 }
 0x2e0   : > { %v10712_v40 = vpop.permute.xlu0 %7582 }
 0x2e1   : > { %v13457_v26 = vunpack.i.h.bf16 %v10712_v40  ;;  %v7584_v24 = vunpack.i.l.bf16 %v10712_v40 }
 0x2e3   : > { %v2875_v44 = vsel %vm13812_vm14, %v7584_v24, %v13457_v26  ;;  %vm13814_vm14 = vmmov %vm13811_vm1  ;;  %vm13817_vm1 = vcmask 1022976  }
 0x2e4   : > { %2929 = vmatpush.msra.mxu0 %v2875_v44  ;;  %v2871_v24 = vsel %vm13814_vm14, %v7554_v36, %v13459_v1  ;;  %v13461_v44 = vunpack.i.h.bf16 %v10706_v12  ;;  %vm13818_vm14 = vcmask 1031168  }
 0x2e5   : > { %v2897_v54 = vsel %vm13815_vm12, %v2812_v5, %v2871_v24  ;;  %v2746_v36 = vsel %vm13818_vm14, %v7609_v41, %v13460_v15  ;;  %vm13819_vm12 = vmmov %vm13817_vm1  ;;  %v7579_v41 = vunpack.i.l.bf16 %v10704_v14  ;;  %v2852_v15 = vpop.permute.xlu2 %2851 }
 0x2e6   : > { %2930 = vmatpush.msra.mxu0 %v2873_v56  ;;  %v2810_v56 = vsel %vm13817_vm1, %v7589_v30, %v13816_v13  ;;  %v2808_v24 = vsel %vm13819_vm12, %v7574_v29, %v13461_v44  ;;  %v13820_v13 = vunpack.i.h.bf16 %v10687_v60  ;;  %v7564_v29 = vunpack.i.l.bf16 %v10699_v0 }
 0x2e7   : > { %vm13823_vm12 = vcmask 1039360  }
 0x2e8   : > { %v10745_v34 = vpop.permute.xlu0 %7592  ;;  %2931 = vmatpush.msra.mxu0 %v2897_v54  ;;  %v7614_v54 = vunpack.i.l.bf16 %v10722_v55  ;;  %v2806_v30 = vsel %vm13817_vm1, %v7559_v43, %v13820_v13  ;;  %v13822_v43 = vunpack.i.h.bf16 %v10722_v55  ;;  %vm13825_vm1 = vmmov %vm13818_vm14 }
 0x2e9   : > { %v7594_v5 = vunpack.i.l.bf16 %v10745_v34  ;;  %v2894_v1 = vsel %vm13463_vm4, %v2746_v36, %v2806_v30  ;;  %v13821_v44 = vunpack.i.h.bf16 %v10745_v34  ;;  %v13824_v30 = vunpack.i.h.bf16 %v10704_v14  ;;  %vm13827_vm8 = vmmov %vm13825_vm1 }
 0x2ea   : > { %2932 = vmatpush.msra.mxu0 %v2810_v56  ;;  %v2681_v13 = vsel %vm13823_vm12, %v7614_v54, %v13822_v43  ;;  %vm13829_vm4 = vcmask 1014784  }
 0x2eb   : > { %v2742_v4 = vsel %vm13825_vm1, %v7579_v41, %v13824_v30  ;;  %vm13834_vm1 = vmmov %vm13829_vm4 }
 0x2ec   : > { %2933 = vmatpush.msra.mxu0 %v2808_v24  ;;  %v2744_v24 = vsel %vm13818_vm14, %v7594_v5, %v13821_v44  ;;  %vm13828_vm14 = vcmask 1041408  }
 0x2ee   : > { %2934 = vmatpush.msra.mxu0 %v2894_v1  ;;  %v13826_v1 = vunpack.i.h.bf16 %v10699_v0 }
 0x2f0   : > { %v10771_v26 = vpop.permute.xlu0 %7597  ;;  %2935 = vmatpush.msra.mxu0 %v2744_v24  ;;  %v2740_v44 = vsel %vm13827_vm8, %v7564_v29, %v13826_v1  ;;  %vm13831_vm8 = vmmov %vm13829_vm4 }
 0x2f1   : > { %v13464_v56 = vunpack.i.h.bf16 %v10771_v26  ;;  %v7599_v36 = vunpack.i.l.bf16 %v10771_v26  ;;  %v2891_v5 = vsel %vm13828_vm14, %v2681_v13, %v2740_v44  ;;  %v13830_v13 = vunpack.i.h.bf16 %v10712_v40 }
 0x2f2   : > { %2936 = vmatpush.msra.mxu0 %v2742_v4  ;;  %vm13835_vm14 = vcmask 1043456  }
 0x2f3   : > { %v2679_v54 = vsel %vm13823_vm12, %v7599_v36, %v13464_v56  ;;  %v13832_v36 = vunpack.i.h.bf16 %v10692_v57  ;;  %vm13837_vm12 = vcmask 1022976  }
 0x2f4   : > { %2937 = vmatpush.msra.mxu0 %v2891_v5 }
 0x2f5   : > { %v2870_v24 = vpop.permute.xlu2 %2869 }
 0x2f6   : > { %v2878_v43 = vsel %vm13829_vm4, %v10679_v63, %v2870_v24  ;;  %7091 = vmatpush.msk.msra.mxu2 %vm13466_vm9, %v2870_v24  ;;  %2938 = vmatpush.msra.mxu0 %v2679_v54 }
 0x2f7   : > { %7083 = vmatpush.msk.msrb.mxu1 %vm13466_vm9, %v2878_v43  ;;  %v13833_v43 = vunpack.i.h.bf16 %v10674_v33 }
 0x2f9   : > { %v2872_v56 = vsel %vm13834_vm1, %v13833_v43, %v2852_v15 }
 0x2fd   : > { %v7638_v30 = vpop.permute.xlu2 %7637 }
 0x2ff   : > { %v7618_v4 = vpop.permute.xlu1 %7617 }
 0x300   : > { %v7619_v57 = vunpack.i.l.bf16 %v7618_v4 }
 0x305   : > { %v10801_v49 = vpop.permute.xlu2 %7642 }
 0x306   : > { %v7644_v33 = vunpack.i.l.bf16 %v10801_v49 }
 0x307   : > { %v7623_v41 = vpop.permute.xlu1 %7622 }
 0x308   : > { %v7625_v29 = vunpack.i.h.bf16 %v7623_v41  ;;  %v7624_v1 = vunpack.i.l.bf16 %v7623_v41  ;;  %v7620_v41 = vunpack.i.h.bf16 %v7618_v4 }
 0x30a   : > { %3005 = vmatpush.msra.mxu2 %v7624_v1  ;;  %v2876_v44 = vsel %vm13831_vm8, %v13830_v13, %v7624_v1  ;;  %v2874_v63 = vsel %vm13829_vm4, %v13832_v36, %v7625_v29  ;;  %v13836_v1 = vunpack.i.h.bf16 %v10694_v37  ;;  %vm13838_vm8 = vmmov %vm13835_vm14  ;;  %v7645_v36 = vunpack.i.h.bf16 %v10801_v49 }
 0x30b   : > { %2967 = vmatpush.msrb.mxu1 %v2876_v44  ;;  %v7639_v44 = vunpack.i.l.bf16 %v7638_v30  ;;  %vm13840_vm4 = vmmov %vm13837_vm12  ;;  %v13841_v37 = vunpack.i.h.bf16 %v10687_v60 }
 0x30c   : > { %3006 = vmatpush.msra.mxu2 %v7625_v29  ;;  %vm13842_vm1 = vmmov %vm13840_vm4 }
 0x30d   : > { %2968 = vmatpush.msrb.mxu1 %v2874_v63  ;;  %v13839_v63 = vunpack.i.h.bf16 %v10720_v58  ;;  %v2807_v4 = vsel %vm13842_vm1, %v13841_v37, %v7620_v41 }
 0x30f   : > { %v7628_v5 = vpop.permute.xlu1 %7627 }
 0x310   : > { %v7629_v24 = vunpack.i.l.bf16 %v7628_v5  ;;  %v7630_v54 = vunpack.i.h.bf16 %v7628_v5 }
 0x312   : > { %v2899_v40 = vsel %vm13835_vm14, %v7629_v24, %v2852_v15  ;;  %v2813_v13 = vsel %vm13837_vm12, %v13836_v1, %v7629_v24  ;;  %v2811_v5 = vsel %vm13840_vm4, %v13839_v63, %v7630_v54  ;;  %v7648_v15 = vpop.permute.xlu0 %7647  ;;  %v7640_v24 = vunpack.i.h.bf16 %v7638_v30  ;;  %vm13844_vm14 = vmmov %vm13842_vm1 }
 0x313   : > { %3007 = vmatpush.msra.mxu2 %v2899_v40  ;;  %v2898_v29 = vsel %vm13838_vm8, %v2813_v13, %v2872_v56  ;;  %v13843_v56 = vunpack.i.h.bf16 %v10706_v12  ;;  %vm13845_vm12 = vcmask 1042432   ;;  %vm13847_vm8 = vcmask 1031168  }
 0x314   : > { %2969 = vmatpush.msrb.mxu1 %v2898_v29  ;;  %v2896_v58 = vsel %vm13845_vm12, %v7639_v44, %v7620_v41  ;;  %v7649_v29 = vunpack.i.l.bf16 %v7648_v15  ;;  %vm13848_vm4 = vmmov %vm13845_vm12  ;;  %vm13849_vm1 = vcmask 1039360   ;;  %vm13853_vm12 = vcmask 1040384  }
 0x315   : > { %3008 = vmatpush.msra.mxu2 %v7630_v54  ;;  %v2809_v40 = vsel %vm13844_vm14, %v13843_v56, %v7619_v57  ;;  %v13846_v54 = vunpack.i.h.bf16 %v10708_v51  ;;  %v2675_v30 = vsel %vm13849_vm1, %v7644_v33, %v7645_v36  ;;  %vm13850_vm9 = vmmov %vm13849_vm1  ;;  %v13854_v41 = vunpack.i.h.bf16 %v10704_v14 }
 0x316   : > { %2970 = vmatpush.msrb.mxu1 %v2811_v5  ;;  %vm13852_vm14 = vmmov %vm13847_vm8  ;;  %v2888_v51 = vsel %vm13853_vm12, %v10452_v18, %v2675_v30  ;;  %v7650_v33 = vunpack.i.h.bf16 %v7648_v15  ;;  %v7658_v5 = vpop.permute.xlu2 %7657  ;;  %v2596_v18 = vld [vmem:[%s13855_s4] sm:$0xff]  ;;  %v13857_v14 = vunpack.i.h.bf16 %v10722_v55  ;;  %v13859_v56 = vunpack.i.h.bf16 %v10699_v0 }
 0x317   : > { %v7633_v43 = vpop.permute.xlu1 %7632  ;;  %3009 = vmatpush.msra.mxu2 %v7619_v57  ;;  %v2747_v13 = vsel %vm13847_vm8, %v13846_v54, %v7639_v44  ;;  %v13851_v57 = vunpack.i.h.bf16 %v10745_v34  ;;  %v2743_v44 = vsel %vm13847_vm8, %v13854_v41, %v7649_v29  ;;  %vm13862_vm12 = vcmask 1022976   ;;  %v13926_v54 = vld [vmem:[#allocation28_spill] sm:$0xff]  ;;  %v13934_v30 = vld [vmem:[#allocation58_spill] sm:$0xff] }
 0x318   : > { %v7635_v1 = vunpack.i.h.bf16 %v7633_v43  ;;  %v7634_v49 = vunpack.i.l.bf16 %v7633_v43  ;;  %2971 = vmatpush.msrb.mxu1 %v2809_v40  ;;  %v2895_v60 = vsel %vm13848_vm4, %v2747_v13, %v2807_v4  ;;  %vm13858_vm4 = vmmov %vm13849_vm1  ;;  %v13928_v13 = vld [vmem:[#allocation54_spill] sm:$0xff] }
 0x319   : > { %3010 = vmatpush.msra.mxu2 %v2896_v58  ;;  %v2745_v63 = vsel %vm13852_vm14, %v13851_v57, %v7640_v24  ;;  %vm13860_vm1 = vmmov %vm13847_vm8  ;;  %v13924_v58 = vld [vmem:[#allocation55_spill] sm:$0xff]  ;;  %v13945_v41 = vld [vmem:[#allocation66_spill] sm:$0xff] }
 0x31a   : > { %2972 = vmatpush.msrb.mxu1 %v2895_v60  ;;  %v2677_v12 = vsel %vm13850_vm9, %v7634_v49, %v7635_v1  ;;  %vm13856_vm9 = vcmask 1041408   ;;  %v2741_v40 = vsel %vm13860_vm1, %v13859_v56, %v7650_v33  ;;  %v13863_v49 = vunpack.i.h.bf16 %v10771_v26  ;;  %vm13864_vm8 = vmmov %vm13858_vm4  ;;  %v13932_v60 = vld [vmem:[#allocation31_spill] sm:$0xff] }
 0x31b   : > { %2939 = vmatpush.msra.mxu0 %v2677_v12  ;;  %3011 = vmatpush.msra.mxu2 %v7640_v24  ;;  %v7660_v24 = vunpack.i.h.bf16 %v7658_v5  ;;  %vm13861_vm14 = vmmov %vm13856_vm9  ;;  %v13938_v57 = vld [vmem:[#allocation63_spill] sm:$0xff] }
 0x31c   : > { %2973 = vmatpush.msrb.mxu1 %v2745_v63  ;;  %vm13866_vm1 = vmmov %vm13858_vm4  ;;  %v2601_v63 = vld [vmem:[%s13855_s4 + $0x28] sm:$0xff] }
 0x31d   : > { %2940 = vmatpush.msra.mxu0 %v2888_v51  ;;  %3012 = vmatpush.msra.mxu2 %v7649_v29  ;;  %v13930_v29 = vld [vmem:[#allocation59_spill] sm:$0xff]  ;;  %v13941_v51 = vld [vmem:[#allocation34_spill] sm:$0xff] }
 0x31e   : > { %2974 = vmatpush.msrb.mxu1 %v2743_v44  ;;  %v13947_v44 = vld [vmem:[#allocation38_spill] sm:$0xff] }
 0x31f   : > { %v7653_v37 = vpop.permute.xlu1 %7652  ;;  %2941 = vmatpush.msra.mxu0 %v10446_v2 }
 0x320   : > { %v7654_v4 = vunpack.i.l.bf16 %v7653_v37  ;;  %v7655_v34 = vunpack.i.h.bf16 %v7653_v37  ;;  %v13955_v37 = vld [vmem:[#allocation73_spill] sm:$0xff] }
 0x321   : > { %2942 = vmatpush.msra.mxu0 %v10503_v42  ;;  %v7659_v42 = vunpack.i.l.bf16 %v7658_v5  ;;  %v13952_v5 = vld [vmem:[#allocation42_spill] sm:$0xff] }
 0x322   : > { %v2893_v43 = vsel %vm13856_vm9, %v7654_v4, %v7650_v33  ;;  %v2682_v15 = vsel %vm13858_vm4, %v13857_v14, %v7654_v4  ;;  %v2680_v55 = vsel %vm13864_vm8, %v13863_v49, %v7655_v34  ;;  %vm13865_vm9 = vcmp.eq.s32.totalorder %v13769_v19, %v13740_v3  ;;  %v13950_v33 = vld [vmem:[#allocation69_spill] sm:$0xff]  ;;  %v13957_v4 = vld [vmem:[#allocation7_spill] sm:$0xff] }
 0x323   : > { %2943 = vmatpush.msra.mxu0 %v10492_v61  ;;  %3013 = vmatpush.msra.mxu2 %v2893_v43  ;;  %v2892_v2 = vsel %vm13861_vm14, %v2682_v15, %v2741_v40  ;;  %v2676_v61 = vsel %vm13858_vm4, %v7645_v36, %v7660_v24  ;;  %v2678_v0 = vsel %vm13866_vm1, %v7635_v1, %v7659_v42  ;;  %v2597_v36 = vld [vmem:[%s13855_s4 + $0x8] sm:$0xff]  ;;  %vm13872_vm1 = vcmask 1022976   ;;  %v13921_v1 = vld [vmem:[#allocation25_spill] sm:$0xff] }
 0x324   : > { %7076 = vmatmul.msk.f32.vlgmr.msra.gmra.mxu0 %vm13862_vm12, %v2596_v18  ;;  %2975 = vmatpush.msrb.mxu1 %v2892_v2  ;;  %vm13867_vm14 = vcmp.eq.s32.totalorder %v13771_v20, %v13740_v3  ;;  %vm13868_vm12 = vcmask 1040384   ;;  %vm13871_vm4 = vcmp.eq.s32.totalorder %v8592_v17, %v13740_v3  ;;  %v2598_v17 = vld [vmem:[%s13855_s4 + $0x10] sm:$0xff]  ;;  %v3050_v2 = vpop.permute.xlu2 %3049 }
 0x325   : > { %3014 = vmatpush.msra.mxu2 %v7655_v34  ;;  %7136 = vmatpush.msk.msrb.mxu0 %vm13865_vm9, %v13597_v46  ;;  %v2890_v26 = vsel %vm13868_vm12, %v10616_v50, %v7660_v24  ;;  %vm13869_vm8 = vmmov %vm13868_vm12  ;;  %vm13870_vm9 = vcmp.eq.s32.totalorder %v13773_v11, %v13740_v3  ;;  %vm13874_vm12 = vcmp.eq.s32.totalorder %v8628_v22, %v13740_v3  ;;  %v13901_v11 = vld [vmem:[#allocation40_spill] sm:$0xff]  ;;  %v13919_v50 = vld [vmem:[#allocation50_spill] sm:$0xff] }
 0x326   : > { %2976 = vmatpush.msrb.mxu1 %v2680_v55  ;;  %v2889_v19 = vsel %vm13869_vm8, %v10539_v45, %v2676_v61  ;;  %v6637_v20 = vsel %vm13874_vm12, 1.0, %v13654_v52  ;;  %vm13875_vm8 = vcmp.eq.s32.totalorder %v8643_v25, %v13740_v3  ;;  %vm13880_vm12 = vcmp.eq.s32.totalorder %v8682_v28, %v13740_v3  ;;  %v13887_v25 = vld [vmem:[#allocation29_spill] sm:$0xff]  ;;  %v13892_v28 = vld [vmem:[#allocation32_spill] sm:$0xff]  ;;  %v13912_v45 = vld [vmem:[#allocation47_spill] sm:$0xff] }
 0x327   : > { %3015 = vmatpush.msra.mxu2 %v7659_v42  ;;  %7137 = vmatpush.msk.msrb.mxu0 %vm13867_vm14, %v13597_v46  ;;  %vm13873_vm14 = vcmp.eq.s32.totalorder %v8616_v21, %v13740_v3  ;;  %v13883_v21 = vld [vmem:[#allocation26_spill] sm:$0xff]  ;;  %v2602_v34 = vld [vmem:[%s13855_s4 + $0x30] sm:$0x3]  ;;  %v3101_v14 = vpop.permute.xlu1 %3100 }
 0x328   : > { %2977 = vmatpush.msrb.mxu1 %v2678_v0 }
 0x329   : > { %3016 = vmatpush.msra.mxu2 %v2890_v26  ;;  %7138 = vmatpush.msk.msrb.mxu0 %vm13870_vm9, %v13597_v46  ;;  %vm13876_vm9 = vmmov %vm13872_vm1 }
 0x32a   : > { %2978 = vmatpush.msrb.mxu1 %v2889_v19 }
 0x32b   : > { %3017 = vmatpush.msra.mxu2 %v10606_v48  ;;  %7139 = vmatpush.msk.msrb.mxu0 %vm13871_vm4, %v13597_v46  ;;  %vm13877_vm4 = vmmov %vm13872_vm1  ;;  %v13917_v48 = vld [vmem:[#allocation51_spill] sm:$0xff] }
 0x32c   : > { %7077 = vmatmul.msk.f32.gmra.mxu0 %vm13872_vm1, %v2597_v36  ;;  %2979 = vmatpush.msrb.mxu1 %v10525_v6  ;;  %vm13878_vm1 = vcmp.eq.s32.totalorder %v13739_v27, %v9079_v47  ;;  %v13908_v6 = vld [vmem:[#allocation21_spill] sm:$0xff] }
 0x32d   : > { %3018 = vmatpush.msra.mxu2 %v10593_v23  ;;  %7140 = vmatpush.msk.msrb.mxu0 %vm13873_vm14, %v13597_v46  ;;  %vm13879_vm14 = vcmask 1040384   ;;  %v13915_v23 = vld [vmem:[#allocation23_spill] sm:$0xff] }
 0x32e   : > { %2980 = vmatpush.msrb.mxu1 %v10509_v32  ;;  %v13906_v32 = vld [vmem:[#allocation44_spill] sm:$0xff] }
 0x32f   : > { %3019 = vmatpush.msra.mxu2 %v10591_v39  ;;  %7141 = vmatpush.msk.msrb.mxu0 %vm13875_vm8, %v13597_v46  ;;  %vm13881_vm8 = vcmp.eq.s32.totalorder %v13742_v9, %v9079_v47  ;;  %v2600_v39 = vld [vmem:[%s13855_s4 + $0x20] sm:$0xff] }
 0x330   : > { %2981 = vmatpush.msrb.mxu1 %v10494_v59  ;;  %7092 = vmatmul.msk.f32.vlgmr.msra.gmra.mxu2 %vm13876_vm9, %v2596_v18  ;;  %vm13882_vm9 = vmmov %vm13877_vm4  ;;  %v13903_v59 = vld [vmem:[#allocation18_spill] sm:$0xff] }
 0x331   : > { %7084 = vmatmul.msk.f32.vlgmr.msrb.gmra.mxu1 %vm13877_vm4, %v2596_v18  ;;  %7174 = vmatpush.msk.msrb.mxu2 %vm13878_vm1, %v13597_v46  ;;  %vm13884_vm4 = vcmp.eq.s32.totalorder %v13883_v21, %v13740_v3  ;;  %vm13885_vm1 = vcmp.eq.s32.totalorder %v13744_v7, %v9079_v47  ;;  %v3045_v18 = vpop.permute.xlu0 %3044 }
 0x332   : > { %7152 = vmatpush.msk.msra.mxu1 %vm13879_vm14, %v6637_v20  ;;  %7142 = vmatpush.msk.msrb.mxu0 %vm13880_vm12, %v13597_v46  ;;  %vm13886_vm14 = vcmp.eq.s32.totalorder %v8701_v31, %v13740_v3  ;;  %vm13888_vm12 = vcmp.eq.s32.totalorder %v13887_v25, %v13740_v3  ;;  %v2599_v31 = vld [vmem:[%s13855_s4 + $0x18] sm:$0xff]  ;;  %s6381_s4 = scalar_lea.hbm %s13121_s15, %s8280_s22  ;;  %s6373_s22 = scalar_lea.sflag [#allocation3], %s485_s3 }
 0x333   : > { %7175 = vmatpush.msk.msrb.mxu2 %vm13881_vm8, %v13597_v46  ;;  %vm13889_vm8 = vcmp.eq.s32.totalorder %v13746_v62, %v9079_v47 }
 0x334   : > { %7078 = vmatmul.msk.f32.gmra.mxu0 %vm13882_vm9, %v2598_v17  ;;  %7153 = vmatpush.msk.msra.mxu1 %vm13884_vm4, %v13597_v46  ;;  %vm13890_vm9 = vcmp.eq.s32.totalorder %v13606_v10, %v13740_v3  ;;  %vm13891_vm4 = vcmask 1022976   ;;  %v13896_v10 = vld [vmem:[#allocation36_spill] sm:$0xff] }
 0x335   : > { %7176 = vmatpush.msk.msrb.mxu2 %vm13885_vm1, %v13597_v46  ;;  %7143 = vmatpush.msk.msrb.mxu0 %vm13886_vm14, %v13597_v46  ;;  %vm13893_vm1 = vcmp.eq.s32.totalorder %v13892_v28, %v13740_v3  ;;  %vm13894_vm14 = vmmov %vm13891_vm4 }
 0x336   : > { %7154 = vmatpush.msk.msra.mxu1 %vm13888_vm12, %v13597_v46  ;;  %vm13895_vm12 = vcmp.eq.s32.totalorder %v13749_v35, %v9079_v47 }
 0x337   : > { %7177 = vmatpush.msk.msrb.mxu2 %vm13889_vm8, %v13597_v46  ;;  %7144 = vmatpush.msk.msrb.mxu0 %vm13890_vm9, %v13597_v46  ;;  %vm13897_vm8 = vcmp.eq.s32.totalorder %v13896_v10, %v13740_v3  ;;  %vm13898_vm9 = vcmp.eq.s32.totalorder %v13614_v53, %v13740_v3 }
 0x338   : > { %7093 = vmatmul.msk.f32.gmra.mxu2 %vm13891_vm4, %v2597_v36  ;;  %7155 = vmatpush.msk.msra.mxu1 %vm13893_vm1, %v13597_v46  ;;  %vm13899_vm4 = vcmp.eq.s32.totalorder %v13751_v16, %v9079_v47  ;;  %vm13900_vm1 = vmmov %vm13894_vm14 }
 0x339   : > { %7085 = vmatmul.msk.f32.gmra.mxu1 %vm13894_vm14, %v2597_v36  ;;  %7178 = vmatpush.msk.msrb.mxu2 %vm13895_vm12, %v13597_v46  ;;  %vm13902_vm14 = vcmp.eq.s32.totalorder %v13901_v11, %v13740_v3  ;;  %vm13904_vm12 = vcmp.eq.s32.totalorder %v13903_v59, %v9079_v47  ;;  %v3106_v55 = vpop.permute.xlu0 %3105 }
 0x33a   : > { %7156 = vmatpush.msk.msra.mxu1 %vm13897_vm8, %v13597_v46  ;;  %7145 = vmatpush.msk.msrb.mxu0 %vm13898_vm9, %v13597_v46  ;;  %vm13905_vm8 = vcmp.eq.s32.totalorder %v13692_v38, %v13740_v3  ;;  %vm13907_vm9 = vcmp.eq.s32.totalorder %v13906_v32, %v13740_v3 }
 0x33b   : > { %7179 = vmatpush.msk.msrb.mxu2 %vm13899_vm4, %v13597_v46  ;;  %vm13909_vm4 = vcmp.eq.s32.totalorder %v13908_v6, %v9079_v47 }
 0x33c   : > { %7079 = vmatmul.msk.f32.gmra.mxu0 %vm13900_vm1, %v2599_v31  ;;  %7157 = vmatpush.msk.msra.mxu1 %vm13902_vm14, %v13597_v46  ;;  %vm13910_vm1 = vcmp.eq.s32.totalorder %v13621_v8, %v13740_v3  ;;  %vm13911_vm14 = vcmask 1022976  }
 0x33d   : > { %7180 = vmatpush.msk.msrb.mxu2 %vm13904_vm12, %v13597_v46  ;;  %7146 = vmatpush.msk.msrb.mxu0 %vm13905_vm8, %v13597_v46  ;;  %vm13913_vm12 = vcmp.eq.s32.totalorder %v13912_v45, %v13740_v3  ;;  %vm13914_vm8 = vmmov %vm13911_vm14 }
 0x33e   : > { %7158 = vmatpush.msk.msra.mxu1 %vm13907_vm9, %v13597_v46  ;;  %vm13916_vm9 = vcmp.eq.s32.totalorder %v13915_v23, %v9079_v47 }
 0x33f   : > { %7181 = vmatpush.msk.msrb.mxu2 %vm13909_vm4, %v13597_v46  ;;  %7147 = vmatpush.msk.msrb.mxu0 %vm13910_vm1, %v13597_v46  ;;  %vm13918_vm4 = vcmp.eq.s32.totalorder %v13917_v48, %v13740_v3  ;;  %vm13920_vm1 = vcmp.eq.s32.totalorder %v13919_v50, %v13740_v3 }
 0x340   : > { %7094 = vmatmul.msk.f32.gmra.mxu2 %vm13911_vm14, %v2598_v17  ;;  %7159 = vmatpush.msk.msra.mxu1 %vm13913_vm12, %v13597_v46  ;;  %vm13922_vm14 = vcmp.eq.s32.totalorder %v13921_v1, %v9079_v47  ;;  %vm13923_vm12 = vmmov %vm13914_vm8 }
 0x341   : > { %7086 = vmatmul.msk.f32.gmra.mxu1 %vm13914_vm8, %v2598_v17  ;;  %7182 = vmatpush.msk.msrb.mxu2 %vm13916_vm9, %v13597_v46  ;;  %vm13925_vm8 = vcmp.eq.s32.totalorder %v13924_v58, %v13740_v3  ;;  %vm13927_vm9 = vcmp.eq.s32.totalorder %v13926_v54, %v9079_v47 }
 0x342   : > { %7160 = vmatpush.msk.msra.mxu1 %vm13918_vm4, %v13597_v46  ;;  %7148 = vmatpush.msk.msrb.mxu0 %vm13920_vm1, %v13597_v46  ;;  %vm13929_vm4 = vcmp.eq.s32.totalorder %v13928_v13, %v13740_v3  ;;  %vm13931_vm1 = vcmp.eq.s32.totalorder %v13930_v29, %v13740_v3 }
 0x343   : > { %7183 = vmatpush.msk.msrb.mxu2 %vm13922_vm14, %v13597_v46  ;;  %vm13933_vm14 = vcmp.eq.s32.totalorder %v13932_v60, %v9079_v47  ;;  %v11158_v60 = vpop.permute.xlu0 %3059 }
 0x344   : > { %7080 = vmatmul.msk.f32.gmra.mxu0 %vm13923_vm12, %v2600_v39  ;;  %7161 = vmatpush.msk.msra.mxu1 %vm13925_vm8, %v13597_v46  ;;  %vm13935_vm12 = vcmp.eq.s32.totalorder %v13934_v30, %v13740_v3  ;;  %vm13936_vm8 = vcmp.eq.s32.totalorder %v8628_v22, %v9079_v47  ;;  %v13943_v22 = vld [vmem:[#allocation62_spill] sm:$0xff] }
 0x345   : > { %7184 = vmatpush.msk.msrb.mxu2 %vm13927_vm9, %v13597_v46  ;;  %7149 = vmatpush.msk.msrb.mxu0 %vm13929_vm4, %v13597_v46  ;;  %v6638_v12 = vsel %vm13936_vm8, 1.0, %v13654_v52  ;;  %vm13937_vm9 = vcmask 1022976   ;;  %vm13939_vm4 = vcmp.eq.s32.totalorder %v13938_v57, %v13740_v3  ;;  %vm13946_vm8 = vcmp.eq.s32.totalorder %v13945_v41, %v13740_v3 }
 0x346   : > { %7162 = vmatpush.msk.msra.mxu1 %vm13931_vm1, %v13597_v46  ;;  %vm13940_vm1 = vmmov %vm13937_vm9 }
 0x347   : > { %7185 = vmatpush.msk.msrb.mxu2 %vm13933_vm14, %v13597_v46  ;;  %7150 = vmatpush.msk.msrb.mxu0 %vm13935_vm12, %v13597_v46  ;;  %vm13942_vm14 = vcmp.eq.s32.totalorder %v13941_v51, %v9079_v47  ;;  %vm13944_vm12 = vcmp.eq.s32.totalorder %v13943_v22, %v13740_v3 }
 0x348   : > { %7095 = vmatmul.msk.f32.gmra.mxu2 %vm13937_vm9, %v2599_v31  ;;  %7163 = vmatpush.msk.msra.mxu1 %vm13939_vm4, %v13597_v46  ;;  %vm13948_vm9 = vcmp.eq.s32.totalorder %v13947_v44, %v9079_v47  ;;  %vm13949_vm4 = vcmask 1040384  }
 0x349   : > { %7087 = vmatmul.msk.f32.gmra.mxu1 %vm13940_vm1, %v2599_v31  ;;  %7186 = vmatpush.msk.msrb.mxu2 %vm13942_vm14, %v13597_v46  ;;  %vm13951_vm14 = vcmp.eq.s32.totalorder %v13950_v33, %v13740_v3  ;;  %v11155_v31 = vpop.permute.xlu2 %3110 }
 0x34a   : > { %7151 = vmatpush.msk.msrb.mxu0 %vm13944_vm12, %v13597_v46  ;;  %7164 = vmatpush.msk.msra.mxu1 %vm13946_vm8, %v13597_v46  ;;  %vm13953_vm12 = vcmp.eq.s32.totalorder %v13952_v5, %v9079_v47  ;;  %vm13954_vm8 = vcmp.eq.s32.totalorder %v13883_v21, %v9079_v47 }
 0x34b   : > { %7187 = vmatpush.msk.msrb.mxu2 %vm13948_vm9, %v13597_v46  ;;  %vm13956_vm9 = vcmp.eq.s32.totalorder %v13955_v37, %v13740_v3 }
 0x34c   : > { %7206 = vmatpush.msk.msra.mxu0 %vm13949_vm4, %v6638_v12  ;;  %7165 = vmatpush.msk.msra.mxu1 %vm13951_vm14, %v13597_v46  ;;  %vm13958_vm4 = vcmp.eq.s32.totalorder %v13957_v4, %v9079_v47  ;;  %vm13960_vm14 = vcmask 1022976  }
 0x34d   : > { %7081 = vmatmul.msk.f32.gmra.mxu0 %vm13940_vm1, %v2601_v63  ;;  %7188 = vmatpush.msk.msrb.mxu2 %vm13953_vm12, %v13597_v46  ;;  %vm13959_vm1 = vcmp.eq.s32.totalorder %v13887_v25, %v9079_v47  ;;  %vm13961_vm12 = vmmov %vm13960_vm14 }
 0x34e   : > { %7207 = vmatpush.msk.msra.mxu0 %vm13954_vm8, %v13597_v46  ;;  %7166 = vmatpush.msk.msra.mxu1 %vm13956_vm9, %v13597_v46  ;;  %vm13962_vm8 = vcmp.eq.s32.totalorder %v13892_v28, %v9079_v47  ;;  %vm13963_vm9 = vcmp.eq.s32.totalorder %v13896_v10, %v9079_v47 }
 0x34f   : > { %7189 = vmatpush.msk.msrb.mxu2 %vm13958_vm4, %v13597_v46  ;;  %vm13964_vm4 = vmmov %vm13961_vm12 }
 0x350   : > { %7208 = vmatpush.msk.msra.mxu0 %vm13959_vm1, %v13597_v46  ;;  %7096 = vmatmul.msk.f32.gmra.mxu2 %vm13960_vm14, %v2600_v39  ;;  %vm13965_vm1 = vcmp.eq.s32.totalorder %v13901_v11, %v9079_v47  ;;  %vm13966_vm14 = vcmp.eq.s32.totalorder %v13906_v32, %v9079_v47 }
 0x351   : > { %7088 = vmatmul.msk.f32.gmra.mxu1 %vm13961_vm12, %v2600_v39  ;;  %vm13967_vm12 = vmmov %vm13964_vm4 }
 0x352   : > { %7209 = vmatpush.msk.msra.mxu0 %vm13962_vm8, %v13597_v46  ;;  %vm13968_vm8 = vmmov %vm13964_vm4 }
 0x354   : > { %7210 = vmatpush.msk.msra.mxu0 %vm13963_vm9, %v13597_v46  ;;  %vm13969_vm9 = vcmp.eq.s32.totalorder %v13912_v45, %v9079_v47 }
 0x355   : > { %7082 = vmatmul.msk.f32.gmra.mxu0 %vm13964_vm4, %v2602_v34  ;;  %vm13970_vm4 = vcmp.eq.s32.totalorder %v13917_v48, %v9079_v47 }
 0x356   : > { %7211 = vmatpush.msk.msra.mxu0 %vm13965_vm1, %v13597_v46  ;;  %vm13971_vm1 = vcmp.eq.s32.totalorder %v13924_v58, %v9079_v47 }
 0x358   : > { %7212 = vmatpush.msk.msra.mxu0 %vm13966_vm14, %v13597_v46  ;;  %7097 = vmatmul.msk.f32.gmra.mxu2 %vm13967_vm12, %v2601_v63  ;;  %vm13972_vm14 = vcmp.eq.s32.totalorder %v13930_v29, %v9079_v47  ;;  %vm13973_vm12 = vmmov %vm13968_vm8 }
 0x359   : > { %7089 = vmatmul.msk.f32.gmra.mxu1 %vm13968_vm8, %v2601_v63 }
 0x35a   : > { %7213 = vmatpush.msk.msra.mxu0 %vm13969_vm9, %v13597_v46  ;;  %vm13974_vm9 = vcmp.eq.s32.totalorder %v13938_v57, %v9079_v47 }
 0x35c   : > { %7214 = vmatpush.msk.msra.mxu0 %vm13970_vm4, %v13597_v46  ;;  %vm13975_vm4 = vcmp.eq.s32.totalorder %v13945_v41, %v9079_v47 }
 0x35e   : > { %7215 = vmatpush.msk.msra.mxu0 %vm13971_vm1, %v13597_v46  ;;  %vm13976_vm1 = vcmp.eq.s32.totalorder %v13950_v33, %v9079_v47 }
 0x360   : > { %7216 = vmatpush.msk.msra.mxu0 %vm13972_vm14, %v13597_v46  ;;  %7098 = vmatmul.msk.f32.gmra.mxu2 %vm13973_vm12, %v2602_v34  ;;  %vm13977_vm14 = vcmp.eq.s32.totalorder %v13955_v37, %v9079_v47  ;;  %v11152_v47 = vpop.permute.xlu1 %3054 }
 0x361   : > { %7090 = vmatmul.msk.f32.gmra.mxu1 %vm13968_vm8, %v2602_v34 }
 0x362   : > { %7217 = vmatpush.msk.msra.mxu0 %vm13974_vm9, %v13597_v46 }
 0x364   : > { %7218 = vmatpush.msk.msra.mxu0 %vm13975_vm4, %v13597_v46 }
 0x366   : > { %7219 = vmatpush.msk.msra.mxu0 %vm13976_vm1, %v13597_v46  ;;  %vm3280_vm1 = vcmask 924672  }
 0x368   : > { %7220 = vmatpush.msk.msra.mxu0 %vm13977_vm14, %v13597_v46  ;;  %v11163_v44 = vpop.permute.xlu1 %3115 }
 0x3a1   : > { %v2945_v24 = vpop.f32.mrf.mxu0 }
 0x3a2   : > { %v3077_v43 = vmul.f32 %v3045_v18, %v2945_v24 }
 0x3a4   : > { %v3133_v15 = vadd.f32 %v3101_v14, %v3077_v43 }
 0x3a6   : > { %v3175_v56 = vmin.f32 %v3133_v15, 0.0  ;;  %vm3154_vm12 = vcmp.gt.f32.partialorder %v3133_v15, 0.0 }
 0x3a8   : > { %v3196_v40 = vmul.f32 1.442695, %v3175_v56 }
 0x3a9   : > { %v2948_v42 = vpop.f32.mrf.mxu0 }
 0x3aa   : > { %7964 = vpow2.f32 %v3196_v40  ;;  %v3080_v49 = vmul.f32 %v3050_v2, %v2948_v42 }
 0x3ac   : > { %v3136_v61 = vadd.f32 %v3106_v55, %v3080_v49 }
 0x3ae   : > { %v3178_v0 = vmin.f32 %v3136_v61, 0.0  ;;  %v2983_v26 = vpop.f32.mrf.mxu1  ;;  %vm3157_vm8 = vcmp.gt.f32.partialorder %v3136_v61, 0.0 }
 0x3af   : > { %v3078_v19 = vmul.f32 %v3045_v18, %v2983_v26 }
 0x3b0   : > { %v7965_v36 = vpop.eup %7964  ;;  %v3202_v20 = vmul.f32 1.442695, %v3178_v0  ;;  %v11176_v0 = vpop.permute.xlu2 %3064 }
 0x3b1   : > { %v3134_v17 = vadd.f32 %v3101_v14, %v3078_v19  ;;  %v2951_v21 = vpop.f32.mrf.mxu0  ;;  %v7099_v25 = vadd.f32 -1.0, %v7965_v36 }
 0x3b2   : > { %v3083_v28 = vmul.f32 %v11152_v47, %v2951_v21  ;;  %7966 = vpow2.f32 %v3202_v20 }
 0x3b3   : > { %v3176_v10 = vmin.f32 %v3134_v17, 0.0  ;;  %v3021_v11 = vpop.f32.mrf.mxu2  ;;  %v3259_v59 = vsel %vm3154_vm12, %v3133_v15, %v7099_v25  ;;  %vm3155_vm9 = vcmp.gt.f32.partialorder %v3134_v17, 0.0  ;;  %v11183_v25 = vpop.permute.xlu0 %3120 }
 0x3b4   : > { %v3139_v32 = vadd.f32 %v11155_v31, %v3083_v28  ;;  %v3079_v6 = vmul.f32 %v3045_v18, %v3021_v11  ;;  %3324 = vmatmul.f32.vlgmr.msra.gmra.mxu3 %v3259_v59  ;;  %3438 = vmatmul.f32.vlgmr.msrb.gmra.mxu2 %v3259_v59 }
 0x3b5   : > { %v3198_v45 = vmul.f32 1.442695, %v3176_v10 }
 0x3b6   : > { %v3181_v39 = vmin.f32 %v3139_v32, 0.0  ;;  %v3135_v23 = vadd.f32 %v3101_v14, %v3079_v6  ;;  %v2986_v48 = vpop.f32.mrf.mxu1  ;;  %vm3160_vm4 = vcmp.gt.f32.partialorder %v3139_v32, 0.0 }
 0x3b7   : > { %7968 = vpow2.f32 %v3198_v45  ;;  %v3081_v1 = vmul.f32 %v3050_v2, %v2986_v48 }
 0x3b8   : > { %v7967_v58 = vpop.eup %7966  ;;  %v3177_v54 = vmin.f32 %v3135_v23, 0.0  ;;  %v3208_v29 = vmul.f32 1.442695, %v3181_v39  ;;  %vm3156_vm14 = vcmp.gt.f32.partialorder %v3135_v23, 0.0 }
 0x3b9   : > { %v11160_v12 = vadd.f32 %v3106_v55, %v3081_v1  ;;  %v2954_v57 = vpop.f32.mrf.mxu0  ;;  %v7102_v63 = vadd.f32 -1.0, %v7967_v58 }
 0x3ba   : > { %v3200_v51 = vmul.f32 1.442695, %v3177_v54  ;;  %v3086_v41 = vmul.f32 %v11158_v60, %v2954_v57  ;;  %7970 = vpow2.f32 %v3208_v29 }
 0x3bb   : > { %v3179_v33 = vmin.f32 %v11160_v12, 0.0  ;;  %v3024_v5 = vpop.f32.mrf.mxu2  ;;  %v3262_v37 = vsel %vm3157_vm8, %v3136_v61, %v7102_v63  ;;  %vm3158_vm12 = vcmp.gt.f32.partialorder %v11160_v12, 0.0 }
 0x3bc   : > { %7972 = vpow2.f32 %v3200_v51  ;;  %v11167_v4 = vadd.f32 %v11163_v44, %v3086_v41  ;;  %v3082_v34 = vmul.f32 %v3050_v2, %v3024_v5  ;;  %3327 = vmatmul.f32.gmra.mxu3 %v3262_v37  ;;  %3441 = vmatmul.f32.gmra.mxu2 %v3262_v37  ;;  %v11204_v51 = vpop.permute.xlu1 %3069 }
 0x3bd   : > { %v7969_v18 = vpop.eup %7968  ;;  %v3204_v24 = vmul.f32 1.442695, %v3179_v33 }
 0x3be   : > { %v3184_v43 = vmin.f32 %v11167_v4, 0.0  ;;  %v11170_v14 = vadd.f32 %v3106_v55, %v3082_v34  ;;  %v2989_v15 = vpop.f32.mrf.mxu1  ;;  %v7100_v56 = vadd.f32 -1.0, %v7969_v18  ;;  %vm3163_vm8 = vcmp.gt.f32.partialorder %v11167_v4, 0.0  ;;  %v11212_v18 = vpop.permute.xlu2 %3125 }
 0x3bf   : > { %v3084_v40 = vmul.f32 %v11152_v47, %v2989_v15  ;;  %7974 = vpow2.f32 %v3204_v24 }
 0x3c0   : > { %v7971_v42 = vpop.eup %7970  ;;  %v3180_v49 = vmin.f32 %v11170_v14, 0.0  ;;  %v11174_v61 = vsel %vm3155_vm9, %v3134_v17, %v7100_v56  ;;  %v3214_v2 = vmul.f32 1.442695, %v3184_v43  ;;  %vm3159_vm9 = vcmp.gt.f32.partialorder %v11170_v14, 0.0 }
 0x3c1   : > { %v11179_v26 = vadd.f32 %v11155_v31, %v3084_v40  ;;  %v2957_v19 = vpop.f32.mrf.mxu0  ;;  %3362 = vmatmul.f32.vlgmr.msrb.gmra.mxu0 %v11174_v61  ;;  %v7105_v55 = vadd.f32 -1.0, %v7971_v42 }
 0x3c2   : > { %v7973_v36 = vpop.eup %7972  ;;  %v3206_v20 = vmul.f32 1.442695, %v3180_v49  ;;  %v3089_v21 = vmul.f32 %v11176_v0, %v2957_v19  ;;  %7976 = vpow2.f32 %v3214_v2 }
 0x3c3   : > { %v7101_v17 = vadd.f32 -1.0, %v7973_v36  ;;  %v3182_v28 = vmin.f32 %v11179_v26, 0.0  ;;  %v3027_v10 = vpop.f32.mrf.mxu2  ;;  %v3265_v11 = vsel %vm3160_vm4, %v3139_v32, %v7105_v55  ;;  %vm3161_vm4 = vcmp.gt.f32.partialorder %v11179_v26, 0.0 }
 0x3c4   : > { %7978 = vpow2.f32 %v3206_v20  ;;  %v11187_v59 = vadd.f32 %v11183_v25, %v3089_v21  ;;  %v3085_v6 = vmul.f32 %v11152_v47, %v3027_v10  ;;  %3330 = vmatmul.f32.gmra.mxu3 %v3265_v11  ;;  %3444 = vmatmul.f32.gmra.mxu2 %v3265_v11 }
 0x3c5   : > { %v7975_v45 = vpop.eup %7974  ;;  %v11190_v39 = vsel %vm3156_vm14, %v3135_v23, %v7101_v17  ;;  %v3210_v48 = vmul.f32 1.442695, %v3182_v28  ;;  %v11236_v28 = vpop.permute.xlu0 %3074 }
 0x3c6   : > { %v3187_v1 = vmin.f32 %v11187_v59, 0.0  ;;  %v11194_v58 = vadd.f32 %v11155_v31, %v3085_v6  ;;  %v2992_v32 = vpop.f32.mrf.mxu1  ;;  %7167 = vmatmul.msk.f32.vlgmr.msra.gmra.mxu1 %vm3280_vm1, %v11190_v39  ;;  %v7103_v54 = vadd.f32 -1.0, %v7975_v45  ;;  %vm3166_vm14 = vcmp.gt.f32.partialorder %v11187_v59, 0.0 }
 0x3c7   : > { %v3087_v29 = vmul.f32 %v11158_v60, %v2992_v32  ;;  %7980 = vpow2.f32 %v3210_v48 }
 0x3c8   : > { %v7977_v47 = vpop.eup %7976  ;;  %v3183_v23 = vmin.f32 %v11194_v58, 0.0  ;;  %v11202_v57 = vsel %vm3158_vm12, %v11160_v12, %v7103_v54  ;;  %v3220_v63 = vmul.f32 1.442695, %v3187_v1  ;;  %v11244_v1 = vpop.permute.xlu1 %3130  ;;  %vm3162_vm12 = vcmp.gt.f32.partialorder %v11194_v58, 0.0 }
 0x3c9   : > { %v11207_v31 = vadd.f32 %v11163_v44, %v3087_v29  ;;  %3365 = vmatmul.f32.gmra.mxu0 %v11202_v57  ;;  %v7108_v33 = vadd.f32 -1.0, %v7977_v47 }
 0x3ca   : > { %v2960_v41 = vpop.f32.mrf.mxu0  ;;  %v7979_v5 = vpop.eup %7978  ;;  %v3212_v37 = vmul.f32 1.442695, %v3183_v23  ;;  %7982 = vpow2.f32 %v3220_v63 }
 0x3cb   : > { %v3092_v34 = vmul.f32 %v11204_v51, %v2960_v41  ;;  %v3185_v12 = vmin.f32 %v11207_v31, 0.0  ;;  %v3030_v24 = vpop.f32.mrf.mxu2  ;;  %v3268_v43 = vsel %vm3163_vm8, %v11167_v4, %v7108_v33  ;;  %v7104_v15 = vadd.f32 -1.0, %v7979_v5 }
 0x3cc   : > { %7984 = vpow2.f32 %v3212_v37  ;;  %v3088_v40 = vmul.f32 %v11158_v60, %v3030_v24  ;;  %3333 = vmatmul.f32.gmra.mxu3 %v3268_v43  ;;  %3447 = vmatmul.f32.gmra.mxu2 %v3268_v43  ;;  %vm3164_vm8 = vcmp.gt.f32.partialorder %v11207_v31, 0.0 }
 0x3cd   : > { %v11217_v56 = vadd.f32 %v11212_v18, %v3092_v34  ;;  %v7981_v42 = vpop.eup %7980  ;;  %v11222_v49 = vsel %vm3159_vm9, %v11170_v14, %v7104_v15  ;;  %v3216_v2 = vmul.f32 1.442695, %v3185_v12 }
 0x3ce   : > { %v11226_v4 = vadd.f32 %v11163_v44, %v3088_v40  ;;  %v2995_v55 = vpop.f32.mrf.mxu1  ;;  %7168 = vmatmul.msk.f32.gmra.mxu1 %vm3280_vm1, %v11222_v49  ;;  %v7106_v36 = vadd.f32 -1.0, %v7981_v42 }
 0x3cf   : > { %v3190_v19 = vmin.f32 %v11217_v56, 0.0  ;;  %v3090_v60 = vmul.f32 %v11176_v0, %v2995_v55  ;;  %7986 = vpow2.f32 %v3216_v2  ;;  %vm3169_vm9 = vcmp.gt.f32.partialorder %v11217_v56, 0.0 }
 0x3d0   : > { %v7983_v20 = vpop.eup %7982  ;;  %v3186_v14 = vmin.f32 %v11226_v4, 0.0  ;;  %v11234_v21 = vsel %vm3161_vm4, %v11179_v26, %v7106_v36  ;;  %vm3165_vm4 = vcmp.gt.f32.partialorder %v11226_v4, 0.0 }
 0x3d1   : > { %v3226_v17 = vmul.f32 1.442695, %v3190_v19  ;;  %v11239_v44 = vadd.f32 %v11183_v25, %v3090_v60  ;;  %3368 = vmatmul.f32.gmra.mxu0 %v11234_v21  ;;  %v7111_v11 = vadd.f32 -1.0, %v7983_v20 }
 0x3d2   : > { %v2963_v10 = vpop.f32.mrf.mxu0  ;;  %v7985_v6 = vpop.eup %7984  ;;  %v3218_v45 = vmul.f32 1.442695, %v3186_v14 }
 0x3d3   : > { %v3095_v48 = vmul.f32 %v11236_v28, %v2963_v10  ;;  %7988 = vpow2.f32 %v3226_v17  ;;  %v3188_v26 = vmin.f32 %v11239_v44, 0.0  ;;  %v3033_v32 = vpop.f32.mrf.mxu2  ;;  %v3271_v54 = vsel %vm3166_vm14, %v11187_v59, %v7111_v11 }
 0x3d4   : > { %v7107_v29 = vadd.f32 -1.0, %v7985_v6  ;;  %7990 = vpow2.f32 %v3218_v45  ;;  %v3091_v23 = vmul.f32 %v11176_v0, %v3033_v32  ;;  %3336 = vmatmul.f32.gmra.mxu3 %v3271_v54  ;;  %3450 = vmatmul.f32.gmra.mxu2 %v3271_v54  ;;  %vm3167_vm14 = vcmp.gt.f32.partialorder %v11239_v44, 0.0 }
 0x3d5   : > { %v3151_v47 = vadd.f32 %v11244_v1, %v3095_v48  ;;  %v7987_v63 = vpop.eup %7986  ;;  %v3222_v33 = vmul.f32 1.442695, %v3188_v26 }
 0x3d6   : > { %v11252_v41 = vsel %vm3162_vm12, %v11194_v58, %v7107_v29  ;;  %v3147_v37 = vadd.f32 %v11183_v25, %v3091_v23  ;;  %v2998_v34 = vpop.f32.mrf.mxu1  ;;  %v7109_v59 = vadd.f32 -1.0, %v7987_v63 }
 0x3d7   : > { %v3193_v5 = vmin.f32 %v3151_v47, 0.0  ;;  %7169 = vmatmul.msk.f32.gmra.mxu1 %vm3280_vm1, %v11252_v41  ;;  %v3093_v12 = vmul.f32 %v11204_v51, %v2998_v34  ;;  %7992 = vpow2.f32 %v3222_v33  ;;  %vm3172_vm12 = vcmp.gt.f32.partialorder %v3151_v47, 0.0 }
 0x3d8   : > { %v3189_v24 = vmin.f32 %v3147_v37, 0.0  ;;  %v11260_v43 = vsel %vm3164_vm8, %v11207_v31, %v7109_v59  ;;  %vm3168_vm8 = vcmp.gt.f32.partialorder %v3147_v37, 0.0 }
 0x3d9   : > { %v7989_v0 = vpop.eup %7988  ;;  %v3232_v58 = vmul.f32 1.442695, %v3193_v5  ;;  %v3149_v15 = vadd.f32 %v11212_v18, %v3093_v12  ;;  %3371 = vmatmul.f32.gmra.mxu0 %v11260_v43 }
 0x3da   : > { %v7114_v25 = vadd.f32 -1.0, %v7989_v0  ;;  %v7991_v40 = vpop.eup %7990  ;;  %v3224_v42 = vmul.f32 1.442695, %v3189_v24 }
 0x3db   : > { %7994 = vpow2.f32 %v3232_v58  ;;  %v3191_v2 = vmin.f32 %v3149_v15, 0.0  ;;  %v3036_v19 = vpop.f32.mrf.mxu2  ;;  %v7110_v36 = vadd.f32 -1.0, %v7991_v40 }
 0x3dc   : > { %v3274_v55 = vsel %vm3169_vm9, %v11217_v56, %v7114_v25  ;;  %7996 = vpow2.f32 %v3224_v42  ;;  %v3094_v31 = vmul.f32 %v11204_v51, %v3036_v19  ;;  %vm3170_vm9 = vcmp.gt.f32.partialorder %v3149_v15, 0.0 }
 0x3dd   : > { %3339 = vmatmul.f32.gmra.mxu3 %v3274_v55  ;;  %3453 = vmatmul.f32.gmra.mxu2 %v3274_v55  ;;  %v7993_v60 = vpop.eup %7992  ;;  %v11269_v20 = vsel %vm3165_vm4, %v11226_v4, %v7110_v36  ;;  %v3228_v14 = vmul.f32 1.442695, %v3191_v2 }
 0x3de   : > { %v3150_v17 = vadd.f32 %v11212_v18, %v3094_v31  ;;  %v3001_v10 = vpop.f32.mrf.mxu1  ;;  %v7112_v56 = vadd.f32 -1.0, %v7993_v60 }
 0x3df   : > { %7170 = vmatmul.msk.f32.gmra.mxu1 %vm3280_vm1, %v11269_v20  ;;  %v3096_v11 = vmul.f32 %v11236_v28, %v3001_v10  ;;  %7998 = vpow2.f32 %v3228_v14 }
 0x3e0   : > { %v3192_v6 = vmin.f32 %v3150_v17, 0.0  ;;  %v3272_v45 = vsel %vm3167_vm14, %v11239_v44, %v7112_v56  ;;  %vm3171_vm4 = vcmp.gt.f32.partialorder %v3150_v17, 0.0 }
 0x3e1   : > { %v7995_v51 = vpop.eup %7994  ;;  %v3152_v4 = vadd.f32 %v11244_v1, %v3096_v11  ;;  %3374 = vmatmul.f32.gmra.mxu0 %v3272_v45 }
 0x3e2   : > { %v7117_v48 = vadd.f32 -1.0, %v7995_v51  ;;  %v7997_v26 = vpop.eup %7996  ;;  %v3230_v18 = vmul.f32 1.442695, %v3192_v6 }
 0x3e3   : > { %v3194_v32 = vmin.f32 %v3152_v4, 0.0  ;;  %v3039_v54 = vpop.f32.mrf.mxu2  ;;  %v7113_v23 = vadd.f32 -1.0, %v7997_v26  ;;  %vm3173_vm14 = vcmp.gt.f32.partialorder %v3152_v4, 0.0 }
 0x3e4   : > { %v3277_v29 = vsel %vm3172_vm12, %v3151_v47, %v7117_v48  ;;  %8000 = vpow2.f32 %v3230_v18  ;;  %v3097_v63 = vmul.f32 %v11236_v28, %v3039_v54 }
 0x3e5   : > { %3342 = vmatmul.f32.gmra.mxu3 %v3277_v29  ;;  %3456 = vmatmul.f32.gmra.mxu2 %v3277_v29  ;;  %v7999_v33 = vpop.eup %7998  ;;  %v3273_v5 = vsel %vm3168_vm8, %v3147_v37, %v7113_v23  ;;  %v3234_v44 = vmul.f32 1.442695, %v3194_v32  ;;  %vm13979_vm8 = vcmask 1041408  }
 0x3e6   : > { %v3153_v34 = vadd.f32 %v11244_v1, %v3097_v63  ;;  %v7115_v59 = vadd.f32 -1.0, %v7999_v33 }
 0x3e7   : > { %7171 = vmatmul.msk.f32.gmra.mxu1 %vm3280_vm1, %v3273_v5  ;;  %8002 = vpow2.f32 %v3234_v44 }
 0x3e8   : > { %v3195_v12 = vmin.f32 %v3153_v34, 0.0  ;;  %v3275_v0 = vsel %vm3170_vm9, %v3149_v15, %v7115_v59  ;;  %vm3174_vm12 = vcmp.gt.f32.partialorder %v3153_v34, 0.0  ;;  %vm13980_vm9 = vmmov %vm13979_vm8 }
 0x3e9   : > { %3377 = vmatmul.f32.gmra.mxu0 %v3275_v0 }
 0x3ea   : > { %v8001_v47 = vpop.eup %8000  ;;  %v3236_v24 = vmul.f32 1.442695, %v3195_v12 }
 0x3eb   : > { %v7116_v58 = vadd.f32 -1.0, %v8001_v47 }
 0x3ec   : > { %8004 = vpow2.f32 %v3236_v24 }
 0x3ed   : > { %3476 = vmatmul.f32.vlgmr.msrb.gmra.mxu3 %v11174_v61  ;;  %v8003_v28 = vpop.eup %8002  ;;  %v3276_v37 = vsel %vm3171_vm4, %v3150_v17, %v7116_v58 }
 0x3ee   : > { %v7118_v1 = vadd.f32 -1.0, %v8003_v28 }
 0x3ef   : > { %7172 = vmatmul.msk.f32.gmra.mxu1 %vm3280_vm1, %v3276_v37 }
 0x3f0   : > { %v3278_v25 = vsel %vm3173_vm14, %v3152_v4, %v7118_v1 }
 0x3f1   : > { %3380 = vmatmul.f32.gmra.mxu0 %v3278_v25 }
 0x3f2   : > { %v8005_v40 = vpop.eup %8004 }
 0x3f3   : > { %v7119_v42 = vadd.f32 -1.0, %v8005_v40 }
 0x3f5   : > { %3479 = vmatmul.f32.gmra.mxu3 %v11202_v57  ;;  %v3279_v15 = vsel %vm3174_vm12, %v3153_v34, %v7119_v42  ;;  %vm13983_vm12 = vmmov %vm13979_vm8 }
 0x3f7   : > { %7173 = vmatmul.msk.f32.gmra.mxu1 %vm3280_vm1, %v3279_v15 }
 0x3f9   : > { %7221 = vmatmul.msk.f32.vlgmr.msra.gmra.mxu0 %vm3280_vm1, %v11190_v39 }
 0x3fd   : > { %3482 = vmatmul.f32.gmra.mxu3 %v11234_v21 }
 0x401   : > { %7222 = vmatmul.msk.f32.gmra.mxu0 %vm3280_vm1, %v11222_v49 }
 0x405   : > { %3485 = vmatmul.f32.gmra.mxu3 %v11260_v43 }
 0x409   : > { %7223 = vmatmul.msk.f32.gmra.mxu0 %vm3280_vm1, %v11252_v41 }
 0x40d   : > { %3488 = vmatmul.f32.gmra.mxu3 %v3272_v45 }
 0x411   : > { %7224 = vmatmul.msk.f32.gmra.mxu0 %vm3280_vm1, %v11269_v20 }
 0x415   : > { %3491 = vmatmul.f32.gmra.mxu3 %v3275_v0 }
 0x419   : > { %7225 = vmatmul.msk.f32.gmra.mxu0 %vm3280_vm1, %v3273_v5 }
 0x41d   : > { %3494 = vmatmul.f32.gmra.mxu3 %v3278_v25 }
 0x421   : > { %7226 = vmatmul.msk.f32.gmra.mxu0 %vm3280_vm1, %v3276_v37 }
 0x429   : > { %7227 = vmatmul.msk.f32.gmra.mxu0 %vm3280_vm1, %v3279_v15  ;;  %vm13978_vm1 = vcmask 1043456  }
 0x42a   : > { %vm13981_vm4 = vmmov %vm13978_vm1 }
 0x42b   : > { %vm13982_vm14 = vmmov %vm13978_vm1 }
 0x437   : > { %v11298_v61 = vpop.f32.mrf.mxu3  ;;  %v3439_v14 = vpop.f32.mrf.mxu2 }
 0x43e   : > { %v11300_v39 = vpop.f32.mrf.mxu0 }
 0x43f   : > { %v11302_v57 = vpop.f32.mrf.mxu3  ;;  %v3442_v11 = vpop.f32.mrf.mxu2 }
 0x443   : > { %v11320_v31 = vpop.f32.mrf.mxu1 }
 0x446   : > { %v11304_v49 = vpop.f32.mrf.mxu0 }
 0x447   : > { %v11306_v21 = vpop.f32.mrf.mxu3  ;;  %v3445_v48 = vpop.f32.mrf.mxu2 }
 0x44b   : > { %v11324_v10 = vpop.f32.mrf.mxu1 }
 0x44e   : > { %v11308_v41 = vpop.f32.mrf.mxu0 }
 0x44f   : > { %v11310_v43 = vpop.f32.mrf.mxu3  ;;  %v3448_v59 = vpop.f32.mrf.mxu2 }
 0x454   : > { %v11326_v45 = vpop.f32.mrf.mxu1 }
 0x456   : > { %v11312_v2 = vpop.f32.mrf.mxu0 }
 0x457   : > { %v11314_v19 = vpop.f32.mrf.mxu3 }
 0x45c   : > { %v3410_v33 = vpop.f32.mrf.mxu1 }
 0x45e   : > { %v11316_v55 = vpop.f32.mrf.mxu0 }
 0x460   : > { %v11318_v36 = vpop.f32.mrf.mxu3 }
 0x464   : > { %v3413_v40 = vpop.f32.mrf.mxu1 }
 0x466   : > { %v11322_v60 = vpop.f32.mrf.mxu0 }
 0x468   : > { %v3343_v20 = vpop.f32.mrf.mxu3 }
 0x46e   : > { %v3381_v17 = vpop.f32.mrf.mxu0 }
 0x470   : > { %v3477_v56 = vpop.f32.mrf.mxu3 }
 0x471   : > { %v3478_v4 = vadd.f32 %v3477_v56, %v3439_v14 }
 0x476   : > { %v3515_v51 = vpop.f32.mrf.mxu0 }
 0x477   : > { %v11328_v26 = vadd.f32 %v3515_v51, %v3478_v4  ;;  %v3451_v51 = vpop.f32.mrf.mxu2 }
 0x478   : > { %v3480_v6 = vpop.f32.mrf.mxu3 }
 0x479   : > { %v3481_v18 = vadd.f32 %v3480_v6, %v3442_v11  ;;  %v3678_v23 = vrot.slane %v11328_v26, 4  ;;  %v3603_v58 = vrot.slane %v11328_v26, 6 }
 0x47e   : > { %v3518_v32 = vpop.f32.mrf.mxu0 }
 0x47f   : > { %v11330_v54 = vadd.f32 %v3518_v32, %v3481_v18 }
 0x480   : > { %v3483_v29 = vpop.f32.mrf.mxu3 }
 0x481   : > { %v3681_v63 = vrot.slane %v11330_v54, 4  ;;  %v3484_v34 = vadd.f32 %v3483_v29, %v3445_v48  ;;  %v3606_v24 = vrot.slane %v11330_v54, 6 }
 0x483   : > { %v3682_v5 = vsel %vm13978_vm1, %v3678_v23, %v3681_v63  ;;  %v3607_v37 = vsel %vm13979_vm8, %v3603_v58, %v3606_v24  ;;  %vm13984_vm1 = vmmov %vm13979_vm8 }
 0x484   : > { %v7666_v44 = vpack.i.bf16 %v3678_v23, %v3682_v5  ;;  %v3416_v23 = vpop.f32.mrf.mxu1  ;;  %vm13985_vm8 = vmmov %vm13984_vm1 }
 0x486   : > { %v3521_v12 = vpop.f32.mrf.mxu0  ;;  %7667 = vrot.lane.b32.xlu0 %v7666_v44, %s13794_s16 }
 0x487   : > { %v11336_v0 = vadd.f32 %v3521_v12, %v3484_v34  ;;  %v3454_v12 = vpop.f32.mrf.mxu2 }
 0x488   : > { %v3486_v47 = vpop.f32.mrf.mxu3 }
 0x489   : > { %v3610_v28 = vrot.slane %v11336_v0, 6  ;;  %v3487_v42 = vadd.f32 %v3486_v47, %v3448_v59  ;;  %v3685_v11 = vrot.slane %v11336_v0, 4 }
 0x48b   : > { %v3611_v1 = vsel %vm13980_vm9, %v3606_v24, %v3610_v28  ;;  %v3686_v4 = vsel %vm13981_vm4, %v3681_v63, %v3685_v11  ;;  %vm13986_vm9 = vmmov %vm13984_vm1 }
 0x48c   : > { %v7681_v25 = vpack.i.bf16 %v3607_v37, %v3611_v1  ;;  %v3419_v1 = vpop.f32.mrf.mxu1 }
 0x48e   : > { %v3524_v15 = vpop.f32.mrf.mxu0  ;;  %7682 = vrot.lane.b32.xlu0 %v7681_v25, %s13802_s25 }
 0x48f   : > { %v11346_v14 = vadd.f32 %v3524_v15, %v3487_v42  ;;  %v3373_v42 = vadd.f32 %v11312_v2, %v11310_v43  ;;  %v3382_v15 = vadd.f32 %v3381_v17, %v3343_v20  ;;  %v3376_v20 = vadd.f32 %v11316_v55, %v11314_v19 }
 0x490   : > { %v3489_v56 = vpop.f32.mrf.mxu3 }
 0x491   : > { %v3689_v6 = vrot.slane %v11346_v14, 4  ;;  %v3490_v32 = vadd.f32 %v3489_v56, %v3451_v51  ;;  %v3614_v44 = vrot.slane %v11346_v14, 6  ;;  %v3370_v51 = vadd.f32 %v11308_v41, %v11306_v21 }
 0x493   : > { %v3690_v48 = vsel %vm13982_vm14, %v3685_v11, %v3689_v6  ;;  %v3615_v63 = vsel %vm13983_vm12, %v3610_v28, %v3614_v44  ;;  %v3457_v28 = vpop.f32.mrf.mxu2  ;;  %vm13987_vm14 = vmmov %vm13981_vm4 }
 0x494   : > { %v7661_v18 = vpack.i.bf16 %v3686_v4, %v3690_v48  ;;  %v11368_v4 = vadd.f32 %v3410_v33, %v3373_v42  ;;  %v11370_v48 = vadd.f32 %v3419_v1, %v3382_v15  ;;  %v3364_v33 = vadd.f32 %v11300_v39, %v11298_v61  ;;  %vm13988_vm12 = vmmov %vm13984_vm1 }
 0x496   : > { %v3527_v29 = vpop.f32.mrf.mxu0  ;;  %7662 = vrot.lane.b32.xlu2 %v7661_v18, %s13794_s16  ;;  %v3687_v17 = vrot.slane %v11368_v4, 4  ;;  %v11409_v61 = vadd.f32 %v11320_v31, %v3364_v33 }
 0x497   : > { %v11355_v5 = vadd.f32 %v3527_v29, %v3490_v32  ;;  %v3367_v32 = vadd.f32 %v11304_v49, %v11302_v57  ;;  %v11375_v29 = vadd.f32 %v11326_v45, %v3370_v51  ;;  %v11391_v49 = vadd.f32 %v3413_v40, %v3376_v20 }
 0x498   : > { %v3492_v34 = vpop.f32.mrf.mxu3  ;;  %v7726_v42 = vpack.i.bf16 %v11328_v26, %v11409_v61 }
 0x499   : > { %v3618_v59 = vrot.slane %v11355_v5, 6  ;;  %v3493_v25 = vadd.f32 %v3492_v34, %v3454_v12  ;;  %v11383_v41 = vadd.f32 %v11324_v10, %v3367_v32  ;;  %v3683_v45 = vrot.slane %v11375_v29, 4 }
 0x49a   : > { %v3379_v10 = vadd.f32 %v11322_v60, %v11318_v36  ;;  %v7696_v34 = vpack.i.bf16 %v11355_v5, %v11391_v49  ;;  %v3624_v60 = vrot.slane %v11370_v48, 6  ;;  %v7711_v31 = vpack.i.bf16 %v11336_v0, %v11375_v29 }
 0x49b   : > { %v3619_v47 = vsel %vm13984_vm1, %v3614_v44, %v3618_v59  ;;  %v3679_v12 = vrot.slane %v11383_v41, 4  ;;  %v3688_v40 = vsel %vm13981_vm4, %v3683_v45, %v3687_v17  ;;  %vm13989_vm1 = vmmov %vm13981_vm4  ;;  %v3768_v32 = vrot.slane %v11355_v5, 2 }
 0x49c   : > { %v7676_v24 = vpack.i.bf16 %v3615_v63, %v3619_v47  ;;  %v11406_v63 = vadd.f32 %v3416_v23, %v3379_v10  ;;  %v3677_v47 = vrot.slane %v11409_v61, 4  ;;  %vm13991_vm4 = vcmask 1045504  }
 0x49d   : > { %v3684_v39 = vsel %vm13987_vm14, %v3679_v12, %v3683_v45  ;;  %vm13992_vm14 = vmmov %vm13991_vm4  ;;  %v7706_v10 = vpack.i.bf16 %v11346_v14, %v11368_v4 }
 0x49e   : > { %v3530_v37 = vpop.f32.mrf.mxu0  ;;  %7677 = vrot.lane.b32.xlu2 %v7676_v24, %s13802_s25  ;;  %v7701_v36 = vpack.i.bf16 %v3684_v39, %v3688_v40  ;;  %v3760_v40 = vrot.slane %v11336_v0, 2  ;;  %v3762_v39 = vrot.slane %v11368_v4, 2 }
 0x49f   : > { %v11364_v11 = vadd.f32 %v3530_v37, %v3493_v25  ;;  %v3680_v37 = vsel %vm13989_vm1, %v3677_v47, %v3679_v12  ;;  %v3616_v25 = vrot.slane %v11391_v49, 6  ;;  %vm13994_vm1 = vmmov %vm13985_vm8 }
 0x4a0   : > { %v3495_v56 = vpop.f32.mrf.mxu3  ;;  %v7716_v1 = vpack.i.bf16 %v3677_v47, %v3680_v37  ;;  %v3756_v37 = vrot.slane %v11330_v54, 2 }
 0x4a1   : > { %v3496_v18 = vadd.f32 %v3495_v56, %v3457_v28  ;;  %v3622_v21 = vrot.slane %v11364_v11, 6  ;;  %v7691_v15 = vpack.i.bf16 %v11364_v11, %v11406_v63  ;;  %v3612_v56 = vrot.slane %v11368_v4, 6 }
 0x4a2   : > { %v3772_v51 = vrot.slane %v11364_v11, 2 }
 0x4a3   : > { %v3623_v44 = vsel %vm13985_vm8, %v3618_v59, %v3622_v21  ;;  %v3620_v59 = vrot.slane %v11406_v63, 6 }
 0x4a4   : > { %v3773_v20 = vsel %vm13991_vm4, %v3768_v32, %v3772_v51 }
 0x4a5   : > { %v3625_v23 = vsel %vm13988_vm12, %v3620_v59, %v3624_v60  ;;  %vm13993_vm12 = vmmov %vm13985_vm8 }
 0x4a6   : > { %v3533_v43 = vpop.f32.mrf.mxu0  ;;  %3851 = vrot.lane.b32.xlu2 %v11370_v48, %s13786_s23  ;;  %v7686_v24 = vpack.i.bf16 %v3625_v23, %v3603_v58  ;;  %v3621_v58 = vsel %vm13985_vm8, %v3616_v25, %v3620_v59  ;;  %v3602_v59 = vrot.slane %v11409_v61, 6 }
 0x4a7   : > { %v11379_v2 = vadd.f32 %v3533_v43, %v3496_v18  ;;  %v3770_v43 = vrot.slane %v11406_v63, 2 }
 0x4a9   : > { %3853 = vrot.lane.b32.xlu0 %v11379_v2, %s13786_s23  ;;  %v3626_v57 = vrot.slane %v11379_v2, 6 }
 0x4ab   : > { %v3627_v19 = vsel %vm13986_vm9, %v3622_v21, %v3626_v57  ;;  %vm13990_vm9 = vmmov %vm13985_vm8  ;;  %v3766_v21 = vrot.slane %v11391_v49, 2  ;;  %v3608_v57 = vrot.slane %v11375_v29, 6 }
 0x4ac   : > { %v7671_v55 = vpack.i.bf16 %v3623_v44, %v3627_v19  ;;  %v3617_v28 = vsel %vm13990_vm9, %v3612_v56, %v3616_v25  ;;  %v3604_v44 = vrot.slane %v11383_v41, 6  ;;  %vm13995_vm8 = vmmov %vm13991_vm4  ;;  %v3753_v25 = vrot.slane %v11328_v26, 2 }
 0x4ad   : > { %v7731_v18 = vpack.i.bf16 %v3617_v28, %v3621_v58  ;;  %v3771_v45 = vsel %vm13992_vm14, %v3766_v21, %v3770_v43  ;;  %v3613_v19 = vsel %vm13993_vm12, %v3608_v57, %v3612_v56  ;;  %vm13996_vm9 = vmmov %vm13991_vm4  ;;  %v3752_v56 = vrot.slane %v11409_v61, 2 }
 0x4ae   : > { %7672 = vrot.lane.b32.xlu1 %v7671_v55, %s13802_s25  ;;  %7697 = vrot.lane.b32.xlu2 %v7696_v34, %s13786_s23  ;;  %v7736_v33 = vpack.i.bf16 %v3773_v20, %v3771_v45  ;;  %v3764_v55 = vrot.slane %v11346_v14, 2  ;;  %v3609_v34 = vsel %vm13994_vm1, %v3604_v44, %v3608_v57  ;;  %vm13997_vm4 = vmmov %vm13994_vm1  ;;  %v3699_v20 = vrot.slane %v11370_v48, 4 }
 0x4af   : > { %v7741_v12 = vpack.i.bf16 %v3609_v34, %v3613_v19  ;;  %vm13998_vm14 = vmmov %vm13995_vm8  ;;  %v3776_v34 = vrot.slane %v11379_v2, 2 }
 0x4b0   : > { %v3765_v60 = vsel %vm13995_vm8, %v3760_v40, %v3764_v55  ;;  %v3757_v58 = vsel %vm13998_vm14, %v3753_v25, %v3756_v37  ;;  %vm13999_vm12 = vmmov %vm13995_vm8 }
 0x4b1   : > { %7702 = vrot.lane.b32.xlu0 %v7701_v36, %s13794_s16  ;;  %v3758_v36 = vrot.slane %v11375_v29, 2  ;;  %v3769_v28 = vsel %vm13999_vm12, %v3764_v55, %v3768_v32  ;;  %vm14000_vm1 = vmmov %vm13995_vm8 }
 0x4b2   : > { %vm14001_vm8 = vmmov %vm14000_vm1 }
 0x4b3   : > { %v3763_v47 = vsel %vm13996_vm9, %v3758_v36, %v3762_v39  ;;  %v3767_v45 = vsel %vm14001_vm8, %v3762_v39, %v3766_v21  ;;  %vm14002_vm9 = vcmask 1043456   ;;  %v3691_v21 = vrot.slane %v11391_v49, 4  ;;  %vm14005_vm12 = vmmov %vm14000_vm1 }
 0x4b4   : > { %v7751_v23 = vpack.i.bf16 %v3765_v60, %v3763_v47  ;;  %v3774_v60 = vrot.slane %v11370_v48, 2 }
 0x4b6   : > { %7712 = vrot.lane.b32.xlu2 %v7711_v31, %s13786_s23  ;;  %7687 = vrot.lane.b32.xlu1 %v7686_v24, %s13802_s25  ;;  %v7721_v31 = vpack.i.bf16 %v11330_v54, %v11383_v41  ;;  %v3605_v24 = vsel %vm13997_vm4, %v3602_v59, %v3604_v44  ;;  %v3695_v44 = vrot.slane %v11406_v63, 4  ;;  %vm14003_vm4 = vmmov %vm14002_vm9 }
 0x4b7   : > { %vm14004_vm14 = vmmov %vm14003_vm4 }
 0x4b8   : > { %v3700_v32 = vsel %vm14003_vm4, %v3695_v44, %v3699_v20 }
 0x4b9   : > { %7717 = vrot.lane.b32.xlu0 %v7716_v1, %s13794_s16  ;;  %v7756_v1 = vpack.i.bf16 %v3602_v59, %v3605_v24  ;;  %v3777_v59 = vsel %vm14005_vm12, %v3772_v51, %v3776_v34  ;;  %vm14010_vm12 = vmmov %vm14001_vm8  ;;  %v3581_v34 = vld [vmem:[%s13115_s9 + $0x30] sm:$0xff] }
 0x4be   : > { %7727 = vrot.lane.b32.xlu2 %v7726_v42, %s13786_s23  ;;  %7692 = vrot.lane.b32.xlu1 %v7691_v15, %s13786_s23  ;;  %v3754_v42 = vrot.slane %v11383_v41, 2  ;;  %v3701_v15 = vrot.slane %v11379_v2, 4 }
 0x4c0   : > { %v3755_v57 = vsel %vm14000_vm1, %v3752_v56, %v3754_v42  ;;  %vm14006_vm1 = vmmov %vm14003_vm4 }
 0x4c1   : > { %7732 = vrot.lane.b32.xlu0 %v7731_v18, %s13802_s25  ;;  %v3697_v18 = vrot.slane %v11364_v11, 4  ;;  %v3696_v47 = vsel %vm14006_vm1, %v3691_v21, %v3695_v44  ;;  %vm14008_vm4 = vmmov %vm14006_vm1  ;;  %v3576_v44 = vld [vmem:[%s13115_s9 + $0x8] sm:$0xff] }
 0x4c3   : > { %v3702_v19 = vsel %vm14002_vm9, %v3697_v18, %v3701_v15  ;;  %vm14007_vm9 = vmmov %vm14006_vm1  ;;  %v3692_v15 = vsel %vm14008_vm4, %v3687_v17, %v3691_v21  ;;  %v3564_v17 = vld [vmem:[%s13114_s8 + $0x10] sm:$0xff]  ;;  %v3583_v21 = vld [vmem:[%s13115_s9 + $0x40] sm:$0xff]  ;;  %vm14011_vm1 = vcmask 1014784  }
 0x4c4   : > { %v7786_v55 = vpack.i.bf16 %v3702_v19, %v3700_v32  ;;  %v3580_v19 = vld [vmem:[%s13115_s9 + $0x28] sm:$0xff]  ;;  %v3565_v32 = vld [vmem:[%s13114_s8 + $0x18] sm:$0xff] }
 0x4c6   : > { %7737 = vrot.lane.b32.xlu2 %v7736_v33, %s13790_s30  ;;  %7707 = vrot.lane.b32.xlu1 %v7706_v10, %s13786_s23  ;;  %v7771_v33 = vpack.i.bf16 %v3757_v58, %v3755_v57  ;;  %v7746_v10 = vpack.i.bf16 %v3769_v28, %v3767_v45  ;;  %v3759_v28 = vsel %vm14010_vm12, %v3754_v42, %v3758_v36  ;;  %v3577_v36 = vld [vmem:[%s13115_s9 + $0x10] sm:$0xff]  ;;  %v3566_v57 = vld [vmem:[%s13114_s8 + $0x20] sm:$0xff] }
 0x4c9   : > { %7742 = vrot.lane.b32.xlu0 %v7741_v12, %s13802_s25  ;;  %v3693_v12 = vrot.slane %v11355_v5, 4 }
 0x4cb   : > { %v3698_v39 = vsel %vm14004_vm14, %v3693_v12, %v3697_v18  ;;  %vm14009_vm14 = vmmov %vm14001_vm8  ;;  %v3563_v18 = vld [vmem:[%s13114_s8 + $0x8] sm:$0xff] }
 0x4cc   : > { %v3761_v51 = vsel %vm14009_vm14, %v3756_v37, %v3760_v40  ;;  %v7776_v40 = vpack.i.bf16 %v3753_v25, %v3752_v56  ;;  %v3578_v25 = vld [vmem:[%s13115_s9 + $0x18] sm:$0xff]  ;;  %v3562_v56 = vld [vmem:[%s13114_s8] sm:$0xff] }
 0x4ce   : > { %7752 = vrot.lane.b32.xlu2 %v7751_v23, %s13790_s30  ;;  %7722 = vrot.lane.b32.xlu1 %v7721_v31, %s13786_s23  ;;  %v3775_v23 = vsel %vm14001_vm8, %v3770_v43, %v3774_v60  ;;  %v7781_v31 = vpack.i.bf16 %v3698_v39, %v3696_v47  ;;  %v3575_v43 = vld [vmem:[%s13115_s9] sm:$0xff]  ;;  %v3584_v47 = vld [vmem:[%s13115_s9 + $0x48] sm:$0xff]  ;;  %vm14012_vm8 = vcmask 1041408  }
 0x4cf   : > { %v7761_v24 = vpack.i.bf16 %v3777_v59, %v3775_v23  ;;  %v3579_v60 = vld [vmem:[%s13115_s9 + $0x20] sm:$0xff]  ;;  %v3568_v23 = vld [vmem:[%s13114_s8 + $0x30] sm:$0xff] }
 0x4d1   : > { %7757 = vrot.lane.b32.xlu0 %v7756_v1, %s13802_s25  ;;  %v3694_v1 = vsel %vm14007_vm9, %v3689_v6, %v3693_v12  ;;  %v7766_v6 = vpack.i.bf16 %v3761_v51, %v3759_v28  ;;  %v3570_v12 = vld [vmem:[%s13114_s8 + $0x40] sm:$0xff]  ;;  %vm14013_vm9 = vmmov %vm14008_vm4  ;;  %vm14014_vm4 = vcmask 1031168  }
 0x4d2   : > { %v7791_v58 = vpack.i.bf16 %v3694_v1, %v3692_v15  ;;  %v3573_v15 = vld [vmem:[%s13114_s8 + $0x58] sm:$0xff]  ;;  %vm14015_vm14 = vmmov %vm14014_vm4 }
 0x4d3   : > { %vm14016_vm12 = vmmov %vm14014_vm4 }
 0x4d6   : > { %7772 = vrot.lane.b32.xlu2 %v7771_v33, %s13790_s30  ;;  %7747 = vrot.lane.b32.xlu1 %v7746_v10, %s13790_s30  ;;  %v3567_v10 = vld [vmem:[%s13114_s8 + $0x28] sm:$0xff] }
 0x4d9   : > { %7787 = vrot.lane.b32.xlu0 %v7786_v55, %s13794_s16  ;;  %v3569_v55 = vld [vmem:[%s13114_s8 + $0x38] sm:$0xff] }
 0x4de   : > { %7782 = vrot.lane.b32.xlu2 %v7781_v31, %s13794_s16  ;;  %7762 = vrot.lane.b32.xlu1 %v7761_v24, %s13790_s30  ;;  %v3572_v31 = vld [vmem:[%s13114_s8 + $0x50] sm:$0xff] }
 0x4e1   : > { %7792 = vrot.lane.b32.xlu0 %v7791_v58, %s13794_s16  ;;  %v3582_v58 = vld [vmem:[%s13115_s9 + $0x38] sm:$0xff] }
 0x4e6   : > { %4241 = vperm.xlu2 %7549, %v3575_v43   ;;  %7767 = vrot.lane.b32.xlu1 %v7766_v6, %s13790_s30  ;;  %v3586_v43 = vld [vmem:[%s13115_s9 + $0x58] sm:$0xff] }
 0x4e9   : > { %4155 = vperm.xlu0 %7550, %v3563_v18  }
 0x4ee   : > { %4160 = vperm.xlu2 %7549, %v3564_v17   ;;  %7777 = vrot.lane.b32.xlu1 %v7776_v40, %s13790_s30 }
 0x4f0   : > { %v7663_v37 = vpop.permute.xlu2 %7662 }
 0x4f1   : > { %v11516_v42 = vunpack.i.l.bf16 %v7663_v37  ;;  %4251 = vperm.xlu0 %7550, %v3577_v36   ;;  %v11518_v20 = vunpack.i.h.bf16 %v7663_v37 }
 0x4f3   : > { %4036 = vmatpush.msrb.mxu0 %v11516_v42  ;;  %7434 = vmatpush.msra.mxu3 %v11516_v42 }
 0x4f5   : > { %4037 = vmatpush.msrb.mxu0 %v11518_v20  ;;  %7435 = vmatpush.msra.mxu3 %v11518_v20 }
 0x4f6   : > { %4256 = vperm.xlu2 %7549, %v3578_v25   ;;  %4150 = vperm.xlu1 %7548, %v3562_v56   ;;  %v3587_v56 = vld [vmem:[%s13115_s9 + $0x60] sm:$0xf] }
 0x4f8   : > { %v11533_v45 = vpop.permute.xlu0 %7667  ;;  %v7678_v39 = vpop.permute.xlu2 %7677 }
 0x4f9   : > { %v11536_v33 = vunpack.i.l.bf16 %v11533_v45  ;;  %4170 = vperm.xlu0 %7550, %v3566_v57   ;;  %v7670_v6 = vunpack.i.h.bf16 %v11533_v45  ;;  %v3571_v57 = vld [vmem:[%s13114_s8 + $0x48] sm:$0xff] }
 0x4fb   : > { %4038 = vmatpush.msrb.mxu0 %v11536_v33  ;;  %7436 = vmatpush.msra.mxu3 %v11536_v33 }
 0x4fe   : > { %4175 = vperm.xlu2 %7549, %v3567_v10   ;;  %4246 = vperm.xlu1 %7548, %v3576_v44   ;;  %v11602_v10 = vunpack.i.l.bf16 %v7678_v39 }
 0x500   : > { %v7683_v59 = vpop.permute.xlu0 %7682  ;;  %v3852_v24 = vpop.permute.xlu2 %3851 }
 0x501   : > { %4266 = vperm.xlu0 %7550, %v3580_v19   ;;  %v11608_v19 = vunpack.i.h.bf16 %v7678_v39 }
 0x506   : > { %4271 = vperm.xlu2 %7549, %v3581_v34   ;;  %4165 = vperm.xlu1 %7548, %v3565_v32  }
 0x508   : > { %v11591_v17 = vpop.permute.xlu2 %7697 }
 0x509   : > { %4185 = vperm.xlu0 %7550, %v3569_v55   ;;  %v11616_v55 = vunpack.i.l.bf16 %v7683_v59 }
 0x50e   : > { %4190 = vperm.xlu2 %7549, %v3570_v12   ;;  %4261 = vperm.xlu1 %7548, %v3579_v60  }
 0x511   : > { %4281 = vperm.xlu0 %7550, %v3583_v21   ;;  %v11622_v21 = vunpack.i.h.bf16 %v7683_v59 }
 0x516   : > { %4286 = vperm.xlu2 %7549, %v3584_v47   ;;  %4180 = vperm.xlu1 %7548, %v3568_v23   ;;  %v11628_v23 = vpop.permute.xlu2 %7712 }
 0x519   : > { %4200 = vperm.xlu0 %7550, %v3572_v31  }
 0x51b   : > { %v11576_v1 = vpop.permute.xlu0 %3853 }
 0x51c   : > { %v3861_v51 = vsel %vm14011_vm1, %v3852_v24, %v11576_v1  ;;  %vm14017_vm1 = vcmask 1039360  }
 0x51d   : > { %7228 = vmatpush.msk.msra.mxu2 %vm14012_vm8, %v3861_v51  ;;  %vm14018_vm8 = vmmov %vm14014_vm4 }
 0x51e   : > { %4205 = vperm.xlu2 %7549, %v3573_v15   ;;  %4276 = vperm.xlu1 %7548, %v3582_v58  }
 0x520   : > { %v7673_v28 = vpop.permute.xlu1 %7672 }
 0x521   : > { %v7674_v18 = vunpack.i.l.bf16 %v7673_v28  ;;  %4296 = vperm.xlu0 %7550, %v3586_v43   ;;  %v11594_v37 = vunpack.i.h.bf16 %v7673_v28  ;;  %v7700_v43 = vunpack.i.h.bf16 %v11591_v17 }
 0x523   : > { %v7703_v40 = vpop.permute.xlu0 %7702  ;;  %v3877_v36 = vsel %vm14013_vm9, %v7674_v18, %v7670_v6  ;;  %vm14019_vm9 = vcmask 1041408  }
 0x524   : > { %v7704_v25 = vunpack.i.l.bf16 %v7703_v40  ;;  %4039 = vmatpush.msrb.mxu0 %v3877_v36  ;;  %7437 = vmatpush.msra.mxu3 %v3877_v36  ;;  %v7705_v45 = vunpack.i.h.bf16 %v7703_v40  ;;  %v3574_v36 = vld [vmem:[%s13114_s8 + $0x60] sm:$0xf] }
 0x526   : > { %4040 = vmatpush.msrb.mxu0 %v11594_v37  ;;  %7438 = vmatpush.msra.mxu3 %v11594_v37  ;;  %v3734_v44 = vsel %vm14014_vm4, %v7704_v25, %v11516_v42  ;;  %v3733_v32 = vsel %vm14015_vm14, %v7705_v45, %v11518_v20  ;;  %v3585_v20 = vld [vmem:[%s13115_s9 + $0x50] sm:$0xff]  ;;  %vm14020_vm4 = vcmask 1043456   ;;  %vm14021_vm14 = vcmask 1014784  }
 0x527   : > { %4301 = vperm.xlu2 %7549, %v3587_v56   ;;  %4195 = vperm.xlu1 %7548, %v3571_v57   ;;  %v7728_v56 = vpop.permute.xlu2 %7727  ;;  %v7715_v57 = vunpack.i.h.bf16 %v11628_v23 }
 0x528   : > { %3924 = vmatpush.msrb.mxu1 %v3734_v44  ;;  %4041 = vmatpush.msrb.mxu0 %v11602_v10  ;;  %v11611_v34 = vpop.permute.xlu1 %7687 }
 0x529   : > { %7439 = vmatpush.msra.mxu3 %v11602_v10  ;;  %v7690_v12 = vunpack.i.h.bf16 %v11611_v34  ;;  %v7689_v42 = vunpack.i.l.bf16 %v11611_v34 }
 0x52a   : > { %3925 = vmatpush.msrb.mxu1 %v3733_v32  ;;  %4042 = vmatpush.msrb.mxu0 %v11608_v19 }
 0x52b   : > { %7440 = vmatpush.msra.mxu3 %v11608_v19  ;;  %v7718_v60 = vpop.permute.xlu0 %7717  ;;  %v3662_v59 = vsel %vm14017_vm1, %v7690_v12, %v7674_v18  ;;  %v3875_v15 = vsel %vm14019_vm9, %v11379_v2, %v7689_v42 }
 0x52c   : > { %v7720_v39 = vunpack.i.h.bf16 %v7718_v60  ;;  %v7719_v47 = vunpack.i.l.bf16 %v7718_v60  ;;  %4043 = vmatpush.msrb.mxu0 %v11616_v55 }
 0x52d   : > { %7441 = vmatpush.msra.mxu3 %v11616_v55 }
 0x52e   : > { %4044 = vmatpush.msrb.mxu0 %v11622_v21  ;;  %v3732_v31 = vsel %vm14016_vm12, %v7719_v47, %v11536_v33  ;;  %v3731_v24 = vsel %vm14018_vm8, %v7720_v39, %v7670_v6  ;;  %v7699_v33 = vunpack.i.l.bf16 %v11591_v17  ;;  %vm14022_vm12 = vmmov %vm14021_vm14 }
 0x52f   : > { %7442 = vmatpush.msra.mxu3 %v11622_v21  ;;  %4291 = vperm.xlu1 %7548, %v3585_v20   ;;  %v3876_v58 = vsel %vm14020_vm4, %v3662_v59, %v3731_v24  ;;  %vm14023_vm8 = vmmov %vm14017_vm1 }
 0x530   : > { %3926 = vmatpush.msrb.mxu1 %v3732_v31  ;;  %v7693_v51 = vpop.permute.xlu1 %7692  ;;  %4045 = vmatpush.msrb.mxu0 %v3875_v15  ;;  %v3859_v25 = vsel %vm14022_vm12, %v7699_v33, %v7700_v43  ;;  %vm14024_vm9 = vmmov %vm14022_vm12  ;;  %v7729_v31 = vunpack.i.l.bf16 %v7728_v56 }
 0x531   : > { %v7695_v28 = vunpack.i.h.bf16 %v7693_v51  ;;  %v7694_v18 = vunpack.i.l.bf16 %v7693_v51  ;;  %7443 = vmatpush.msra.mxu3 %v3875_v15  ;;  %vm14025_vm4 = vmmov %vm14024_vm9 }
 0x532   : > { %3927 = vmatpush.msrb.mxu1 %v3876_v58  ;;  %4046 = vmatpush.msrb.mxu0 %v11364_v11  ;;  %vm14027_vm12 = vmmov %vm14017_vm1 }
 0x533   : > { %7444 = vmatpush.msra.mxu3 %v11364_v11  ;;  %v7733_v6 = vpop.permute.xlu0 %7732  ;;  %v3860_v2 = vsel %vm14021_vm14, %v7694_v18, %v7695_v28  ;;  %vm14026_vm14 = vcmask 1041408  }
 0x534   : > { %v7734_v40 = vunpack.i.l.bf16 %v7733_v6  ;;  %3981 = vmatpush.msra.mxu2 %v3860_v2  ;;  %4047 = vmatpush.msrb.mxu0 %v11355_v5  ;;  %v7735_v17 = vunpack.i.h.bf16 %v7733_v6  ;;  %v11699_v6 = vld [vmem:[%s13113_s7 + $0x20] sm:$0xff] }
 0x535   : > { %7445 = vmatpush.msra.mxu3 %v11355_v5  ;;  %v7714_v5 = vunpack.i.l.bf16 %v11628_v23  ;;  %v7730_v23 = vunpack.i.h.bf16 %v7728_v56 }
 0x536   : > { %3982 = vmatpush.msra.mxu2 %v3859_v25  ;;  %4048 = vmatpush.msrb.mxu0 %v11346_v14  ;;  %v3661_v11 = vsel %vm14017_vm1, %v7734_v40, %v11594_v37  ;;  %v3660_v12 = vsel %vm14023_vm8, %v7735_v17, %v11602_v10  ;;  %vm14028_vm8 = vmmov %vm14025_vm4 }
 0x537   : > { %4210 = vperm.xlu1 %7548, %v3574_v36   ;;  %7446 = vmatpush.msra.mxu3 %v11346_v14  ;;  %v11667_v14 = vld [vmem:[%s13113_s7] sm:$0xff]  ;;  %v11709_v36 = vld [vmem:[%s13113_s7 + $0x30] sm:$0xff] }
 0x538   : > { %3928 = vmatpush.msrb.mxu1 %v3661_v11  ;;  %v7708_v45 = vpop.permute.xlu1 %7707  ;;  %4049 = vmatpush.msrb.mxu0 %v11336_v0 }
 0x539   : > { %v7710_v44 = vunpack.i.h.bf16 %v7708_v45  ;;  %v7709_v32 = vunpack.i.l.bf16 %v7708_v45  ;;  %7447 = vmatpush.msra.mxu3 %v11336_v0  ;;  %v3857_v0 = vsel %vm14025_vm4, %v7714_v5, %v7715_v57 }
 0x53a   : > { %3929 = vmatpush.msrb.mxu1 %v3660_v12  ;;  %4050 = vmatpush.msrb.mxu0 %v11330_v54  ;;  %v11726_v12 = vld [vmem:[%s13113_s7 + $0x40] sm:$0xff] }
 0x53b   : > { %7448 = vmatpush.msra.mxu3 %v11330_v54  ;;  %v7743_v37 = vpop.permute.xlu0 %7742  ;;  %v3858_v60 = vsel %vm14024_vm9, %v7709_v32, %v7710_v44  ;;  %vm14029_vm9 = vmmov %vm14025_vm4 }
 0x53c   : > { %v7745_v39 = vunpack.i.h.bf16 %v7743_v37  ;;  %v7744_v47 = vunpack.i.l.bf16 %v7743_v37  ;;  %3983 = vmatpush.msra.mxu2 %v3858_v60  ;;  %4051 = vmatpush.msrb.mxu0 %v11328_v26  ;;  %vm14030_vm4 = vmmov %vm14017_vm1 }
 0x53d   : > { %7449 = vmatpush.msra.mxu3 %v11328_v26  ;;  %4052 = vmatmul.f32.vlgmr.msrb.gmra.mxu0 %v11667_v14  ;;  %v7738_v26 = vpop.permute.xlu2 %7737 }
 0x53e   : > { %7242 = vmatpush.msk.msra.mxu0 %vm14026_vm14, %v11576_v1  ;;  %3984 = vmatpush.msra.mxu2 %v3857_v0  ;;  %v3659_v54 = vsel %vm14027_vm12, %v7744_v47, %v11608_v19  ;;  %v3658_v20 = vsel %vm14017_vm1, %v7745_v39, %v11616_v55  ;;  %v11684_v1 = vld [vmem:[%s13113_s7 + $0x10] sm:$0xff]  ;;  %v3855_v55 = vsel %vm14029_vm9, %v7729_v31, %v7730_v23  ;;  %vm14031_vm14 = vmmov %vm14017_vm1  ;;  %vm14032_vm12 = vcmask 1041408  }
 0x53f   : > { %3930 = vmatpush.msrb.mxu1 %v3659_v54  ;;  %vm14033_vm1 = vcmask 1022976  }
 0x540   : > { %4093 = vmatpush.msra.mxu0 %v7695_v28  ;;  %v7723_v10 = vpop.permute.xlu1 %7722  ;;  %vm14035_vm9 = vmmov %vm14033_vm1 }
 0x541   : > { %v7725_v59 = vunpack.i.h.bf16 %v7723_v10  ;;  %v7724_v24 = vunpack.i.l.bf16 %v7723_v10  ;;  %3931 = vmatpush.msrb.mxu1 %v3658_v20 }
 0x542   : > { %4094 = vmatpush.msra.mxu0 %v7700_v43 }
 0x543   : > { %v7758_v15 = vpop.permute.xlu0 %7757  ;;  %v3856_v19 = vsel %vm14028_vm8, %v7724_v24, %v7725_v59  ;;  %vm14034_vm8 = vmmov %vm14033_vm1 }
 0x544   : > { %v7760_v58 = vunpack.i.h.bf16 %v7758_v15  ;;  %v7759_v51 = vunpack.i.l.bf16 %v7758_v15  ;;  %4095 = vmatpush.msra.mxu0 %v7710_v44  ;;  %3985 = vmatpush.msra.mxu2 %v3856_v19  ;;  %v3537_v15 = vld [vmem:[%s13113_s7 + $0x8] sm:$0xff] }
 0x545   : > { %4055 = vmatmul.f32.gmra.mxu0 %v11684_v1  ;;  %v7753_v2 = vpop.permute.xlu2 %7752 }
 0x546   : > { %4096 = vmatpush.msra.mxu0 %v7715_v57  ;;  %3986 = vmatpush.msra.mxu2 %v3855_v55  ;;  %v3657_v43 = vsel %vm14030_vm4, %v7759_v51, %v11622_v21  ;;  %v3656_v33 = vsel %vm14031_vm14, %v7760_v58, %v7689_v42  ;;  %v7739_v42 = vunpack.i.l.bf16 %v7738_v26  ;;  %v7754_v25 = vunpack.i.l.bf16 %v7753_v2  ;;  %vm14036_vm4 = vmmov %vm14033_vm1  ;;  %v3548_v55 = vld [vmem:[%s13113_s7 + $0x60] sm:$0xff]  ;;  %v4652_v51 = vld [vmem:[%s13116_s10 + $0x58] sm:$0xff] }
 0x547   : > { %3932 = vmatpush.msrb.mxu1 %v3657_v43  ;;  %v3874_v28 = vsel %vm14032_vm12, %v11370_v48, %v3656_v33  ;;  %v7740_v48 = vunpack.i.h.bf16 %v7738_v26  ;;  %vm14037_vm14 = vcmp.eq.s32.totalorder %v13739_v27, %v13740_v3  ;;  %vm14038_vm12 = vmmov %vm14033_vm1  ;;  %v4650_v43 = vld [vmem:[%s13116_s10 + $0x48] sm:$0xff]  ;;  %v4656_v33 = vld [vmem:[%s13116_s10 + $0x78] sm:$0xff] }
 0x548   : > { %4097 = vmatpush.msra.mxu0 %v7725_v59  ;;  %v7748_v18 = vpop.permute.xlu1 %7747 }
 0x549   : > { %3933 = vmatpush.msrb.mxu1 %v3874_v28  ;;  %v7750_v17 = vunpack.i.h.bf16 %v7748_v18  ;;  %v3539_v28 = vld [vmem:[%s13113_s7 + $0x18] sm:$0xff] }
 0x54a   : > { %4098 = vmatpush.msra.mxu0 %v7730_v23 }
 0x54b   : > { %3934 = vmatpush.msrb.mxu1 %v11406_v63  ;;  %v7749_v63 = vunpack.i.l.bf16 %v7748_v18  ;;  %v7788_v56 = vpop.permute.xlu0 %7787  ;;  %v4654_v18 = vld [vmem:[%s13116_s10 + $0x68] sm:$0xff] }
 0x54c   : > { %v7790_v60 = vunpack.i.h.bf16 %v7788_v56  ;;  %v7789_v39 = vunpack.i.l.bf16 %v7788_v56 }
 0x54d   : > { %3935 = vmatpush.msrb.mxu1 %v11391_v49  ;;  %4058 = vmatmul.f32.gmra.mxu0 %v11699_v6  ;;  %v7773_v11 = vpop.permute.xlu2 %7772  ;;  %v3810_v57 = vsel %vm14035_vm9, %v7749_v63, %v7750_v17  ;;  %vm14041_vm9 = vcmp.eq.s32.totalorder %v13744_v7, %v13740_v3  ;;  %v3546_v7 = vld [vmem:[%s13113_s7 + $0x50] sm:$0xff]  ;;  %v3553_v63 = vld [vmem:[%s13113_s7 + $0x88] sm:$0xff] }
 0x54e   : > { %v7775_v5 = vunpack.i.h.bf16 %v7773_v11  ;;  %v7774_v44 = vunpack.i.l.bf16 %v7773_v11 }
 0x54f   : > { %3936 = vmatpush.msrb.mxu1 %v11368_v4  ;;  %v7755_v4 = vunpack.i.h.bf16 %v7753_v2  ;;  %v3541_v2 = vld [vmem:[%s13113_s7 + $0x28] sm:$0xff] }
 0x550   : > { %v7763_v34 = vpop.permute.xlu1 %7762 }
 0x551   : > { %v7765_v21 = vunpack.i.h.bf16 %v7763_v34  ;;  %v7764_v40 = vunpack.i.l.bf16 %v7763_v34  ;;  %3937 = vmatpush.msrb.mxu1 %v11375_v29  ;;  %v3811_v29 = vsel %vm14034_vm8, %v7739_v42, %v7740_v48  ;;  %v3809_v45 = vsel %vm14036_vm4, %v7754_v25, %v7755_v4  ;;  %vm14040_vm8 = vmmov %vm14036_vm4  ;;  %v3543_v34 = vld [vmem:[%s13113_s7 + $0x38] sm:$0xff]  ;;  %v3554_v42 = vld [vmem:[%s13113_s7 + $0x90] sm:$0xff] }
 0x552   : > { %v3807_v27 = vsel %vm14040_vm8, %v7774_v44, %v7775_v5  ;;  %vm14042_vm4 = vcmp.eq.s32.totalorder %v13746_v62, %v13740_v3  ;;  %4079 = vmatmul.f32.vlgmr.msra.gmra.mxu3 %v3554_v42  ;;  %v3557_v25 = vld [vmem:[%s13113_s7 + $0xa8] sm:$0xff] }
 0x553   : > { %3938 = vmatpush.msrb.mxu1 %v11383_v41  ;;  %4099 = vmatpush.msra.mxu0 %v7765_v21  ;;  %v3812_v49 = vsel %vm14033_vm1, %v7764_v40, %v7765_v21  ;;  %vm14039_vm1 = vcmp.eq.s32.totalorder %v13742_v9, %v13740_v3  ;;  %v7793_v47 = vpop.permute.xlu0 %7792  ;;  %v3549_v21 = vld [vmem:[%s13113_s7 + $0x68] sm:$0xff]  ;;  %v3556_v40 = vld [vmem:[%s13113_s7 + $0xa0] sm:$0xff] }
 0x554   : > { %3987 = vmatpush.msra.mxu2 %v3812_v49  ;;  %v7795_v26 = vunpack.i.h.bf16 %v7793_v47  ;;  %v7794_v59 = vunpack.i.l.bf16 %v7793_v47  ;;  %v3560_v49 = vld [vmem:[%s13113_s7 + $0xc0] sm:$0xf] }
 0x555   : > { %3939 = vmatpush.msrb.mxu1 %v11409_v61  ;;  %4061 = vmatmul.f32.gmra.mxu0 %v11709_v36  ;;  %v7783_v37 = vpop.permute.xlu2 %7782 }
 0x556   : > { %4100 = vmatpush.msra.mxu0 %v7740_v48  ;;  %3988 = vmatpush.msra.mxu2 %v3811_v29  ;;  %v7785_v10 = vunpack.i.h.bf16 %v7783_v37  ;;  %v7784_v20 = vunpack.i.l.bf16 %v7783_v37  ;;  %v3547_v48 = vld [vmem:[%s13113_s7 + $0x58] sm:$0xff] }
 0x557   : > { %3940 = vmatmul.f32.vlgmr.msrb.gmra.mxu1 %v11667_v14  ;;  %v3559_v29 = vld [vmem:[%s13113_s7 + $0xb8] sm:$0xff] }
 0x558   : > { %4101 = vmatpush.msra.mxu0 %v7750_v17  ;;  %v7768_v41 = vpop.permute.xlu1 %7767  ;;  %3989 = vmatpush.msra.mxu2 %v3810_v57  ;;  %v3558_v17 = vld [vmem:[%s13113_s7 + $0xb0] sm:$0xff]  ;;  %v3561_v57 = vld [vmem:[%s13113_s7 + $0xc8] sm:$0xf] }
 0x559   : > { %v7770_v32 = vunpack.i.h.bf16 %v7768_v41  ;;  %v7769_v61 = vunpack.i.l.bf16 %v7768_v41  ;;  %7282 = vmatpush.msk.msra.mxu1 %vm14037_vm14, %v13597_v46  ;;  %vm14043_vm14 = vcmp.eq.s32.totalorder %v13749_v35, %v13740_v3 }
 0x55a   : > { %4102 = vmatpush.msra.mxu0 %v7755_v4  ;;  %3990 = vmatpush.msra.mxu2 %v3809_v45  ;;  %v3555_v4 = vld [vmem:[%s13113_s7 + $0x98] sm:$0xff] }
 0x55b   : > { %v3808_v14 = vsel %vm14038_vm12, %v7769_v61, %v7770_v32  ;;  %7283 = vmatpush.msk.msra.mxu1 %vm14039_vm1, %v13597_v46  ;;  %vm14044_vm12 = vcmask 1045504   ;;  %vm14045_vm1 = vcmask 1031168   ;;  %4082 = vmatmul.f32.gmra.mxu3 %v3556_v40 }
 0x55c   : > { %4103 = vmatpush.msra.mxu0 %v7770_v32  ;;  %3991 = vmatpush.msra.mxu2 %v3808_v14  ;;  %v3737_v31 = vsel %vm14045_vm1, %v7789_v39, %v7790_v60 }
 0x55d   : > { %4064 = vmatmul.f32.gmra.mxu0 %v11726_v12  ;;  %7284 = vmatpush.msk.msra.mxu1 %vm14041_vm9, %v13597_v46  ;;  %vm14046_vm9 = vmmov %vm14044_vm12 }
 0x55e   : > { %4104 = vmatpush.msra.mxu0 %v7775_v5  ;;  %3992 = vmatpush.msra.mxu2 %v3807_v27 }
 0x55f   : > { %3943 = vmatmul.f32.gmra.mxu1 %v11684_v1  ;;  %v4789_v1 = vld [vmem:[%s13118_s12 + $0xb8] sm:$0xff] }
 0x560   : > { %v7778_v9 = vpop.permute.xlu1 %7777  ;;  %7285 = vmatpush.msk.msra.mxu1 %vm14042_vm4, %v13597_v46  ;;  %vm14047_vm4 = vcmp.eq.s32.totalorder %v13751_v16, %v13740_v3 }
 0x561   : > { %v7780_v0 = vunpack.i.h.bf16 %v7778_v9  ;;  %v7779_v54 = vunpack.i.l.bf16 %v7778_v9  ;;  %v4242_v9 = vpop.permute.xlu2 %4241 }
 0x562   : > { %7286 = vmatpush.msk.msra.mxu1 %vm14043_vm14, %v13597_v46  ;;  %vm14048_vm14 = vmmov %vm14045_vm1  ;;  %vm14050_vm1 = vcmp.eq.s32.totalorder %v13614_v53, %v13740_v3  ;;  %v4765_v53 = vld [vmem:[%s13117_s11 + $0xc0] sm:$0xff] }
 0x563   : > { %v3879_v23 = vsel %vm14044_vm12, %v7790_v60, %v7780_v0  ;;  %v3806_v62 = vsel %vm14040_vm8, %v7779_v54, %v7780_v0  ;;  %v3736_v35 = vsel %vm14048_vm14, %v7784_v20, %v7785_v10  ;;  %vm3880_vm12 = vcmask 998400   ;;  %vm14051_vm8 = vmmov %vm14048_vm14  ;;  %4085 = vmatmul.f32.gmra.mxu3 %v3558_v17 }
 0x564   : > { %4105 = vmatpush.msra.mxu0 %v3879_v23  ;;  %v3878_v24 = vsel %vm14046_vm9, %v3737_v31, %v3806_v62  ;;  %7287 = vmatpush.msk.msra.mxu1 %vm14047_vm4, %v13597_v46  ;;  %v6565_v19 = vsel %vm14050_vm1, 1.0, %v13654_v52  ;;  %v3735_v58 = vsel %vm14051_vm8, %v7794_v59, %v7795_v26  ;;  %vm14054_vm9 = vcmask 1044480   ;;  %v4156_v31 = vpop.permute.xlu0 %4155 }
 0x565   : > { %3993 = vmatpush.msra.mxu2 %v3878_v24  ;;  %4067 = vmatmul.f32.gmra.mxu0 %v3546_v7  ;;  %vm14056_vm4 = vcmp.eq.s32.totalorder %v13692_v38, %v13740_v3  ;;  %vm14058_vm14 = vcmp.eq.s32.totalorder %v13621_v8, %v13740_v3  ;;  %vm14060_vm1 = vcmp.eq.s32.totalorder %v13919_v50, %v13740_v3  ;;  %v3550_v38 = vld [vmem:[%s13113_s7 + $0x70] sm:$0xff]  ;;  %v4658_v50 = vld [vmem:[%s13116_s10 + $0x88] sm:$0xff] }
 0x566   : > { %4106 = vmatpush.msra.mxu0 %v7785_v10  ;;  %7288 = vmatpush.msk.msra.mxu1 %vm8582_vm6, %v13597_v46  ;;  %vm14062_vm8 = vcmp.eq.s32.totalorder %v13928_v13, %v13740_v3  ;;  %v4655_v8 = vld [vmem:[%s13116_s10 + $0x70] sm:$0xff]  ;;  %v4664_v13 = vld [vmem:[%s13116_s10 + $0xb8] sm:$0xff] }
 0x567   : > { %3994 = vmatpush.msra.mxu2 %v3736_v35  ;;  %3946 = vmatmul.f32.gmra.mxu1 %v11699_v6  ;;  %v4685_v6 = vld [vmem:[%s13116_s10 + $0x160] sm:$0xff] }
 0x568   : > { %4107 = vmatpush.msra.mxu0 %v7795_v26  ;;  %7289 = vmatpush.msk.msra.mxu1 %vm8606_vm7, %v13597_v46  ;;  %v4151_v60 = vpop.permute.xlu1 %4150 }
 0x569   : > { %3995 = vmatpush.msra.mxu2 %v3735_v58 }
 0x56a   : > { %7229 = vmatmul.msk.f32.vlgmr.msra.gmra.mxu2 %vm3880_vm12, %v3537_v15  ;;  %7290 = vmatpush.msk.msra.mxu1 %vm8633_vm0, %v13597_v46 }
 0x56b   : > { %7298 = vmatpush.msk.msrb.mxu2 %vm14054_vm9, %v6565_v19  ;;  %vm14064_vm9 = vcmp.eq.s32.totalorder %v13934_v30, %v13740_v3  ;;  %v3552_v30 = vld [vmem:[%s13113_s7 + $0x80] sm:$0xff]  ;;  %4088 = vmatmul.f32.gmra.mxu3 %v3560_v49 }
 0x56c   : > { %7291 = vmatpush.msk.msra.mxu1 %vm8663_vm15, %v13597_v46 }
 0x56d   : > { %4070 = vmatmul.f32.gmra.mxu0 %v3548_v55  ;;  %7299 = vmatpush.msk.msrb.mxu2 %vm14056_vm4, %v13597_v46  ;;  %vm14066_vm4 = vcmp.eq.s32.totalorder %v13943_v22, %v13740_v3  ;;  %v3545_v22 = vld [vmem:[%s13113_s7 + $0x48] sm:$0xff] }
 0x56e   : > { %7292 = vmatpush.msk.msra.mxu1 %vm8693_vm3, %v13597_v46 }
 0x56f   : > { %3949 = vmatmul.f32.gmra.mxu1 %v11709_v36  ;;  %7300 = vmatpush.msk.msrb.mxu2 %vm14058_vm14, %v13597_v46  ;;  %v3551_v36 = vld [vmem:[%s13113_s7 + $0x78] sm:$0xff] }
 0x570   : > { %7293 = vmatpush.msk.msra.mxu1 %vm8723_vm5, %v13597_v46  ;;  %v4247_v26 = vpop.permute.xlu1 %4246 }
 0x571   : > { %7301 = vmatpush.msk.msrb.mxu2 %vm14060_vm1, %v13597_v46 }
 0x572   : > { %7230 = vmatmul.msk.f32.gmra.mxu2 %vm3880_vm12, %v3539_v28  ;;  %7294 = vmatpush.msk.msra.mxu1 %vm13762_vm10, %v13597_v46 }
 0x573   : > { %7302 = vmatpush.msk.msrb.mxu2 %vm14062_vm8, %v13597_v46  ;;  %vm4486_vm8 = vcmask 433152  }
 0x574   : > { %7295 = vmatpush.msk.msra.mxu1 %vm13764_vm11, %v13597_v46 }
 0x575   : > { %4073 = vmatmul.f32.gmra.mxu0 %v3550_v38  ;;  %7303 = vmatpush.msk.msrb.mxu2 %vm14064_vm9, %v13597_v46 }
 0x576   : > { %7296 = vmatpush.msk.msra.mxu1 %vm13766_vm13, %v13597_v46 }
 0x577   : > { %3952 = vmatmul.f32.gmra.mxu1 %v11726_v12  ;;  %7304 = vmatpush.msk.msrb.mxu2 %vm14066_vm4, %v13597_v46 }
 0x578   : > { %7297 = vmatpush.msk.msra.mxu1 %vm13768_vm2, %v13597_v46 }
 0x57a   : > { %7231 = vmatmul.msk.f32.gmra.mxu2 %vm3880_vm12, %v3541_v2 }
 0x57d   : > { %4076 = vmatmul.f32.gmra.mxu0 %v3552_v30 }
 0x57f   : > { %3955 = vmatmul.f32.gmra.mxu1 %v3546_v7 }
 0x582   : > { %7232 = vmatmul.msk.f32.gmra.mxu2 %vm3880_vm12, %v3543_v34 }
 0x585   : > { %7243 = vmatmul.msk.f32.vlgmr.msra.gmra.mxu0 %vm3880_vm12, %v3537_v15 }
 0x587   : > { %3958 = vmatmul.f32.gmra.mxu1 %v3548_v55 }
 0x58a   : > { %7233 = vmatmul.msk.f32.gmra.mxu2 %vm3880_vm12, %v3545_v22 }
 0x58d   : > { %7244 = vmatmul.msk.f32.gmra.mxu0 %vm3880_vm12, %v3539_v28 }
 0x58f   : > { %3961 = vmatmul.f32.gmra.mxu1 %v3550_v38  ;;  %v4161_v38 = vpop.permute.xlu2 %4160 }
 0x592   : > { %7234 = vmatmul.msk.f32.gmra.mxu2 %vm3880_vm12, %v3547_v48 }
 0x595   : > { %7245 = vmatmul.msk.f32.gmra.mxu0 %vm3880_vm12, %v3541_v2 }
 0x597   : > { %3964 = vmatmul.f32.gmra.mxu1 %v3552_v30 }
 0x59a   : > { %7235 = vmatmul.msk.f32.gmra.mxu2 %vm3880_vm12, %v3549_v21 }
 0x59d   : > { %7246 = vmatmul.msk.f32.gmra.mxu0 %vm3880_vm12, %v3543_v34  ;;  %v4252_v34 = vpop.permute.xlu0 %4251 }
 0x59f   : > { %3967 = vmatmul.f32.gmra.mxu1 %v3554_v42 }
 0x5a2   : > { %7236 = vmatmul.msk.f32.gmra.mxu2 %vm3880_vm12, %v3551_v36 }
 0x5a5   : > { %7247 = vmatmul.msk.f32.gmra.mxu0 %vm3880_vm12, %v3545_v22 }
 0x5a7   : > { %3970 = vmatmul.f32.gmra.mxu1 %v3556_v40 }
 0x5aa   : > { %7237 = vmatmul.msk.f32.gmra.mxu2 %vm3880_vm12, %v3553_v63 }
 0x5ad   : > { %7248 = vmatmul.msk.f32.gmra.mxu0 %vm3880_vm12, %v3547_v48 }
 0x5af   : > { %3973 = vmatmul.f32.gmra.mxu1 %v3558_v17 }
 0x5b2   : > { %7238 = vmatmul.msk.f32.gmra.mxu2 %vm3880_vm12, %v3555_v4 }
 0x5b5   : > { %7249 = vmatmul.msk.f32.gmra.mxu0 %vm3880_vm12, %v3549_v21 }
 0x5b7   : > { %3976 = vmatmul.f32.gmra.mxu1 %v3560_v49 }
 0x5ba   : > { %7239 = vmatmul.msk.f32.gmra.mxu2 %vm3880_vm12, %v3557_v25  ;;  %v4053_v11 = vpop.f32.mrf.mxu0 }
 0x5bd   : > { %7250 = vmatmul.msk.f32.gmra.mxu0 %vm3880_vm12, %v3551_v36 }
 0x5c2   : > { %7240 = vmatmul.msk.f32.gmra.mxu2 %vm3880_vm12, %v3559_v29  ;;  %v11900_v56 = vpop.f32.mrf.mxu0 }
 0x5c5   : > { %7251 = vmatmul.msk.f32.gmra.mxu0 %vm3880_vm12, %v3553_v63 }
 0x5ca   : > { %7241 = vmatmul.msk.f32.gmra.mxu2 %vm3880_vm12, %v3561_v57  ;;  %v11907_v41 = vpop.f32.mrf.mxu0 }
 0x5cd   : > { %7252 = vmatmul.msk.f32.gmra.mxu0 %vm3880_vm12, %v3555_v4 }
 0x5d2   : > { %v11910_v45 = vpop.f32.mrf.mxu0 }
 0x5d4   : > { %v3941_v5 = vpop.f32.mrf.mxu1 }
 0x5d5   : > { %7253 = vmatmul.msk.f32.gmra.mxu0 %vm3880_vm12, %v3557_v25 }
 0x5da   : > { %v11913_v44 = vpop.f32.mrf.mxu0 }
 0x5dc   : > { %v3944_v32 = vpop.f32.mrf.mxu1 }
 0x5dd   : > { %7254 = vmatmul.msk.f32.gmra.mxu0 %vm3880_vm12, %v3559_v29  ;;  %v11925_v29 = vpop.permute.xlu1 %4165 }
 0x5e2   : > { %v11916_v61 = vpop.f32.mrf.mxu0 }
 0x5e4   : > { %v3947_v12 = vpop.f32.mrf.mxu1 }
 0x5e5   : > { %7255 = vmatmul.msk.f32.gmra.mxu0 %vm3880_vm12, %v3561_v57 }
 0x5ea   : > { %v11919_v14 = vpop.f32.mrf.mxu0 }
 0x5ec   : > { %v3950_v47 = vpop.f32.mrf.mxu1 }
 0x5ed   : > { %v3997_v27 = vpop.f32.mrf.mxu2 }
 0x5ee   : > { %v3998_v37 = vadd.f32 %v3997_v27, %v3941_v5 }
 0x5f0   : > { %v4213_v39 = vmul.f32 %v4151_v60, %v3998_v37 }
 0x5f2   : > { %v4304_v0 = vadd.f32 %v4242_v9, %v4213_v39  ;;  %v11921_v54 = vpop.f32.mrf.mxu0 }
 0x5f4   : > { %v4356_v10 = vmin.f32 %v4304_v0, 0.0  ;;  %v3953_v35 = vpop.f32.mrf.mxu1  ;;  %vm4330_vm12 = vcmp.gt.f32.partialorder %v4304_v0, 0.0 }
 0x5f5   : > { %v4000_v20 = vpop.f32.mrf.mxu2 }
 0x5f6   : > { %v4382_v7 = vmul.f32 1.442695, %v4356_v10  ;;  %v4001_v23 = vadd.f32 %v4000_v20, %v3944_v32 }
 0x5f8   : > { %8006 = vpow2.f32 %v4382_v7  ;;  %v4215_v62 = vmul.f32 %v4156_v31, %v4001_v23 }
 0x5fa   : > { %v4306_v59 = vadd.f32 %v4247_v26, %v4215_v62  ;;  %v11923_v24 = vpop.f32.mrf.mxu0  ;;  %v11932_v62 = vpop.permute.xlu0 %4170 }
 0x5fc   : > { %v4358_v15 = vmin.f32 %v4306_v59, 0.0  ;;  %v3956_v63 = vpop.f32.mrf.mxu1  ;;  %vm4332_vm14 = vcmp.gt.f32.partialorder %v4306_v59, 0.0 }
 0x5fd   : > { %v4003_v19 = vpop.f32.mrf.mxu2 }
 0x5fe   : > { %v8007_v58 = vpop.eup %8006  ;;  %v4004_v55 = vadd.f32 %v4003_v19, %v3947_v12  ;;  %v4386_v28 = vmul.f32 1.442695, %v4358_v15  ;;  %v11928_v12 = vpop.permute.xlu2 %4256 }
 0x5ff   : > { %v7256_v2 = vadd.f32 -1.0, %v8007_v58 }
 0x600   : > { %v4217_v30 = vmul.f32 %v4161_v38, %v4004_v55  ;;  %8008 = vpow2.f32 %v4386_v28  ;;  %v11935_v55 = vpop.permute.xlu1 %4261 }
 0x601   : > { %v4460_v22 = vsel %vm4330_vm12, %v4304_v0, %v7256_v2 }
 0x602   : > { %v4308_v48 = vadd.f32 %v4252_v34, %v4217_v30  ;;  %v4109_v42 = vpop.f32.mrf.mxu0  ;;  %4545 = vmatmul.f32.vlgmr.msra.gmra.mxu1 %v4460_v22 }
 0x603   : > { %v4110_v21 = vadd.f32 %v4109_v42, %v4053_v11 }
 0x604   : > { %v4360_v40 = vmin.f32 %v4308_v48, 0.0  ;;  %v3959_v58 = vpop.f32.mrf.mxu1  ;;  %vm4334_vm1 = vcmp.gt.f32.partialorder %v4308_v48, 0.0 }
 0x605   : > { %v4214_v36 = vmul.f32 %v4151_v60, %v4110_v21  ;;  %v4006_v17 = vpop.f32.mrf.mxu2 }
 0x606   : > { %v8009_v49 = vpop.eup %8008  ;;  %v4007_v4 = vadd.f32 %v4006_v17, %v3950_v47  ;;  %v4390_v25 = vmul.f32 1.442695, %v4360_v40 }
 0x607   : > { %v4305_v57 = vadd.f32 %v4242_v9, %v4214_v36  ;;  %v7258_v5 = vadd.f32 -1.0, %v8009_v49 }
 0x608   : > { %v4219_v32 = vmul.f32 %v11925_v29, %v4007_v4  ;;  %8010 = vpow2.f32 %v4390_v25 }
 0x609   : > { %v4357_v27 = vmin.f32 %v4305_v57, 0.0  ;;  %v4462_v37 = vsel %vm4332_vm14, %v4306_v59, %v7258_v5  ;;  %vm4331_vm9 = vcmp.gt.f32.partialorder %v4305_v57, 0.0 }
 0x60a   : > { %v4310_v11 = vadd.f32 %v11928_v12, %v4219_v32  ;;  %v4112_v60 = vpop.f32.mrf.mxu0  ;;  %4548 = vmatmul.f32.gmra.mxu1 %v4462_v37  ;;  %v11943_v32 = vpop.permute.xlu0 %4266 }
 0x60b   : > { %v4384_v39 = vmul.f32 1.442695, %v4357_v27  ;;  %v4113_v47 = vadd.f32 %v4112_v60, %v11900_v56 }
 0x60c   : > { %v4362_v0 = vmin.f32 %v4310_v11, 0.0  ;;  %vm4336_vm4 = vcmp.gt.f32.partialorder %v4310_v11, 0.0  ;;  %v3962_v37 = vpop.f32.mrf.mxu1 }
 0x60d   : > { %8012 = vpow2.f32 %v4384_v39  ;;  %v4216_v10 = vmul.f32 %v4156_v31, %v4113_v47  ;;  %v4009_v9 = vpop.f32.mrf.mxu2 }
 0x60e   : > { %v8011_v20 = vpop.eup %8010  ;;  %v4010_v7 = vadd.f32 %v4009_v9, %v3953_v35  ;;  %v4394_v23 = vmul.f32 1.442695, %v4362_v0 }
 0x60f   : > { %v4307_v15 = vadd.f32 %v4247_v26, %v4216_v10  ;;  %v7260_v19 = vadd.f32 -1.0, %v8011_v20 }
 0x610   : > { %v4221_v59 = vmul.f32 %v11932_v62, %v4010_v7  ;;  %8014 = vpow2.f32 %v4394_v23 }
 0x611   : > { %v4359_v28 = vmin.f32 %v4307_v15, 0.0  ;;  %v4464_v56 = vsel %vm4334_vm1, %v4308_v48, %v7260_v19  ;;  %v11939_v48 = vpop.permute.xlu2 %4175  ;;  %vm4333_vm12 = vcmp.gt.f32.partialorder %v4307_v15, 0.0  ;;  %v11948_v19 = vpop.permute.xlu1 %4180 }
 0x612   : > { %v4312_v2 = vadd.f32 %v11935_v55, %v4221_v59  ;;  %v4115_v31 = vpop.f32.mrf.mxu0  ;;  %4551 = vmatmul.f32.gmra.mxu1 %v4464_v56 }
 0x613   : > { %v8013_v30 = vpop.eup %8012  ;;  %v4116_v35 = vadd.f32 %v4115_v31, %v11907_v41  ;;  %v4388_v22 = vmul.f32 1.442695, %v4359_v28 }
 0x614   : > { %v7257_v42 = vadd.f32 -1.0, %v8013_v30  ;;  %v4364_v26 = vmin.f32 %v4312_v2, 0.0  ;;  %vm4338_vm14 = vcmp.gt.f32.partialorder %v4312_v2, 0.0 }
 0x615   : > { %v4218_v21 = vmul.f32 %v4161_v38, %v4116_v35  ;;  %v4012_v40 = vpop.f32.mrf.mxu2  ;;  %8016 = vpow2.f32 %v4388_v22  ;;  %v3965_v22 = vpop.f32.mrf.mxu1 }
 0x616   : > { %v8015_v36 = vpop.eup %8014  ;;  %v4013_v17 = vadd.f32 %v4012_v40, %v3956_v63  ;;  %v4461_v49 = vsel %vm4331_vm9, %v4305_v57, %v7257_v42  ;;  %v4398_v4 = vmul.f32 1.442695, %v4364_v26 }
 0x617   : > { %v4309_v25 = vadd.f32 %v4252_v34, %v4218_v21  ;;  %7305 = vmatmul.msk.f32.vlgmr.msrb.gmra.mxu2 %vm4486_vm8, %v4461_v49  ;;  %v7262_v5 = vadd.f32 -1.0, %v8015_v36 }
 0x618   : > { %v4223_v41 = vmul.f32 %v11939_v48, %v4013_v17  ;;  %8018 = vpow2.f32 %v4398_v4  ;;  %v11958_v4 = vpop.permute.xlu0 %4185 }
 0x619   : > { %v4361_v27 = vmin.f32 %v4309_v25, 0.0  ;;  %v4466_v38 = vsel %vm4336_vm4, %v4310_v11, %v7262_v5  ;;  %v11953_v56 = vpop.permute.xlu2 %4271  ;;  %vm4335_vm1 = vcmp.gt.f32.partialorder %v4309_v25, 0.0 }
 0x61a   : > { %v4314_v60 = vadd.f32 %v11943_v32, %v4223_v41  ;;  %v4118_v63 = vpop.f32.mrf.mxu0  ;;  %4554 = vmatmul.f32.gmra.mxu1 %v4466_v38 }
 0x61b   : > { %v8017_v57 = vpop.eup %8016  ;;  %v4119_v39 = vadd.f32 %v4118_v63, %v11910_v45  ;;  %v4392_v34 = vmul.f32 1.442695, %v4361_v27  ;;  %v11963_v27 = vpop.permute.xlu1 %4276 }
 0x61c   : > { %v7259_v47 = vadd.f32 -1.0, %v8017_v57  ;;  %v4366_v0 = vmin.f32 %v4314_v60, 0.0  ;;  %vm4340_vm9 = vcmp.gt.f32.partialorder %v4314_v60, 0.0 }
 0x61d   : > { %v4220_v10 = vmul.f32 %v11925_v29, %v4119_v39  ;;  %v4015_v9 = vpop.f32.mrf.mxu2  ;;  %8020 = vpow2.f32 %v4392_v34 }
 0x61e   : > { %v8019_v20 = vpop.eup %8018  ;;  %v4016_v7 = vadd.f32 %v4015_v9, %v3959_v58  ;;  %v4463_v23 = vsel %vm4333_vm12, %v4307_v15, %v7259_v47  ;;  %v4402_v11 = vmul.f32 1.442695, %v4366_v0 }
 0x61f   : > { %v4311_v59 = vadd.f32 %v11928_v12, %v4220_v10  ;;  %7306 = vmatmul.msk.f32.gmra.mxu2 %vm4486_vm8, %v4463_v23  ;;  %v7264_v28 = vadd.f32 -1.0, %v8019_v20  ;;  %v3968_v10 = vpop.f32.mrf.mxu1 }
 0x620   : > { %v4225_v45 = vmul.f32 %v11948_v19, %v4016_v7  ;;  %8022 = vpow2.f32 %v4402_v11 }
 0x621   : > { %v4363_v29 = vmin.f32 %v4311_v59, 0.0  ;;  %v4468_v31 = vsel %vm4338_vm14, %v4312_v2, %v7264_v28  ;;  %vm4337_vm4 = vcmp.gt.f32.partialorder %v4311_v59, 0.0  ;;  %v11968_v23 = vpop.permute.xlu2 %4190 }
 0x622   : > { %v4316_v30 = vadd.f32 %v11953_v56, %v4225_v45  ;;  %v4121_v58 = vpop.f32.mrf.mxu0  ;;  %4557 = vmatmul.f32.gmra.mxu1 %v4468_v31 }
 0x623   : > { %v8021_v15 = vpop.eup %8020  ;;  %v4122_v35 = vadd.f32 %v4121_v58, %v11913_v44  ;;  %v4396_v12 = vmul.f32 1.442695, %v4363_v29 }
 0x624   : > { %v7261_v42 = vadd.f32 -1.0, %v8021_v15  ;;  %v4368_v26 = vmin.f32 %v4316_v30, 0.0  ;;  %vm4342_vm12 = vcmp.gt.f32.partialorder %v4316_v30, 0.0 }
 0x625   : > { %v4222_v21 = vmul.f32 %v11932_v62, %v4122_v35  ;;  %v4018_v40 = vpop.f32.mrf.mxu2  ;;  %8024 = vpow2.f32 %v4396_v12 }
 0x626   : > { %v8023_v36 = vpop.eup %8022  ;;  %v4019_v17 = vadd.f32 %v4018_v40, %v3962_v37  ;;  %v4465_v49 = vsel %vm4335_vm1, %v4309_v25, %v7261_v42  ;;  %v4406_v2 = vmul.f32 1.442695, %v4368_v26 }
 0x627   : > { %v4313_v5 = vadd.f32 %v11935_v55, %v4222_v21  ;;  %7307 = vmatmul.msk.f32.gmra.mxu2 %vm4486_vm8, %v4465_v49  ;;  %v7266_v44 = vadd.f32 -1.0, %v8023_v36 }
 0x628   : > { %v4227_v41 = vmul.f32 %v11958_v4, %v4019_v17  ;;  %8026 = vpow2.f32 %v4406_v2 }
 0x629   : > { %v4365_v62 = vmin.f32 %v4313_v5, 0.0  ;;  %v4470_v38 = vsel %vm4340_vm9, %v4314_v60, %v7266_v44  ;;  %vm4339_vm14 = vcmp.gt.f32.partialorder %v4313_v5, 0.0 }
 0x62a   : > { %v4318_v63 = vadd.f32 %v11963_v27, %v4227_v41  ;;  %v4124_v37 = vpop.f32.mrf.mxu0  ;;  %4560 = vmatmul.f32.gmra.mxu1 %v4470_v38 }
 0x62b   : > { %v8025_v25 = vpop.eup %8024  ;;  %v4125_v57 = vadd.f32 %v4124_v37, %v11916_v61  ;;  %v4400_v39 = vmul.f32 1.442695, %v4365_v62 }
 0x62c   : > { %v7263_v55 = vadd.f32 -1.0, %v8025_v25  ;;  %v4370_v34 = vmin.f32 %v4318_v63, 0.0  ;;  %vm4344_vm1 = vcmp.gt.f32.partialorder %v4318_v63, 0.0 }
 0x62d   : > { %v4224_v47 = vmul.f32 %v11939_v48, %v4125_v57  ;;  %v4021_v0 = vpop.f32.mrf.mxu2  ;;  %8028 = vpow2.f32 %v4400_v39  ;;  %v11973_v48 = vpop.permute.xlu0 %4281 }
 0x62e   : > { %v8027_v9 = vpop.eup %8026  ;;  %v4022_v20 = vadd.f32 %v4021_v0, %v3965_v22  ;;  %v4467_v7 = vsel %vm4337_vm4, %v4311_v59, %v7263_v55  ;;  %v4410_v60 = vmul.f32 1.442695, %v4370_v34 }
 0x62f   : > { %v4315_v11 = vadd.f32 %v11943_v32, %v4224_v47  ;;  %7308 = vmatmul.msk.f32.gmra.mxu2 %vm4486_vm8, %v4467_v7  ;;  %v7268_v61 = vadd.f32 -1.0, %v8027_v9 }
 0x630   : > { %v4229_v28 = vmul.f32 %v11968_v23, %v4022_v20  ;;  %8030 = vpow2.f32 %v4410_v60 }
 0x631   : > { %v4367_v45 = vmin.f32 %v4315_v11, 0.0  ;;  %v4472_v29 = vsel %vm4342_vm12, %v4316_v30, %v7268_v61  ;;  %v11978_v30 = vpop.permute.xlu1 %4195  ;;  %vm4341_vm9 = vcmp.gt.f32.partialorder %v4315_v11, 0.0 }
 0x632   : > { %v4320_v31 = vadd.f32 %v11973_v48, %v4229_v28  ;;  %v4127_v58 = vpop.f32.mrf.mxu0  ;;  %4563 = vmatmul.f32.gmra.mxu1 %v4472_v29 }
 0x633   : > { %v8029_v59 = vpop.eup %8028  ;;  %v4128_v15 = vadd.f32 %v4127_v58, %v11919_v14  ;;  %v4404_v35 = vmul.f32 1.442695, %v4367_v45  ;;  %v3971_v14 = vpop.f32.mrf.mxu1 }
 0x634   : > { %v7265_v32 = vadd.f32 -1.0, %v8029_v59  ;;  %v4372_v22 = vmin.f32 %v4320_v31, 0.0  ;;  %vm4346_vm4 = vcmp.gt.f32.partialorder %v4320_v31, 0.0  ;;  %v4080_v45 = vpop.f32.mrf.mxu3 }
 0x635   : > { %v4226_v12 = vmul.f32 %v11948_v19, %v4128_v15  ;;  %v4024_v42 = vpop.f32.mrf.mxu2  ;;  %8032 = vpow2.f32 %v4404_v35  ;;  %v11983_v19 = vpop.permute.xlu2 %4286 }
 0x636   : > { %v8031_v26 = vpop.eup %8030  ;;  %v4025_v21 = vadd.f32 %v4024_v42, %v3968_v10  ;;  %v4469_v40 = vsel %vm4339_vm14, %v4313_v5, %v7265_v32  ;;  %v4414_v36 = vmul.f32 1.442695, %v4372_v22 }
 0x637   : > { %v4317_v17 = vadd.f32 %v11953_v56, %v4226_v12  ;;  %7309 = vmatmul.msk.f32.gmra.mxu2 %vm4486_vm8, %v4469_v40  ;;  %v7270_v49 = vadd.f32 -1.0, %v8031_v26 }
 0x638   : > { %v4231_v2 = vmul.f32 %v11978_v30, %v4025_v21  ;;  %8034 = vpow2.f32 %v4414_v36 }
 0x639   : > { %v4369_v44 = vmin.f32 %v4317_v17, 0.0  ;;  %v4474_v41 = vsel %vm4344_vm1, %v4318_v63, %v7270_v49  ;;  %v11988_v63 = vpop.permute.xlu0 %4200  ;;  %v11993_v7 = vpop.permute.xlu1 %4291  ;;  %vm4343_vm12 = vcmp.gt.f32.partialorder %v4317_v17, 0.0 }
 0x63a   : > { %v4322_v62 = vadd.f32 %v11983_v19, %v4231_v2  ;;  %v4130_v5 = vpop.f32.mrf.mxu0  ;;  %4566 = vmatmul.f32.gmra.mxu1 %v4474_v41 }
 0x63b   : > { %v8033_v38 = vpop.eup %8032  ;;  %v4131_v37 = vadd.f32 %v4130_v5, %v11921_v54  ;;  %v4408_v56 = vmul.f32 1.442695, %v4369_v44  ;;  %v3974_v61 = vpop.f32.mrf.mxu1 }
 0x63c   : > { %v7267_v25 = vadd.f32 -1.0, %v8033_v38  ;;  %v4374_v57 = vmin.f32 %v4322_v62, 0.0  ;;  %vm4348_vm14 = vcmp.gt.f32.partialorder %v4322_v62, 0.0  ;;  %v4083_v38 = vpop.f32.mrf.mxu3 }
 0x63d   : > { %v4228_v39 = vmul.f32 %v11958_v4, %v4131_v37  ;;  %v4027_v55 = vpop.f32.mrf.mxu2  ;;  %8036 = vpow2.f32 %v4408_v56  ;;  %v11998_v26 = vpop.permute.xlu2 %4205 }
 0x63e   : > { %v8035_v34 = vpop.eup %8034  ;;  %v4028_v47 = vadd.f32 %v4027_v55, %v3971_v14  ;;  %v4471_v0 = vsel %vm4341_vm9, %v4315_v11, %v7267_v25  ;;  %v4418_v10 = vmul.f32 1.442695, %v4374_v57 }
 0x63f   : > { %v4319_v9 = vadd.f32 %v11963_v27, %v4228_v39  ;;  %7310 = vmatmul.msk.f32.gmra.mxu2 %vm4486_vm8, %v4471_v0  ;;  %v7272_v20 = vadd.f32 -1.0, %v8035_v34 }
 0x640   : > { %v4233_v54 = vmul.f32 %v11988_v63, %v4028_v47  ;;  %8038 = vpow2.f32 %v4418_v10 }
 0x641   : > { %v4371_v4 = vmin.f32 %v4319_v9, 0.0  ;;  %v4476_v60 = vsel %vm4346_vm4, %v4320_v31, %v7272_v20  ;;  %v12003_v36 = vpop.permute.xlu0 %4296  ;;  %vm4345_vm1 = vcmp.gt.f32.partialorder %v4319_v9, 0.0  ;;  %v4211_v34 = vpop.permute.xlu1 %4210 }
 0x642   : > { %v4324_v28 = vadd.f32 %v11993_v7, %v4233_v54  ;;  %v4133_v11 = vpop.f32.mrf.mxu0  ;;  %4569 = vmatmul.f32.gmra.mxu1 %v4476_v60 }
 0x643   : > { %v8037_v29 = vpop.eup %8036  ;;  %v4134_v27 = vadd.f32 %v4133_v11, %v11923_v24  ;;  %v4412_v58 = vmul.f32 1.442695, %v4371_v4  ;;  %v3977_v41 = vpop.f32.mrf.mxu1 }
 0x644   : > { %v7269_v59 = vadd.f32 -1.0, %v8037_v29  ;;  %v4376_v15 = vmin.f32 %v4324_v28, 0.0  ;;  %vm4350_vm9 = vcmp.gt.f32.partialorder %v4324_v28, 0.0 }
 0x645   : > { %v4230_v35 = vmul.f32 %v11968_v23, %v4134_v27  ;;  %v4030_v32 = vpop.f32.mrf.mxu2  ;;  %8040 = vpow2.f32 %v4412_v58  ;;  %v4302_v20 = vpop.permute.xlu2 %4301 }
 0x646   : > { %v8039_v22 = vpop.eup %8038  ;;  %v4031_v12 = vadd.f32 %v4030_v32, %v3974_v61  ;;  %v4473_v31 = vsel %vm4343_vm12, %v4317_v17, %v7269_v59  ;;  %v4422_v42 = vmul.f32 1.442695, %v4376_v15  ;;  %v4086_v59 = vpop.f32.mrf.mxu3 }
 0x647   : > { %v4321_v21 = vadd.f32 %v11973_v48, %v4230_v35  ;;  %7311 = vmatmul.msk.f32.gmra.mxu2 %vm4486_vm8, %v4473_v31  ;;  %v7274_v40 = vadd.f32 -1.0, %v8039_v22 }
 0x648   : > { %v4235_v24 = vmul.f32 %v11998_v26, %v4031_v12  ;;  %8042 = vpow2.f32 %v4422_v42 }
 0x649   : > { %v4373_v23 = vmin.f32 %v4321_v21, 0.0  ;;  %v4478_v49 = vsel %vm4348_vm14, %v4322_v62, %v7274_v40  ;;  %vm4347_vm4 = vcmp.gt.f32.partialorder %v4321_v21, 0.0 }
 0x64a   : > { %v4326_v14 = vadd.f32 %v12003_v36, %v4235_v24  ;;  %v4136_v2 = vpop.f32.mrf.mxu0  ;;  %4572 = vmatmul.f32.gmra.mxu1 %v4478_v49 }
 0x64b   : > { %v8041_v17 = vpop.eup %8040  ;;  %v4137_v44 = vadd.f32 %v4136_v2, %v4080_v45  ;;  %v4416_v5 = vmul.f32 1.442695, %v4373_v23 }
 0x64c   : > { %v7271_v48 = vadd.f32 -1.0, %v8041_v17  ;;  %v4378_v37 = vmin.f32 %v4326_v14, 0.0  ;;  %vm4352_vm12 = vcmp.gt.f32.partialorder %v4326_v14, 0.0 }
 0x64d   : > { %v4232_v56 = vmul.f32 %v11978_v30, %v4137_v44  ;;  %v4033_v25 = vpop.f32.mrf.mxu2  ;;  %8044 = vpow2.f32 %v4416_v5 }
 0x64e   : > { %v8043_v57 = vpop.eup %8042  ;;  %v4034_v39 = vadd.f32 %v4033_v25, %v3977_v41  ;;  %v4475_v55 = vsel %vm4345_vm1, %v4319_v9, %v7271_v48  ;;  %v4426_v62 = vmul.f32 1.442695, %v4378_v37  ;;  %v4089_v2 = vpop.f32.mrf.mxu3 }
 0x64f   : > { %v4323_v47 = vadd.f32 %v11983_v19, %v4232_v56  ;;  %7312 = vmatmul.msk.f32.gmra.mxu2 %vm4486_vm8, %v4475_v55  ;;  %v7276_v0 = vadd.f32 -1.0, %v8043_v57 }
 0x650   : > { %v4237_v10 = vmul.f32 %v4211_v34, %v4034_v39  ;;  %8046 = vpow2.f32 %v4426_v62 }
 0x651   : > { %v4375_v54 = vmin.f32 %v4323_v47, 0.0  ;;  %v4480_v4 = vsel %vm4350_vm9, %v4324_v28, %v7276_v0  ;;  %vm4349_vm14 = vcmp.gt.f32.partialorder %v4323_v47, 0.0 }
 0x652   : > { %v4328_v30 = vadd.f32 %v4302_v20, %v4237_v10  ;;  %v4139_v60 = vpop.f32.mrf.mxu0  ;;  %4575 = vmatmul.f32.gmra.mxu1 %v4480_v4 }
 0x653   : > { %v8045_v61 = vpop.eup %8044  ;;  %v4140_v11 = vadd.f32 %v4139_v60, %v4083_v38  ;;  %v4420_v45 = vmul.f32 1.442695, %v4375_v54 }
 0x654   : > { %v7273_v9 = vadd.f32 -1.0, %v8045_v61  ;;  %v4380_v29 = vmin.f32 %v4328_v30, 0.0  ;;  %vm4354_vm1 = vcmp.gt.f32.partialorder %v4328_v30, 0.0 }
 0x655   : > { %v4234_v27 = vmul.f32 %v11988_v63, %v4140_v11  ;;  %8048 = vpow2.f32 %v4420_v45 }
 0x656   : > { %v8047_v19 = vpop.eup %8046  ;;  %v4477_v58 = vsel %vm4347_vm4, %v4321_v21, %v7273_v9  ;;  %v4430_v15 = vmul.f32 1.442695, %v4380_v29 }
 0x657   : > { %v4325_v35 = vadd.f32 %v11993_v7, %v4234_v27  ;;  %7313 = vmatmul.msk.f32.gmra.mxu2 %vm4486_vm8, %v4477_v58  ;;  %v7278_v28 = vadd.f32 -1.0, %v8047_v19 }
 0x658   : > { %8050 = vpow2.f32 %v4430_v15 }
 0x659   : > { %v4377_v32 = vmin.f32 %v4325_v35, 0.0  ;;  %v4482_v22 = vsel %vm4352_vm12, %v4326_v14, %v7278_v28  ;;  %vm4351_vm9 = vcmp.gt.f32.partialorder %v4325_v35, 0.0 }
 0x65a   : > { %v4142_v12 = vpop.f32.mrf.mxu0  ;;  %4578 = vmatmul.f32.gmra.mxu1 %v4482_v22 }
 0x65b   : > { %v8049_v31 = vpop.eup %8048  ;;  %v4143_v42 = vadd.f32 %v4142_v12, %v4086_v59  ;;  %v4424_v63 = vmul.f32 1.442695, %v4377_v32 }
 0x65c   : > { %v7275_v40 = vadd.f32 -1.0, %v8049_v31 }
 0x65d   : > { %v4236_v24 = vmul.f32 %v11998_v26, %v4143_v42  ;;  %8052 = vpow2.f32 %v4424_v63 }
 0x65e   : > { %v8051_v21 = vpop.eup %8050  ;;  %v4479_v23 = vsel %vm4349_vm14, %v4323_v47, %v7275_v40  ;;  %vm14068_vm14 = vcmask 1043456  }
 0x65f   : > { %v4327_v7 = vadd.f32 %v12003_v36, %v4236_v24  ;;  %7314 = vmatmul.msk.f32.gmra.mxu2 %vm4486_vm8, %v4479_v23  ;;  %v7280_v49 = vadd.f32 -1.0, %v8051_v21 }
 0x661   : > { %v4379_v14 = vmin.f32 %v4327_v7, 0.0  ;;  %v4484_v17 = vsel %vm4354_vm1, %v4328_v30, %v7280_v49  ;;  %vm4353_vm4 = vcmp.gt.f32.partialorder %v4327_v7, 0.0 }
 0x662   : > { %v4145_v44 = vpop.f32.mrf.mxu0  ;;  %4581 = vmatmul.f32.gmra.mxu1 %v4484_v17 }
 0x663   : > { %v8053_v41 = vpop.eup %8052  ;;  %v4146_v5 = vadd.f32 %v4145_v44, %v4089_v2  ;;  %v4428_v48 = vmul.f32 1.442695, %v4379_v14 }
 0x664   : > { %v7277_v38 = vadd.f32 -1.0, %v8053_v41 }
 0x665   : > { %v4238_v26 = vmul.f32 %v4211_v34, %v4146_v5  ;;  %8054 = vpow2.f32 %v4428_v48 }
 0x666   : > { %v4481_v37 = vsel %vm4351_vm9, %v4325_v35, %v7277_v38 }
 0x667   : > { %v4329_v56 = vadd.f32 %v4302_v20, %v4238_v26  ;;  %7315 = vmatmul.msk.f32.gmra.mxu2 %vm4486_vm8, %v4481_v37 }
 0x669   : > { %v4381_v36 = vmin.f32 %v4329_v56, 0.0  ;;  %vm4355_vm12 = vcmp.gt.f32.partialorder %v4329_v56, 0.0 }
 0x66b   : > { %v8055_v25 = vpop.eup %8054  ;;  %v4432_v57 = vmul.f32 1.442695, %v4381_v36 }
 0x66c   : > { %v7279_v39 = vadd.f32 -1.0, %v8055_v25 }
 0x66d   : > { %8056 = vpow2.f32 %v4432_v57 }
 0x66e   : > { %v4483_v55 = vsel %vm4353_vm4, %v4327_v7, %v7279_v39 }
 0x66f   : > { %7316 = vmatmul.msk.f32.gmra.mxu2 %vm4486_vm8, %v4483_v55 }
 0x673   : > { %v8057_v62 = vpop.eup %8056 }
 0x674   : > { %v7281_v47 = vadd.f32 -1.0, %v8057_v62 }
 0x676   : > { %v4485_v0 = vsel %vm4355_vm12, %v4329_v56, %v7281_v47 }
 0x677   : > { %7317 = vmatmul.msk.f32.gmra.mxu2 %vm4486_vm8, %v4485_v0  ;;  %vm14069_vm8 = vmmov %vm14068_vm14 }
 0x678   : > { %vm14070_vm1 = vmmov %vm14069_vm8 }
 0x679   : > { %vm14071_vm9 = vmmov %vm14070_vm1 }
 0x67a   : > { %vm14072_vm4 = vmmov %vm14070_vm1 }
 0x67b   : > { %vm14073_vm12 = vmmov %vm14070_vm1 }
 0x67f   : > { %v4546_v34 = vpop.f32.mrf.mxu1 }
 0x687   : > { %v4549_v10 = vpop.f32.mrf.mxu1 }
 0x68f   : > { %v4552_v20 = vpop.f32.mrf.mxu1 }
 0x697   : > { %v4555_v4 = vpop.f32.mrf.mxu1 }
 0x69a   : > { %v4602_v54 = vpop.f32.mrf.mxu2 }
 0x69b   : > { %v12018_v30 = vadd.f32 %v4602_v54, %v4546_v34 }
 0x69d   : > { %v12023_v11 = vrot.slane %v12018_v30, 4 }
 0x69f   : > { %v4558_v27 = vpop.f32.mrf.mxu1 }
 0x6a2   : > { %v4605_v60 = vpop.f32.mrf.mxu2 }
 0x6a3   : > { %v12020_v61 = vadd.f32 %v4605_v60, %v4549_v10 }
 0x6a5   : > { %v4805_v45 = vrot.slane %v12020_v61, 4 }
 0x6a7   : > { %v12028_v9 = vsel %vm14068_vm14, %v12023_v11, %v4805_v45  ;;  %v4561_v22 = vpop.f32.mrf.mxu1  ;;  %vm14074_vm14 = vmmov %vm14070_vm1 }
 0x6a8   : > { %v7801_v29 = vpack.i.bf16 %v12023_v11, %v12028_v9 }
 0x6aa   : > { %v4608_v19 = vpop.f32.mrf.mxu2  ;;  %7802 = vrot.lane.b32.xlu1 %v7801_v29, %s13802_s25 }
 0x6ab   : > { %v12033_v58 = vadd.f32 %v4608_v19, %v4552_v20 }
 0x6ad   : > { %v4807_v59 = vrot.slane %v12033_v58, 4  ;;  %v7806_v7 = vpack.i.bf16 %v12020_v61, %v12033_v58 }
 0x6af   : > { %v12037_v15 = vsel %vm14069_vm8, %v4805_v45, %v4807_v59  ;;  %v4564_v21 = vpop.f32.mrf.mxu1  ;;  %vm14075_vm8 = vmmov %vm14070_vm1 }
 0x6b0   : > { %v7866_v35 = vpack.i.bf16 %v12028_v9, %v12037_v15  ;;  %v7886_v9 = vpack.i.bf16 %v12018_v30, %v12020_v61 }
 0x6b2   : > { %v4611_v28 = vpop.f32.mrf.mxu2 }
 0x6b3   : > { %v12041_v32 = vadd.f32 %v4611_v28, %v4555_v4 }
 0x6b5   : > { %v4809_v12 = vrot.slane %v12041_v32, 4  ;;  %v7871_v47 = vpack.i.bf16 %v12033_v58, %v12041_v32 }
 0x6b7   : > { %v4810_v31 = vsel %vm14070_vm1, %v4807_v59, %v4809_v12  ;;  %v4567_v17 = vpop.f32.mrf.mxu1 }
 0x6b8   : > { %v7796_v42 = vpack.i.bf16 %v12037_v15, %v4810_v31 }
 0x6ba   : > { %v4614_v63 = vpop.f32.mrf.mxu2  ;;  %7797 = vrot.lane.b32.xlu0 %v7796_v42, %s13802_s25 }
 0x6bb   : > { %v12047_v40 = vadd.f32 %v4614_v63, %v4558_v27 }
 0x6bd   : > { %v4811_v24 = vrot.slane %v12047_v40, 4  ;;  %v7811_v44 = vpack.i.bf16 %v12041_v32, %v12047_v40 }
 0x6bf   : > { %v12051_v23 = vsel %vm14071_vm9, %v4809_v12, %v4811_v24  ;;  %v4570_v57 = vpop.f32.mrf.mxu1  ;;  %vm14076_vm9 = vmmov %vm14070_vm1 }
 0x6c0   : > { %v7816_v49 = vpack.i.bf16 %v4810_v31, %v12051_v23 }
 0x6c2   : > { %v4617_v2 = vpop.f32.mrf.mxu2  ;;  %7807 = vrot.lane.b32.xlu0 %v7806_v7, %s13794_s16  ;;  %7817 = vrot.lane.b32.xlu2 %v7816_v49, %s13790_s30 }
 0x6c3   : > { %v12058_v14 = vadd.f32 %v4617_v2, %v4561_v22 }
 0x6c5   : > { %v4813_v48 = vrot.slane %v12058_v14, 4  ;;  %v7821_v36 = vpack.i.bf16 %v12047_v40, %v12058_v14 }
 0x6c7   : > { %v4814_v37 = vsel %vm14072_vm4, %v4811_v24, %v4813_v48  ;;  %v4573_v20 = vpop.f32.mrf.mxu1  ;;  %vm14077_vm4 = vmmov %vm14070_vm1 }
 0x6ca   : > { %v4620_v41 = vpop.f32.mrf.mxu2  ;;  %7812 = vrot.lane.b32.xlu0 %v7811_v44, %s13794_s16 }
 0x6cb   : > { %v12063_v5 = vadd.f32 %v4620_v41, %v4564_v21 }
 0x6cd   : > { %v7826_v38 = vpack.i.bf16 %v12058_v14, %v12063_v5  ;;  %v4815_v26 = vrot.slane %v12063_v5, 4 }
 0x6cf   : > { %7827 = vrot.lane.b32.xlu2 %v7826_v38, %s13794_s16  ;;  %v4816_v56 = vsel %vm14073_vm12, %v4813_v48, %v4815_v26  ;;  %v4576_v59 = vpop.f32.mrf.mxu1  ;;  %vm14078_vm12 = vmmov %vm14070_vm1 }
 0x6d0   : > { %v7831_v25 = vpack.i.bf16 %v4814_v37, %v4816_v56 }
 0x6d2   : > { %v4623_v39 = vpop.f32.mrf.mxu2  ;;  %7822 = vrot.lane.b32.xlu0 %v7821_v36, %s13786_s23  ;;  %7832 = vrot.lane.b32.xlu1 %v7831_v25, %s13790_s30 }
 0x6d3   : > { %v12076_v55 = vadd.f32 %v4623_v39, %v4567_v17  ;;  %v4744_v39 = vld [vmem:[%s13117_s11 + $0x18] sm:$0xff] }
 0x6d5   : > { %v7836_v62 = vpack.i.bf16 %v12063_v5, %v12076_v55  ;;  %v4817_v10 = vrot.slane %v12076_v55, 4 }
 0x6d7   : > { %7837 = vrot.lane.b32.xlu2 %v7836_v62, %s13786_s23  ;;  %v4818_v4 = vsel %vm14074_vm14, %v4815_v26, %v4817_v10  ;;  %v4579_v24 = vpop.f32.mrf.mxu1  ;;  %vm14079_vm14 = vmmov %vm14070_vm1 }
 0x6da   : > { %v4626_v0 = vpop.f32.mrf.mxu2  ;;  %7872 = vrot.lane.b32.xlu0 %v7871_v47, %s13786_s23 }
 0x6db   : > { %v12084_v34 = vadd.f32 %v4626_v0, %v4570_v57  ;;  %v4745_v57 = vld [vmem:[%s13117_s11 + $0x20] sm:$0xff]  ;;  %v4767_v0 = vld [vmem:[%s13118_s12 + $0x8] sm:$0xff] }
 0x6dd   : > { %v4819_v54 = vrot.slane %v12084_v34, 4 }
 0x6df   : > { %v4820_v60 = vsel %vm14075_vm8, %v4817_v10, %v4819_v54  ;;  %v4582_v17 = vpop.f32.mrf.mxu1  ;;  %vm14080_vm8 = vmmov %vm14070_vm1 }
 0x6e0   : > { %v7841_v45 = vpack.i.bf16 %v4818_v4, %v4820_v60 }
 0x6e2   : > { %v4629_v29 = vpop.f32.mrf.mxu2  ;;  %7842 = vrot.lane.b32.xlu1 %v7841_v45, %s13790_s30 }
 0x6e3   : > { %v12091_v27 = vadd.f32 %v4629_v29, %v4573_v20  ;;  %v4746_v29 = vld [vmem:[%s13117_s11 + $0x28] sm:$0xff] }
 0x6e5   : > { %v7846_v19 = vpack.i.bf16 %v12084_v34, %v12091_v27  ;;  %v4821_v12 = vrot.slane %v12091_v27, 4 }
 0x6e7   : > { %7847 = vrot.lane.b32.xlu2 %v7846_v19, %s13786_s23  ;;  %v4822_v42 = vsel %vm14070_vm1, %v4819_v54, %v4821_v12  ;;  %v4768_v54 = vld [vmem:[%s13118_s12 + $0x10] sm:$0xff] }
 0x6ea   : > { %v4632_v28 = vpop.f32.mrf.mxu2 }
 0x6eb   : > { %v12096_v22 = vadd.f32 %v4632_v28, %v4576_v59  ;;  %v4769_v28 = vld [vmem:[%s13118_s12 + $0x18] sm:$0xff] }
 0x6ed   : > { %v4823_v31 = vrot.slane %v12096_v22, 4 }
 0x6ef   : > { %v4824_v63 = vsel %vm14076_vm9, %v4821_v12, %v4823_v31  ;;  %vm4986_vm9 = vcmask 949248  }
 0x6f0   : > { %v7851_v21 = vpack.i.bf16 %v4822_v42, %v4824_v63  ;;  %v4747_v42 = vld [vmem:[%s13117_s11 + $0x30] sm:$0xff]  ;;  %v4770_v63 = vld [vmem:[%s13118_s12 + $0x20] sm:$0xff] }
 0x6f2   : > { %v4635_v7 = vpop.f32.mrf.mxu2  ;;  %7852 = vrot.lane.b32.xlu1 %v7851_v21, %s13790_s30 }
 0x6f3   : > { %v12103_v49 = vadd.f32 %v4635_v7, %v4579_v24  ;;  %v4771_v24 = vld [vmem:[%s13118_s12 + $0x28] sm:$0xff]  ;;  %v4748_v7 = vld [vmem:[%s13117_s11 + $0x38] sm:$0xff] }
 0x6f5   : > { %v7861_v2 = vpack.i.bf16 %v12096_v22, %v12103_v49  ;;  %v4825_v26 = vrot.slane %v12103_v49, 4 }
 0x6f7   : > { %7862 = vrot.lane.b32.xlu2 %v7861_v2, %s13786_s23  ;;  %v4826_v56 = vsel %vm14078_vm12, %v4823_v31, %v4825_v26  ;;  %vm5958_vm12 = vcmask 1046528  }
 0x6fa   : > { %v4638_v44 = vpop.f32.mrf.mxu2  ;;  %7857 = vrot.lane.b32.xlu1 %v7851_v21, %s13802_s25 }
 0x6fb   : > { %v4639_v41 = vadd.f32 %v4638_v44, %v4582_v17 }
 0x6fd   : > { %4970 = vrot.lane.b32.xlu0 %v4639_v41, %s13786_s23  ;;  %v4827_v48 = vrot.slane %v4639_v41, 4  ;;  %v7881_v38 = vpack.i.bf16 %v4639_v41, %v12018_v30 }
 0x6ff   : > { %7867 = vrot.lane.b32.xlu2 %v7866_v35, %s13790_s30  ;;  %v4828_v37 = vsel %vm14077_vm4, %v4825_v26, %v4827_v48  ;;  %v4742_v35 = vld [vmem:[%s13117_s11 + $0x8] sm:$0xff]  ;;  %v4753_v26 = vld [vmem:[%s13117_s11 + $0x60] sm:$0xff]  ;;  %vm14081_vm4 = vcmp.eq.s32.totalorder %v13751_v16, %v13740_v3  ;;  %v4763_v3 = vld [vmem:[%s13117_s11 + $0xb0] sm:$0xff] }
 0x700   : > { %v7906_v36 = vpack.i.bf16 %v4826_v56, %v4828_v37  ;;  %v7911_v15 = vpack.i.bf16 %v4828_v37, %v12023_v11  ;;  %v4741_v11 = vld [vmem:[%s13117_s11] sm:$0xff]  ;;  %v4764_v16 = vld [vmem:[%s13117_s11 + $0xb8] sm:$0xff] }
 0x702   : > { %7892 = vrot.lane.b32.xlu1 %v7861_v2, %s13794_s16 }
 0x705   : > { %7882 = vrot.lane.b32.xlu0 %v7881_v38, %s13794_s16  ;;  %v4752_v38 = vld [vmem:[%s13117_s11 + $0x58] sm:$0xff] }
 0x707   : > { %7877 = vrot.lane.b32.xlu2 %v7841_v45, %s13802_s25 }
 0x70a   : > { %7907 = vrot.lane.b32.xlu1 %v7906_v36, %s13802_s25  ;;  %v4649_v36 = vld [vmem:[%s13116_s10 + $0x40] sm:$0xff] }
 0x70d   : > { %7887 = vrot.lane.b32.xlu0 %v7886_v9, %s13786_s23  ;;  %s6385_s23 = sshll.u32 %s6381_s4, 4  ;;  %s6386_s23 = int_to_ptr.hbm [resolvable:$true] %s6385_s23 }
 0x70e   : > { %s8122_s1 = sshra.s32 %s6386_s23, 4  ;;  %s8123_s1 = int_to_ptr.hbm [resolvable:$true] %s8122_s1 }
 0x70f   : > { %7897 = vrot.lane.b32.xlu2 %v7831_v25, %s13802_s25  ;;  %s8124_s26 = scalar_lea.hbm %s8123_s1, 1  ;;  %p8129_p0 = scmp.lt.s32.totalorder %s8123_s1, %s13121_s15 }
 0x710   : > { %p8125_p11 = scmp.ne.s32.totalorder %s8123_s1, %s8124_s26 }
 0x712   : > { %7912 = vrot.lane.b32.xlu1 %v7911_v15, %s13790_s30  ;;  %p8126_p12 = pnand %p8125_p11, %p8297_p5 }
 0x714   : > { %p8127_p13 = pneg %p8126_p12 }
 0x715   : > { %7902 = vrot.lane.b32.xlu0 %v7846_v19, %s13794_s16 }
 0x717   : > { %4837 = vrot.lane.b32.xlu2 %v12051_v23, %s13802_s25  ;;  %v4743_v23 = vld [vmem:[%s13117_s11 + $0x10] sm:$0xff]  ;;  %s8128_s25 = scalar_lea.hbm %s13121_s15, 2 }
 0x718   : > { %p8130_p1 = scmp.lt.s32.totalorder %s8128_s25, %s8124_s26 }
 0x71a   : > { %4929 = vrot.lane.b32.xlu1 %v4826_v56, %s13790_s30  ;;  %v4754_v56 = vld [vmem:[%s13117_s11 + $0x68] sm:$0xff]  ;;  %p8131_p2 = por %p8130_p1, %p8129_p0 }
 0x71c   : > { %v12140_v25 = vpop.permute.xlu2 %7817  ;;  %v7803_v4 = vpop.permute.xlu1 %7802  ;;  %p8132_p3 = pnand %p8131_p2, %p8127_p13 }
 0x71d   : > { %4882 = vrot.lane.b32.xlu0 %v12076_v55, %s13794_s16  ;;  %v7805_v19 = vunpack.i.h.bf16 %v7803_v4  ;;  %v7804_v59 = vunpack.i.l.bf16 %v7803_v4  ;;  %v4756_v4 = vld [vmem:[%s13117_s11 + $0x78] sm:$0xff] }
 0x71f   : > { %5439 = vperm.xlu2 %7549, %v4742_v35   ;;  %v4984_v31 = vsel %vm14079_vm14, %v4639_v41, %v7805_v19  ;;  %v4777_v41 = vld [vmem:[%s13118_s12 + $0x58] sm:$0xff]  ;;  %v4778_v35 = vld [vmem:[%s13118_s12 + $0x60] sm:$0xff] }
 0x722   : > { %5434 = vperm.xlu1 %7548, %v4741_v11   ;;  %v4779_v11 = vld [vmem:[%s13118_s12 + $0x68] sm:$0xff] }
 0x725   : > { %5444 = vperm.xlu0 %7550, %v4743_v23  }
 0x727   : > { %5454 = vperm.xlu2 %7549, %v4745_v57   ;;  %v4780_v57 = vld [vmem:[%s13118_s12 + $0x70] sm:$0xff] }
 0x729   : > { %v7828_v62 = vpop.permute.xlu2 %7827 }
 0x72a   : > { %v7829_v47 = vunpack.i.l.bf16 %v7828_v62  ;;  %5449 = vperm.xlu1 %7548, %v4744_v39   ;;  %v7830_v10 = vunpack.i.h.bf16 %v7828_v62  ;;  %v4653_v62 = vld [vmem:[%s13116_s10 + $0x60] sm:$0xff] }
 0x72c   : > { %v7798_v20 = vpop.permute.xlu0 %7797  ;;  %5156 = vmatpush.msrb.mxu0 %v7829_v47 }
 0x72d   : > { %v7799_v60 = vunpack.i.l.bf16 %v7798_v20  ;;  %5589 = vperm.xlu0 %7550, %v4767_v0   ;;  %v7800_v45 = vunpack.i.h.bf16 %v7798_v20  ;;  %v4755_v20 = vld [vmem:[%s13117_s11 + $0x70] sm:$0xff] }
 0x72e   : > { %5157 = vmatpush.msrb.mxu0 %v7830_v10 }
 0x72f   : > { %5064 = vmatpush.msrb.mxu3 %v7799_v60  ;;  %5594 = vperm.xlu2 %7549, %v4768_v54  }
 0x731   : > { %5065 = vmatpush.msrb.mxu3 %v7800_v45  ;;  %v12221_v48 = vpop.permute.xlu2 %7837 }
 0x732   : > { %5459 = vperm.xlu1 %7548, %v4746_v29   ;;  %v4757_v29 = vld [vmem:[%s13117_s11 + $0x80] sm:$0xff] }
 0x733   : > { %5066 = vmatpush.msrb.mxu3 %v7804_v59  ;;  %v4657_v59 = vld [vmem:[%s13116_s10 + $0x80] sm:$0xff] }
 0x734   : > { %v7808_v12 = vpop.permute.xlu0 %7807 }
 0x735   : > { %5599 = vperm.xlu0 %7550, %v4769_v28   ;;  %5067 = vmatpush.msrb.mxu3 %v4984_v31  ;;  %v7809_v17 = vunpack.i.l.bf16 %v7808_v12  ;;  %v7810_v44 = vunpack.i.h.bf16 %v7808_v12  ;;  %v4781_v31 = vld [vmem:[%s13118_s12 + $0x78] sm:$0xff] }
 0x737   : > { %5464 = vperm.xlu2 %7549, %v4747_v42   ;;  %5068 = vmatpush.msrb.mxu3 %v12103_v49 }
 0x739   : > { %5069 = vmatpush.msrb.mxu3 %v12096_v22  ;;  %v4772_v22 = vld [vmem:[%s13118_s12 + $0x30] sm:$0xff] }
 0x73a   : > { %5604 = vperm.xlu1 %7548, %v4770_v63   ;;  %v7819_v63 = vunpack.i.l.bf16 %v12140_v25 }
 0x73b   : > { %5070 = vmatpush.msrb.mxu3 %v12091_v27  ;;  %v4773_v27 = vld [vmem:[%s13118_s12 + $0x38] sm:$0xff] }
 0x73c   : > { %v7813_v21 = vpop.permute.xlu0 %7812 }
 0x73d   : > { %v7814_v2 = vunpack.i.l.bf16 %v7813_v21  ;;  %5609 = vperm.xlu0 %7550, %v4771_v24   ;;  %5071 = vmatpush.msrb.mxu3 %v12084_v34  ;;  %v7815_v49 = vunpack.i.h.bf16 %v7813_v21  ;;  %v4774_v34 = vld [vmem:[%s13118_s12 + $0x40] sm:$0xff] }
 0x73f   : > { %5158 = vmatpush.msrb.mxu0 %v7814_v2  ;;  %5469 = vperm.xlu2 %7549, %v4748_v7   ;;  %v4782_v7 = vld [vmem:[%s13118_s12 + $0x80] sm:$0xff]  ;;  %v7820_v2 = vunpack.i.h.bf16 %v12140_v25 }
 0x740   : > { %5072 = vmatpush.msrb.mxu3 %v12076_v55  ;;  %v4641_v55 = vld [vmem:[%s13116_s10] sm:$0xff] }
 0x741   : > { %5159 = vmatpush.msrb.mxu0 %v7815_v49  ;;  %v12237_v15 = vpop.permute.xlu2 %7847 }
 0x742   : > { %5073 = vmatpush.msrb.mxu3 %v12063_v5  ;;  %5614 = vperm.xlu1 %7548, %v4772_v22   ;;  %v4749_v5 = vld [vmem:[%s13117_s11 + $0x40] sm:$0xff]  ;;  %v7849_v49 = vunpack.i.l.bf16 %v12237_v15 }
 0x743   : > { %5160 = vmatpush.msrb.mxu0 %v7809_v17  ;;  %v4783_v17 = vld [vmem:[%s13118_s12 + $0x88] sm:$0xff] }
 0x744   : > { %5074 = vmatpush.msrb.mxu3 %v12058_v14  ;;  %v4750_v14 = vld [vmem:[%s13117_s11 + $0x48] sm:$0xff]  ;;  %v12235_v9 = vpop.permute.xlu0 %7822 }
 0x745   : > { %5161 = vmatpush.msrb.mxu0 %v7810_v44  ;;  %5619 = vperm.xlu0 %7550, %v4773_v27   ;;  %v4661_v44 = vld [vmem:[%s13116_s10 + $0xa0] sm:$0xff] }
 0x746   : > { %5075 = vmatpush.msrb.mxu3 %v12047_v40  ;;  %v4751_v40 = vld [vmem:[%s13117_s11 + $0x50] sm:$0xff] }
 0x747   : > { %5624 = vperm.xlu2 %7549, %v4774_v34   ;;  %v7850_v34 = vunpack.i.h.bf16 %v12237_v15 }
 0x748   : > { %5076 = vmatpush.msrb.mxu3 %v12041_v32  ;;  %v7833_v32 = vpop.permute.xlu1 %7832 }
 0x749   : > { %v7834_v19 = vunpack.i.l.bf16 %v7833_v32  ;;  %v7835_v28 = vunpack.i.h.bf16 %v7833_v32 }
 0x74a   : > { %5077 = vmatpush.msrb.mxu3 %v12033_v58  ;;  %5474 = vperm.xlu1 %7548, %v4749_v5   ;;  %v4775_v58 = vld [vmem:[%s13118_s12 + $0x48] sm:$0xff] }
 0x74c   : > { %5078 = vmatpush.msrb.mxu3 %v12020_v61  ;;  %v4776_v61 = vld [vmem:[%s13118_s12 + $0x50] sm:$0xff]  ;;  %v12251_v47 = vpop.permute.xlu0 %7872 }
 0x74d   : > { %5479 = vperm.xlu0 %7550, %v4750_v14   ;;  %v7839_v14 = vunpack.i.l.bf16 %v12221_v48  ;;  %v7874_v15 = vunpack.i.l.bf16 %v12251_v47 }
 0x74e   : > { %5079 = vmatpush.msrb.mxu3 %v12018_v30  ;;  %v4645_v30 = vld [vmem:[%s13116_s10 + $0x20] sm:$0xff] }
 0x74f   : > { %5484 = vperm.xlu2 %7549, %v4751_v40   ;;  %5080 = vmatmul.f32.vlgmr.msrb.gmra.mxu3 %v4641_v55  ;;  %v4758_v55 = vld [vmem:[%s13117_s11 + $0x88] sm:$0xff] }
 0x751   : > { %v7863_v0 = vpop.permute.xlu2 %7862 }
 0x752   : > { %5629 = vperm.xlu1 %7548, %v4775_v58   ;;  %v7864_v42 = vunpack.i.l.bf16 %v7863_v0  ;;  %v7865_v21 = vunpack.i.h.bf16 %v7863_v0  ;;  %v7840_v58 = vunpack.i.h.bf16 %v12221_v48  ;;  %v4665_v48 = vld [vmem:[%s13116_s10 + $0xc0] sm:$0xff] }
 0x753   : > { %v4761_v0 = vld [vmem:[%s13117_s11 + $0xa0] sm:$0xff] }
 0x754   : > { %v7843_v37 = vpop.permute.xlu1 %7842 }
 0x755   : > { %5634 = vperm.xlu0 %7550, %v4776_v61   ;;  %v7844_v54 = vunpack.i.l.bf16 %v7843_v37  ;;  %v7845_v60 = vunpack.i.h.bf16 %v7843_v37  ;;  %v4759_v61 = vld [vmem:[%s13117_s11 + $0x90] sm:$0xff]  ;;  %v7825_v37 = vunpack.i.h.bf16 %v12235_v9 }
 0x757   : > { %5639 = vperm.xlu2 %7549, %v4777_v41   ;;  %5083 = vmatmul.f32.gmra.mxu3 %v4645_v30  ;;  %v7824_v41 = vunpack.i.l.bf16 %v12235_v9  ;;  %v4760_v9 = vld [vmem:[%s13117_s11 + $0x98] sm:$0xff] }
 0x759   : > { %v7868_v24 = vpop.permute.xlu2 %7867 }
 0x75a   : > { %5489 = vperm.xlu1 %7548, %v4752_v38   ;;  %v7869_v27 = vunpack.i.l.bf16 %v7868_v24  ;;  %v7870_v25 = vunpack.i.h.bf16 %v7868_v24  ;;  %v4766_v38 = vld [vmem:[%s13118_s12] sm:$0xff] }
 0x75d   : > { %5494 = vperm.xlu0 %7550, %v4753_v26  }
 0x75f   : > { %5499 = vperm.xlu2 %7549, %v4754_v56   ;;  %5086 = vmatmul.f32.gmra.mxu3 %v4649_v36 }
 0x761   : > { %v7878_v32 = vpop.permute.xlu2 %7877 }
 0x762   : > { %5644 = vperm.xlu1 %7548, %v4778_v35   ;;  %v4784_v35 = vld [vmem:[%s13118_s12 + $0x90] sm:$0xff] }
 0x764   : > { %v7853_v23 = vpop.permute.xlu1 %7852 }
 0x765   : > { %v7854_v39 = vunpack.i.l.bf16 %v7853_v23  ;;  %5649 = vperm.xlu0 %7550, %v4779_v11   ;;  %v7855_v10 = vunpack.i.h.bf16 %v7853_v23  ;;  %v7875_v23 = vunpack.i.h.bf16 %v12251_v47 }
 0x767   : > { %5248 = vmatpush.msrb.mxu1 %v7854_v39  ;;  %5654 = vperm.xlu2 %7549, %v4780_v57  }
 0x768   : > { %5089 = vmatmul.f32.gmra.mxu3 %v4653_v62 }
 0x769   : > { %5249 = vmatpush.msrb.mxu1 %v7855_v10  ;;  %v7879_v10 = vunpack.i.l.bf16 %v7878_v32 }
 0x76a   : > { %5504 = vperm.xlu1 %7548, %v4755_v20   ;;  %v7898_v20 = vpop.permute.xlu2 %7897 }
 0x76b   : > { %5250 = vmatpush.msrb.mxu1 %v7844_v54  ;;  %v7900_v24 = vunpack.i.h.bf16 %v7898_v20 }
 0x76c   : > { %v12259_v45 = vpop.permute.xlu1 %7857 }
 0x76d   : > { %5251 = vmatpush.msrb.mxu1 %v7845_v60  ;;  %5509 = vperm.xlu0 %7550, %v4756_v4   ;;  %v7859_v11 = vunpack.i.l.bf16 %v12259_v45  ;;  %v7860_v57 = vunpack.i.h.bf16 %v12259_v45  ;;  %v4669_v60 = vld [vmem:[%s13116_s10 + $0xe0] sm:$0xff]  ;;  %v7880_v45 = vunpack.i.h.bf16 %v7878_v32 }
 0x76e   : > { %v4790_v32 = vld [vmem:[%s13118_s12 + $0xc0] sm:$0xff] }
 0x76f   : > { %5252 = vmatpush.msrb.mxu1 %v7834_v19  ;;  %5514 = vperm.xlu2 %7549, %v4757_v29   ;;  %v4971_v12 = vpop.permute.xlu0 %4970 }
 0x770   : > { %7318 = vmatpush.msk.msra.mxu2 %vm14080_vm8, %v4971_v12  ;;  %5092 = vmatmul.f32.gmra.mxu3 %v4657_v59  ;;  %v4785_v12 = vld [vmem:[%s13118_s12 + $0x98] sm:$0xff] }
 0x771   : > { %5253 = vmatpush.msrb.mxu1 %v7835_v28 }
 0x772   : > { %5342 = vmatpush.msra.mxu2 %v7864_v42  ;;  %5659 = vperm.xlu1 %7548, %v4781_v31   ;;  %v7899_v31 = vunpack.i.l.bf16 %v7898_v20  ;;  %v4674_v20 = vld [vmem:[%s13116_s10 + $0x108] sm:$0xff] }
 0x773   : > { %5254 = vmatpush.msrb.mxu1 %v7819_v63  ;;  %v4786_v63 = vld [vmem:[%s13118_s12 + $0xa0] sm:$0xff] }
 0x774   : > { %v12277_v22 = vpop.permute.xlu1 %7892  ;;  %5343 = vmatpush.msra.mxu2 %v7865_v21 }
 0x775   : > { %5255 = vmatpush.msrb.mxu1 %v7820_v2  ;;  %5664 = vperm.xlu0 %7550, %v4782_v7   ;;  %v7894_v59 = vunpack.i.l.bf16 %v12277_v22  ;;  %v7895_v42 = vunpack.i.h.bf16 %v12277_v22  ;;  %v4644_v2 = vld [vmem:[%s13116_s10 + $0x18] sm:$0xff] }
 0x776   : > { %5344 = vmatpush.msra.mxu2 %v7849_v49  ;;  %v4787_v49 = vld [vmem:[%s13118_s12 + $0xa8] sm:$0xff] }
 0x777   : > { %5669 = vperm.xlu2 %7549, %v4783_v17   ;;  %5256 = vmatpush.msrb.mxu1 %v7869_v27  ;;  %v7883_v5 = vpop.permute.xlu0 %7882  ;;  %v4642_v17 = vld [vmem:[%s13116_s10 + $0x8] sm:$0xff]  ;;  %v4673_v27 = vld [vmem:[%s13116_s10 + $0x100] sm:$0xff] }
 0x778   : > { %v7884_v40 = vunpack.i.l.bf16 %v7883_v5  ;;  %5345 = vmatpush.msra.mxu2 %v7850_v34  ;;  %5095 = vmatmul.f32.gmra.mxu3 %v4661_v44  ;;  %v7885_v54 = vunpack.i.h.bf16 %v7883_v5  ;;  %v4838_v44 = vpop.permute.xlu2 %4837  ;;  %v6529_v34 = vsel %vm14081_vm4, 1.0, %v13654_v52  ;;  %v4643_v5 = vld [vmem:[%s13116_s10 + $0x10] sm:$0xff]  ;;  %v4648_v52 = vld [vmem:[%s13116_s10 + $0x38] sm:$0xff] }
 0x779   : > { %5257 = vmatpush.msrb.mxu1 %v7870_v25  ;;  %v4762_v25 = vld [vmem:[%s13117_s11 + $0xa8] sm:$0xff]  ;;  %7450 = vmatpush.msk.msra.mxu3 %vm5958_vm12, %v6529_v34 }
 0x77a   : > { %5162 = vmatpush.msrb.mxu0 %v7884_v40  ;;  %5346 = vmatpush.msra.mxu2 %v7839_v14  ;;  %v4646_v40 = vld [vmem:[%s13116_s10 + $0x28] sm:$0xff] }
 0x77b   : > { %5519 = vperm.xlu1 %7548, %v4758_v55   ;;  %7451 = vmatpush.msk.msra.mxu3 %vm8582_vm6, %v13597_v46  ;;  %v4677_v55 = vld [vmem:[%s13116_s10 + $0x120] sm:$0xff] }
 0x77c   : > { %5347 = vmatpush.msra.mxu2 %v7840_v58  ;;  %v7908_v30 = vpop.permute.xlu1 %7907  ;;  %v4788_v58 = vld [vmem:[%s13118_s12 + $0xb0] sm:$0xff] }
 0x77d   : > { %v7909_v26 = vunpack.i.l.bf16 %v7908_v30  ;;  %5524 = vperm.xlu0 %7550, %v4759_v61   ;;  %v7910_v56 = vunpack.i.h.bf16 %v7908_v30  ;;  %7452 = vmatpush.msk.msra.mxu3 %vm8606_vm7, %v13597_v46  ;;  %v4647_v61 = vld [vmem:[%s13116_s10 + $0x30] sm:$0xff] }
 0x77e   : > { %5348 = vmatpush.msra.mxu2 %v7824_v41  ;;  %v4681_v41 = vld [vmem:[%s13116_s10 + $0x140] sm:$0xff]  ;;  %v4651_v30 = vld [vmem:[%s13116_s10 + $0x50] sm:$0xff] }
 0x77f   : > { %5584 = vperm.xlu2 %7549, %v4766_v38   ;;  %v7888_v36 = vpop.permute.xlu0 %7887  ;;  %5163 = vmatpush.msrb.mxu0 %v7909_v26  ;;  %v4660_v38 = vld [vmem:[%s13116_s10 + $0x98] sm:$0xff]  ;;  %v4689_v26 = vld [vmem:[%s13116_s10 + $0x180] sm:$0xff] }
 0x780   : > { %5349 = vmatpush.msra.mxu2 %v7825_v37  ;;  %5098 = vmatmul.f32.gmra.mxu3 %v4665_v48  ;;  %v7889_v39 = vunpack.i.l.bf16 %v7888_v36  ;;  %v7890_v4 = vunpack.i.h.bf16 %v7888_v36  ;;  %v4662_v48 = vld [vmem:[%s13116_s10 + $0xa8] sm:$0xff]  ;;  %v4693_v37 = vld [vmem:[%s13116_s10 + $0x1a0] sm:$0xff]  ;;  %v4668_v36 = vld [vmem:[%s13116_s10 + $0xd8] sm:$0xff] }
 0x781   : > { %5164 = vmatpush.msrb.mxu0 %v7910_v56  ;;  %7453 = vmatpush.msk.msra.mxu3 %vm8633_vm0, %v13597_v46  ;;  %v4663_v56 = vld [vmem:[%s13116_s10 + $0xb0] sm:$0xff] }
 0x782   : > { %5350 = vmatpush.msra.mxu2 %v7874_v15  ;;  %v4666_v15 = vld [vmem:[%s13116_s10 + $0xc8] sm:$0xff] }
 0x783   : > { %5674 = vperm.xlu1 %7548, %v4784_v35   ;;  %5165 = vmatpush.msrb.mxu0 %v7859_v11  ;;  %v4697_v35 = vld [vmem:[%s13116_s10 + $0x1c0] sm:$0xff]  ;;  %v4667_v11 = vld [vmem:[%s13116_s10 + $0xd0] sm:$0xff] }
 0x784   : > { %5351 = vmatpush.msra.mxu2 %v7875_v23  ;;  %v7913_v62 = vpop.permute.xlu1 %7912  ;;  %7454 = vmatpush.msk.msra.mxu3 %vm8663_vm15, %v13597_v46  ;;  %v12508_v23 = vpop.permute.xlu2 %5439 }
 0x785   : > { %v7914_v47 = vunpack.i.l.bf16 %v7913_v62  ;;  %5529 = vperm.xlu0 %7550, %v4760_v9   ;;  %5166 = vmatpush.msrb.mxu0 %v7860_v57  ;;  %v7915_v28 = vunpack.i.h.bf16 %v7913_v62  ;;  %v4672_v9 = vld [vmem:[%s13116_s10 + $0xf8] sm:$0xff]  ;;  %v4670_v57 = vld [vmem:[%s13116_s10 + $0xe8] sm:$0xff]  ;;  %v4671_v62 = vld [vmem:[%s13116_s10 + $0xf0] sm:$0xff] }
 0x786   : > { %5352 = vmatpush.msra.mxu2 %v7889_v39  ;;  %7455 = vmatpush.msk.msra.mxu3 %vm8693_vm3, %v13597_v46  ;;  %v4701_v39 = vld [vmem:[%s13116_s10 + $0x1e0] sm:$0xff] }
 0x787   : > { %5534 = vperm.xlu2 %7549, %v4761_v0   ;;  %v7903_v29 = vpop.permute.xlu0 %7902  ;;  %5167 = vmatpush.msrb.mxu0 %v7879_v10  ;;  %v4985_v19 = vsel %vm14070_vm1, %v7885_v54, %v7914_v47  ;;  %v4676_v0 = vld [vmem:[%s13116_s10 + $0x118] sm:$0xff]  ;;  %v4705_v54 = vld [vmem:[%s13116_s10 + $0x200] sm:$0xff]  ;;  %v4675_v47 = vld [vmem:[%s13116_s10 + $0x110] sm:$0xff] }
 0x788   : > { %5258 = vmatpush.msrb.mxu1 %v4985_v19  ;;  %5353 = vmatpush.msra.mxu2 %v7890_v4  ;;  %v7904_v21 = vunpack.i.l.bf16 %v7903_v29  ;;  %v7905_v22 = vunpack.i.h.bf16 %v7903_v29  ;;  %v4709_v29 = vld [vmem:[%s13116_s10 + $0x220] sm:$0xff] }
 0x789   : > { %5168 = vmatpush.msrb.mxu0 %v7880_v45  ;;  %5101 = vmatmul.f32.gmra.mxu3 %v4669_v60  ;;  %v4680_v60 = vld [vmem:[%s13116_s10 + $0x138] sm:$0xff]  ;;  %v4678_v45 = vld [vmem:[%s13116_s10 + $0x128] sm:$0xff] }
 0x78a   : > { %5259 = vmatpush.msrb.mxu1 %v7894_v59  ;;  %5354 = vmatpush.msra.mxu2 %v7915_v28  ;;  %v4679_v59 = vld [vmem:[%s13116_s10 + $0x130] sm:$0xff] }
 0x78b   : > { %5679 = vperm.xlu1 %7548, %v4785_v12   ;;  %5169 = vmatpush.msrb.mxu0 %v7899_v31  ;;  %v4684_v12 = vld [vmem:[%s13116_s10 + $0x158] sm:$0xff]  ;;  %v4682_v31 = vld [vmem:[%s13116_s10 + $0x148] sm:$0xff] }
 0x78c   : > { %v4930_v7 = vpop.permute.xlu1 %4929  ;;  %5260 = vmatpush.msrb.mxu1 %v7895_v42  ;;  %7456 = vmatpush.msk.msra.mxu3 %vm8723_vm5, %v13597_v46  ;;  %v12526_v10 = vpop.permute.xlu2 %5454  ;;  %v4713_v42 = vld [vmem:[%s13116_s10 + $0x240] sm:$0xff] }
 0x78d   : > { %5684 = vperm.xlu0 %7550, %v4786_v63   ;;  %5170 = vmatpush.msrb.mxu0 %v7900_v24  ;;  %v4683_v63 = vld [vmem:[%s13116_s10 + $0x150] sm:$0xff] }
 0x78e   : > { %5355 = vmatpush.msra.mxu2 %v4930_v7  ;;  %5261 = vmatpush.msrb.mxu1 %v7904_v21  ;;  %v4688_v7 = vld [vmem:[%s13116_s10 + $0x178] sm:$0xff] }
 0x78f   : > { %7319 = vmatmul.msk.f32.vlgmr.msra.gmra.mxu2 %vm4986_vm9, %v4644_v2  ;;  %5689 = vperm.xlu2 %7549, %v4787_v49   ;;  %v4883_v14 = vpop.permute.xlu0 %4882  ;;  %v4686_v2 = vld [vmem:[%s13116_s10 + $0x168] sm:$0xff]  ;;  %v4717_v49 = vld [vmem:[%s13116_s10 + $0x260] sm:$0xff] }
 0x790   : > { %5171 = vmatpush.msrb.mxu0 %v4838_v44  ;;  %5262 = vmatpush.msrb.mxu1 %v7905_v22  ;;  %v4687_v22 = vld [vmem:[%s13116_s10 + $0x170] sm:$0xff]  ;;  %v4692_v44 = vld [vmem:[%s13116_s10 + $0x198] sm:$0xff] }
 0x791   : > { %5172 = vmatmul.f32.vlgmr.msrb.gmra.mxu0 %v4642_v17  ;;  %5104 = vmatmul.f32.gmra.mxu3 %v4673_v27 }
 0x792   : > { %5263 = vmatpush.msrb.mxu1 %v4883_v14  ;;  %7369 = vmatpush.msk.msrb.mxu2 %vm5958_vm12, %v6529_v34  ;;  %v4690_v34 = vld [vmem:[%s13116_s10 + $0x188] sm:$0xff] }
 0x793   : > { %5539 = vperm.xlu1 %7548, %v4762_v25   ;;  %5264 = vmatmul.f32.vlgmr.msrb.gmra.mxu1 %v4643_v5  ;;  %v4721_v25 = vld [vmem:[%s13116_s10 + $0x280] sm:$0xff]  ;;  %v4691_v5 = vld [vmem:[%s13116_s10 + $0x190] sm:$0xff] }
 0x794   : > { %7370 = vmatpush.msk.msrb.mxu2 %vm8582_vm6, %v13597_v46  ;;  %7457 = vmatpush.msk.msra.mxu3 %vm13762_vm10, %v13597_v46  ;;  %v12550_v19 = vpop.permute.xlu2 %5594 }
 0x795   : > { %5544 = vperm.xlu0 %7550, %v4763_v3   ;;  %v4696_v3 = vld [vmem:[%s13116_s10 + $0x1b8] sm:$0xff] }
 0x796   : > { %7371 = vmatpush.msk.msrb.mxu2 %vm8606_vm7, %v13597_v46  ;;  %7458 = vmatpush.msk.msra.mxu3 %vm13764_vm11, %v13597_v46 }
 0x797   : > { %7320 = vmatmul.msk.f32.gmra.mxu2 %vm4986_vm9, %v4648_v52  ;;  %5549 = vperm.xlu2 %7549, %v4764_v16   ;;  %v4694_v16 = vld [vmem:[%s13116_s10 + $0x1a8] sm:$0xff] }
 0x798   : > { %7372 = vmatpush.msk.msrb.mxu2 %vm8633_vm0, %v13597_v46  ;;  %7459 = vmatpush.msk.msra.mxu3 %vm13766_vm13, %v13597_v46  ;;  %vm5882_vm0 = vcmask 711680  }
 0x799   : > { %5175 = vmatmul.f32.gmra.mxu0 %v4646_v40  ;;  %5107 = vmatmul.f32.gmra.mxu3 %v4677_v55  ;;  %v4725_v40 = vld [vmem:[%s13116_s10 + $0x2a0] sm:$0xff]  ;;  %v4695_v55 = vld [vmem:[%s13116_s10 + $0x1b0] sm:$0xff] }
 0x79a   : > { %7373 = vmatpush.msk.msrb.mxu2 %vm8663_vm15, %v13597_v46  ;;  %7460 = vmatpush.msk.msra.mxu3 %vm13768_vm2, %v13597_v46 }
 0x79b   : > { %5694 = vperm.xlu1 %7548, %v4788_v58   ;;  %5267 = vmatmul.f32.gmra.mxu1 %v4647_v61  ;;  %v4700_v61 = vld [vmem:[%s13116_s10 + $0x1d8] sm:$0xff] }
 0x79c   : > { %7374 = vmatpush.msk.msrb.mxu2 %vm8693_vm3, %v13597_v46  ;;  %v12570_v24 = vpop.permute.xlu2 %5464 }
 0x79d   : > { %5699 = vperm.xlu0 %7550, %v4789_v1   ;;  %v4698_v1 = vld [vmem:[%s13116_s10 + $0x1c8] sm:$0xff] }
 0x79e   : > { %7375 = vmatpush.msk.msrb.mxu2 %vm8723_vm5, %v13597_v46 }
 0x79f   : > { %7321 = vmatmul.msk.f32.gmra.mxu2 %vm4986_vm9, %v4652_v51  ;;  %5704 = vperm.xlu2 %7549, %v4790_v32   ;;  %v4729_v51 = vld [vmem:[%s13116_s10 + $0x2c0] sm:$0xff] }
 0x7a0   : > { %7376 = vmatpush.msk.msrb.mxu2 %vm13762_vm10, %v13597_v46 }
 0x7a1   : > { %5178 = vmatmul.f32.gmra.mxu0 %v4650_v43  ;;  %5110 = vmatmul.f32.gmra.mxu3 %v4681_v41  ;;  %v4699_v43 = vld [vmem:[%s13116_s10 + $0x1d0] sm:$0xff] }
 0x7a2   : > { %7377 = vmatpush.msk.msrb.mxu2 %vm13764_vm11, %v13597_v46 }
 0x7a3   : > { %5554 = vperm.xlu1 %7548, %v4765_v53   ;;  %5270 = vmatmul.f32.gmra.mxu1 %v4651_v30  ;;  %v4704_v53 = vld [vmem:[%s13116_s10 + $0x1f8] sm:$0xff]  ;;  %v4702_v30 = vld [vmem:[%s13116_s10 + $0x1e8] sm:$0xff] }
 0x7a4   : > { %7378 = vmatpush.msk.msrb.mxu2 %vm13766_vm13, %v13597_v46  ;;  %v12589_v27 = vpop.permute.xlu2 %5469 }
 0x7a6   : > { %7379 = vmatpush.msk.msrb.mxu2 %vm13768_vm2, %v13597_v46  ;;  %v4659_v46 = vld [vmem:[%s13116_s10 + $0x90] sm:$0xff] }
 0x7a7   : > { %7322 = vmatmul.msk.f32.gmra.mxu2 %vm4986_vm9, %v4656_v33  ;;  %v4733_v33 = vld [vmem:[%s13116_s10 + $0x2e0] sm:$0xff] }
 0x7a9   : > { %5181 = vmatmul.f32.gmra.mxu0 %v4654_v18  ;;  %5113 = vmatmul.f32.gmra.mxu3 %v4685_v6  ;;  %v4703_v18 = vld [vmem:[%s13116_s10 + $0x1f0] sm:$0xff] }
 0x7ab   : > { %5273 = vmatmul.f32.gmra.mxu1 %v4655_v8  ;;  %v4708_v8 = vld [vmem:[%s13116_s10 + $0x218] sm:$0xff] }
 0x7ac   : > { %v12609_v52 = vpop.permute.xlu2 %5624 }
 0x7af   : > { %7323 = vmatmul.msk.f32.gmra.mxu2 %vm4986_vm9, %v4660_v38 }
 0x7b1   : > { %5184 = vmatmul.f32.gmra.mxu0 %v4658_v50  ;;  %5116 = vmatmul.f32.gmra.mxu3 %v4689_v26  ;;  %v4706_v26 = vld [vmem:[%s13116_s10 + $0x208] sm:$0xff] }
 0x7b3   : > { %5276 = vmatmul.f32.gmra.mxu1 %v4659_v46  ;;  %v4737_v46 = vld [vmem:[%s13116_s10 + $0x300] sm:$0xff] }
 0x7b4   : > { %v12633_v32 = vpop.permute.xlu2 %5484 }
 0x7b7   : > { %7324 = vmatmul.msk.f32.gmra.mxu2 %vm4986_vm9, %v4664_v13 }
 0x7b9   : > { %5187 = vmatmul.f32.gmra.mxu0 %v4662_v48  ;;  %5119 = vmatmul.f32.gmra.mxu3 %v4693_v37  ;;  %v4707_v48 = vld [vmem:[%s13116_s10 + $0x210] sm:$0xff] }
 0x7bb   : > { %5279 = vmatmul.f32.gmra.mxu1 %v4663_v56  ;;  %v5445_v56 = vpop.permute.xlu0 %5444 }
 0x7bc   : > { %v12653_v6 = vpop.permute.xlu2 %5639 }
 0x7bf   : > { %7325 = vmatmul.msk.f32.gmra.mxu2 %vm4986_vm9, %v4668_v36 }
 0x7c1   : > { %5190 = vmatmul.f32.gmra.mxu0 %v4666_v15  ;;  %5122 = vmatmul.f32.gmra.mxu3 %v4697_v35  ;;  %v4712_v15 = vld [vmem:[%s13116_s10 + $0x238] sm:$0xff] }
 0x7c3   : > { %5282 = vmatmul.f32.gmra.mxu1 %v4667_v11 }
 0x7c4   : > { %v12676_v36 = vpop.permute.xlu2 %5499 }
 0x7c7   : > { %7326 = vmatmul.msk.f32.gmra.mxu2 %vm4986_vm9, %v4672_v9  ;;  %v4710_v9 = vld [vmem:[%s13116_s10 + $0x228] sm:$0xff] }
 0x7c9   : > { %5193 = vmatmul.f32.gmra.mxu0 %v4670_v57  ;;  %5125 = vmatmul.f32.gmra.mxu3 %v4701_v39  ;;  %v12688_v39 = vpop.permute.xlu1 %5434 }
 0x7cb   : > { %5285 = vmatmul.f32.gmra.mxu1 %v4671_v62 }
 0x7cf   : > { %7327 = vmatmul.msk.f32.gmra.mxu2 %vm4986_vm9, %v4676_v0  ;;  %v4711_v0 = vld [vmem:[%s13116_s10 + $0x230] sm:$0xff] }
 0x7d1   : > { %5196 = vmatmul.f32.gmra.mxu0 %v4674_v20  ;;  %5128 = vmatmul.f32.gmra.mxu3 %v4705_v54 }
 0x7d2   : > { %v12538_v4 = vpop.f32.mrf.mxu3 }
 0x7d3   : > { %5288 = vmatmul.f32.gmra.mxu1 %v4675_v47 }
 0x7d7   : > { %7328 = vmatmul.msk.f32.gmra.mxu2 %vm4986_vm9, %v4680_v60  ;;  %v4716_v60 = vld [vmem:[%s13116_s10 + $0x258] sm:$0xff] }
 0x7d9   : > { %5199 = vmatmul.f32.gmra.mxu0 %v4678_v45  ;;  %5131 = vmatmul.f32.gmra.mxu3 %v4709_v29  ;;  %v5590_v29 = vpop.permute.xlu0 %5589 }
 0x7da   : > { %v12555_v28 = vpop.f32.mrf.mxu3 }
 0x7db   : > { %5291 = vmatmul.f32.gmra.mxu1 %v4679_v59 }
 0x7df   : > { %7329 = vmatmul.msk.f32.gmra.mxu2 %vm4986_vm9, %v4684_v12 }
 0x7e1   : > { %5202 = vmatmul.f32.gmra.mxu0 %v4682_v31  ;;  %5134 = vmatmul.f32.gmra.mxu3 %v4713_v42  ;;  %v4714_v31 = vld [vmem:[%s13116_s10 + $0x248] sm:$0xff] }
 0x7e2   : > { %v12572_v21 = vpop.f32.mrf.mxu3 }
 0x7e3   : > { %5294 = vmatmul.f32.gmra.mxu1 %v4683_v63 }
 0x7e7   : > { %7330 = vmatmul.msk.f32.gmra.mxu2 %vm4986_vm9, %v4688_v7 }
 0x7e9   : > { %5205 = vmatmul.f32.gmra.mxu0 %v4686_v2  ;;  %5137 = vmatmul.f32.gmra.mxu3 %v4717_v49  ;;  %v4715_v2 = vld [vmem:[%s13116_s10 + $0x250] sm:$0xff] }
 0x7eb   : > { %5297 = vmatmul.f32.gmra.mxu1 %v4687_v22  ;;  %v12587_v17 = vpop.f32.mrf.mxu3 }
 0x7ef   : > { %7331 = vmatmul.msk.f32.gmra.mxu2 %vm4986_vm9, %v4692_v44 }
 0x7f1   : > { %5208 = vmatmul.f32.gmra.mxu0 %v4690_v34  ;;  %5140 = vmatmul.f32.gmra.mxu3 %v4721_v25 }
 0x7f3   : > { %5300 = vmatmul.f32.gmra.mxu1 %v4691_v5  ;;  %v12604_v14 = vpop.f32.mrf.mxu3  ;;  %v4720_v5 = vld [vmem:[%s13116_s10 + $0x278] sm:$0xff] }
 0x7f7   : > { %7332 = vmatmul.msk.f32.gmra.mxu2 %vm4986_vm9, %v4696_v3 }
 0x7f9   : > { %5211 = vmatmul.f32.gmra.mxu0 %v4694_v16  ;;  %5143 = vmatmul.f32.gmra.mxu3 %v4725_v40  ;;  %v4718_v40 = vld [vmem:[%s13116_s10 + $0x268] sm:$0xff] }
 0x7fb   : > { %5303 = vmatmul.f32.gmra.mxu1 %v4695_v55  ;;  %v12621_v58 = vpop.f32.mrf.mxu3 }
 0x7ff   : > { %7333 = vmatmul.msk.f32.gmra.mxu2 %vm4986_vm9, %v4700_v61 }
 0x801   : > { %5214 = vmatmul.f32.gmra.mxu0 %v4698_v1  ;;  %5146 = vmatmul.f32.gmra.mxu3 %v4729_v51 }
 0x803   : > { %5306 = vmatmul.f32.gmra.mxu1 %v4699_v43  ;;  %v12638_v41 = vpop.f32.mrf.mxu3  ;;  %v4719_v43 = vld [vmem:[%s13116_s10 + $0x270] sm:$0xff] }
 0x807   : > { %7334 = vmatmul.msk.f32.gmra.mxu2 %vm4986_vm9, %v4704_v53 }
 0x809   : > { %5217 = vmatmul.f32.gmra.mxu0 %v4702_v30  ;;  %5149 = vmatmul.f32.gmra.mxu3 %v4733_v33 }
 0x80b   : > { %5309 = vmatmul.f32.gmra.mxu1 %v4703_v18 }
 0x80c   : > { %v12658_v38 = vpop.f32.mrf.mxu3 }
 0x80e   : > { %v12660_v50 = vpop.f32.mrf.mxu0 }
 0x80f   : > { %7335 = vmatmul.msk.f32.gmra.mxu2 %vm4986_vm9, %v4708_v8 }
 0x810   : > { %v12669_v13 = vpop.f32.mrf.mxu1 }
 0x811   : > { %5220 = vmatmul.f32.gmra.mxu0 %v4706_v26  ;;  %5152 = vmatmul.f32.gmra.mxu3 %v4737_v46 }
 0x812   : > { %v12674_v37 = vpop.f32.mrf.mxu2 }
 0x813   : > { %5312 = vmatmul.f32.gmra.mxu1 %v4707_v48 }
 0x814   : > { %v12681_v35 = vpop.f32.mrf.mxu3 }
 0x816   : > { %v5176_v11 = vpop.f32.mrf.mxu0 }
 0x817   : > { %v5177_v57 = vadd.f32 %v5176_v11, %v12555_v28  ;;  %7336 = vmatmul.msk.f32.gmra.mxu2 %vm4986_vm9, %v4712_v15  ;;  %v12699_v28 = vpop.permute.xlu2 %5654  ;;  %v5600_v11 = vpop.permute.xlu0 %5599 }
 0x818   : > { %v5268_v62 = vpop.f32.mrf.mxu1 }
 0x819   : > { %v5269_v20 = vadd.f32 %v5268_v62, %v5177_v57  ;;  %5223 = vmatmul.f32.gmra.mxu0 %v4710_v9  ;;  %v4722_v62 = vld [vmem:[%s13116_s10 + $0x288] sm:$0xff] }
 0x81a   : > { %v5360_v54 = vpop.f32.mrf.mxu2 }
 0x81b   : > { %v5361_v47 = vadd.f32 %v5360_v54, %v5269_v20  ;;  %5315 = vmatmul.f32.gmra.mxu1 %v4711_v0 }
 0x81c   : > { %v12696_v45 = vpop.f32.mrf.mxu3 }
 0x81d   : > { %v5558_v59 = vmul.f32 %v12508_v23, %v5361_v47  ;;  %v5450_v23 = vpop.permute.xlu1 %5449 }
 0x81e   : > { %v5179_v12 = vpop.f32.mrf.mxu0 }
 0x81f   : > { %v5708_v42 = vadd.f32 %v5590_v29, %v5558_v59  ;;  %v5180_v63 = vadd.f32 %v5179_v12, %v12572_v21  ;;  %7337 = vmatmul.msk.f32.gmra.mxu2 %vm4986_vm9, %v4716_v60  ;;  %v12720_v1 = vpop.permute.xlu2 %5514 }
 0x820   : > { %v5271_v7 = vpop.f32.mrf.mxu1 }
 0x821   : > { %v5758_v49 = vmin.f32 %v5708_v42, 0.0  ;;  %v5272_v22 = vadd.f32 %v5271_v7, %v5180_v63  ;;  %5226 = vmatmul.f32.gmra.mxu0 %v4714_v31  ;;  %vm5733_vm3 = vcmp.gt.f32.partialorder %v5708_v42, 0.0 }
 0x822   : > { %v5363_v44 = vpop.f32.mrf.mxu2 }
 0x823   : > { %v5784_v34 = vmul.f32 1.442695, %v5758_v49  ;;  %v5364_v25 = vadd.f32 %v5363_v44, %v5272_v22  ;;  %5318 = vmatmul.f32.gmra.mxu1 %v4715_v2  ;;  %v4726_v44 = vld [vmem:[%s13116_s10 + $0x2a8] sm:$0xff] }
 0x824   : > { %v12712_v21 = vpop.f32.mrf.mxu3 }
 0x825   : > { %8058 = vpow2.f32 %v5784_v34  ;;  %v5559_v3 = vmul.f32 %v5445_v56, %v5364_v25  ;;  %v5174_v56 = vadd.f32 %v12660_v50, %v12538_v4  ;;  %v4723_v4 = vld [vmem:[%s13116_s10 + $0x290] sm:$0xff] }
 0x826   : > { %v5182_v16 = vpop.f32.mrf.mxu0 }
 0x827   : > { %v5709_v55 = vadd.f32 %v12550_v19, %v5559_v3  ;;  %v5183_v61 = vadd.f32 %v5182_v16, %v12587_v17  ;;  %7338 = vmatmul.msk.f32.gmra.mxu2 %vm4986_vm9, %v4720_v5  ;;  %v5460_v19 = vpop.permute.xlu1 %5459  ;;  %v4724_v17 = vld [vmem:[%s13116_s10 + $0x298] sm:$0xff]  ;;  %v5266_v50 = vadd.f32 %v12669_v13, %v5174_v56  ;;  %v12742_v29 = vpop.permute.xlu2 %5669 }
 0x828   : > { %v5274_v51 = vpop.f32.mrf.mxu1 }
 0x829   : > { %v5759_v53 = vmin.f32 %v5709_v55, 0.0  ;;  %v5275_v30 = vadd.f32 %v5274_v51, %v5183_v61  ;;  %5229 = vmatmul.f32.gmra.mxu0 %v4718_v40  ;;  %v5358_v2 = vadd.f32 %v12674_v37, %v5266_v50  ;;  %vm5734_vm5 = vcmp.gt.f32.partialorder %v5709_v55, 0.0 }
 0x82a   : > { %v5366_v33 = vpop.f32.mrf.mxu2 }
 0x82b   : > { %v8059_v18 = vpop.eup %8058  ;;  %v5786_v8 = vmul.f32 1.442695, %v5759_v53  ;;  %v5367_v26 = vadd.f32 %v5366_v33, %v5275_v30  ;;  %5321 = vmatmul.f32.gmra.mxu1 %v4719_v43  ;;  %v5557_v37 = vmul.f32 %v12688_v39, %v5358_v2  ;;  %v4732_v43 = vld [vmem:[%s13116_s10 + $0x2d8] sm:$0xff]  ;;  %v5610_v39 = vpop.permute.xlu0 %5609 }
 0x82c   : > { %v7345_v46 = vadd.f32 -1.0, %v8059_v18  ;;  %v12728_v48 = vpop.f32.mrf.mxu3 }
 0x82d   : > { %v5560_v15 = vmul.f32 %v5450_v23, %v5367_v26  ;;  %8060 = vpow2.f32 %v5786_v8 }
 0x82e   : > { %v5185_v9 = vpop.f32.mrf.mxu0  ;;  %v5858_v57 = vsel %vm5733_vm3, %v5708_v42, %v7345_v46  ;;  %v4728_v42 = vld [vmem:[%s13116_s10 + $0x2b8] sm:$0xff] }
 0x82f   : > { %v5710_v0 = vadd.f32 %v5600_v11, %v5560_v15  ;;  %v5186_v20 = vadd.f32 %v5185_v9, %v12604_v14  ;;  %7339 = vmatmul.msk.f32.gmra.mxu2 %vm4986_vm9, %v4724_v17  ;;  %7381 = vmatmul.msk.f32.vlgmr.msra.gmra.mxu3 %vm5882_vm0, %v5858_v57  ;;  %v5605_v49 = vpop.permute.xlu1 %5604  ;;  %v4730_v17 = vld [vmem:[%s13116_s10 + $0x2c8] sm:$0xff] }
 0x830   : > { %v5277_v54 = vpop.f32.mrf.mxu1 }
 0x831   : > { %v5760_v47 = vmin.f32 %v5710_v0, 0.0  ;;  %v5278_v60 = vadd.f32 %v5277_v54, %v5186_v20  ;;  %5232 = vmatmul.f32.gmra.mxu0 %v4722_v62  ;;  %vm5735_vm6 = vcmp.gt.f32.partialorder %v5710_v0, 0.0 }
 0x832   : > { %v5369_v59 = vpop.f32.mrf.mxu2 }
 0x833   : > { %v8061_v12 = vpop.eup %8060  ;;  %v5788_v31 = vmul.f32 1.442695, %v5760_v47  ;;  %v5370_v14 = vadd.f32 %v5369_v59, %v5278_v60  ;;  %5324 = vmatmul.f32.gmra.mxu1 %v4723_v4 }
 0x834   : > { %v7346_v63 = vadd.f32 -1.0, %v8061_v12  ;;  %v12747_v7 = vpop.f32.mrf.mxu3 }
 0x835   : > { %v5561_v13 = vmul.f32 %v12526_v10, %v5370_v14  ;;  %8062 = vpow2.f32 %v5788_v31  ;;  %v4727_v10 = vld [vmem:[%s13116_s10 + $0x2b0] sm:$0xff]  ;;  %v4734_v14 = vld [vmem:[%s13116_s10 + $0x2e8] sm:$0xff] }
 0x836   : > { %v5188_v22 = vpop.f32.mrf.mxu0  ;;  %v5859_v23 = vsel %vm5734_vm5, %v5709_v55, %v7346_v63 }
 0x837   : > { %v5711_v34 = vadd.f32 %v5605_v49, %v5561_v13  ;;  %v5189_v25 = vadd.f32 %v5188_v22, %v12621_v58  ;;  %7340 = vmatmul.msk.f32.gmra.mxu2 %vm4986_vm9, %v4728_v42  ;;  %7382 = vmatmul.msk.f32.gmra.mxu3 %vm5882_vm0, %v5859_v23  ;;  %v5585_v58 = vpop.permute.xlu2 %5584  ;;  %v5615_v59 = vpop.permute.xlu1 %5614 }
 0x838   : > { %v5280_v5 = vpop.f32.mrf.mxu1  ;;  %v12766_v33 = vadd.f32 %v5585_v58, %v5557_v37 }
 0x839   : > { %v5761_v3 = vmin.f32 %v5711_v34, 0.0  ;;  %v5281_v16 = vadd.f32 %v5280_v5, %v5189_v25  ;;  %5235 = vmatmul.f32.gmra.mxu0 %v4726_v44  ;;  %vm5736_vm15 = vcmp.gt.f32.partialorder %v5711_v34, 0.0  ;;  %v5620_v5 = vpop.permute.xlu0 %5619 }
 0x83a   : > { %v5372_v40 = vpop.f32.mrf.mxu2  ;;  %v5757_v11 = vmin.f32 %v12766_v33, 0.0  ;;  %vm5732_vm10 = vcmp.gt.f32.partialorder %v12766_v33, 0.0 }
 0x83b   : > { %v8063_v55 = vpop.eup %8062  ;;  %v5790_v61 = vmul.f32 1.442695, %v5761_v3  ;;  %v5373_v51 = vadd.f32 %v5372_v40, %v5281_v16  ;;  %5327 = vmatmul.f32.gmra.mxu1 %v4727_v10  ;;  %v4738_v16 = vld [vmem:[%s13116_s10 + $0x308] sm:$0xff] }
 0x83c   : > { %v7347_v53 = vadd.f32 -1.0, %v8063_v55  ;;  %v12764_v30 = vpop.f32.mrf.mxu3  ;;  %v5782_v47 = vmul.f32 1.442695, %v5757_v11 }
 0x83d   : > { %v5562_v18 = vmul.f32 %v5460_v19, %v5373_v51  ;;  %8064 = vpow2.f32 %v5790_v61  ;;  %v4731_v19 = vld [vmem:[%s13116_s10 + $0x2d0] sm:$0xff] }
 0x83e   : > { %v5191_v8 = vpop.f32.mrf.mxu0  ;;  %v5860_v26 = vsel %vm5735_vm6, %v5710_v0, %v7347_v53 }
 0x83f   : > { %v5712_v46 = vadd.f32 %v5610_v39, %v5562_v18  ;;  %v5192_v56 = vadd.f32 %v5191_v8, %v12638_v41  ;;  %7341 = vmatmul.msk.f32.gmra.mxu2 %vm4986_vm9, %v4732_v43  ;;  %7383 = vmatmul.msk.f32.gmra.mxu3 %vm5882_vm0, %v5860_v26  ;;  %v4736_v41 = vld [vmem:[%s13116_s10 + $0x2f8] sm:$0xff] }
 0x840   : > { %v5283_v15 = vpop.f32.mrf.mxu1 }
 0x841   : > { %v5762_v9 = vmin.f32 %v5712_v46, 0.0  ;;  %v5284_v57 = vadd.f32 %v5283_v15, %v5192_v56  ;;  %5238 = vmatmul.f32.gmra.mxu0 %v4730_v17  ;;  %vm5737_vm7 = vcmp.gt.f32.partialorder %v5712_v46, 0.0 }
 0x842   : > { %v5375_v62 = vpop.f32.mrf.mxu2 }
 0x843   : > { %v8065_v0 = vpop.eup %8064  ;;  %v5792_v20 = vmul.f32 1.442695, %v5762_v9  ;;  %v5376_v54 = vadd.f32 %v5375_v62, %v5284_v57  ;;  %5330 = vmatmul.f32.gmra.mxu1 %v4731_v19 }
 0x844   : > { %v7348_v4 = vadd.f32 -1.0, %v8065_v0  ;;  %v12781_v50 = vpop.f32.mrf.mxu3 }
 0x845   : > { %v5563_v60 = vmul.f32 %v12570_v24, %v5376_v54  ;;  %8066 = vpow2.f32 %v5792_v20  ;;  %v4735_v24 = vld [vmem:[%s13116_s10 + $0x2f0] sm:$0xff] }
 0x846   : > { %v5194_v12 = vpop.f32.mrf.mxu0  ;;  %v5861_v31 = vsel %vm5736_vm15, %v5711_v34, %v7348_v4  ;;  %8068 = vpow2.f32 %v5782_v47  ;;  %vm6130_vm15 = vcmask 359424  }
 0x847   : > { %v5713_v42 = vadd.f32 %v5615_v59, %v5563_v60  ;;  %v5195_v63 = vadd.f32 %v5194_v12, %v12658_v38  ;;  %7342 = vmatmul.msk.f32.gmra.mxu2 %vm4986_vm9, %v4736_v41  ;;  %7384 = vmatmul.msk.f32.gmra.mxu3 %vm5882_vm0, %v5861_v31  ;;  %v4740_v38 = vld [vmem:[%s13116_s10 + $0x318] sm:$0xff]  ;;  %v5480_v59 = vpop.permute.xlu0 %5479 }
 0x848   : > { %v5286_v2 = vpop.f32.mrf.mxu1 }
 0x849   : > { %v5763_v13 = vmin.f32 %v5713_v42, 0.0  ;;  %v5287_v49 = vadd.f32 %v5286_v2, %v5195_v63  ;;  %5241 = vmatmul.f32.gmra.mxu0 %v4734_v14  ;;  %vm5738_vm11 = vcmp.gt.f32.partialorder %v5713_v42, 0.0 }
 0x84a   : > { %v5378_v22 = vpop.f32.mrf.mxu2 }
 0x84b   : > { %v8067_v23 = vpop.eup %8066  ;;  %v5794_v44 = vmul.f32 1.442695, %v5763_v13  ;;  %v5379_v34 = vadd.f32 %v5378_v22, %v5287_v49  ;;  %5333 = vmatmul.f32.gmra.mxu1 %v4735_v24 }
 0x84c   : > { %v7349_v25 = vadd.f32 -1.0, %v8067_v23  ;;  %v12800_v40 = vpop.f32.mrf.mxu3  ;;  %v8069_v55 = vpop.eup %8068 }
 0x84d   : > { %v5564_v10 = vmul.f32 %v12589_v27, %v5379_v34  ;;  %8070 = vpow2.f32 %v5794_v44  ;;  %v4739_v27 = vld [vmem:[%s13116_s10 + $0x310] sm:$0xff]  ;;  %v7344_v39 = vadd.f32 -1.0, %v8069_v55 }
 0x84e   : > { %v5197_v37 = vpop.f32.mrf.mxu0  ;;  %v5862_v3 = vsel %vm5737_vm7, %v5712_v46, %v7349_v25  ;;  %v5475_v46 = vpop.permute.xlu1 %5474 }
 0x84f   : > { %v5714_v61 = vadd.f32 %v5620_v5, %v5564_v10  ;;  %v5198_v51 = vadd.f32 %v5197_v37, %v12681_v35  ;;  %7343 = vmatmul.msk.f32.gmra.mxu2 %vm4986_vm9, %v4740_v38  ;;  %7385 = vmatmul.msk.f32.gmra.mxu3 %vm5882_vm0, %v5862_v3  ;;  %v5857_v19 = vsel %vm5732_vm10, %v12766_v33, %v7344_v39  ;;  %v5635_v25 = vpop.permute.xlu0 %5634 }
 0x850   : > { %v5289_v58 = vpop.f32.mrf.mxu1 }
 0x851   : > { %v5764_v43 = vmin.f32 %v5714_v61, 0.0  ;;  %v5290_v53 = vadd.f32 %v5289_v58, %v5198_v51  ;;  %5244 = vmatmul.f32.gmra.mxu0 %v4738_v16  ;;  %vm5739_vm13 = vcmp.gt.f32.partialorder %v5714_v61, 0.0 }
 0x852   : > { %v5381_v18 = vpop.f32.mrf.mxu2 }
 0x853   : > { %v8071_v8 = vpop.eup %8070  ;;  %v5796_v26 = vmul.f32 1.442695, %v5764_v43  ;;  %v5382_v17 = vadd.f32 %v5381_v18, %v5290_v53  ;;  %5336 = vmatmul.f32.gmra.mxu1 %v4739_v27 }
 0x854   : > { %v7350_v35 = vadd.f32 -1.0, %v8071_v8  ;;  %v12814_v0 = vpop.f32.mrf.mxu3 }
 0x855   : > { %v5565_v56 = vmul.f32 %v5475_v46, %v5382_v17  ;;  %8072 = vpow2.f32 %v5796_v26 }
 0x856   : > { %v5200_v15 = vpop.f32.mrf.mxu0  ;;  %v5863_v11 = vsel %vm5738_vm11, %v5713_v42, %v7350_v35 }
 0x857   : > { %v5715_v9 = vadd.f32 %v12609_v52, %v5565_v56  ;;  %v5201_v57 = vadd.f32 %v5200_v15, %v12696_v45  ;;  %7380 = vmatmul.msk.f32.vlgmr.msrb.gmra.mxu2 %vm5882_vm0, %v5857_v19  ;;  %7386 = vmatmul.msk.f32.gmra.mxu3 %vm5882_vm0, %v5863_v11  ;;  %v5630_v52 = vpop.permute.xlu1 %5629 }
 0x858   : > { %v5292_v62 = vpop.f32.mrf.mxu1 }
 0x859   : > { %v5765_v20 = vmin.f32 %v5715_v9, 0.0  ;;  %v5293_v54 = vadd.f32 %v5292_v62, %v5201_v57  ;;  %vm5740_vm2 = vcmp.gt.f32.partialorder %v5715_v9, 0.0 }
 0x85a   : > { %v5384_v41 = vpop.f32.mrf.mxu2 }
 0x85b   : > { %v8073_v4 = vpop.eup %8072  ;;  %v5798_v47 = vmul.f32 1.442695, %v5765_v20  ;;  %v5385_v60 = vadd.f32 %v5384_v41, %v5293_v54 }
 0x85c   : > { %v7351_v33 = vadd.f32 -1.0, %v8073_v4  ;;  %v12818_v49 = vpop.f32.mrf.mxu3 }
 0x85d   : > { %v5566_v12 = vmul.f32 %v5480_v59, %v5385_v60  ;;  %8074 = vpow2.f32 %v5798_v47 }
 0x85e   : > { %v5203_v45 = vpop.f32.mrf.mxu0  ;;  %v5864_v31 = vsel %vm5739_vm13, %v5714_v61, %v7351_v33 }
 0x85f   : > { %v5716_v14 = vadd.f32 %v5630_v52, %v5566_v12  ;;  %v5204_v42 = vadd.f32 %v5203_v45, %v12712_v21  ;;  %7387 = vmatmul.msk.f32.gmra.mxu3 %vm5882_vm0, %v5864_v31  ;;  %v5490_v58 = vpop.permute.xlu1 %5489 }
 0x860   : > { %v5295_v63 = vpop.f32.mrf.mxu1 }
 0x861   : > { %v5766_v2 = vmin.f32 %v5716_v14, 0.0  ;;  %v5296_v24 = vadd.f32 %v5295_v63, %v5204_v42  ;;  %vm5741_vm14 = vcmp.gt.f32.partialorder %v5716_v14, 0.0 }
 0x862   : > { %v5387_v13 = vpop.f32.mrf.mxu2 }
 0x863   : > { %v8075_v22 = vpop.eup %8074  ;;  %v5800_v23 = vmul.f32 1.442695, %v5766_v2  ;;  %v5388_v44 = vadd.f32 %v5387_v13, %v5296_v24 }
 0x864   : > { %v7352_v34 = vadd.f32 -1.0, %v8075_v22 }
 0x865   : > { %v5567_v38 = vmul.f32 %v12633_v32, %v5388_v44  ;;  %8076 = vpow2.f32 %v5800_v23  ;;  %v12823_v32 = vpop.f32.mrf.mxu3 }
 0x866   : > { %v5206_v5 = vpop.f32.mrf.mxu0  ;;  %v5865_v10 = vsel %vm5740_vm2, %v5715_v9, %v7352_v34  ;;  %v5495_v9 = vpop.permute.xlu0 %5494 }
 0x867   : > { %v5717_v21 = vadd.f32 %v5635_v25, %v5567_v38  ;;  %v5207_v37 = vadd.f32 %v5206_v5, %v12728_v48  ;;  %7388 = vmatmul.msk.f32.gmra.mxu3 %vm5882_vm0, %v5865_v10  ;;  %v5645_v62 = vpop.permute.xlu1 %5644 }
 0x868   : > { %v5298_v3 = vpop.f32.mrf.mxu1 }
 0x869   : > { %v5767_v16 = vmin.f32 %v5717_v21, 0.0  ;;  %v5299_v55 = vadd.f32 %v5298_v3, %v5207_v37  ;;  %vm5742_vm8 = vcmp.gt.f32.partialorder %v5717_v21, 0.0 }
 0x86a   : > { %v5390_v61 = vpop.f32.mrf.mxu2 }
 0x86b   : > { %v8077_v51 = vpop.eup %8076  ;;  %v5802_v27 = vmul.f32 1.442695, %v5767_v16  ;;  %v5391_v43 = vadd.f32 %v5390_v61, %v5299_v55 }
 0x86c   : > { %v7353_v53 = vadd.f32 -1.0, %v8077_v51 }
 0x86d   : > { %v5568_v18 = vmul.f32 %v5490_v58, %v5391_v43  ;;  %8078 = vpow2.f32 %v5802_v27 }
 0x86e   : > { %v5209_v39 = vpop.f32.mrf.mxu0  ;;  %v5866_v8 = vsel %vm5741_vm14, %v5716_v14, %v7353_v53  ;;  %v5650_v42 = vpop.permute.xlu0 %5649 }
 0x86f   : > { %v5718_v48 = vadd.f32 %v12653_v6, %v5568_v18  ;;  %v5210_v26 = vadd.f32 %v5209_v39, %v12747_v7  ;;  %7389 = vmatmul.msk.f32.gmra.mxu3 %vm5882_vm0, %v5866_v8  ;;  %v12828_v6 = vpop.f32.mrf.mxu3 }
 0x870   : > { %v5301_v17 = vpop.f32.mrf.mxu1 }
 0x871   : > { %v5768_v46 = vmin.f32 %v5718_v48, 0.0  ;;  %v5302_v35 = vadd.f32 %v5301_v17, %v5210_v26  ;;  %vm5743_vm1 = vcmp.gt.f32.partialorder %v5718_v48, 0.0 }
 0x872   : > { %v5393_v56 = vpop.f32.mrf.mxu2 }
 0x873   : > { %v8079_v15 = vpop.eup %8078  ;;  %v5804_v19 = vmul.f32 1.442695, %v5768_v46  ;;  %v5394_v11 = vadd.f32 %v5393_v56, %v5302_v35 }
 0x874   : > { %v7354_v57 = vadd.f32 -1.0, %v8079_v15 }
 0x875   : > { %v5569_v20 = vmul.f32 %v5495_v9, %v5394_v11  ;;  %8080 = vpow2.f32 %v5804_v19 }
 0x876   : > { %v5212_v54 = vpop.f32.mrf.mxu0  ;;  %v5867_v41 = vsel %vm5742_vm8, %v5717_v21, %v7354_v57  ;;  %v5510_v39 = vpop.permute.xlu0 %5509 }
 0x877   : > { %v5719_v7 = vadd.f32 %v5645_v62, %v5569_v20  ;;  %v5213_v4 = vadd.f32 %v5212_v54, %v12764_v30  ;;  %7390 = vmatmul.msk.f32.gmra.mxu3 %vm5882_vm0, %v5867_v41  ;;  %v12835_v22 = vpop.f32.mrf.mxu3 }
 0x878   : > { %v5304_v47 = vpop.f32.mrf.mxu1 }
 0x879   : > { %v5769_v60 = vmin.f32 %v5719_v7, 0.0  ;;  %v5305_v59 = vadd.f32 %v5304_v47, %v5213_v4  ;;  %vm5744_vm9 = vcmp.gt.f32.partialorder %v5719_v7, 0.0 }
 0x87a   : > { %v5396_v33 = vpop.f32.mrf.mxu2 }
 0x87b   : > { %v8081_v12 = vpop.eup %8080  ;;  %v5806_v52 = vmul.f32 1.442695, %v5769_v60  ;;  %v5397_v45 = vadd.f32 %v5396_v33, %v5305_v59 }
 0x87c   : > { %v7355_v31 = vadd.f32 -1.0, %v8081_v12 }
 0x87d   : > { %v5570_v14 = vmul.f32 %v12676_v36, %v5397_v45  ;;  %8082 = vpow2.f32 %v5806_v52  ;;  %v5505_v36 = vpop.permute.xlu1 %5504 }
 0x87e   : > { %v5215_v63 = vpop.f32.mrf.mxu0  ;;  %v5868_v2 = vsel %vm5743_vm1, %v5718_v48, %v7355_v31  ;;  %v5665_v41 = vpop.permute.xlu0 %5664  ;;  %vm6370_vm1 = vcmask 8192  }
 0x87f   : > { %v5720_v24 = vadd.f32 %v5650_v42, %v5570_v14  ;;  %v5216_v30 = vadd.f32 %v5215_v63, %v12781_v50  ;;  %7391 = vmatmul.msk.f32.gmra.mxu3 %vm5882_vm0, %v5868_v2  ;;  %v12840_v27 = vpop.f32.mrf.mxu3 }
 0x880   : > { %v5307_v13 = vpop.f32.mrf.mxu1 }
 0x881   : > { %v5770_v23 = vmin.f32 %v5720_v24, 0.0  ;;  %v5308_v44 = vadd.f32 %v5307_v13, %v5216_v30  ;;  %vm5745_vm4 = vcmp.gt.f32.partialorder %v5720_v24, 0.0 }
 0x882   : > { %v5399_v34 = vpop.f32.mrf.mxu2 }
 0x883   : > { %v8083_v38 = vpop.eup %8082  ;;  %v5808_v25 = vmul.f32 1.442695, %v5770_v23  ;;  %v5400_v5 = vadd.f32 %v5399_v34, %v5308_v44 }
 0x884   : > { %v7356_v10 = vadd.f32 -1.0, %v8083_v38 }
 0x885   : > { %v5571_v21 = vmul.f32 %v5505_v36, %v5400_v5  ;;  %8084 = vpow2.f32 %v5808_v25  ;;  %v5660_v26 = vpop.permute.xlu1 %5659 }
 0x886   : > { %v5218_v37 = vpop.f32.mrf.mxu0  ;;  %v5869_v3 = vsel %vm5744_vm9, %v5719_v7, %v7356_v10  ;;  %v5525_v34 = vpop.permute.xlu0 %5524 }
 0x887   : > { %v5721_v50 = vadd.f32 %v12699_v28, %v5571_v21  ;;  %v5219_v16 = vadd.f32 %v5218_v37, %v12800_v40  ;;  %7392 = vmatmul.msk.f32.gmra.mxu3 %vm5882_vm0, %v5869_v3  ;;  %v12844_v20 = vpop.f32.mrf.mxu3 }
 0x888   : > { %v5310_v55 = vpop.f32.mrf.mxu1 }
 0x889   : > { %v5771_v61 = vmin.f32 %v5721_v50, 0.0  ;;  %v5311_v51 = vadd.f32 %v5310_v55, %v5219_v16  ;;  %vm5746_vm12 = vcmp.gt.f32.partialorder %v5721_v50, 0.0 }
 0x88a   : > { %v5402_v58 = vpop.f32.mrf.mxu2 }
 0x88b   : > { %v8085_v43 = vpop.eup %8084  ;;  %v5810_v53 = vmul.f32 1.442695, %v5771_v61  ;;  %v5403_v18 = vadd.f32 %v5402_v58, %v5311_v51 }
 0x88c   : > { %v7357_v8 = vadd.f32 -1.0, %v8085_v43 }
 0x88d   : > { %v5572_v48 = vmul.f32 %v5510_v39, %v5403_v18  ;;  %8086 = vpow2.f32 %v5810_v53  ;;  %v5520_v12 = vpop.permute.xlu1 %5519 }
 0x88e   : > { %v5221_v28 = vpop.f32.mrf.mxu0  ;;  %v5870_v17 = vsel %vm5745_vm4, %v5720_v24, %v7357_v8  ;;  %v5530_v39 = vpop.permute.xlu0 %5529 }
 0x88f   : > { %v5722_v40 = vadd.f32 %v5660_v26, %v5572_v48  ;;  %v5222_v46 = vadd.f32 %v5221_v28, %v12814_v0  ;;  %7393 = vmatmul.msk.f32.gmra.mxu3 %vm5882_vm0, %v5870_v17  ;;  %v12849_v24 = vpop.f32.mrf.mxu3 }
 0x890   : > { %v5313_v35 = vpop.f32.mrf.mxu1 }
 0x891   : > { %v5772_v56 = vmin.f32 %v5722_v40, 0.0  ;;  %v5314_v15 = vadd.f32 %v5313_v35, %v5222_v46  ;;  %vm5747_vm3 = vcmp.gt.f32.partialorder %v5722_v40, 0.0  ;;  %v6055_v35 = vld [vmem:[%s13119_s13 + $0x8] sm:$0xff] }
 0x892   : > { %v5405_v19 = vpop.f32.mrf.mxu2 }
 0x893   : > { %v8087_v11 = vpop.eup %8086  ;;  %v5812_v9 = vmul.f32 1.442695, %v5772_v56  ;;  %v5406_v57 = vadd.f32 %v5405_v19, %v5314_v15 }
 0x894   : > { %v7358_v62 = vadd.f32 -1.0, %v8087_v11 }
 0x895   : > { %v5573_v54 = vmul.f32 %v12720_v1, %v5406_v57  ;;  %8088 = vpow2.f32 %v5812_v9  ;;  %v5675_v10 = vpop.permute.xlu1 %5674 }
 0x896   : > { %v5224_v7 = vpop.f32.mrf.mxu0  ;;  %v5871_v4 = vsel %vm5746_vm12, %v5721_v50, %v7358_v62 }
 0x897   : > { %v5723_v0 = vadd.f32 %v5665_v41, %v5573_v54  ;;  %v5225_v47 = vadd.f32 %v5224_v7, %v12818_v49  ;;  %7394 = vmatmul.msk.f32.gmra.mxu3 %vm5882_vm0, %v5871_v4  ;;  %v12856_v55 = vpop.f32.mrf.mxu3  ;;  %v5535_v41 = vpop.permute.xlu2 %5534 }
 0x898   : > { %v5316_v60 = vpop.f32.mrf.mxu1 }
 0x899   : > { %v5773_v59 = vmin.f32 %v5723_v0, 0.0  ;;  %v5317_v33 = vadd.f32 %v5316_v60, %v5225_v47  ;;  %vm5748_vm5 = vcmp.gt.f32.partialorder %v5723_v0, 0.0  ;;  %v7406_v47 = vld [vmem:[%s13119_s13 + $0xd0] sm:$0xff] }
 0x89a   : > { %v5408_v52 = vpop.f32.mrf.mxu2 }
 0x89b   : > { %v8089_v45 = vpop.eup %8088  ;;  %v5814_v31 = vmul.f32 1.442695, %v5773_v59  ;;  %v5409_v14 = vadd.f32 %v5408_v52, %v5317_v33 }
 0x89c   : > { %v7359_v42 = vadd.f32 -1.0, %v8089_v45  ;;  %v6056_v45 = vld [vmem:[%s13119_s13 + $0x10] sm:$0xff] }
 0x89d   : > { %v5574_v1 = vmul.f32 %v5520_v12, %v5409_v14  ;;  %8090 = vpow2.f32 %v5814_v31  ;;  %v5680_v26 = vpop.permute.xlu1 %5679 }
 0x89e   : > { %v5227_v63 = vpop.f32.mrf.mxu0  ;;  %v5872_v2 = vsel %vm5747_vm3, %v5722_v40, %v7359_v42 }
 0x89f   : > { %v5724_v49 = vadd.f32 %v12742_v29, %v5574_v1  ;;  %v5228_v30 = vadd.f32 %v5227_v63, %v12823_v32  ;;  %7395 = vmatmul.msk.f32.gmra.mxu3 %vm5882_vm0, %v5872_v2 }
 0x8a0   : > { %v5319_v13 = vpop.f32.mrf.mxu1 }
 0x8a1   : > { %v5774_v23 = vmin.f32 %v5724_v49, 0.0  ;;  %v5320_v44 = vadd.f32 %v5319_v13, %v5228_v30  ;;  %vm5749_vm6 = vcmp.gt.f32.partialorder %v5724_v49, 0.0 }
 0x8a2   : > { %v5411_v38 = vpop.f32.mrf.mxu2 }
 0x8a3   : > { %v8091_v25 = vpop.eup %8090  ;;  %v5816_v5 = vmul.f32 1.442695, %v5774_v23  ;;  %v5412_v36 = vadd.f32 %v5411_v38, %v5320_v44 }
 0x8a4   : > { %v7360_v21 = vadd.f32 -1.0, %v8091_v25  ;;  %v5690_v25 = vpop.permute.xlu2 %5689 }
 0x8a5   : > { %v5575_v37 = vmul.f32 %v5525_v34, %v5412_v36  ;;  %8092 = vpow2.f32 %v5816_v5  ;;  %v5540_v23 = vpop.permute.xlu1 %5539  ;;  %v7407_v5 = vld [vmem:[%s13119_s13 + $0xd8] sm:$0xff] }
 0x8a6   : > { %v5230_v3 = vpop.f32.mrf.mxu0  ;;  %v5873_v50 = vsel %vm5748_vm5, %v5723_v0, %v7360_v21  ;;  %v5685_v0 = vpop.permute.xlu0 %5684 }
 0x8a7   : > { %v5725_v29 = vadd.f32 %v5675_v10, %v5575_v37  ;;  %v5231_v32 = vadd.f32 %v5230_v3, %v12828_v6  ;;  %7396 = vmatmul.msk.f32.gmra.mxu3 %vm5882_vm0, %v5873_v50  ;;  %v7408_v50 = vld [vmem:[%s13119_s13 + $0xe0] sm:$0xff] }
 0x8a8   : > { %v5322_v16 = vpop.f32.mrf.mxu1 }
 0x8a9   : > { %v5775_v61 = vmin.f32 %v5725_v29, 0.0  ;;  %v5323_v51 = vadd.f32 %v5322_v16, %v5231_v32  ;;  %vm5750_vm7 = vcmp.gt.f32.partialorder %v5725_v29, 0.0 }
 0x8aa   : > { %v5414_v58 = vpop.f32.mrf.mxu2 }
 0x8ab   : > { %v8093_v43 = vpop.eup %8092  ;;  %v5818_v53 = vmul.f32 1.442695, %v5775_v61  ;;  %v5415_v18 = vadd.f32 %v5414_v58, %v5323_v51 }
 0x8ac   : > { %v7361_v8 = vadd.f32 -1.0, %v8093_v43 }
 0x8ad   : > { %v5576_v48 = vmul.f32 %v5530_v39, %v5415_v18  ;;  %8094 = vpow2.f32 %v5818_v53 }
 0x8ae   : > { %v5233_v28 = vpop.f32.mrf.mxu0  ;;  %v5874_v17 = vsel %vm5749_vm6, %v5724_v49, %v7361_v8  ;;  %v5545_v39 = vpop.permute.xlu0 %5544 }
 0x8af   : > { %v5726_v6 = vadd.f32 %v5680_v26, %v5576_v48  ;;  %v5234_v40 = vadd.f32 %v5233_v28, %v12835_v22  ;;  %7397 = vmatmul.msk.f32.gmra.mxu3 %vm5882_vm0, %v5874_v17  ;;  %v6057_v48 = vld [vmem:[%s13119_s13 + $0x18] sm:$0xff]  ;;  %v5695_v17 = vpop.permute.xlu1 %5694 }
 0x8b0   : > { %v5325_v46 = vpop.f32.mrf.mxu1 }
 0x8b1   : > { %v5776_v56 = vmin.f32 %v5726_v6, 0.0  ;;  %v5326_v15 = vadd.f32 %v5325_v46, %v5234_v40  ;;  %vm5751_vm10 = vcmp.gt.f32.partialorder %v5726_v6, 0.0 }
 0x8b2   : > { %v5417_v19 = vpop.f32.mrf.mxu2  ;;  %v5982_v11 = vpop.f32.mrf.mxu3 }
 0x8b3   : > { %v8095_v9 = vpop.eup %8094  ;;  %v5820_v57 = vmul.f32 1.442695, %v5776_v56  ;;  %v5418_v62 = vadd.f32 %v5417_v19, %v5326_v15  ;;  %v6106_v54 = vmul.f32 %v6055_v35, %v5982_v11  ;;  %v6237_v14 = vmul.f32 %v7406_v47, %v5982_v11  ;;  %v6058_v19 = vld [vmem:[%s13119_s13 + $0x20] sm:$0xff]  ;;  %v7409_v11 = vld [vmem:[%s13119_s13 + $0xe8] sm:$0xff] }
 0x8b4   : > { %v7362_v7 = vadd.f32 -1.0, %v8095_v9 }
 0x8b5   : > { %v5577_v4 = vmul.f32 %v5535_v41, %v5418_v62  ;;  %v6134_v22 = vsel %vm6130_vm15, %v6106_v54, 0.0  ;;  %8096 = vpow2.f32 %v5820_v57  ;;  %v6264_v34 = vsel %vm6130_vm15, %v6237_v14, 0.0 }
 0x8b6   : > { %v5236_v60 = vpop.f32.mrf.mxu0  ;;  %6135 = vadd.xlane.f32.xlu1 %v6134_v22  ;;  %v5875_v59 = vsel %vm5750_vm7, %v5725_v29, %v7362_v7 }
 0x8b7   : > { %v5727_v33 = vadd.f32 %v5685_v0, %v5577_v4  ;;  %v5237_v12 = vadd.f32 %v5236_v60, %v12840_v27  ;;  %7398 = vmatmul.msk.f32.gmra.mxu3 %vm5882_vm0, %v5875_v59  ;;  %v5550_v0 = vpop.permute.xlu2 %5549 }
 0x8b8   : > { %v5328_v52 = vpop.f32.mrf.mxu1 }
 0x8b9   : > { %v5777_v31 = vmin.f32 %v5727_v33, 0.0  ;;  %v5329_v42 = vadd.f32 %v5328_v52, %v5237_v12  ;;  %vm5752_vm11 = vcmp.gt.f32.partialorder %v5727_v33, 0.0  ;;  %v5700_v52 = vpop.permute.xlu0 %5699 }
 0x8ba   : > { %v5420_v1 = vpop.f32.mrf.mxu2  ;;  %v5985_v63 = vpop.f32.mrf.mxu3 }
 0x8bb   : > { %v8097_v2 = vpop.eup %8096  ;;  %v5822_v49 = vmul.f32 1.442695, %v5777_v31  ;;  %v5421_v30 = vadd.f32 %v5420_v1, %v5329_v42  ;;  %v6107_v13 = vmul.f32 %v6056_v45, %v5985_v63  ;;  %v6238_v32 = vmul.f32 %v7407_v5, %v5985_v63  ;;  %v6059_v63 = vld [vmem:[%s13119_s13 + $0x28] sm:$0xff] }
 0x8bc   : > { %v7363_v44 = vadd.f32 -1.0, %v8097_v2  ;;  %v7410_v2 = vld [vmem:[%s13119_s13 + $0xf0] sm:$0xff] }
 0x8bd   : > { %v5578_v27 = vmul.f32 %v5540_v23, %v5421_v30  ;;  %v6137_v38 = vsel %vm6130_vm15, %v6107_v13, 0.0  ;;  %8098 = vpow2.f32 %v5822_v49  ;;  %v6267_v26 = vsel %vm6130_vm15, %v6238_v32, 0.0  ;;  %v6060_v32 = vld [vmem:[%s13119_s13 + $0x30] sm:$0xff] }
 0x8be   : > { %v5239_v36 = vpop.f32.mrf.mxu0  ;;  %6265 = vadd.xlane.f32.xlu1 %v6264_v34  ;;  %6138 = vadd.xlane.f32.xlu2 %v6137_v38  ;;  %v5876_v10 = vsel %vm5751_vm10, %v5726_v6, %v7363_v44 }
 0x8bf   : > { %v5728_v21 = vadd.f32 %v5690_v25, %v5578_v27  ;;  %v5240_v37 = vadd.f32 %v5239_v36, %v12844_v20  ;;  %7399 = vmatmul.msk.f32.gmra.mxu3 %vm5882_vm0, %v5876_v10  ;;  %v5555_v25 = vpop.permute.xlu1 %5554 }
 0x8c0   : > { %v5331_v3 = vpop.f32.mrf.mxu1 }
 0x8c1   : > { %v5778_v29 = vmin.f32 %v5728_v21, 0.0  ;;  %v5332_v16 = vadd.f32 %v5331_v3, %v5240_v37  ;;  %vm5753_vm13 = vcmp.gt.f32.partialorder %v5728_v21, 0.0  ;;  %v5705_v37 = vpop.permute.xlu2 %5704 }
 0x8c2   : > { %v5423_v61 = vpop.f32.mrf.mxu2  ;;  %v5988_v51 = vpop.f32.mrf.mxu3 }
 0x8c3   : > { %v8099_v58 = vpop.eup %8098  ;;  %v5824_v43 = vmul.f32 1.442695, %v5778_v29  ;;  %v5424_v53 = vadd.f32 %v5423_v61, %v5332_v16  ;;  %v6239_v18 = vmul.f32 %v7408_v50, %v5988_v51  ;;  %v6108_v56 = vmul.f32 %v6057_v48, %v5988_v51  ;;  %v6054_v29 = vld [vmem:[%s13119_s13] sm:$0xff]  ;;  %v7405_v48 = vld [vmem:[%s13119_s13 + $0xc8] sm:$0xff] }
 0x8c4   : > { %v7364_v8 = vadd.f32 -1.0, %v8099_v58 }
 0x8c5   : > { %v5579_v20 = vmul.f32 %v5545_v39, %v5424_v53  ;;  %v6270_v28 = vsel %vm6130_vm15, %v6239_v18, 0.0  ;;  %8100 = vpow2.f32 %v5824_v43  ;;  %v6140_v47 = vsel %vm6130_vm15, %v6108_v56, 0.0 }
 0x8c6   : > { %v5242_v6 = vpop.f32.mrf.mxu0  ;;  %6268 = vadd.xlane.f32.xlu2 %v6267_v26  ;;  %6271 = vadd.xlane.f32.xlu0 %v6270_v28  ;;  %v5877_v40 = vsel %vm5752_vm11, %v5727_v33, %v7364_v8  ;;  %v7412_v28 = vld [vmem:[%s13119_s13 + $0x100] sm:$0xff] }
 0x8c7   : > { %v5729_v46 = vadd.f32 %v5695_v17, %v5579_v20  ;;  %v5243_v35 = vadd.f32 %v5242_v6, %v12849_v24  ;;  %7400 = vmatmul.msk.f32.gmra.mxu3 %vm5882_vm0, %v5877_v40 }
 0x8c8   : > { %v5334_v15 = vpop.f32.mrf.mxu1 }
 0x8c9   : > { %v5779_v9 = vmin.f32 %v5729_v46, 0.0  ;;  %v5335_v57 = vadd.f32 %v5334_v15, %v5243_v35  ;;  %vm5754_vm2 = vcmp.gt.f32.partialorder %v5729_v46, 0.0 }
 0x8ca   : > { %v5426_v62 = vpop.f32.mrf.mxu2  ;;  %v5991_v54 = vpop.f32.mrf.mxu3 }
 0x8cb   : > { %v8101_v41 = vpop.eup %8100  ;;  %v5826_v7 = vmul.f32 1.442695, %v5779_v9  ;;  %v5427_v4 = vadd.f32 %v5426_v62, %v5335_v57  ;;  %v6109_v24 = vmul.f32 %v6058_v19, %v5991_v54  ;;  %v6240_v22 = vmul.f32 %v7409_v11, %v5991_v54  ;;  %v7411_v19 = vld [vmem:[%s13119_s13 + $0xf8] sm:$0xff]  ;;  %v6062_v9 = vld [vmem:[%s13119_s13 + $0x40] sm:$0xff]  ;;  %v7413_v57 = vld [vmem:[%s13119_s13 + $0x108] sm:$0xff] }
 0x8cc   : > { %v7365_v60 = vadd.f32 -1.0, %v8101_v41 }
 0x8cd   : > { %v5580_v59 = vmul.f32 %v5550_v0, %v5427_v4  ;;  %v6273_v33 = vsel %vm6130_vm15, %v6240_v22, 0.0  ;;  %v6143_v12 = vsel %vm6130_vm15, %v6109_v24, 0.0  ;;  %8102 = vpow2.f32 %v5826_v7  ;;  %v6061_v0 = vld [vmem:[%s13119_s13 + $0x38] sm:$0xff] }
 0x8ce   : > { %v5245_v45 = vpop.f32.mrf.mxu0  ;;  %6141 = vadd.xlane.f32.xlu2 %v6140_v47  ;;  %6274 = vadd.xlane.f32.xlu1 %v6273_v33  ;;  %v5878_v31 = vsel %vm5753_vm13, %v5728_v21, %v7365_v60  ;;  %v6063_v47 = vld [vmem:[%s13119_s13 + $0x48] sm:$0xff] }
 0x8cf   : > { %v5730_v14 = vadd.f32 %v5700_v52, %v5580_v59  ;;  %v5246_v42 = vadd.f32 %v5245_v45, %v12856_v55  ;;  %6144 = vadd.xlane.f32.xlu0 %v6143_v12  ;;  %7401 = vmatmul.msk.f32.gmra.mxu3 %vm5882_vm0, %v5878_v31  ;;  %v7414_v45 = vld [vmem:[%s13119_s13 + $0x110] sm:$0xff]  ;;  %v7415_v31 = vld [vmem:[%s13119_s13 + $0x118] sm:$0xff] }
 0x8d0   : > { %v5337_v1 = vpop.f32.mrf.mxu1 }
 0x8d1   : > { %v5780_v49 = vmin.f32 %v5730_v14, 0.0  ;;  %v5338_v30 = vadd.f32 %v5337_v1, %v5246_v42  ;;  %vm5755_vm14 = vcmp.gt.f32.partialorder %v5730_v14, 0.0 }
 0x8d2   : > { %v5429_v13 = vpop.f32.mrf.mxu2  ;;  %v5994_v23 = vpop.f32.mrf.mxu3 }
 0x8d3   : > { %v8103_v44 = vpop.eup %8102  ;;  %v5828_v27 = vmul.f32 1.442695, %v5780_v49  ;;  %v5430_v34 = vadd.f32 %v5429_v13, %v5338_v30  ;;  %v6110_v55 = vmul.f32 %v6059_v63, %v5994_v23  ;;  %v6241_v38 = vmul.f32 %v7410_v2, %v5994_v23  ;;  %v6064_v49 = vld [vmem:[%s13119_s13 + $0x50] sm:$0xff]  ;;  %v6065_v30 = vld [vmem:[%s13119_s13 + $0x58] sm:$0xff]  ;;  %v7416_v13 = vld [vmem:[%s13119_s13 + $0x120] sm:$0xff] }
 0x8d4   : > { %v7366_v5 = vadd.f32 -1.0, %v8103_v44 }
 0x8d5   : > { %v5581_v36 = vmul.f32 %v5555_v25, %v5430_v34  ;;  %v6276_v10 = vsel %vm6130_vm15, %v6241_v38, 0.0  ;;  %v6146_v21 = vsel %vm6130_vm15, %v6110_v55, 0.0  ;;  %8104 = vpow2.f32 %v5828_v27 }
 0x8d6   : > { %6277 = vadd.xlane.f32.xlu2 %v6276_v10  ;;  %6147 = vadd.xlane.f32.xlu1 %v6146_v21  ;;  %v5879_v3 = vsel %vm5754_vm2, %v5729_v46, %v7366_v5  ;;  %v6066_v5 = vld [vmem:[%s13119_s13 + $0x60] sm:$0xff] }
 0x8d7   : > { %v5731_v50 = vadd.f32 %v5705_v37, %v5581_v36  ;;  %7402 = vmatmul.msk.f32.gmra.mxu3 %vm5882_vm0, %v5879_v3  ;;  %v7417_v36 = vld [vmem:[%s13119_s13 + $0x128] sm:$0xff] }
 0x8d9   : > { %v5781_v16 = vmin.f32 %v5731_v50, 0.0  ;;  %vm5756_vm8 = vcmp.gt.f32.partialorder %v5731_v50, 0.0 }
 0x8da   : > { %v5979_v61 = vpop.f32.mrf.mxu2  ;;  %v5997_v51 = vpop.f32.mrf.mxu3 }
 0x8db   : > { %v8105_v58 = vpop.eup %8104  ;;  %v5830_v43 = vmul.f32 1.442695, %v5781_v16  ;;  %v6105_v53 = vmul.f32 %v6054_v29, %v5979_v61  ;;  %v6111_v18 = vmul.f32 %v6060_v32, %v5997_v51  ;;  %v6236_v17 = vmul.f32 %v7405_v48, %v5979_v61  ;;  %v6067_v29 = vld [vmem:[%s13119_s13 + $0x68] sm:$0xff]  ;;  %v7418_v32 = vld [vmem:[%s13119_s13 + $0x130] sm:$0xff] }
 0x8dc   : > { %v7367_v39 = vadd.f32 -1.0, %v8105_v58  ;;  %v6242_v62 = vmul.f32 %v7411_v19, %v5997_v51  ;;  %v7421_v19 = vld [vmem:[%s13119_s13 + $0x148] sm:$0xff] }
 0x8dd   : > { %v6131_v8 = vsel %vm6130_vm15, %v6105_v53, 0.0  ;;  %v6149_v20 = vsel %vm6130_vm15, %v6111_v18, 0.0  ;;  %8106 = vpow2.f32 %v5830_v43  ;;  %v6261_v56 = vsel %vm6130_vm15, %v6236_v17, 0.0  ;;  %v6068_v53 = vld [vmem:[%s13119_s13 + $0x70] sm:$0xff]  ;;  %v7419_v18 = vld [vmem:[%s13119_s13 + $0x138] sm:$0xff]  ;;  %v7420_v17 = vld [vmem:[%s13119_s13 + $0x140] sm:$0xff] }
 0x8de   : > { %6132 = vadd.xlane.f32.xlu0 %v6131_v8  ;;  %6150 = vadd.xlane.f32.xlu2 %v6149_v20  ;;  %v5880_v26 = vsel %vm5755_vm14, %v5730_v14, %v7367_v39  ;;  %v6279_v4 = vsel %vm6130_vm15, %v6242_v62, 0.0 }
 0x8df   : > { %7403 = vmatmul.msk.f32.gmra.mxu3 %vm5882_vm0, %v5880_v26 }
 0x8e2   : > { %v6000_v6 = vpop.f32.mrf.mxu3 }
 0x8e3   : > { %v8107_v40 = vpop.eup %8106  ;;  %v6243_v46 = vmul.f32 %v7412_v28, %v6000_v6  ;;  %v6112_v60 = vmul.f32 %v6061_v0, %v6000_v6  ;;  %v6069_v28 = vld [vmem:[%s13119_s13 + $0x78] sm:$0xff] }
 0x8e4   : > { %v7368_v35 = vadd.f32 -1.0, %v8107_v40 }
 0x8e5   : > { %v6282_v15 = vsel %vm6130_vm15, %v6243_v46, 0.0  ;;  %v6152_v12 = vsel %vm6130_vm15, %v6112_v60, 0.0  ;;  %v6072_v60 = vld [vmem:[%s13119_s13 + $0x90] sm:$0xff] }
 0x8e6   : > { %6262 = vadd.xlane.f32.xlu0 %v6261_v56  ;;  %6283 = vadd.xlane.f32.xlu1 %v6282_v15  ;;  %v5881_v11 = vsel %vm5756_vm8, %v5731_v50, %v7368_v35  ;;  %v6070_v15 = vld [vmem:[%s13119_s13 + $0x80] sm:$0xff] }
 0x8e7   : > { %7404 = vmatmul.msk.f32.gmra.mxu3 %vm5882_vm0, %v5881_v11  ;;  %vm6366_vm0 = vcmask 7168  }
 0x8ea   : > { %v6003_v54 = vpop.f32.mrf.mxu3 }
 0x8eb   : > { %v6113_v41 = vmul.f32 %v6062_v9, %v6003_v54  ;;  %v6244_v7 = vmul.f32 %v7413_v57, %v6003_v54 }
 0x8ed   : > { %v6285_v24 = vsel %vm6130_vm15, %v6244_v7, 0.0  ;;  %v6155_v22 = vsel %vm6130_vm15, %v6113_v41, 0.0  ;;  %v6071_v41 = vld [vmem:[%s13119_s13 + $0x88] sm:$0xff]  ;;  %v7422_v7 = vld [vmem:[%s13119_s13 + $0x150] sm:$0xff] }
 0x8ee   : > { %6280 = vadd.xlane.f32.xlu0 %v6279_v4  ;;  %6286 = vadd.xlane.f32.xlu2 %v6285_v24 }
 0x8ef   : > { %6156 = vadd.xlane.f32.xlu1 %v6155_v22 }
 0x8f2   : > { %v6006_v59 = vpop.f32.mrf.mxu3 }
 0x8f3   : > { %v6114_v33 = vmul.f32 %v6063_v47, %v6006_v59  ;;  %v6245_v14 = vmul.f32 %v7414_v45, %v6006_v59  ;;  %v7423_v59 = vld [vmem:[%s13119_s13 + $0x158] sm:$0xff] }
 0x8f5   : > { %v6158_v52 = vsel %vm6130_vm15, %v6114_v33, 0.0  ;;  %v6288_v63 = vsel %vm6130_vm15, %v6245_v14, 0.0 }
 0x8f6   : > { %6153 = vadd.xlane.f32.xlu0 %v6152_v12  ;;  %6159 = vadd.xlane.f32.xlu2 %v6158_v52 }
 0x8fa   : > { %v6009_v42 = vpop.f32.mrf.mxu3 }
 0x8fb   : > { %v6246_v1 = vmul.f32 %v7415_v31, %v6009_v42  ;;  %v6115_v23 = vmul.f32 %v6064_v49, %v6009_v42  ;;  %v6073_v42 = vld [vmem:[%s13119_s13 + $0x98] sm:$0xff] }
 0x8fd   : > { %v6291_v2 = vsel %vm6130_vm15, %v6246_v1, 0.0  ;;  %v6161_v55 = vsel %vm6130_vm15, %v6115_v23, 0.0  ;;  %v7424_v1 = vld [vmem:[%s13119_s13 + $0x160] sm:$0xff] }
 0x8fe   : > { %6289 = vadd.xlane.f32.xlu0 %v6288_v63  ;;  %6292 = vadd.xlane.f32.xlu1 %v6291_v2 }
 0x902   : > { %v6012_v44 = vpop.f32.mrf.mxu3 }
 0x903   : > { %v6116_v27 = vmul.f32 %v6065_v30, %v6012_v44  ;;  %v6247_v34 = vmul.f32 %v7416_v13, %v6012_v44  ;;  %v6074_v44 = vld [vmem:[%s13119_s13 + $0xa0] sm:$0xff] }
 0x905   : > { %v6294_v38 = vsel %vm6130_vm15, %v6247_v34, 0.0  ;;  %v6164_v25 = vsel %vm6130_vm15, %v6116_v27, 0.0  ;;  %v7425_v27 = vld [vmem:[%s13119_s13 + $0x168] sm:$0xff] }
 0x906   : > { %6162 = vadd.xlane.f32.xlu0 %v6161_v55  ;;  %6295 = vadd.xlane.f32.xlu2 %v6294_v38 }
 0x907   : > { %6165 = vadd.xlane.f32.xlu1 %v6164_v25 }
 0x90a   : > { %v6015_v10 = vpop.f32.mrf.mxu3 }
 0x90b   : > { %v6117_v21 = vmul.f32 %v6066_v5, %v6015_v10  ;;  %v6248_v37 = vmul.f32 %v7417_v36, %v6015_v10 }
 0x90d   : > { %v6167_v3 = vsel %vm6130_vm15, %v6117_v21, 0.0  ;;  %v6297_v50 = vsel %vm6130_vm15, %v6248_v37, 0.0  ;;  %v6075_v37 = vld [vmem:[%s13119_s13 + $0xa8] sm:$0xff] }
 0x90e   : > { %6168 = vadd.xlane.f32.xlu2 %v6167_v3  ;;  %6298 = vadd.xlane.f32.xlu0 %v6297_v50  ;;  %v7426_v3 = vld [vmem:[%s13119_s13 + $0x170] sm:$0xff] }
 0x912   : > { %v6018_v16 = vpop.f32.mrf.mxu3 }
 0x913   : > { %v6118_v61 = vmul.f32 %v6067_v29, %v6018_v16  ;;  %v6249_v51 = vmul.f32 %v7418_v32, %v6018_v16 }
 0x915   : > { %v6300_v58 = vsel %vm6130_vm15, %v6249_v51, 0.0  ;;  %v6170_v43 = vsel %vm6130_vm15, %v6118_v61, 0.0 }
 0x916   : > { %6301 = vadd.xlane.f32.xlu1 %v6300_v58  ;;  %6171 = vadd.xlane.f32.xlu0 %v6170_v43 }
 0x91a   : > { %v6021_v39 = vpop.f32.mrf.mxu3 }
 0x91b   : > { %v6119_v8 = vmul.f32 %v6068_v53, %v6021_v39  ;;  %v6250_v20 = vmul.f32 %v7419_v18, %v6021_v39 }
 0x91d   : > { %v6303_v48 = vsel %vm6130_vm15, %v6250_v20, 0.0  ;;  %v6173_v26 = vsel %vm6130_vm15, %v6119_v8, 0.0  ;;  %v6076_v20 = vld [vmem:[%s13119_s13 + $0xb0] sm:$0xff] }
 0x91e   : > { %6304 = vadd.xlane.f32.xlu2 %v6303_v48  ;;  %6174 = vadd.xlane.f32.xlu1 %v6173_v26  ;;  %v7427_v48 = vld [vmem:[%s13119_s13 + $0x178] sm:$0xff] }
 0x922   : > { %v6024_v6 = vpop.f32.mrf.mxu3 }
 0x923   : > { %v6120_v40 = vmul.f32 %v6069_v28, %v6024_v6  ;;  %v6251_v46 = vmul.f32 %v7420_v17, %v6024_v6 }
 0x925   : > { %v6176_v35 = vsel %vm6130_vm15, %v6120_v40, 0.0  ;;  %v6306_v56 = vsel %vm6130_vm15, %v6251_v46, 0.0 }
 0x926   : > { %6177 = vadd.xlane.f32.xlu2 %v6176_v35  ;;  %6307 = vadd.xlane.f32.xlu0 %v6306_v56 }
 0x929   : > { %v6136_v36 = vpop.xlane.xlu1 %6135 }
 0x92a   : > { %v6027_v11 = vpop.f32.mrf.mxu3 }
 0x92b   : > { %v6121_v9 = vmul.f32 %v6070_v15, %v6027_v11  ;;  %v6252_v57 = vmul.f32 %v7421_v19, %v6027_v11 }
 0x92d   : > { %v6309_v62 = vsel %vm6130_vm15, %v6252_v57, 0.0  ;;  %v6179_v54 = vsel %vm6130_vm15, %v6121_v9, 0.0  ;;  %v6077_v9 = vld [vmem:[%s13119_s13 + $0xb8] sm:$0xff]  ;;  %v7428_v57 = vld [vmem:[%s13119_s13 + $0x180] sm:$0xff] }
 0x92e   : > { %6310 = vadd.xlane.f32.xlu2 %v6309_v62  ;;  %6180 = vadd.xlane.f32.xlu1 %v6179_v54 }
 0x931   : > { %v6139_v63 = vpop.xlane.xlu2 %6138  ;;  %v6266_v39 = vpop.xlane.xlu1 %6265 }
 0x932   : > { %v6030_v4 = vpop.f32.mrf.mxu3 }
 0x933   : > { %v6122_v24 = vmul.f32 %v6071_v41, %v6030_v4  ;;  %v6253_v22 = vmul.f32 %v7422_v7, %v6030_v4 }
 0x935   : > { %v6312_v0 = vsel %vm6130_vm15, %v6253_v22, 0.0  ;;  %v6182_v47 = vsel %vm6130_vm15, %v6122_v24, 0.0 }
 0x936   : > { %6313 = vadd.xlane.f32.xlu1 %v6312_v0  ;;  %6183 = vadd.xlane.f32.xlu0 %v6182_v47  ;;  %v6078_v0 = vld [vmem:[%s13119_s13 + $0xc0] sm:$0xff]  ;;  %v7429_v47 = vld [vmem:[%s13119_s13 + $0x188] sm:$0xff] }
 0x939   : > { %v6272_v14 = vpop.xlane.xlu0 %6271  ;;  %v6269_v38 = vpop.xlane.xlu2 %6268 }
 0x93a   : > { %v6033_v33 = vpop.f32.mrf.mxu3 }
 0x93b   : > { %v6123_v12 = vmul.f32 %v6072_v60, %v6033_v33  ;;  %v6254_v52 = vmul.f32 %v7423_v59, %v6033_v33 }
 0x93d   : > { %v6185_v45 = vsel %vm6130_vm15, %v6123_v12, 0.0  ;;  %v6315_v31 = vsel %vm6130_vm15, %v6254_v52, 0.0 }
 0x93e   : > { %6186 = vadd.xlane.f32.xlu2 %v6185_v45  ;;  %6316 = vadd.xlane.f32.xlu0 %v6315_v31 }
 0x941   : > { %v6142_v58 = vpop.xlane.xlu2 %6141  ;;  %v6275_v19 = vpop.xlane.xlu1 %6274 }
 0x942   : > { %v6036_v2 = vpop.f32.mrf.mxu3  ;;  %v6145_v34 = vpop.xlane.xlu0 %6144 }
 0x943   : > { %v6124_v49 = vmul.f32 %v6073_v42, %v6036_v2  ;;  %v6255_v30 = vmul.f32 %v7424_v1, %v6036_v2 }
 0x945   : > { %v6318_v13 = vsel %vm6130_vm15, %v6255_v30, 0.0  ;;  %v6188_v23 = vsel %vm6130_vm15, %v6124_v49, 0.0 }
 0x946   : > { %6319 = vadd.xlane.f32.xlu2 %v6318_v13  ;;  %6189 = vadd.xlane.f32.xlu1 %v6188_v23 }
 0x949   : > { %v6278_v62 = vpop.xlane.xlu2 %6277  ;;  %v6148_v45 = vpop.xlane.xlu1 %6147 }
 0x94a   : > { %v6039_v55 = vpop.f32.mrf.mxu3 }
 0x94b   : > { %v6125_v25 = vmul.f32 %v6074_v44, %v6039_v55  ;;  %v6256_v5 = vmul.f32 %v7425_v27, %v6039_v55 }
 0x94d   : > { %v6321_v10 = vsel %vm6130_vm15, %v6256_v5, 0.0  ;;  %v6191_v21 = vsel %vm6130_vm15, %v6125_v25, 0.0 }
 0x94e   : > { %6322 = vadd.xlane.f32.xlu1 %v6321_v10  ;;  %6192 = vadd.xlane.f32.xlu0 %v6191_v21 }
 0x951   : > { %v6133_v50 = vpop.xlane.xlu0 %6132 }
 0x952   : > { %v6206_v29 = vadd.f32 %v6136_v36, %v6133_v50  ;;  %v6042_v32 = vpop.f32.mrf.mxu3 }
 0x953   : > { %v6126_v16 = vmul.f32 %v6075_v37, %v6042_v32  ;;  %v6257_v61 = vmul.f32 %v7426_v3, %v6042_v32 }
 0x954   : > { %v6207_v51 = vadd.f32 %v6206_v29, %v6139_v63 }
 0x955   : > { %v6194_v43 = vsel %vm6130_vm15, %v6126_v16, 0.0  ;;  %v6324_v53 = vsel %vm6130_vm15, %v6257_v61, 0.0 }
 0x956   : > { %v6208_v18 = vadd.f32 %v6207_v51, %v6142_v58  ;;  %6195 = vadd.xlane.f32.xlu2 %v6194_v43  ;;  %6325 = vadd.xlane.f32.xlu0 %v6324_v53 }
 0x958   : > { %v6209_v8 = vadd.f32 %v6208_v18, %v6145_v34 }
 0x959   : > { %v6263_v26 = vpop.xlane.xlu0 %6262  ;;  %v6284_v42 = vpop.xlane.xlu1 %6283 }
 0x95a   : > { %v6336_v28 = vadd.f32 %v6266_v39, %v6263_v26  ;;  %v6045_v17 = vpop.f32.mrf.mxu3  ;;  %v6210_v3 = vadd.f32 %v6209_v8, %v6148_v45 }
 0x95b   : > { %v6127_v6 = vmul.f32 %v6076_v20, %v6045_v17  ;;  %v6258_v40 = vmul.f32 %v7427_v48, %v6045_v17 }
 0x95c   : > { %v6337_v46 = vadd.f32 %v6336_v28, %v6269_v38 }
 0x95d   : > { %v6327_v35 = vsel %vm6130_vm15, %v6258_v40, 0.0  ;;  %v6197_v56 = vsel %vm6130_vm15, %v6127_v6, 0.0 }
 0x95e   : > { %v6338_v15 = vadd.f32 %v6337_v46, %v6272_v14  ;;  %6328 = vadd.xlane.f32.xlu2 %v6327_v35  ;;  %6198 = vadd.xlane.f32.xlu1 %v6197_v56  ;;  %v6151_v14 = vpop.xlane.xlu2 %6150 }
 0x95f   : > { %v6211_v32 = vadd.f32 %v6210_v3, %v6151_v14 }
 0x960   : > { %v6339_v11 = vadd.f32 %v6338_v15, %v6275_v19 }
 0x961   : > { %v6281_v31 = vpop.xlane.xlu0 %6280 }
 0x962   : > { %v6340_v54 = vadd.f32 %v6339_v11, %v6278_v62  ;;  %v6048_v41 = vpop.f32.mrf.mxu3  ;;  %v6157_v2 = vpop.xlane.xlu1 %6156 }
 0x963   : > { %v6128_v7 = vmul.f32 %v6077_v9, %v6048_v41  ;;  %v6259_v4 = vmul.f32 %v7428_v57, %v6048_v41 }
 0x964   : > { %v6341_v16 = vadd.f32 %v6340_v54, %v6281_v31 }
 0x965   : > { %v6330_v24 = vsel %vm6130_vm15, %v6259_v4, 0.0  ;;  %v6200_v22 = vsel %vm6130_vm15, %v6128_v7, 0.0 }
 0x966   : > { %6331 = vadd.xlane.f32.xlu1 %v6330_v24  ;;  %6201 = vadd.xlane.f32.xlu0 %v6200_v22  ;;  %v6287_v1 = vpop.xlane.xlu2 %6286  ;;  %v6342_v58 = vadd.f32 %v6341_v16, %v6284_v42  ;;  %v6368_v16 = vld [vmem:[%s13120_s14] sm:$0x1] }
 0x968   : > { %v6343_v39 = vadd.f32 %v6342_v58, %v6287_v1 }
 0x969   : > { %v6154_v63 = vpop.xlane.xlu0 %6153 }
 0x96a   : > { %v6051_v60 = vpop.f32.mrf.mxu3  ;;  %v6212_v51 = vadd.f32 %v6211_v32, %v6154_v63 }
 0x96b   : > { %v6129_v59 = vmul.f32 %v6078_v0, %v6051_v60  ;;  %v6260_v33 = vmul.f32 %v7429_v47, %v6051_v60 }
 0x96c   : > { %v6213_v53 = vadd.f32 %v6212_v51, %v6157_v2 }
 0x96d   : > { %v6203_v12 = vsel %vm6130_vm15, %v6129_v59, 0.0  ;;  %v6333_v52 = vsel %vm6130_vm15, %v6260_v33, 0.0 }
 0x96e   : > { %6204 = vadd.xlane.f32.xlu2 %v6203_v12  ;;  %6334 = vadd.xlane.f32.xlu0 %v6333_v52  ;;  %v6160_v49 = vpop.xlane.xlu2 %6159 }
 0x96f   : > { %v6214_v48 = vadd.f32 %v6213_v53, %v6160_v49 }
 0x971   : > { %v6290_v30 = vpop.xlane.xlu0 %6289  ;;  %v6293_v13 = vpop.xlane.xlu1 %6292 }
 0x972   : > { %v6344_v26 = vadd.f32 %v6343_v39, %v6290_v30 }
 0x974   : > { %v6345_v17 = vadd.f32 %v6344_v26, %v6293_v13 }
 0x979   : > { %v6296_v23 = vpop.xlane.xlu2 %6295  ;;  %v6163_v44 = vpop.xlane.xlu0 %6162 }
 0x97a   : > { %v6166_v27 = vpop.xlane.xlu1 %6165  ;;  %v6215_v28 = vadd.f32 %v6214_v48, %v6163_v44  ;;  %v6346_v46 = vadd.f32 %v6345_v17, %v6296_v23 }
 0x97c   : > { %v6216_v8 = vadd.f32 %v6215_v28, %v6166_v27 }
 0x981   : > { %v6169_v34 = vpop.xlane.xlu2 %6168  ;;  %v6299_v55 = vpop.xlane.xlu0 %6298 }
 0x982   : > { %v6217_v35 = vadd.f32 %v6216_v8, %v6169_v34  ;;  %v6347_v56 = vadd.f32 %v6346_v46, %v6299_v55 }
 0x989   : > { %v6302_v38 = vpop.xlane.xlu1 %6301  ;;  %v6172_v5 = vpop.xlane.xlu0 %6171 }
 0x98a   : > { %v6348_v19 = vadd.f32 %v6347_v56, %v6302_v38  ;;  %v6218_v11 = vadd.f32 %v6217_v35, %v6172_v5 }
 0x991   : > { %v6305_v25 = vpop.xlane.xlu2 %6304  ;;  %v6175_v36 = vpop.xlane.xlu1 %6174 }
 0x992   : > { %v6349_v9 = vadd.f32 %v6348_v19, %v6305_v25  ;;  %v6219_v57 = vadd.f32 %v6218_v11, %v6175_v36 }
 0x999   : > { %v6178_v10 = vpop.xlane.xlu2 %6177  ;;  %v6308_v21 = vpop.xlane.xlu0 %6307 }
 0x99a   : > { %v6220_v54 = vadd.f32 %v6219_v57, %v6178_v10  ;;  %v6350_v41 = vadd.f32 %v6349_v9, %v6308_v21 }
 0x9a1   : > { %v6181_v37 = vpop.xlane.xlu1 %6180  ;;  %v6311_v50 = vpop.xlane.xlu2 %6310 }
 0x9a2   : > { %v6351_v4 = vadd.f32 %v6350_v41, %v6311_v50  ;;  %v6221_v24 = vadd.f32 %v6220_v54, %v6181_v37 }
 0x9a9   : > { %v6184_v29 = vpop.xlane.xlu0 %6183  ;;  %v6314_v61 = vpop.xlane.xlu1 %6313 }
 0x9aa   : > { %v6352_v0 = vadd.f32 %v6351_v4, %v6314_v61  ;;  %v6222_v47 = vadd.f32 %v6221_v24, %v6184_v29 }
 0x9b1   : > { %v6187_v43 = vpop.xlane.xlu2 %6186  ;;  %v6317_v18 = vpop.xlane.xlu0 %6316 }
 0x9b2   : > { %v6223_v60 = vadd.f32 %v6222_v47, %v6187_v43  ;;  %v6353_v59 = vadd.f32 %v6352_v0, %v6317_v18 }
 0x9b9   : > { %v6190_v20 = vpop.xlane.xlu1 %6189  ;;  %v6320_v6 = vpop.xlane.xlu2 %6319 }
 0x9ba   : > { %v6354_v33 = vadd.f32 %v6353_v59, %v6320_v6  ;;  %v6224_v12 = vadd.f32 %v6223_v60, %v6190_v20 }
 0x9c1   : > { %v6193_v40 = vpop.xlane.xlu0 %6192  ;;  %v6323_v15 = vpop.xlane.xlu1 %6322 }
 0x9c2   : > { %v6355_v31 = vadd.f32 %v6354_v33, %v6323_v15  ;;  %v6225_v14 = vadd.f32 %v6224_v12, %v6193_v40 }
 0x9c9   : > { %v6196_v62 = vpop.xlane.xlu2 %6195  ;;  %v6326_v7 = vpop.xlane.xlu0 %6325 }
 0x9ca   : > { %v6226_v42 = vadd.f32 %v6225_v14, %v6196_v62  ;;  %v6356_v1 = vadd.f32 %v6355_v31, %v6326_v7 }
 0x9d1   : > { %v6199_v22 = vpop.xlane.xlu1 %6198  ;;  %v6329_v52 = vpop.xlane.xlu2 %6328 }
 0x9d2   : > { %v6357_v2 = vadd.f32 %v6356_v1, %v6329_v52  ;;  %v6227_v49 = vadd.f32 %v6226_v42, %v6199_v22 }
 0x9d9   : > { %v6202_v45 = vpop.xlane.xlu0 %6201  ;;  %v6332_v63 = vpop.xlane.xlu1 %6331 }
 0x9da   : > { %v6358_v30 = vadd.f32 %v6357_v2, %v6332_v63  ;;  %v6228_v13 = vadd.f32 %v6227_v49, %v6202_v45 }
 0x9e1   : > { %v6205_v23 = vpop.xlane.xlu2 %6204  ;;  %v6335_v44 = vpop.xlane.xlu0 %6334 }
 0x9e2   : > { %v6229_v27 = vadd.f32 %v6228_v13, %v6205_v23  ;;  %v6359_v34 = vadd.f32 %v6358_v30, %v6335_v44 }
 0x9e4   : > { %v6230_v55 = vrot.slane %v6229_v27, 4  ;;  %v6360_v38 = vrot.slane %v6359_v34, 4 }
 0x9e6   : > { %v6231_v25 = vadd.f32 %v6230_v55, %v6229_v27  ;;  %v6361_v5 = vadd.f32 %v6360_v38, %v6359_v34 }
 0x9e8   : > { %v6232_v36 = vrot.slane %v6231_v25, 2  ;;  %v6362_v10 = vrot.slane %v6361_v5, 2 }
 0x9ea   : > { %v6233_v21 = vadd.f32 %v6232_v36, %v6231_v25  ;;  %v6363_v37 = vadd.f32 %v6362_v10, %v6361_v5 }
 0x9ec   : > { %v6234_v3 = vrot.slane %v6233_v21, 1  ;;  %v6364_v50 = vrot.slane %v6363_v37, 1 }
 0x9ee   : > { %v6235_v29 = vadd.f32 %v6234_v3, %v6233_v21  ;;  %v6365_v32 = vadd.f32 %v6364_v50, %v6363_v37 }
 0x9f0   : > { %v6367_v61 = vsel %vm6366_vm0, %v6235_v29, %v6365_v32 }
 0x9f1   : > { %v6369_v51 = vadd.f32 %v6368_v16, %v6367_v61 }
 0x9f3   : > { %6371 = vst.msk [vmem:[%s486_s0] sm:$0x1] %vm6370_vm1, %v6369_v51 }
 0x9f4   : > { %8135 = shalt.err (!%p8132_p3)
}
 0x9f5   : > { %7462 = dma.vmem_to_hbm [thread:$0]  (%p8297_p5), %s6384_s27, 16, %s6386_s23, %s6373_s22  }
 0x9f6 PF: > { %p7468_p4 = scmp.ge.s32.totalorder %s8170_s21, 2  ;;  %s6397_s3 = sand.u32 1, %s8158_s18  }
 0x9f7   : > { %s6398_s4 = scalar_lea.sflag [#allocation3], %s6397_s3 }
 0x9f8   : > { %p7465_p7 = pnand %p7468_p4, %p8301_p6 }
 0x9fa   : > { %p7466_p8 = pneg %p7465_p7 }
 0x9fc   : > { %8153 = dma.done.wait (%p7466_p8), %s6398_s4, 16  }
 0x9fd   : > { %8155 = vsyncadd (%p7466_p8), %s6398_s4, 4294967280  ;;  %s14082_s5 = sld [smem:[#allocation5_spill]]  ;;  %p25_p9 = scmp.ge.s32.totalorder %s8284_s24, 4  }
 0x9fe   : > { %s14083_s20 = sld [smem:[#allocation6_spill]]  ;;  %s14084_s18 = smov %s8162_s19 }
 0x9ff   : > { %s14086_s21 = smov %s8284_s24  ;;  %27 = sbr.rel (!%p25_p9) target bundleno = 10 (0xa), region = 124 }
 0xa03   : > { %s14085_s19 = smov %s14082_s5 }
 0xa04   :  { %6403 = vsyncpa [#allocation3], 1 }
 0xa05   :  { %6405 = vsyncpa [#allocation3 + $0x1], 1 }

</bundles_post_ra>
